<compile_context>
chip_gen: v5e
topology: v5e:2x2
jax: 0.10.0
libtpu: 0.0.40
codegen_flags: <defaults>
</compile_context>

<pallas_src>
import functools

import jax
import jax.numpy as jnp
from jax.experimental import pallas as pl
from jax.experimental.pallas import tpu as pltpu

EPS = 1e-5
LANE = 128
SUBLANE = 8


def _round_up(x, m):
    return (x + m - 1) // m * m


def _mxu_is_256_wide():
    """True on TPU generations with a 256-wide MXU (v6e / v7x)."""
    try:
        kind = jax.devices()[0].device_kind.lower()
    except Exception:
        return True
    return ("v6" in kind) or ("v7" in kind)


def _choose_block_rows(h):
    """Whole image when small (no halo duplication, amortized per-step cost),
    otherwise the largest divisor of H that is <= 32."""
    if h <= 32:
        return h
    for th in (32, 28, 24, 16, 14, 12, 8, 7, 4, 2):
        if h % th == 0:
            return th
    return h


# ----------------------------------------------------------------------------
# Fused Pallas kernel
# ----------------------------------------------------------------------------
def _residual_block_kernel(x_ref, w1_ref, s1_ref, b1_ref,
                           w2_ref, s2_ref, b2_ref,
                           *rest, block_rows, width, valid_width,
                           has_projection, fold_taps):
    """One (image, row-tile) step of the fused residual block.

    x_ref : (1, 1, TH+4, Wp+2, Cin_p) bf16  x window (2-row / 1-col zero halo)
    w*_ref: (3, 3*C_in_p, C_out_p)    bf16  conv weights, [dx, dy*C_in_p + ci, co]
    s/b   : (1, C_out_p)              f32   folded BatchNorm scale / bias
    wsc   : (Cin_p, Cout_p)           bf16  1x1 projection weight (if needed)
    o_ref : (1, TH, Wp, Cout_p)             output tile
    y_ref : (TH+2, Wp+2, Cmid_p)      bf16  VMEM scratch for the intermediate
    """
    if has_projection:
        wsc_ref, ssc_ref, bsc_ref, o_ref, y_ref = rest
    else:
        o_ref, y_ref = rest
        wsc_ref = ssc_ref = bsc_ref = None

    TH, W = block_rows, width            # W == padded (sublane-multiple) width
    t = pl.program_id(1)
    n_t = pl.num_programs(1)

    Cin = x_ref.shape[-1]
    Cmid = w1_ref.shape[-1]
    Cout = w2_ref.shape[-1]

    xw = x_ref[0, 0]                     # (TH+4, W+2, Cin) bf16

    # ---------------- conv1 (3x3) over TH+2 rows + folded BN + ReLU ----------
    # TODO(synk): the dx=1,2 column windows are sublane-misaligned slices of an
    #             (W+2)-wide axis; they could be moved onto the XLU with
    #             pltpu.roll to co-issue with the MXU work.
    acc1 = None
    x_center = None
    for dx in range(3):
        col = xw[:, dx:dx + W, :].reshape((TH + 4) * W, Cin)
        if dx == 1:                      # reused by the shortcut below
            x_center = col[2 * W:(TH + 2) * W, :]
        if fold_taps:                    # K = 3*Cin -> fills a 256-wide MXU
            patch = jnp.concatenate(
                [col[dy * W:(dy + TH + 2) * W, :] for dy in range(3)], axis=-1)
            part = jnp.dot(patch, w1_ref[dx],
                           preferred_element_type=jnp.float32)
            acc1 = part if acc1 is None else acc1 + part
        else:                            # 9 x K=Cin matmuls (128-wide MXU)
            wdx = w1_ref[dx]
            for dy in range(3):
                patch = col[dy * W:(dy + TH + 2) * W, :]
                part = jnp.dot(patch, wdx[dy * Cin:(dy + 1) * Cin, :],
                               preferred_element_type=jnp.float32)
                acc1 = part if acc1 is None else acc1 + part
    y = jnp.maximum(acc1 * s1_ref[...] + b1_ref[...], 0.0)
    y = y.reshape(TH + 2, W, Cmid)

    # conv2's zero padding of out1, folded directly into the value:
    #   * the halo row above / below the image (only on boundary row tiles),
    #   * the columns that only exist because W was padded to a sublane multiple.
    top = y[0:1] * jnp.where(t == 0, 0.0, 1.0)
    bot = y[TH + 1:TH + 2] * jnp.where(t == n_t - 1, 0.0, 1.0)
    y = jnp.concatenate([top, y[1:TH + 1], bot], axis=0)
    if valid_width != W:
        cols = jax.lax.broadcasted_iota(jnp.int32, (W, Cmid), 0)[None]
        y = jnp.where(cols < valid_width, y, 0.0)
    zcol = jnp.zeros((TH + 2, 1, Cmid), y_ref.dtype)
    # Single aligned full-block store of the column-padded intermediate.
    y_ref[...] = jnp.concatenate([zcol, y.astype(y_ref.dtype), zcol], axis=1)

    # ---------------- conv2 (3x3) + folded BN ---------------------------------
    yv = y_ref[...]                      # (TH+2, W+2, Cmid) bf16
    acc2 = None
    for dx in range(3):
        col = yv[:, dx:dx + W, :].reshape((TH + 2) * W, Cmid)
        if fold_taps:
            patch = jnp.concatenate(
                [col[dy * W:(dy + TH) * W, :] for dy in range(3)], axis=-1)
            part = jnp.dot(patch, w2_ref[dx],
                           preferred_element_type=jnp.float32)
            acc2 = part if acc2 is None else acc2 + part
        else:
            wdx = w2_ref[dx]
            for dy in range(3):
                patch = col[dy * W:(dy + TH) * W, :]
                part = jnp.dot(patch, wdx[dy * Cmid:(dy + 1) * Cmid, :],
                               preferred_element_type=jnp.float32)
                acc2 = part if acc2 is None else acc2 + part
    main = acc2 * s2_ref[...] + b2_ref[...]

    # ---------------- shortcut + final ReLU ------------------------------------
    if has_projection:                   # 1x1 conv + folded BN
        sc = jnp.dot(x_center, wsc_ref[...], preferred_element_type=jnp.float32)
        sc = sc * ssc_ref[...] + bsc_ref[...]
    else:                                # identity (trace-time branch)
        sc = x_center.astype(jnp.float32)

    out = jnp.maximum(main + sc, 0.0)
    # TODO(synk): for very large row tiles, accumulate conv2 directly into an
    #             f32 VMEM scratch to bound vreg spilling.
    o_ref[0] = out.reshape(TH, W, Cout).astype(o_ref.dtype)


# ----------------------------------------------------------------------------
# Host-side helpers / wrapper
# ----------------------------------------------------------------------------
def _fold_bn(gamma, beta, mean, var, eps=EPS):
    scale = gamma / jnp.sqrt(var + eps)
    bias = beta - mean * scale
    return scale.astype(jnp.float32), bias.astype(jnp.float32)


def _pad_last(a, target):
    pad = target - a.shape[-1]
    if pad == 0:
        return a
    return jnp.pad(a, [(0, 0)] * (a.ndim - 1) + [(0, pad)])


def _fold_conv_weight(w, ci_p, co_p):
    """(3,3,Ci,Co) HWIO -> (3[dx], 3*Ci_p, Co_p) bf16 with K ordered [dy, ci]."""
    ci, co = w.shape[-2], w.shape[-1]
    w = jnp.pad(w, ((0, 0), (0, 0), (0, ci_p - ci), (0, co_p - co)))
    return jnp.transpose(w, (1, 0, 2, 3)).reshape(3, 3 * ci_p, co_p).astype(jnp.bfloat16)


def residual_block_forward(x_nchw, params, *, block_rows=None, fold_taps=None,
                           out_dtype=jnp.bfloat16, padded_nhwc_out=False):
    N, Cin, H, W = x_nchw.shape
    Cout = params["w1"].shape[-1]
    Cin_p = _round_up(Cin, LANE)
    Cmid_p = _round_up(Cout, LANE)
    Cout_p = Cmid_p
    Wp = _round_up(W, SUBLANE)
    has_projection = "wsc" in params
    if fold_taps is None:
        fold_taps = _mxu_is_256_wide()

    # Row tiling (each tile recomputes its out1 halo rows from the x halo).
    if block_rows is None:
        block_rows = _choose_block_rows(H)
    TH = block_rows if H % block_rows == 0 else H
    T = H // TH

    # NCHW -> NHWC, channel pad to a lane multiple, bf16, single spatial pad.
    x = jnp.transpose(x_nchw, (0, 2, 3, 1))
    x = _pad_last(x, Cin_p).astype(jnp.bfloat16)
    xp = jnp.pad(x, ((0, 0), (2, 2), (1, 1 + Wp - W), (0, 0)))  # (N,H+4,Wp+2,Cp)
    if T == 1:
        xw = xp[:, None]                 # no halo duplication through HBM
    else:
        # Overlapping row windows with a 2-row halo on each side.
        # TODO(synk): express this overlap with an element-indexed BlockSpec
        #             instead of materializing T windows through HBM.
        xw = jnp.stack([xp[:, i * TH: i * TH + TH + 4] for i in range(T)], axis=1)

    # Conv weights folded to (3, 3*Ci_p, Co_p) (dx major, K = [dy, ci]) + BN.
    w1 = _fold_conv_weight(params["w1"], Cin_p, Cmid_p)
    w2 = _fold_conv_weight(params["w2"], Cmid_p, Cout_p)
    s1, b1 = _fold_bn(**params["bn1"])
    s2, b2 = _fold_bn(**params["bn2"])
    s1 = _pad_last(s1, Cmid_p).reshape(1, Cmid_p)
    b1 = _pad_last(b1, Cmid_p).reshape(1, Cmid_p)
    s2 = _pad_last(s2, Cout_p).reshape(1, Cout_p)
    b2 = _pad_last(b2, Cout_p).reshape(1, Cout_p)

    inputs = [xw, w1, s1, b1, w2, s2, b2]
    in_specs = [
        pl.BlockSpec((1, 1, TH + 4, Wp + 2, Cin_p), lambda n, t: (n, t, 0, 0, 0)),
        pl.BlockSpec((3, 3 * Cin_p, Cmid_p), lambda n, t: (0, 0, 0)),
        pl.BlockSpec((1, Cmid_p), lambda n, t: (0, 0)),
        pl.BlockSpec((1, Cmid_p), lambda n, t: (0, 0)),
        pl.BlockSpec((3, 3 * Cmid_p, Cout_p), lambda n, t: (0, 0, 0)),
        pl.BlockSpec((1, Cout_p), lambda n, t: (0, 0)),
        pl.BlockSpec((1, Cout_p), lambda n, t: (0, 0)),
    ]
    sc_flops = 0
    if has_projection:
        wsc = jnp.pad(params["wsc"],
                      ((0, Cin_p - Cin), (0, Cout_p - Cout))).astype(jnp.bfloat16)
        ssc, bsc = _fold_bn(**params["bnsc"])
        ssc = _pad_last(ssc, Cout_p).reshape(1, Cout_p)
        bsc = _pad_last(bsc, Cout_p).reshape(1, Cout_p)
        inputs += [wsc, ssc, bsc]
        in_specs += [
            pl.BlockSpec((Cin_p, Cout_p), lambda n, t: (0, 0)),
            pl.BlockSpec((1, Cout_p), lambda n, t: (0, 0)),
            pl.BlockSpec((1, Cout_p), lambda n, t: (0, 0)),
        ]
        sc_flops = 2 * N * H * Wp * Cin_p * Cout_p

    kernel = functools.partial(_residual_block_kernel,
                               block_rows=TH, width=Wp, valid_width=W,
                               has_projection=has_projection,
                               fold_taps=fold_taps)

    out_bytes = jnp.dtype(out_dtype).itemsize
    flops = (2 * N * T * (TH + 2) * Wp * 9 * Cin_p * Cmid_p
             + 2 * N * H * Wp * 9 * Cmid_p * Cout_p + sc_flops)
    bytes_accessed = int(xw.size * 2 + w1.size * 2 + w2.size * 2
                         + N * H * Wp * Cout_p * out_bytes)

    # Explicit VMEM budget from the actual per-step footprint (double-buffered
    # inputs/outputs + scratch), capped at 64 MiB so it also fits v7x.
    x_blk = (TH + 4) * (Wp + 2) * Cin_p * 2
    o_blk = TH * Wp * Cout_p * out_bytes
    w_bytes = (w1.size + w2.size) * 2 + (Cin_p * Cout_p * 2 if has_projection else 0)
    y_bytes = (TH + 2) * (Wp + 2) * Cmid_p * 2
    vmem_limit = min(64 * 1024 * 1024,
                     max(16 * 1024 * 1024,
                         2 * (x_blk + o_blk + w_bytes) + y_bytes + (8 << 20)))

    out = pl.pallas_call(
        kernel,
        out_shape=jax.ShapeDtypeStruct((N, H, Wp, Cout_p), out_dtype),
        grid=(N, T),
        in_specs=in_specs,
        out_specs=pl.BlockSpec((1, TH, Wp, Cout_p), lambda n, t: (n, t, 0, 0)),
        scratch_shapes=[pltpu.VMEM((TH + 2, Wp + 2, Cmid_p), jnp.bfloat16)],
        compiler_params=pltpu.CompilerParams(
            dimension_semantics=("parallel", "parallel"),
            vmem_limit_bytes=int(vmem_limit)),
        cost_estimate=pl.CostEstimate(flops=int(flops), transcendentals=0,
                                      bytes_accessed=bytes_accessed),
    )(*inputs)

    if padded_nhwc_out:                  # let the next layer fuse crop/transpose
        return out
    out = out[..., :W, :Cout]            # drop width / channel padding
    return jnp.transpose(out, (0, 3, 1, 2))      # NHWC -> NCHW


# ----------------------------------------------------------------------------
# Parameter init + pure-JAX reference (same bf16 weight/activation policy)
# ----------------------------------------------------------------------------
def _init_bn(key, c):
    k1, k2, k3, k4 = jax.random.split(key, 4)
    return dict(gamma=1.0 + 0.1 * jax.random.normal(k1, (c,), jnp.float32),
                beta=0.1 * jax.random.normal(k2, (c,), jnp.float32),
                mean=0.05 * jax.random.normal(k3, (c,), jnp.float32),
                var=1.0 + 0.1 * jax.random.uniform(k4, (c,), jnp.float32))


def init_residual_block_params(key, in_channels, out_channels):
    k_w1, k_bn1, k_w2, k_bn2, k_wsc, k_bnsc = jax.random.split(key, 6)
    p = {
        "w1": 0.1 * jax.random.normal(k_w1, (3, 3, in_channels, out_channels), jnp.float32),
        "bn1": _init_bn(k_bn1, out_channels),
        "w2": 0.1 * jax.random.normal(k_w2, (3, 3, out_channels, out_channels), jnp.float32),
        "bn2": _init_bn(k_bn2, out_channels),
    }
    if in_channels != out_channels:
        p["wsc"] = 0.1 * jax.random.normal(k_wsc, (in_channels, out_channels), jnp.float32)
        p["bnsc"] = _init_bn(k_bnsc, out_channels)
    return p


def _ref_forward(x_nchw, params, out_dtype=jnp.bfloat16):
    """f32 reference with the same bf16 input/weight/intermediate policy."""
    x = jnp.transpose(x_nchw, (0, 2, 3, 1)).astype(jnp.bfloat16).astype(jnp.float32)
    w1 = params["w1"].astype(jnp.bfloat16).astype(jnp.float32)
    w2 = params["w2"].astype(jnp.bfloat16).astype(jnp.float32)
    dn = ("NHWC", "HWIO", "NHWC")
    s1, b1 = _fold_bn(**params["bn1"])
    s2, b2 = _fold_bn(**params["bn2"])
    out = jax.lax.conv_general_dilated(x, w1, (1, 1), "SAME", dimension_numbers=dn)
    out = jnp.maximum(out * s1 + b1, 0.0)
    out = out.astype(jnp.bfloat16).astype(jnp.float32)   # kernel stages out1 in bf16
    out = jax.lax.conv_general_dilated(out, w2, (1, 1), "SAME", dimension_numbers=dn)
    out = out * s2 + b2
    if "wsc" in params:
        wsc = params["wsc"].astype(jnp.bfloat16).astype(jnp.float32)
        ssc, bsc = _fold_bn(**params["bnsc"])
        sc = jnp.einsum("nhwc,co->nhwo", x, wsc) * ssc + bsc
    else:
        sc = x
    out = jnp.maximum(out + sc, 0.0).astype(out_dtype)
    return jnp.transpose(out, (0, 3, 1, 2))


# ----------------------------------------------------------------------------
if __name__ == "__main__":
    key = jax.random.PRNGKey(0)
    kx, kx2, kp1, kp2, kp3 = jax.random.split(key, 5)

    def check(name, x, params, **kw):
        out = jax.block_until_ready(residual_block_forward(x, params, **kw))
        ref = jax.block_until_ready(_ref_forward(x, params))
        assert out.shape == ref.shape, (name, out.shape, ref.shape)
        assert jnp.allclose(out.astype(jnp.float32), ref.astype(jnp.float32),
                            rtol=2e-2, atol=2e-2), f"{name} mismatch"

    # 1) Projection shortcut (Cin != Cout), whole-image tile, K-folded taps.
    x = jax.random.normal(kx, (2, 4, 16, 16), jnp.float32)
    check("projection", x, init_residual_block_params(kp1, 4, 8), fold_taps=True)

    # 2) Identity shortcut, 2 row tiles (exercises the halo-row masking and the
    #    tiled input-window path), unfolded 128-wide-MXU matmul path.
    check("identity", x, init_residual_block_params(kp2, 4, 4),
          block_rows=8, fold_taps=False)

    # 3) Width not a multiple of 8 (exercises width padding + column masking),
    #    taps folded per the detected MXU width.
    x2 = jax.random.normal(kx2, (2, 3, 12, 12), jnp.float32)
    check("odd-width", x2, init_residual_block_params(kp3, 3, 8))

    print("KERNEL_OK")
</pallas_src>

<mosaic_0001>
module attributes {stable_mosaic.version = 11 : i64} {
  func.func @_residual_block_kernel(%arg0: i32, %arg1: i32, %arg2: memref<1x1x20x18x128xbf16, #tpu.memory_space<vmem>>, %arg3: memref<3x384x128xbf16, #tpu.memory_space<vmem>>, %arg4: memref<1x128xf32, #tpu.memory_space<vmem>>, %arg5: memref<1x128xf32, #tpu.memory_space<vmem>>, %arg6: memref<3x384x128xbf16, #tpu.memory_space<vmem>>, %arg7: memref<1x128xf32, #tpu.memory_space<vmem>>, %arg8: memref<1x128xf32, #tpu.memory_space<vmem>>, %arg9: memref<128x128xbf16, #tpu.memory_space<vmem>>, %arg10: memref<1x128xf32, #tpu.memory_space<vmem>>, %arg11: memref<1x128xf32, #tpu.memory_space<vmem>>, %arg12: memref<1x16x16x128xbf16, #tpu.memory_space<vmem>>, %arg13: memref<18x18x128xbf16, #tpu.memory_space<vmem>>) attributes {dimension_semantics = [#tpu.dimension_semantics<parallel>, #tpu.dimension_semantics<parallel>], iteration_bounds = array<i64: 2, 1>, scalar_prefetch = 0 : i64, scratch_operands = 1 : i64, tpu.core_type = #tpu.core_type<tc>, window_params = [{transform_indices = @transform_0, window_bounds = array<i64: 1, 1, 20, 18, 128>}, {pipeline_mode = #tpu.pipeline_mode<synchronous>, transform_indices = @transform_1, window_bounds = array<i64: 3, 384, 128>}, {pipeline_mode = #tpu.pipeline_mode<synchronous>, transform_indices = @transform_2, window_bounds = array<i64: 1, 128>}, {pipeline_mode = #tpu.pipeline_mode<synchronous>, transform_indices = @transform_3, window_bounds = array<i64: 1, 128>}, {pipeline_mode = #tpu.pipeline_mode<synchronous>, transform_indices = @transform_4, window_bounds = array<i64: 3, 384, 128>}, {pipeline_mode = #tpu.pipeline_mode<synchronous>, transform_indices = @transform_5, window_bounds = array<i64: 1, 128>}, {pipeline_mode = #tpu.pipeline_mode<synchronous>, transform_indices = @transform_6, window_bounds = array<i64: 1, 128>}, {pipeline_mode = #tpu.pipeline_mode<synchronous>, transform_indices = @transform_7, window_bounds = array<i64: 128, 128>}, {pipeline_mode = #tpu.pipeline_mode<synchronous>, transform_indices = @transform_8, window_bounds = array<i64: 1, 128>}, {pipeline_mode = #tpu.pipeline_mode<synchronous>, transform_indices = @transform_9, window_bounds = array<i64: 1, 128>}, {transform_indices = @transform_10, window_bounds = array<i64: 1, 16, 16, 128>}]} {
    %c0 = arith.constant 0 : index
    %c0_0 = arith.constant 0 : index
    %c0_1 = arith.constant 0 : index
    %c0_2 = arith.constant 0 : index
    %c0_3 = arith.constant 0 : index
    %0 = vector.load %arg2[%c0, %c0_0, %c0_1, %c0_2, %c0_3] : memref<1x1x20x18x128xbf16, #tpu.memory_space<vmem>>, vector<1x1x20x18x128xbf16>
    %1 = vector.shape_cast %0 : vector<1x1x20x18x128xbf16> to vector<20x18x128xbf16>
    %2 = vector.extract_strided_slice %1 {offsets = [0, 0, 0], sizes = [20, 16, 128], strides = [1, 1, 1]} : vector<20x18x128xbf16> to vector<20x16x128xbf16>
    %3 = vector.shape_cast %2 : vector<20x16x128xbf16> to vector<320x128xbf16>
    %4 = vector.extract_strided_slice %3 {offsets = [0, 0], sizes = [288, 128], strides = [1, 1]} : vector<320x128xbf16> to vector<288x128xbf16>
    %5 = vector.extract_strided_slice %3 {offsets = [16, 0], sizes = [288, 128], strides = [1, 1]} : vector<320x128xbf16> to vector<288x128xbf16>
    %6 = vector.extract_strided_slice %3 {offsets = [32, 0], sizes = [288, 128], strides = [1, 1]} : vector<320x128xbf16> to vector<288x128xbf16>
    %7 = tpu.concatenate %4, %5, %6 in 1 : vector<288x128xbf16>, vector<288x128xbf16>, vector<288x128xbf16> -> vector<288x384xbf16>
    %c0_4 = arith.constant 0 : index
    %c0_5 = arith.constant 0 : index
    %c0_6 = arith.constant 0 : index
    %8 = vector.load %arg3[%c0_4, %c0_5, %c0_6] : memref<3x384x128xbf16, #tpu.memory_space<vmem>>, vector<1x384x128xbf16>
    %9 = vector.shape_cast %8 : vector<1x384x128xbf16> to vector<384x128xbf16>
    %cst = arith.constant dense<0.000000e+00> : vector<288x128xf32>
    %10 = tpu.matmul %7, %9, %cst {dimension_numbers = #tpu.dot_dimension_numbers<[1], [0], [0], [1], [0, 0, 1, 1], [], []>} : vector<288x384xbf16>, vector<384x128xbf16>, vector<288x128xf32> -> vector<288x128xf32>
    %11 = vector.extract_strided_slice %1 {offsets = [0, 1, 0], sizes = [20, 16, 128], strides = [1, 1, 1]} : vector<20x18x128xbf16> to vector<20x16x128xbf16>
    %12 = vector.shape_cast %11 : vector<20x16x128xbf16> to vector<320x128xbf16>
    %13 = vector.extract_strided_slice %12 {offsets = [32, 0], sizes = [256, 128], strides = [1, 1]} : vector<320x128xbf16> to vector<256x128xbf16>
    %14 = vector.extract_strided_slice %12 {offsets = [0, 0], sizes = [288, 128], strides = [1, 1]} : vector<320x128xbf16> to vector<288x128xbf16>
    %15 = vector.extract_strided_slice %12 {offsets = [16, 0], sizes = [288, 128], strides = [1, 1]} : vector<320x128xbf16> to vector<288x128xbf16>
    %16 = vector.extract_strided_slice %12 {offsets = [32, 0], sizes = [288, 128], strides = [1, 1]} : vector<320x128xbf16> to vector<288x128xbf16>
    %17 = tpu.concatenate %14, %15, %16 in 1 : vector<288x128xbf16>, vector<288x128xbf16>, vector<288x128xbf16> -> vector<288x384xbf16>
    %c1 = arith.constant 1 : index
    %c0_7 = arith.constant 0 : index
    %c0_8 = arith.constant 0 : index
    %18 = vector.load %arg3[%c1, %c0_7, %c0_8] : memref<3x384x128xbf16, #tpu.memory_space<vmem>>, vector<1x384x128xbf16>
    %19 = vector.shape_cast %18 : vector<1x384x128xbf16> to vector<384x128xbf16>
    %cst_9 = arith.constant dense<0.000000e+00> : vector<288x128xf32>
    %20 = tpu.matmul %17, %19, %cst_9 {dimension_numbers = #tpu.dot_dimension_numbers<[1], [0], [0], [1], [0, 0, 1, 1], [], []>} : vector<288x384xbf16>, vector<384x128xbf16>, vector<288x128xf32> -> vector<288x128xf32>
    %21 = arith.addf %10, %20 : vector<288x128xf32>
    %22 = vector.extract_strided_slice %1 {offsets = [0, 2, 0], sizes = [20, 16, 128], strides = [1, 1, 1]} : vector<20x18x128xbf16> to vector<20x16x128xbf16>
    %23 = vector.shape_cast %22 : vector<20x16x128xbf16> to vector<320x128xbf16>
    %24 = vector.extract_strided_slice %23 {offsets = [0, 0], sizes = [288, 128], strides = [1, 1]} : vector<320x128xbf16> to vector<288x128xbf16>
    %25 = vector.extract_strided_slice %23 {offsets = [16, 0], sizes = [288, 128], strides = [1, 1]} : vector<320x128xbf16> to vector<288x128xbf16>
    %26 = vector.extract_strided_slice %23 {offsets = [32, 0], sizes = [288, 128], strides = [1, 1]} : vector<320x128xbf16> to vector<288x128xbf16>
    %27 = tpu.concatenate %24, %25, %26 in 1 : vector<288x128xbf16>, vector<288x128xbf16>, vector<288x128xbf16> -> vector<288x384xbf16>
    %c2 = arith.constant 2 : index
    %c0_10 = arith.constant 0 : index
    %c0_11 = arith.constant 0 : index
    %28 = vector.load %arg3[%c2, %c0_10, %c0_11] : memref<3x384x128xbf16, #tpu.memory_space<vmem>>, vector<1x384x128xbf16>
    %29 = vector.shape_cast %28 : vector<1x384x128xbf16> to vector<384x128xbf16>
    %cst_12 = arith.constant dense<0.000000e+00> : vector<288x128xf32>
    %30 = tpu.matmul %27, %29, %cst_12 {dimension_numbers = #tpu.dot_dimension_numbers<[1], [0], [0], [1], [0, 0, 1, 1], [], []>} : vector<288x384xbf16>, vector<384x128xbf16>, vector<288x128xf32> -> vector<288x128xf32>
    %31 = arith.addf %21, %30 : vector<288x128xf32>
    %c0_13 = arith.constant 0 : index
    %c0_14 = arith.constant 0 : index
    %32 = vector.load %arg4[%c0_13, %c0_14] : memref<1x128xf32, #tpu.memory_space<vmem>>, vector<1x128xf32>
    %33 = vector.broadcast %32 : vector<1x128xf32> to vector<288x128xf32>
    %34 = arith.mulf %31, %33 : vector<288x128xf32>
    %c0_15 = arith.constant 0 : index
    %c0_16 = arith.constant 0 : index
    %35 = vector.load %arg5[%c0_15, %c0_16] : memref<1x128xf32, #tpu.memory_space<vmem>>, vector<1x128xf32>
    %36 = vector.broadcast %35 : vector<1x128xf32> to vector<288x128xf32>
    %37 = arith.addf %34, %36 : vector<288x128xf32>
    %cst_17 = arith.constant 0.000000e+00 : f32
    %38 = vector.broadcast %cst_17 : f32 to vector<288x128xf32>
    %39 = arith.maximumf %37, %38 : vector<288x128xf32>
    %40 = vector.shape_cast %39 : vector<288x128xf32> to vector<18x16x128xf32>
    %41 = vector.extract_strided_slice %40 {offsets = [0, 0, 0], sizes = [1, 16, 128], strides = [1, 1, 1]} : vector<18x16x128xf32> to vector<1x16x128xf32>
    %c0_i32 = arith.constant 0 : i32
    %42 = arith.cmpi eq, %arg1, %c0_i32 : i32
    %cst_18 = arith.constant 0.000000e+00 : f32
    %cst_19 = arith.constant 1.000000e+00 : f32
    %43 = arith.select %42, %cst_18, %cst_19 : f32
    %44 = vector.broadcast %43 : f32 to vector<1x16x128xf32>
    %45 = arith.mulf %41, %44 : vector<1x16x128xf32>
    %46 = vector.extract_strided_slice %40 {offsets = [17, 0, 0], sizes = [1, 16, 128], strides = [1, 1, 1]} : vector<18x16x128xf32> to vector<1x16x128xf32>
    %c0_i32_20 = arith.constant 0 : i32
    %47 = arith.cmpi eq, %arg1, %c0_i32_20 : i32
    %cst_21 = arith.constant 0.000000e+00 : f32
    %cst_22 = arith.constant 1.000000e+00 : f32
    %48 = arith.select %47, %cst_21, %cst_22 : f32
    %49 = vector.broadcast %48 : f32 to vector<1x16x128xf32>
    %50 = arith.mulf %46, %49 : vector<1x16x128xf32>
    %51 = vector.extract_strided_slice %40 {offsets = [1, 0, 0], sizes = [16, 16, 128], strides = [1, 1, 1]} : vector<18x16x128xf32> to vector<16x16x128xf32>
    %52 = tpu.concatenate %45, %51, %50 in 0 : vector<1x16x128xf32>, vector<16x16x128xf32>, vector<1x16x128xf32> -> vector<18x16x128xf32>
    %cst_23 = arith.constant 0.000000e+00 : bf16
    %53 = vector.broadcast %cst_23 : bf16 to vector<18x1x128xbf16>
    %54 = arith.truncf %52 : vector<18x16x128xf32> to vector<18x16x128xbf16>
    %55 = tpu.concatenate %53, %54, %53 in 1 : vector<18x1x128xbf16>, vector<18x16x128xbf16>, vector<18x1x128xbf16> -> vector<18x18x128xbf16>
    %c0_24 = arith.constant 0 : index
    %c0_25 = arith.constant 0 : index
    %c0_26 = arith.constant 0 : index
    %56 = vector.load %arg13[%c0_24, %c0_25, %c0_26] : memref<18x18x128xbf16, #tpu.memory_space<vmem>>, vector<18x18x128xbf16>
    tpu.vector_store %arg13[%c0_24, %c0_25, %c0_26], %55 {strides = array<i32>} : memref<18x18x128xbf16, #tpu.memory_space<vmem>>, vector<18x18x128xbf16>,
    %c0_27 = arith.constant 0 : index
    %c0_28 = arith.constant 0 : index
    %c0_29 = arith.constant 0 : index
    %57 = vector.load %arg13[%c0_27, %c0_28, %c0_29] : memref<18x18x128xbf16, #tpu.memory_space<vmem>>, vector<18x18x128xbf16>
    %58 = vector.extract_strided_slice %57 {offsets = [0, 0, 0], sizes = [18, 16, 128], strides = [1, 1, 1]} : vector<18x18x128xbf16> to vector<18x16x128xbf16>
    %59 = vector.shape_cast %58 : vector<18x16x128xbf16> to vector<288x128xbf16>
    %60 = vector.extract_strided_slice %59 {offsets = [0, 0], sizes = [256, 128], strides = [1, 1]} : vector<288x128xbf16> to vector<256x128xbf16>
    %61 = vector.extract_strided_slice %59 {offsets = [16, 0], sizes = [256, 128], strides = [1, 1]} : vector<288x128xbf16> to vector<256x128xbf16>
    %62 = vector.extract_strided_slice %59 {offsets = [32, 0], sizes = [256, 128], strides = [1, 1]} : vector<288x128xbf16> to vector<256x128xbf16>
    %63 = tpu.concatenate %60, %61, %62 in 1 : vector<256x128xbf16>, vector<256x128xbf16>, vector<256x128xbf16> -> vector<256x384xbf16>
    %c0_30 = arith.constant 0 : index
    %c0_31 = arith.constant 0 : index
    %c0_32 = arith.constant 0 : index
    %64 = vector.load %arg6[%c0_30, %c0_31, %c0_32] : memref<3x384x128xbf16, #tpu.memory_space<vmem>>, vector<1x384x128xbf16>
    %65 = vector.shape_cast %64 : vector<1x384x128xbf16> to vector<384x128xbf16>
    %cst_33 = arith.constant dense<0.000000e+00> : vector<256x128xf32>
    %66 = tpu.matmul %63, %65, %cst_33 {dimension_numbers = #tpu.dot_dimension_numbers<[1], [0], [0], [1], [0, 0, 1, 1], [], []>} : vector<256x384xbf16>, vector<384x128xbf16>, vector<256x128xf32> -> vector<256x128xf32>
    %67 = vector.extract_strided_slice %57 {offsets = [0, 1, 0], sizes = [18, 16, 128], strides = [1, 1, 1]} : vector<18x18x128xbf16> to vector<18x16x128xbf16>
    %68 = vector.shape_cast %67 : vector<18x16x128xbf16> to vector<288x128xbf16>
    %69 = vector.extract_strided_slice %68 {offsets = [0, 0], sizes = [256, 128], strides = [1, 1]} : vector<288x128xbf16> to vector<256x128xbf16>
    %70 = vector.extract_strided_slice %68 {offsets = [16, 0], sizes = [256, 128], strides = [1, 1]} : vector<288x128xbf16> to vector<256x128xbf16>
    %71 = vector.extract_strided_slice %68 {offsets = [32, 0], sizes = [256, 128], strides = [1, 1]} : vector<288x128xbf16> to vector<256x128xbf16>
    %72 = tpu.concatenate %69, %70, %71 in 1 : vector<256x128xbf16>, vector<256x128xbf16>, vector<256x128xbf16> -> vector<256x384xbf16>
    %c1_34 = arith.constant 1 : index
    %c0_35 = arith.constant 0 : index
    %c0_36 = arith.constant 0 : index
    %73 = vector.load %arg6[%c1_34, %c0_35, %c0_36] : memref<3x384x128xbf16, #tpu.memory_space<vmem>>, vector<1x384x128xbf16>
    %74 = vector.shape_cast %73 : vector<1x384x128xbf16> to vector<384x128xbf16>
    %cst_37 = arith.constant dense<0.000000e+00> : vector<256x128xf32>
    %75 = tpu.matmul %72, %74, %cst_37 {dimension_numbers = #tpu.dot_dimension_numbers<[1], [0], [0], [1], [0, 0, 1, 1], [], []>} : vector<256x384xbf16>, vector<384x128xbf16>, vector<256x128xf32> -> vector<256x128xf32>
    %76 = arith.addf %66, %75 : vector<256x128xf32>
    %77 = vector.extract_strided_slice %57 {offsets = [0, 2, 0], sizes = [18, 16, 128], strides = [1, 1, 1]} : vector<18x18x128xbf16> to vector<18x16x128xbf16>
    %78 = vector.shape_cast %77 : vector<18x16x128xbf16> to vector<288x128xbf16>
    %79 = vector.extract_strided_slice %78 {offsets = [0, 0], sizes = [256, 128], strides = [1, 1]} : vector<288x128xbf16> to vector<256x128xbf16>
    %80 = vector.extract_strided_slice %78 {offsets = [16, 0], sizes = [256, 128], strides = [1, 1]} : vector<288x128xbf16> to vector<256x128xbf16>
    %81 = vector.extract_strided_slice %78 {offsets = [32, 0], sizes = [256, 128], strides = [1, 1]} : vector<288x128xbf16> to vector<256x128xbf16>
    %82 = tpu.concatenate %79, %80, %81 in 1 : vector<256x128xbf16>, vector<256x128xbf16>, vector<256x128xbf16> -> vector<256x384xbf16>
    %c2_38 = arith.constant 2 : index
    %c0_39 = arith.constant 0 : index
    %c0_40 = arith.constant 0 : index
    %83 = vector.load %arg6[%c2_38, %c0_39, %c0_40] : memref<3x384x128xbf16, #tpu.memory_space<vmem>>, vector<1x384x128xbf16>
    %84 = vector.shape_cast %83 : vector<1x384x128xbf16> to vector<384x128xbf16>
    %cst_41 = arith.constant dense<0.000000e+00> : vector<256x128xf32>
    %85 = tpu.matmul %82, %84, %cst_41 {dimension_numbers = #tpu.dot_dimension_numbers<[1], [0], [0], [1], [0, 0, 1, 1], [], []>} : vector<256x384xbf16>, vector<384x128xbf16>, vector<256x128xf32> -> vector<256x128xf32>
    %86 = arith.addf %76, %85 : vector<256x128xf32>
    %c0_42 = arith.constant 0 : index
    %c0_43 = arith.constant 0 : index
    %87 = vector.load %arg7[%c0_42, %c0_43] : memref<1x128xf32, #tpu.memory_space<vmem>>, vector<1x128xf32>
    %88 = vector.broadcast %87 : vector<1x128xf32> to vector<256x128xf32>
    %89 = arith.mulf %86, %88 : vector<256x128xf32>
    %c0_44 = arith.constant 0 : index
    %c0_45 = arith.constant 0 : index
    %90 = vector.load %arg8[%c0_44, %c0_45] : memref<1x128xf32, #tpu.memory_space<vmem>>, vector<1x128xf32>
    %91 = vector.broadcast %90 : vector<1x128xf32> to vector<256x128xf32>
    %92 = arith.addf %89, %91 : vector<256x128xf32>
    %c0_46 = arith.constant 0 : index
    %c0_47 = arith.constant 0 : index
    %93 = vector.load %arg9[%c0_46, %c0_47] : memref<128x128xbf16, #tpu.memory_space<vmem>>, vector<128x128xbf16>
    %cst_48 = arith.constant dense<0.000000e+00> : vector<256x128xf32>
    %94 = tpu.matmul %13, %93, %cst_48 {dimension_numbers = #tpu.dot_dimension_numbers<[1], [0], [0], [1], [0, 0, 1, 1], [], []>} : vector<256x128xbf16>, vector<128x128xbf16>, vector<256x128xf32> -> vector<256x128xf32>
    %c0_49 = arith.constant 0 : index
    %c0_50 = arith.constant 0 : index
    %95 = vector.load %arg10[%c0_49, %c0_50] : memref<1x128xf32, #tpu.memory_space<vmem>>, vector<1x128xf32>
    %96 = vector.broadcast %95 : vector<1x128xf32> to vector<256x128xf32>
    %97 = arith.mulf %94, %96 : vector<256x128xf32>
    %c0_51 = arith.constant 0 : index
    %c0_52 = arith.constant 0 : index
    %98 = vector.load %arg11[%c0_51, %c0_52] : memref<1x128xf32, #tpu.memory_space<vmem>>, vector<1x128xf32>
    %99 = vector.broadcast %98 : vector<1x128xf32> to vector<256x128xf32>
    %100 = arith.addf %97, %99 : vector<256x128xf32>
    %101 = arith.addf %92, %100 : vector<256x128xf32>
    %cst_53 = arith.constant 0.000000e+00 : f32
    %102 = vector.broadcast %cst_53 : f32 to vector<256x128xf32>
    %103 = arith.maximumf %101, %102 : vector<256x128xf32>
    %104 = vector.shape_cast %103 : vector<256x128xf32> to vector<16x16x128xf32>
    %105 = arith.truncf %104 : vector<16x16x128xf32> to vector<16x16x128xbf16>
    %c0_54 = arith.constant 0 : index
    %c0_55 = arith.constant 0 : index
    %c0_56 = arith.constant 0 : index
    %c0_57 = arith.constant 0 : index
    %106 = vector.load %arg12[%c0_54, %c0_55, %c0_56, %c0_57] : memref<1x16x16x128xbf16, #tpu.memory_space<vmem>>, vector<1x16x16x128xbf16>
    %107 = vector.shape_cast %106 : vector<1x16x16x128xbf16> to vector<16x16x128xbf16>
    %108 = vector.shape_cast %105 : vector<16x16x128xbf16> to vector<1x16x16x128xbf16>
    tpu.vector_store %arg12[%c0_54, %c0_55, %c0_56, %c0_57], %108 {strides = array<i32>} : memref<1x16x16x128xbf16, #tpu.memory_space<vmem>>, vector<1x16x16x128xbf16>,
    return
  }
  func.func @transform_0(%arg0: i32, %arg1: i32) -> (i32, i32, i32, i32, i32) {
    %c0_i32 = arith.constant 0 : i32
    %c0_i32_0 = arith.constant 0 : i32
    %c0_i32_1 = arith.constant 0 : i32
    %c0_i32_2 = arith.constant 0 : i32
    return %arg0, %arg1, %c0_i32, %c0_i32_0, %c0_i32_1 : i32, i32, i32, i32, i32
  }
  func.func @transform_1(%arg0: i32, %arg1: i32) -> (i32, i32, i32) {
    %c0_i32 = arith.constant 0 : i32
    %c0_i32_0 = arith.constant 0 : i32
    %c0_i32_1 = arith.constant 0 : i32
    %c0_i32_2 = arith.constant 0 : i32
    return %c0_i32, %c0_i32_0, %c0_i32_1 : i32, i32, i32
  }
  func.func @transform_2(%arg0: i32, %arg1: i32) -> (i32, i32) {
    %c0_i32 = arith.constant 0 : i32
    %c0_i32_0 = arith.constant 0 : i32
    %c0_i32_1 = arith.constant 0 : i32
    return %c0_i32, %c0_i32_0 : i32, i32
  }
  func.func @transform_3(%arg0: i32, %arg1: i32) -> (i32, i32) {
    %c0_i32 = arith.constant 0 : i32
    %c0_i32_0 = arith.constant 0 : i32
    %c0_i32_1 = arith.constant 0 : i32
    return %c0_i32, %c0_i32_0 : i32, i32
  }
  func.func @transform_4(%arg0: i32, %arg1: i32) -> (i32, i32, i32) {
    %c0_i32 = arith.constant 0 : i32
    %c0_i32_0 = arith.constant 0 : i32
    %c0_i32_1 = arith.constant 0 : i32
    %c0_i32_2 = arith.constant 0 : i32
    return %c0_i32, %c0_i32_0, %c0_i32_1 : i32, i32, i32
  }
  func.func @transform_5(%arg0: i32, %arg1: i32) -> (i32, i32) {
    %c0_i32 = arith.constant 0 : i32
    %c0_i32_0 = arith.constant 0 : i32
    %c0_i32_1 = arith.constant 0 : i32
    return %c0_i32, %c0_i32_0 : i32, i32
  }
  func.func @transform_6(%arg0: i32, %arg1: i32) -> (i32, i32) {
    %c0_i32 = arith.constant 0 : i32
    %c0_i32_0 = arith.constant 0 : i32
    %c0_i32_1 = arith.constant 0 : i32
    return %c0_i32, %c0_i32_0 : i32, i32
  }
  func.func @transform_7(%arg0: i32, %arg1: i32) -> (i32, i32) {
    %c0_i32 = arith.constant 0 : i32
    %c0_i32_0 = arith.constant 0 : i32
    %c0_i32_1 = arith.constant 0 : i32
    return %c0_i32, %c0_i32_0 : i32, i32
  }
  func.func @transform_8(%arg0: i32, %arg1: i32) -> (i32, i32) {
    %c0_i32 = arith.constant 0 : i32
    %c0_i32_0 = arith.constant 0 : i32
    %c0_i32_1 = arith.constant 0 : i32
    return %c0_i32, %c0_i32_0 : i32, i32
  }
  func.func @transform_9(%arg0: i32, %arg1: i32) -> (i32, i32) {
    %c0_i32 = arith.constant 0 : i32
    %c0_i32_0 = arith.constant 0 : i32
    %c0_i32_1 = arith.constant 0 : i32
    return %c0_i32, %c0_i32_0 : i32, i32
  }
  func.func @transform_10(%arg0: i32, %arg1: i32) -> (i32, i32, i32, i32) {
    %c0_i32 = arith.constant 0 : i32
    %c0_i32_0 = arith.constant 0 : i32
    %c0_i32_1 = arith.constant 0 : i32
    return %arg0, %arg1, %c0_i32, %c0_i32_0 : i32, i32, i32, i32
  }
}

</mosaic_0001>

<bundles_post_ra>
// kernel: tpu_custom_call.1
= control target key start
LH: loop header
LB: loop body
LE: loop exit
PB: predicated region body
PF: predicated region fallthrough
CT: control target
= control target key end

     0   :  { %s10536_s0 = inlined_call_operand.vmem [shape: bf16[2,1,20,18,128], index: 0, kind: input, shape index: {}]   ;;  %s10537_s1 = inlined_call_operand.vmem [shape: bf16[3,384,128], index: 1, kind: input, shape index: {}]   ;;  %s10538_s2 = inlined_call_operand.vmem [shape: f32[1,128], index: 2, kind: input, shape index: {}]   ;;  %s10539_s3 = inlined_call_operand.vmem [shape: f32[1,128], index: 3, kind: input, shape index: {}]   ;;  %s10540_s4 = inlined_call_operand.hbm [shape: bf16[3,384,128], index: 4, kind: input, shape index: {}]   ;;  %s10541_s5 = inlined_call_operand.vmem [shape: f32[1,128], index: 5, kind: input, shape index: {}]   ;;  %s10542_s6 = inlined_call_operand.vmem [shape: f32[1,128], index: 6, kind: input, shape index: {}]   ;;  %s10543_s7 = inlined_call_operand.vmem [shape: bf16[128,128], index: 7, kind: input, shape index: {}]   ;;  %s10544_s8 = inlined_call_operand.vmem [shape: f32[1,128], index: 8, kind: input, shape index: {}]   ;;  %s10545_s9 = inlined_call_operand.vmem [shape: f32[1,128], index: 9, kind: input, shape index: {}]   ;;  %s10546_s10 = inlined_call_operand.hbm [shape: bf16[2,16,16,128], index: 10, kind: output, shape index: {}]  }
   0x1   :  { %10573 = sst [smem:[#allocation64_spill]] %s10540_s4 }
   0x2   :  { %15 = vsyncpa [#allocation4], 0 }
   0x3   :  { %16 = vsyncpa [#allocation5], 0 }
   0x4   :  { %18 = vsyncpa [#allocation5 + $0x1], 0  ;;  %s7981_s13 = smov 0   ;;  %s7983_s14 = smov 0  }
   0x5   :  { %s7985_s15 = smov 0   ;;  %s7987_s16 = smov 0  }
   0x6   :  { %s7989_s17 = smov 0   ;;  %s7991_s18 = smov 0  }
   0x7 LB: > { %s6429_s19 = sadd.s32 4294967295, %s7919_s18   ;;  %s6430_s20 = sadd.s32 4294967294, %s7919_s18   ;;  %s7919_s18 = sphi %s7991_s18, %s24_s18   ;;  %s7915_s17 = sphi %s7989_s17, %s10757_s17   ;;  %s7911_s16 = sphi %s7987_s16, %s10756_s16   ;;  %s7907_s15 = sphi %s7985_s15, %s10755_s15   ;;  %s7903_s14 = sphi %s7983_s14, %s10754_s14   ;;  %s7899_s13 = sphi %s7981_s13, %s10753_s13  }
   0x8   : > { %s36_s21 = sadd.s32 1, %s7915_s17  ;;  %s262_s22 = sadd.s32 1, %s7907_s15 }
   0x9   : > { %p38_p0 = scmp.ge.s32.totalorder %s36_s21, 2  ;;  %p272_p1 = scmp.ne.s32.totalorder %s7907_s15, %s7903_s14 }
   0xa   : > { %p273_p2 = scmp.eq.s32.totalorder %s6429_s19, 1  ;;  %p278_p3 = scmp.ne.s32.totalorder %s7903_s14, %s7899_s13 }
   0xb   : > { %s10759_s21 = smov (%p38_p0, %s36_s21), 0  ;;  %p279_p5 = scmp.eq.s32.totalorder %s6430_s20, 1 }
   0xc   : > { %p8021_p4 = por %p273_p2, %p272_p1  ;;  %s257_s24 = ssub.s32 %s7915_s17, %s10759_s21 }
   0xd   : > { %p6431_p6 = scmp.ge.s32.totalorder %s7919_s18, 1  ;;  %p260_p7 = scmp.eq.s32.totalorder %s257_s24, 0 }
   0xe   : > { %p8028_p8 = por %p279_p5, %p278_p3  ;;  %p286_p9 = scmp.lt.s32.totalorder %s7919_s18, 3 }
   0xf   : > { %s8034_s26 = scalar_select %p260_p7, %s7907_s15, %s262_s22  }
  0x10   : > { %p287_p10 = pnand %p6431_p6, %p286_p9  ;;  %p7662_p11 = scmp.eq.s32.totalorder %s6429_s19, 0 }
  0x11   : > { %s10576_s4 = sld [smem:[#allocation64_spill]]  ;;  %s7921_s30 = smov [#allocation3]  }
  0x12   : > { %p7654_p12 = pneg %p287_p10  ;;  %s308_s11 = sshll.u32 %s7921_s30, 4  ;;  %s309_s11 = int_to_ptr.vmem [resolvable:$true] %s308_s11 }
  0x13   : > { %s7922_s12 = smov 64   ;;  %s7923_s20 = smov 4  }
  0x14   : > { %p7655_p13 = pnand %p7662_p11, %p7654_p12  ;;  %351 = sbr.rel (%p287_p10) target bundleno = 1902 (0x76e), region = 60 }
  0x17   : > { %s306_s29 = sshll.u32 %s10576_s4, 4  ;;  %s307_s29 = int_to_ptr.hbm [resolvable:$true] %s306_s29 }
  0x18   : > { %7657 = dma.hbm_to_vmem [thread:$0]  (!%p7655_p13), %s307_s29, 9216, %s309_s11, [#allocation4], %s7922_s12, %s7922_s12, %s7923_s20  }
  0x19   : > { %7890 = dma.done.wait (%p7662_p11), [#allocation4], 9216  }
  0x1a   : > { %7892 = vsyncadd (%p7662_p11), [#allocation4], 4294958080  ;;  %p394_p0 = scmp.lt.s32.totalorder %s7911_s16, 1  ;;  %v7388_v0 = vld [vmem:[%s10537_s1 + $0xf8] sm:$0xff]  ;;  %v7387_v1 = vld [vmem:[%s10537_s1 + $0xf0] sm:$0xff]  ;;  %v10577_v32 = vmov 0 }
  0x1b   : > { %1389 = vmatpush.bf16.msra.mxu0 %v7388_v0  ;;  %v8057_v4 = vld [vmem:[%s10537_s1 + $0x138] sm:$0xff]  ;;  %v7386_v9 = vld [vmem:[%s10537_s1 + $0xe8] sm:$0xff]  ;;  %v7385_v12 = vld [vmem:[%s10537_s1 + $0xe0] sm:$0xff]  ;;  %vm633_vm0 = vsmask.f32 3328  ;;  %vm2147_vm3 = vcmask 1042432  }
  0x1c   : > { %s395_s19 = scalar_select %p394_p0, %s7911_s16, 1  ;;  %v8062_v5 = vld [vmem:[%s10537_s1 + $0x178] sm:$0xff]  ;;  %7623 = vmatpush.bf16.msra.mxu1 %v8057_v4  ;;  %vm634_vm1 = vsmask.f32 7440  ;;  %v8084_v24 = vld [vmem:[%s10537_s1 + $0x170] sm:$0xff]  ;;  %v8101_v31 = vld [vmem:[%s10537_s1 + $0x168] sm:$0xff] }
  0x1d   : > { %v7364_v8 = vld [vmem:[%s10537_s1 + $0x38] sm:$0xff]  ;;  %7631 = vmatpush.bf16.msra.mxu2 %v8062_v5  ;;  %v7363_v25 = vld [vmem:[%s10537_s1 + $0x30] sm:$0xff]  ;;  %vm8103_vm2 = vmor %vm633_vm0, %vm634_vm1  ;;  %vm2148_vm4 = vcmask 1046532   ;;  %vm3307_vm6 = vcmask 1040384   ;;  %vm3308_vm7 = vsmask.f32 256 }
  0x1e   : > { %s7647_s22 = smul.u32 240, %s395_s19  ;;  %7639 = vmatpush.bf16.msra.mxu3 %v7364_v8  ;;  %v7384_v18 = vld [vmem:[%s10537_s1 + $0xd8] sm:$0xff]  ;;  %v8092_v26 = vld [vmem:[%s10537_s1 + $0x130] sm:$0xff]  ;;  %v10578_v32 = vsel %vm8103_vm2, 4294967295, %v10577_v32  ;;  %v7362_v37 = vld [vmem:[%s10537_s1 + $0x28] sm:$0xff]  ;;  %s391_s11 = sand.u32 1, %s7903_s14  }
  0x1f   : > { %1390 = vmatpush.bf16.msra.mxu0 %v7387_v1  ;;  %v7383_v27 = vld [vmem:[%s10537_s1 + $0xd0] sm:$0xff]  ;;  %10579 = vst [vmem:[#allocation9_spill] sm:$0xff] %v10578_v32  ;;  %v8114_v38 = vld [vmem:[%s10537_s1 + $0x128] sm:$0xff]  ;;  %v8128_v43 = vld [vmem:[%s10537_s1 + $0x160] sm:$0xff]  ;;  %s7527_s20 = sshll.u32 %s7911_s16, 7  ;;  %s6317_s16 = scalar_lea.sflag [#allocation5], %s391_s11 }
  0x20   : > { %s8044_s28 = scalar_lea.vmem %s10536_s0, %s7647_s22  ;;  %7624 = vmatpush.bf16.msra.mxu1 %v8092_v26  ;;  %v7382_v39 = vld [vmem:[%s10537_s1 + $0xc8] sm:$0xff]  ;;  %v7361_v48 = vld [vmem:[%s10537_s1 + $0x20] sm:$0xff]  ;;  %v8148_v54 = vld [vmem:[%s10537_s1 + $0x158] sm:$0xff]  ;;  %s6331_s4 = scalar_lea.hbm %s10546_s10, %s7527_s20 }
  0x21   : > { %v405_v2 = vld [vmem:[%s8044_s28] sm:$0xf]  ;;  %v406_v3 = vld [vmem:[%s8044_s28 + $0x4] sm:$0xf]  ;;  %v407_v17 = vld [vmem:[%s8044_s28 + $0x8] sm:$0x1]  ;;  %7632 = vmatpush.bf16.msra.mxu2 %v8084_v24 }
  0x22   : > { %v637_v6 = vshrl.u32 %v405_v2, 16  ;;  %v640_v7 = vshll.u32 %v405_v2, 16  ;;  %v646_v10 = vshll.u32 %v406_v3, 16  ;;  %v650_v11 = vshrl.u32 %v406_v3, 16  ;;  %v408_v22 = vld [vmem:[%s8044_s28 + $0xc] sm:$0xf]  ;;  %7640 = vmatpush.bf16.msra.mxu3 %v7363_v25  ;;  %vm8857_vm5 = vmor %vm2147_vm3, %vm2148_vm4 }
  0x23   : > { %1391 = vmatpush.bf16.msra.mxu0 %v7386_v9  ;;  %v656_v21 = vshll.u32 %v407_v17, 16  ;;  %v409_v23 = vld [vmem:[%s8044_s28 + $0x10] sm:$0xf]  ;;  %v661_v33 = vshrl.u32 %v408_v22, 16  ;;  %v664_v34 = vshll.u32 %v408_v22, 16  ;;  %v8139_v49 = vld [vmem:[%s10537_s1 + $0x120] sm:$0xff]  ;;  %vm9306_vm8 = vmand %vm3307_vm6, %vm3308_vm7 }
  0x24   : > { %v639_v13 = vrot.slane %v637_v6, 4  ;;  %v642_v14 = vrot.slane %v640_v7, 5  ;;  %v648_v15 = vrot.slane %v646_v10, 5  ;;  %v652_v16 = vrot.slane %v650_v11, 4  ;;  %v410_v42 = vld [vmem:[%s8044_s28 + $0x14] sm:$0x1]  ;;  %7625 = vmatpush.bf16.msra.mxu1 %v8114_v38 }
  0x25   : > { %v658_v30 = vrot.slane %v656_v21, 5  ;;  %v670_v35 = vshll.u32 %v409_v23, 16  ;;  %v674_v36 = vshrl.u32 %v409_v23, 16  ;;  %7633 = vmatpush.bf16.msra.mxu2 %v8101_v31  ;;  %v663_v44 = vrot.slane %v661_v33, 4  ;;  %v7381_v52 = vld [vmem:[%s10537_s1 + $0xc0] sm:$0xff]  ;;  %v7360_v57 = vld [vmem:[%s10537_s1 + $0x18] sm:$0xff] }
  0x26   : > { %v643_v19 = vor.u32 %v642_v14, %v639_v13  ;;  %v653_v20 = vor.u32 %v652_v16, %v648_v15  ;;  %v666_v45 = vrot.slane %v664_v34, 5  ;;  %7641 = vmatpush.bf16.msra.mxu3 %v7362_v37  ;;  %v680_v53 = vshll.u32 %v410_v42, 16  ;;  %v411_v59 = vld [vmem:[%s8044_s28 + $0x18] sm:$0xf]  ;;  %v412_v61 = vld [vmem:[%s8044_s28 + $0x1c] sm:$0xf] }
  0x27   : > { %1392 = vmatpush.bf16.msra.mxu0 %v7385_v12  ;;  %v8130_v46 = vrot.slane %v670_v35, 5  ;;  %v676_v47 = vrot.slane %v674_v36, 4  ;;  %v420_v0 = vld [vmem:[%s8044_s28 + $0x3c] sm:$0xf]  ;;  %v421_v1 = vld [vmem:[%s8044_s28 + $0x40] sm:$0xf] }
  0x28   : > { %v644_v28 = vrot.slane %v643_v19, 4  ;;  %v654_v29 = vrot.slane %v653_v20, 4  ;;  %v667_v55 = vor.u32 %v666_v45, %v663_v44  ;;  %7626 = vmatpush.bf16.msra.mxu1 %v8139_v49  ;;  %v682_v60 = vrot.slane %v680_v53, 5  ;;  %v8164_v3 = vld [vmem:[%s10537_s1 + $0x118] sm:$0xff]  ;;  %v8169_v6 = vld [vmem:[%s10537_s1 + $0x150] sm:$0xff]  ;;  %v7358_v20 = vld [vmem:[%s10537_s1 + $0x8] sm:$0xff] }
  0x29   : > { %7634 = vmatpush.bf16.msra.mxu2 %v8128_v43  ;;  %v677_v56 = vor.u32 %v676_v47, %v8130_v46  ;;  %v685_v2 = vshrl.u32 %v411_v59, 16  ;;  %v757_v7 = vshrl.u32 %v420_v0, 16  ;;  %v760_v8 = vshll.u32 %v420_v0, 16  ;;  %v7359_v12 = vld [vmem:[%s10537_s1 + $0x10] sm:$0xff]  ;;  %v422_v21 = vld [vmem:[%s8044_s28 + $0x44] sm:$0x1] }
  0x2a   : > { %v649_v40 = vsel %vm8103_vm2, %v644_v28, %v648_v15  ;;  %v659_v41 = vsel %vm8103_vm2, %v654_v29, %v658_v30  ;;  %7642 = vmatpush.bf16.msra.mxu3 %v7361_v48  ;;  %v668_v62 = vrot.slane %v667_v55, 4  ;;  %v766_v9 = vshll.u32 %v421_v1, 16  ;;  %v8179_v14 = vld [vmem:[%s10537_s1 + $0x110] sm:$0xff]  ;;  %v8184_v15 = vld [vmem:[%s10537_s1 + $0x148] sm:$0xff]  ;;  %v413_v29 = vld [vmem:[%s8044_s28 + $0x20] sm:$0x1] }
  0x2b   : > { %1393 = vmatpush.bf16.msra.mxu0 %v7384_v18  ;;  %v1116_v50 = vunpack.c.l.b16 %v649_v40  ;;  %v1117_v51 = vunpack.c.l.b16 %v659_v41  ;;  %v678_v63 = vrot.slane %v677_v56, 4  ;;  %v694_v10 = vshll.u32 %v412_v61, 16  ;;  %v8204_v35 = vld [vmem:[%s10537_s1 + $0x108] sm:$0xff]  ;;  %v8209_v36 = vld [vmem:[%s10537_s1 + $0x140] sm:$0xff]  ;;  %v417_v40 = vld [vmem:[%s8044_s28 + $0x30] sm:$0xf] }
  0x2c   : > { %v698_v11 = vshrl.u32 %v412_v61, 16  ;;  %v770_v13 = vshrl.u32 %v421_v1, 16  ;;  %7627 = vmatpush.bf16.msra.mxu1 %v8164_v3  ;;  %v759_v16 = vrot.slane %v757_v7, 4  ;;  %v762_v17 = vrot.slane %v760_v8, 5  ;;  %v7357_v42 = vld [vmem:[%s10537_s1] sm:$0xff]  ;;  %s6334_s27 = sshll.u32 %s6331_s4, 4  ;;  %s6335_s27 = int_to_ptr.hbm [resolvable:$true] %s6334_s27 }
  0x2d   : > { %v1152_v58 = vpack.c.b16 %v1117_v51, %v1116_v50  ;;  %7635 = vmatpush.bf16.msra.mxu2 %v8148_v54  ;;  %v768_v18 = vrot.slane %v766_v9, 5  ;;  %v673_v19 = vsel %vm8103_vm2, %v668_v62, %v8130_v46  ;;  %v683_v23 = vsel %vm8103_vm2, %v678_v63, %v682_v60  ;;  %v418_v45 = vld [vmem:[%s8044_s28 + $0x34] sm:$0xf]  ;;  %v419_v50 = vld [vmem:[%s8044_s28 + $0x38] sm:$0x1]  ;;  %v7340_v61 = vld [vmem:[%s8044_s28 + $0x24] sm:$0xff] }
  0x2e   : > { %7643 = vmatpush.bf16.msra.mxu3 %v7360_v57  ;;  %v772_v22 = vrot.slane %v770_v13, 4  ;;  %v687_v25 = vrot.slane %v685_v2, 4  ;;  %v776_v28 = vshll.u32 %v422_v21, 16  ;;  %v8197_v33 = vrot.slane %v694_v10, 5  ;;  %s7851_s30 = sshra.s32 %s6335_s27, 4  ;;  %s7857_s19 = scalar_lea.hbm %s10546_s10, 256  ;;  %s7852_s30 = int_to_ptr.hbm [resolvable:$true] %s7851_s30 }
  0x2f   : > { %1394 = vmatpush.bf16.msra.mxu0 %v7383_v27  ;;  %v763_v27 = vor.u32 %v762_v17, %v759_v16  ;;  %v700_v34 = vrot.slane %v698_v11, 4  ;;  %v1118_v41 = vunpack.c.l.b16 %v673_v19  ;;  %v1119_v46 = vunpack.c.l.b16 %v683_v23  ;;  %v423_v16 = vld [vmem:[%s8044_s28 + $0x48] sm:$0xf]  ;;  %v424_v17 = vld [vmem:[%s8044_s28 + $0x4c] sm:$0xf]  ;;  %s7853_s29 = scalar_lea.hbm %s7852_s30, 128  ;;  %p7858_p5 = scmp.lt.s32.totalorder %s7852_s30, %s10546_s10 }
  0x30   : > { %7628 = vmatpush.bf16.msra.mxu1 %v8179_v14  ;;  %v704_v47 = vshll.u32 %v413_v29, 16  ;;  %v733_v51 = vshrl.u32 %v417_v40, 16  ;;  %v736_v56 = vshll.u32 %v417_v40, 16  ;;  %v742_v60 = vshll.u32 %v418_v45, 16  ;;  %v414_v23 = vld [vmem:[%s8044_s28 + $0x24] sm:$0xf]  ;;  %p7854_p1 = scmp.ne.s32.totalorder %s7852_s30, %s7853_s29  ;;  %p7859_p6 = scmp.lt.s32.totalorder %s7857_s19, %s7853_s29 }
  0x31   : > { %7636 = vmatpush.bf16.msra.mxu2 %v8169_v6  ;;  %v764_v37 = vrot.slane %v763_v27, 4  ;;  %v701_v57 = vor.u32 %v700_v34, %v8197_v33  ;;  %v746_v63 = vshrl.u32 %v418_v45, 16  ;;  %v752_v0 = vshll.u32 %v419_v50, 16  ;;  %v415_v29 = vld [vmem:[%s8044_s28 + $0x28] sm:$0xf] }
  0x32   : > { %7644 = vmatpush.bf16.msra.mxu3 %v7359_v12  ;;  %v738_v62 = vrot.slane %v736_v56, 5  ;;  %v744_v2 = vrot.slane %v742_v60, 5  ;;  %v8234_v7 = vpack.c.b16 %v1119_v46, %v1118_v41  ;;  %v706_v11 = vrot.slane %v704_v47, 5  ;;  %p7855_p2 = pnand %p7854_p1, %p8021_p4  ;;  %p7860_p7 = por %p7859_p6, %p7858_p5 }
  0x33   : > { %1395 = vmatpush.bf16.msra.mxu0 %v7382_v39  ;;  %v778_v39 = vrot.slane %v776_v28, 5  ;;  %v769_v48 = vsel %vm8103_vm2, %v764_v37, %v768_v18  ;;  %v702_v10 = vrot.slane %v701_v57, 4  ;;  %v754_v13 = vrot.slane %v752_v0, 5  ;;  %v425_v28 = vld [vmem:[%s8044_s28 + $0x50] sm:$0x1] }
  0x34   : > { %v1126_v55 = vunpack.c.l.b16 %v769_v48  ;;  %7629 = vmatpush.bf16.msra.mxu1 %v8204_v35  ;;  %v784_v19 = vshll.u32 %v423_v16, 16  ;;  %v794_v21 = vshrl.u32 %v424_v17, 16  ;;  %v800_v41 = vshll.u32 %v425_v28, 16  ;;  %p7856_p3 = pneg %p7855_p2 }
  0x35   : > { %7637 = vmatpush.bf16.msra.mxu2 %v8184_v15  ;;  %v707_v37 = vsel %vm8103_vm2, %v702_v10, %v706_v11  ;;  %v718_v46 = vshll.u32 %v415_v29, 16  ;;  %v722_v47 = vshrl.u32 %v415_v29, 16  ;;  %v426_v11 = vld [vmem:[%s8044_s28 + $0x54] sm:$0xf] }
  0x36   : > { %7645 = vmatpush.bf16.msra.mxu3 %v7358_v20  ;;  %v790_v20 = vshll.u32 %v424_v17, 16  ;;  %v796_v40 = vrot.slane %v794_v21, 4  ;;  %v802_v50 = vrot.slane %v800_v41, 5  ;;  %v1121_v56 = vunpack.c.l.b16 %v707_v37  ;;  %p7861_p9 = pnand %p7860_p7, %p7856_p3 }
  0x37   : > { %1396 = vmatpush.bf16.msra.mxu0 %v7381_v52  ;;  %v724_v60 = vrot.slane %v722_v47, 4 }
  0x39   : > { %7638 = vmatpush.bf16.msra.mxu2 %v8209_v36 }
  0x3a   : > { %1397 = vmatmul.bf16.vlgmr.msra.gmra.mxu0 %v1152_v58  ;;  %v8228_v58 = vld [vmem:[%s10537_s1 + $0x100] sm:$0xff]  ;;  %7646 = vmatpush.bf16.msra.mxu3 %v7357_v42  ;;  %v712_v42 = vshll.u32 %v414_v23, 16 }
  0x3b   : > { %1488 = vmatpush.bf16.msrb.mxu0 %v8057_v4  ;;  %v688_v4 = vshll.u32 %v411_v59, 16  ;;  %v735_v59 = vrot.slane %v733_v51, 4  ;;  %7630 = vmatpush.bf16.msra.mxu1 %v8228_v58 }
  0x3d   : > { %v690_v30 = vrot.slane %v688_v4, 5  ;;  %v739_v9 = vor.u32 %v738_v62, %v735_v59  ;;  %v748_v4 = vrot.slane %v746_v63, 4  ;;  %1853 = vmatmul.bf16.vlgmr.msra.gmra.mxu3 %v7340_v61  ;;  %v720_v59 = vrot.slane %v718_v46, 5  ;;  %v416_v63 = vld [vmem:[%s8044_s28 + $0x2c] sm:$0x1] }
  0x3e   : > { %v728_v10 = vshll.u32 %v416_v63, 16  ;;  %v430_v46 = vld [vmem:[%s8044_s28 + $0x64] sm:$0xf] }
  0x3f   : > { %1489 = vmatpush.bf16.msrb.mxu0 %v8092_v26  ;;  %v773_v26 = vor.u32 %v772_v22, %v768_v18  ;;  %v691_v52 = vor.u32 %v690_v30, %v687_v25  ;;  %v740_v12 = vrot.slane %v739_v9, 4  ;;  %v781_v18 = vshrl.u32 %v423_v16, 16 }
  0x41   : > { %v774_v44 = vrot.slane %v773_v26, 4  ;;  %v692_v8 = vrot.slane %v691_v52, 4  ;;  %v745_v25 = vsel %vm8103_vm2, %v740_v12, %v744_v2  ;;  %v783_v34 = vrot.slane %v781_v18, 4  ;;  %v427_v12 = vld [vmem:[%s8044_s28 + $0x58] sm:$0xf] }
  0x42   : > { %v1124_v30 = vunpack.c.l.b16 %v745_v25  ;;  %v792_v26 = vrot.slane %v790_v20, 5  ;;  %v814_v16 = vshll.u32 %v427_v12, 16  ;;  %v818_v17 = vshrl.u32 %v427_v12, 16 }
  0x43   : > { %1490 = vmatpush.bf16.msrb.mxu0 %v8114_v38  ;;  %v779_v53 = vsel %vm8103_vm2, %v774_v44, %v778_v39  ;;  %v697_v22 = vsel %vm8103_vm2, %v692_v8, %v8197_v33  ;;  %v709_v33 = vshrl.u32 %v414_v23, 16  ;;  %v730_v18 = vrot.slane %v728_v10, 5 }
  0x44   : > { %v1127_v38 = vunpack.c.l.b16 %v779_v53  ;;  %v797_v48 = vor.u32 %v796_v40, %v792_v26  ;;  %v1120_v53 = vunpack.c.l.b16 %v697_v22  ;;  %v816_v22 = vrot.slane %v814_v16, 5 }
  0x45   : > { %v711_v57 = vrot.slane %v709_v33, 4  ;;  %v820_v23 = vrot.slane %v818_v17, 4 }
  0x46   : > { %v8232_v1 = vpack.c.b16 %v1127_v38, %v1126_v55  ;;  %v798_v55 = vrot.slane %v797_v48, 4  ;;  %v8269_v8 = vpack.c.b16 %v1121_v56, %v1120_v53 }
  0x47   : > { %1491 = vmatpush.bf16.msrb.mxu0 %v8139_v49  ;;  %v749_v49 = vor.u32 %v748_v4, %v744_v2  ;;  %v7341_v2 = vld [vmem:[%s8044_s28 + $0x30] sm:$0xff]  ;;  %v725_v4 = vor.u32 %v724_v60, %v720_v59  ;;  %v821_v28 = vor.u32 %v820_v23, %v816_v22 }
  0x48   : > { %10580 = vst [vmem:[#allocation10_spill] sm:$0xff] %v8232_v1  ;;  %1610 = vmatmul.bf16.vlgmr.msra.gmra.mxu2 %v8232_v1  ;;  %v803_v61 = vsel %vm8103_vm2, %v798_v55, %v802_v50  ;;  %v842_v50 = vshrl.u32 %v430_v46, 16 }
  0x49   : > { %v750_v27 = vrot.slane %v749_v49, 4  ;;  %v1129_v0 = vunpack.c.l.b16 %v803_v61  ;;  %10583 = vst [vmem:[#allocation13_spill] sm:$0xff] %v8269_v8  ;;  %v805_v49 = vshrl.u32 %v426_v11, 16 }
  0x4a   : > { %1402 = vmatmul.bf16.gmra.mxu0 %v8234_v7 }
  0x4b   : > { %1492 = vmatpush.bf16.msrb.mxu0 %v8164_v3  ;;  %v786_v3 = vrot.slane %v784_v19, 5  ;;  %v755_v39 = vsel %vm8103_vm2, %v750_v27, %v754_v13  ;;  %v808_v13 = vshll.u32 %v426_v11, 16  ;;  %v428_v19 = vld [vmem:[%s8044_s28 + $0x5c] sm:$0x1]  ;;  %v807_v20 = vrot.slane %v805_v49, 4 }
  0x4c   : > { %v1125_v44 = vunpack.c.l.b16 %v755_v39  ;;  %v824_v25 = vshll.u32 %v428_v19, 16 }
  0x4d   : > { %v787_v45 = vor.u32 %v786_v3, %v783_v34  ;;  %1858 = vmatmul.bf16.gmra.mxu3 %v7341_v2  ;;  %v810_v21 = vrot.slane %v808_v13, 5  ;;  %v822_v3 = vrot.slane %v821_v28, 4  ;;  %v434_v13 = vld [vmem:[%s8044_s28 + $0x74] sm:$0x1] }
  0x4e   : > { %v8255_v51 = vpack.c.b16 %v1125_v44, %v1124_v30  ;;  %v826_v29 = vrot.slane %v824_v25, 5 }
  0x4f   : > { %1493 = vmatpush.bf16.msrb.mxu0 %v8179_v14  ;;  %v788_v52 = vrot.slane %v787_v45, 4  ;;  %v714_v14 = vrot.slane %v712_v42, 5  ;;  %v811_v27 = vor.u32 %v810_v21, %v807_v20  ;;  %v7342_v42 = vld [vmem:[%s8044_s28 + $0x3c] sm:$0xff] }
  0x50   : > { %10581 = vst [vmem:[#allocation11_spill] sm:$0xff] %v8255_v51  ;;  %1511 = vmatmul.bf16.vlgmr.msra.gmra.mxu1 %v8255_v51  ;;  %v827_v37 = vsel %vm8103_vm2, %v822_v3, %v826_v29  ;;  %v429_v45 = vld [vmem:[%s8044_s28 + $0x60] sm:$0xf] }
  0x51   : > { %v793_v38 = vsel %vm8103_vm2, %v788_v52, %v792_v26  ;;  %v715_v9 = vor.u32 %v714_v14, %v711_v57  ;;  %v812_v34 = vrot.slane %v811_v27, 4  ;;  %v1131_v41 = vunpack.c.l.b16 %v827_v37  ;;  %v431_v52 = vld [vmem:[%s8044_s28 + $0x68] sm:$0x1] }
  0x52   : > { %v1128_v62 = vunpack.c.l.b16 %v793_v38  ;;  %v829_v47 = vshrl.u32 %v429_v45, 16  ;;  %v832_v48 = vshll.u32 %v429_v45, 16  ;;  %v848_v57 = vshll.u32 %v431_v52, 16 }
  0x53   : > { %1494 = vmatpush.bf16.msrb.mxu0 %v8204_v35  ;;  %v817_v26 = vsel %vm8103_vm2, %v812_v34, %v816_v22  ;;  %v436_v34 = vld [vmem:[%s8044_s28 + $0x7c] sm:$0xf] }
  0x54   : > { %v8266_v35 = vpack.c.b16 %v1129_v0, %v1128_v62  ;;  %v1130_v40 = vunpack.c.l.b16 %v817_v26  ;;  %v831_v53 = vrot.slane %v829_v47, 4  ;;  %v834_v55 = vrot.slane %v832_v48, 5 }
  0x55   : > { %v886_v37 = vshll.u32 %v436_v34, 16 }
  0x56   : > { %10582 = vst [vmem:[#allocation12_spill] sm:$0xff] %v8266_v35  ;;  %v8288_v33 = vpack.c.b16 %v1131_v41, %v1130_v40  ;;  %v835_v14 = vor.u32 %v834_v55, %v831_v53 }
  0x57   : > { %1495 = vmatpush.bf16.msrb.mxu0 %v8228_v58  ;;  %v726_v58 = vrot.slane %v725_v4, 4  ;;  %v433_v4 = vld [vmem:[%s8044_s28 + $0x70] sm:$0xf] }
  0x58   : > { %1615 = vmatmul.bf16.gmra.mxu2 %v8266_v35  ;;  %10584 = vst [vmem:[#allocation14_spill] sm:$0xff] %v8288_v33  ;;  %v836_v60 = vrot.slane %v835_v14, 4  ;;  %v862_v12 = vshll.u32 %v433_v4, 16  ;;  %v866_v49 = vshrl.u32 %v433_v4, 16  ;;  %v7345_v14 = vld [vmem:[%s8044_s28 + $0x60] sm:$0xff] }
  0x59   : > { %v731_v30 = vsel %vm8103_vm2, %v726_v58, %v730_v18  ;;  %v872_v58 = vshll.u32 %v434_v13, 16  ;;  %v440_v4 = vld [vmem:[%s8044_s28 + $0x8c] sm:$0x1] }
  0x5a   : > { %1407 = vmatmul.bf16.gmra.mxu0 %v8269_v8  ;;  %v1123_v39 = vunpack.c.l.b16 %v731_v30  ;;  %v864_v17 = vrot.slane %v862_v12, 5  ;;  %v435_v30 = vld [vmem:[%s8044_s28 + $0x78] sm:$0xf]  ;;  %v920_v12 = vshll.u32 %v440_v4, 16 }
  0x5b   : > { %1587 = vmatpush.bf16.msra.mxu0 %v8062_v5  ;;  %v716_v5 = vrot.slane %v715_v9, 4  ;;  %v7343_v9 = vld [vmem:[%s8044_s28 + $0x48] sm:$0xff]  ;;  %v874_v20 = vrot.slane %v872_v58, 5  ;;  %v877_v3 = vshrl.u32 %v435_v30, 16  ;;  %v880_v26 = vshll.u32 %v435_v30, 16 }
  0x5d   : > { %1863 = vmatmul.bf16.gmra.mxu3 %v7342_v42  ;;  %v879_v40 = vrot.slane %v877_v3, 4  ;;  %v882_v41 = vrot.slane %v880_v26, 5  ;;  %v888_v42 = vrot.slane %v886_v37, 5  ;;  %v443_v3 = vld [vmem:[%s8044_s28 + $0x98] sm:$0x1] }
  0x5f   : > { %1588 = vmatpush.bf16.msra.mxu0 %v8084_v24  ;;  %v721_v24 = vsel %vm8103_vm2, %v716_v5, %v720_v59  ;;  %v850_v59 = vrot.slane %v848_v57, 5  ;;  %v868_v5 = vrot.slane %v866_v49, 4  ;;  %v883_v47 = vor.u32 %v882_v41, %v879_v40 }
  0x60   : > { %1516 = vmatmul.bf16.gmra.mxu1 %v8232_v1 }
  0x61   : > { %v869_v19 = vor.u32 %v868_v5, %v864_v17 }
  0x63   : > { %1589 = vmatpush.bf16.msra.mxu0 %v8101_v31  ;;  %v1122_v31 = vunpack.c.l.b16 %v721_v24  ;;  %v870_v22 = vrot.slane %v869_v19, 4  ;;  %v7344_v24 = vld [vmem:[%s8044_s28 + $0x54] sm:$0xff]  ;;  %v7346_v19 = vld [vmem:[%s8044_s28 + $0x6c] sm:$0xff] }
  0x65   : > { %v8292_v44 = vpack.c.b16 %v1123_v39, %v1122_v31  ;;  %v875_v25 = vsel %vm8103_vm2, %v870_v22, %v874_v20  ;;  %v890_v31 = vshrl.u32 %v436_v34, 16  ;;  %v437_v39 = vld [vmem:[%s8044_s28 + $0x80] sm:$0x1]  ;;  %v441_v20 = vld [vmem:[%s8044_s28 + $0x90] sm:$0xf] }
  0x66   : > { %v1135_v28 = vunpack.c.l.b16 %v875_v25  ;;  %v925_v22 = vshrl.u32 %v441_v20, 16 }
  0x67   : > { %1590 = vmatpush.bf16.msra.mxu0 %v8128_v43  ;;  %10585 = vst [vmem:[#allocation15_spill] sm:$0xff] %v8292_v44  ;;  %v838_v43 = vshll.u32 %v430_v46, 16  ;;  %v892_v45 = vrot.slane %v890_v31, 4  ;;  %v896_v46 = vshll.u32 %v437_v39, 16  ;;  %v944_v31 = vshll.u32 %v443_v3, 16 }
  0x68   : > { %1620 = vmatmul.bf16.gmra.mxu2 %v8288_v33 }
  0x69   : > { %v840_v56 = vrot.slane %v838_v43, 5  ;;  %v893_v48 = vor.u32 %v892_v45, %v888_v42  ;;  %v898_v43 = vrot.slane %v896_v46, 5  ;;  %v946_v41 = vrot.slane %v944_v31, 5 }
  0x6a   : > { %1412 = vmatmul.bf16.gmra.mxu0 %v8292_v44 }
  0x6b   : > { %1591 = vmatpush.bf16.msra.mxu0 %v8148_v54  ;;  %v844_v54 = vrot.slane %v842_v50, 4  ;;  %v884_v50 = vrot.slane %v883_v47, 4  ;;  %v894_v52 = vrot.slane %v893_v48, 4 }
  0x6d   : > { %v845_v38 = vor.u32 %v844_v54, %v840_v56  ;;  %1868 = vmatmul.bf16.gmra.mxu3 %v7343_v9  ;;  %v889_v53 = vsel %vm8103_vm2, %v884_v50, %v888_v42  ;;  %v899_v55 = vsel %vm8103_vm2, %v894_v52, %v898_v43  ;;  %v8362_v43 = vld [vmem:[%s8044_s28 + $0x78] sm:$0xff] }
  0x6e   : > { %v1137_v54 = vunpack.c.l.b16 %v899_v55  ;;  %v444_v52 = vld [vmem:[%s8044_s28 + $0x9c] sm:$0xf] }
  0x6f   : > { %1592 = vmatpush.bf16.msra.mxu0 %v8169_v6  ;;  %v846_v61 = vrot.slane %v845_v38, 4  ;;  %v841_v6 = vsel %vm8103_vm2, %v836_v60, %v840_v56  ;;  %v1136_v56 = vunpack.c.l.b16 %v889_v53  ;;  %v438_v38 = vld [vmem:[%s8044_s28 + $0x84] sm:$0xf]  ;;  %v445_v53 = vld [vmem:[%s8044_s28 + $0xa0] sm:$0xf]  ;;  %v949_v55 = vshrl.u32 %v444_v52, 16 }
  0x70   : > { %1521 = vmatmul.bf16.gmra.mxu1 %v8266_v35  ;;  %v1132_v63 = vunpack.c.l.b16 %v841_v6  ;;  %v901_v60 = vshrl.u32 %v438_v38, 16 }
  0x71   : > { %v851_v62 = vsel %vm8103_vm2, %v846_v61, %v850_v59  ;;  %v8333_v57 = vpack.c.b16 %v1137_v54, %v1136_v56  ;;  %v439_v59 = vld [vmem:[%s8044_s28 + $0x88] sm:$0xf]  ;;  %v904_v61 = vshll.u32 %v438_v38, 16  ;;  %v952_v56 = vshll.u32 %v444_v52, 16 }
  0x72   : > { %v1133_v0 = vunpack.c.l.b16 %v851_v62  ;;  %v910_v6 = vshll.u32 %v439_v59, 16  ;;  %v914_v62 = vshrl.u32 %v439_v59, 16  ;;  %v958_v54 = vshll.u32 %v445_v53, 16 }
  0x73   : > { %1593 = vmatpush.bf16.msra.mxu0 %v8184_v15  ;;  %v432_v15 = vld [vmem:[%s8044_s28 + $0x6c] sm:$0xf]  ;;  %10588 = vst [vmem:[#allocation18_spill] sm:$0xff] %v8333_v57  ;;  %v951_v38 = vrot.slane %v949_v55, 4  ;;  %v954_v59 = vrot.slane %v952_v56, 5 }
  0x74   : > { %v8307_v2 = vpack.c.b16 %v1133_v0, %v1132_v63  ;;  %v853_v10 = vshrl.u32 %v432_v15, 16  ;;  %v856_v11 = vshll.u32 %v432_v15, 16  ;;  %v903_v63 = vrot.slane %v901_v60, 4 }
  0x75   : > { %v906_v0 = vrot.slane %v904_v61, 5  ;;  %v912_v9 = vrot.slane %v910_v6, 5  ;;  %v916_v15 = vrot.slane %v914_v62, 4  ;;  %v960_v60 = vrot.slane %v958_v54, 5  ;;  %v446_v6 = vld [vmem:[%s8044_s28 + $0xa4] sm:$0x1] }
  0x76   : > { %10586 = vst [vmem:[#allocation16_spill] sm:$0xff] %v8307_v2  ;;  %v855_v16 = vrot.slane %v853_v10, 4  ;;  %v955_v62 = vor.u32 %v954_v59, %v951_v38  ;;  %v450_v59 = vld [vmem:[%s8044_s28 + $0xb4] sm:$0xf] }
  0x77   : > { %1594 = vmatpush.bf16.msra.mxu0 %v8209_v36  ;;  %v858_v36 = vrot.slane %v856_v11, 5  ;;  %v907_v10 = vor.u32 %v906_v0, %v903_v63  ;;  %v917_v11 = vor.u32 %v916_v15, %v912_v9  ;;  %v968_v0 = vshll.u32 %v446_v6, 16 }
  0x78   : > { %1625 = vmatmul.bf16.gmra.mxu2 %v8307_v2  ;;  %v956_v15 = vrot.slane %v955_v62, 4  ;;  %v1000_v6 = vshll.u32 %v450_v59, 16 }
  0x79   : > { %v859_v18 = vor.u32 %v858_v36, %v855_v16  ;;  %v908_v49 = vrot.slane %v907_v10, 4  ;;  %v918_v13 = vrot.slane %v917_v11, 4  ;;  %v922_v16 = vrot.slane %v920_v12, 5 }
  0x7a   : > { %1417 = vmatmul.bf16.gmra.mxu0 %v8255_v51  ;;  %v970_v10 = vrot.slane %v968_v0, 5  ;;  %v961_v11 = vsel %vm8103_vm2, %v956_v15, %v960_v60 }
  0x7b   : > { %v860_v21 = vrot.slane %v859_v18, 4  ;;  %v913_v36 = vsel %vm8103_vm2, %v908_v49, %v912_v9  ;;  %v1142_v49 = vunpack.c.l.b16 %v961_v11 }
  0x7c   : > { %v1138_v5 = vunpack.c.l.b16 %v913_v36  ;;  %v8382_v36 = vld [vmem:[%s8044_s28 + $0x84] sm:$0xff] }
  0x7d   : > { %v865_v23 = vsel %vm8103_vm2, %v860_v21, %v864_v17  ;;  %1873 = vmatmul.bf16.gmra.mxu3 %v7344_v24  ;;  %v923_v17 = vsel %vm8103_vm2, %v918_v13, %v922_v16  ;;  %v442_v21 = vld [vmem:[%s8044_s28 + $0x94] sm:$0xf] }
  0x7e   : > { %v1134_v27 = vunpack.c.l.b16 %v865_v23  ;;  %v1139_v58 = vunpack.c.l.b16 %v923_v17  ;;  %v928_v23 = vshll.u32 %v441_v20, 16  ;;  %v934_v25 = vshll.u32 %v442_v21, 16 }
  0x80   : > { %1526 = vmatmul.bf16.gmra.mxu1 %v8288_v33  ;;  %v8320_v29 = vpack.c.b16 %v1135_v28, %v1134_v27  ;;  %v8346_v18 = vpack.c.b16 %v1139_v58, %v1138_v5  ;;  %v938_v27 = vshrl.u32 %v442_v21, 16  ;;  %v927_v28 = vrot.slane %v925_v22, 4  ;;  %v447_v5 = vld [vmem:[%s8044_s28 + $0xa8] sm:$0xf]  ;;  %v448_v58 = vld [vmem:[%s8044_s28 + $0xac] sm:$0xf] }
  0x81   : > { %v930_v24 = vrot.slane %v928_v23, 5  ;;  %v936_v30 = vrot.slane %v934_v25, 5  ;;  %v976_v20 = vshll.u32 %v447_v5, 16  ;;  %v982_v21 = vshll.u32 %v448_v58, 16 }
  0x82   : > { %10587 = vst [vmem:[#allocation17_spill] sm:$0xff] %v8320_v29  ;;  %v940_v34 = vrot.slane %v938_v27, 4  ;;  %v986_v22 = vshrl.u32 %v448_v58, 16 }
  0x83   : > { %10589 = vst [vmem:[#allocation19_spill] sm:$0xff] %v8346_v18  ;;  %v931_v26 = vor.u32 %v930_v24, %v927_v28  ;;  %v978_v28 = vrot.slane %v976_v20, 5  ;;  %v984_v24 = vrot.slane %v982_v21, 5 }
  0x84   : > { %v941_v37 = vor.u32 %v940_v34, %v936_v30  ;;  %v449_v34 = vld [vmem:[%s8044_s28 + $0xb0] sm:$0x1] }
  0x85   : > { %v932_v39 = vrot.slane %v931_v26, 4 }
  0x86   : > { %v942_v40 = vrot.slane %v941_v37, 4  ;;  %v992_v37 = vshll.u32 %v449_v34, 16 }
  0x87   : > { %v937_v42 = vsel %vm8103_vm2, %v932_v39, %v936_v30  ;;  %v988_v30 = vrot.slane %v986_v22, 4 }
  0x88   : > { %1630 = vmatmul.bf16.gmra.mxu2 %v8320_v29  ;;  %v947_v45 = vsel %vm8103_vm2, %v942_v40, %v946_v41  ;;  %v1140_v46 = vunpack.c.l.b16 %v937_v42  ;;  %v994_v42 = vrot.slane %v992_v37, 5 }
  0x89   : > { %v1141_v47 = vunpack.c.l.b16 %v947_v45  ;;  %v989_v26 = vor.u32 %v988_v30, %v984_v24 }
  0x8a   : > { %1422 = vmatmul.bf16.gmra.mxu0 %v8232_v1 }
  0x8b   : > { %v8359_v48 = vpack.c.b16 %v1141_v47, %v1140_v46  ;;  %v990_v41 = vrot.slane %v989_v26, 4 }
  0x8d   : > { %1878 = vmatmul.bf16.gmra.mxu3 %v7345_v14  ;;  %10590 = vst [vmem:[#allocation20_spill] sm:$0xff] %v8359_v48  ;;  %v962_v14 = vshrl.u32 %v445_v53, 16  ;;  %v995_v46 = vsel %vm8103_vm2, %v990_v41, %v994_v42  ;;  %v8442_v41 = vld [vmem:[%s8044_s28 + $0x9c] sm:$0xff] }
  0x8e   : > { %v1145_v53 = vunpack.c.l.b16 %v995_v46  ;;  %v453_v46 = vld [vmem:[%s8044_s28 + $0xc0] sm:$0xf] }
  0x8f   : > { %v964_v61 = vrot.slane %v962_v14, 4  ;;  %v8412_v14 = vld [vmem:[%s8044_s28 + $0x90] sm:$0xff] }
  0x90   : > { %1531 = vmatmul.bf16.gmra.mxu1 %v8307_v2 }
  0x91   : > { %v965_v63 = vor.u32 %v964_v61, %v960_v60  ;;  %v451_v60 = vld [vmem:[%s8044_s28 + $0xb8] sm:$0xf]  ;;  %v997_v61 = vshrl.u32 %v450_v59, 16  ;;  %v1024_v59 = vshll.u32 %v453_v46, 16 }
  0x92   : > { %v1006_v62 = vshll.u32 %v451_v60, 16 }
  0x93   : > { %v966_v4 = vrot.slane %v965_v63, 4  ;;  %v1010_v63 = vshrl.u32 %v451_v60, 16 }
  0x94   : > { %v1008_v11 = vrot.slane %v1006_v62, 5 }
  0x95   : > { %v971_v12 = vsel %vm8103_vm2, %v966_v4, %v970_v10  ;;  %v999_v4 = vrot.slane %v997_v61, 4  ;;  %v1002_v10 = vrot.slane %v1000_v6, 5 }
  0x96   : > { %v1143_v13 = vunpack.c.l.b16 %v971_v12  ;;  %v1012_v12 = vrot.slane %v1010_v63, 4 }
  0x98   : > { %1635 = vmatmul.bf16.gmra.mxu2 %v8333_v57  ;;  %v8379_v16 = vpack.c.b16 %v1143_v13, %v1142_v49  ;;  %v452_v49 = vld [vmem:[%s8044_s28 + $0xbc] sm:$0x1]  ;;  %v1003_v13 = vor.u32 %v1002_v10, %v999_v4  ;;  %v1026_v10 = vrot.slane %v1024_v59, 5 }
  0x99   : > { %v1016_v58 = vshll.u32 %v452_v49, 16  ;;  %v455_v49 = vld [vmem:[%s8044_s28 + $0xc8] sm:$0x1] }
  0x9a   : > { %1427 = vmatmul.bf16.gmra.mxu0 %v8266_v35  ;;  %10591 = vst [vmem:[#allocation21_spill] sm:$0xff] %v8379_v16  ;;  %v1004_v21 = vrot.slane %v1003_v13, 4 }
  0x9d   : > { %1883 = vmatmul.bf16.gmra.mxu3 %v7346_v19  ;;  %v973_v19 = vshrl.u32 %v447_v5, 16  ;;  %v1013_v5 = vor.u32 %v1012_v12, %v1008_v11 }
  0x9f   : > { %v975_v27 = vrot.slane %v973_v19, 4  ;;  %v1014_v22 = vrot.slane %v1013_v5, 4 }
  0xa0   : > { %1536 = vmatmul.bf16.gmra.mxu1 %v8320_v29 }
  0xa1   : > { %v979_v3 = vor.u32 %v978_v28, %v975_v27  ;;  %v1018_v27 = vrot.slane %v1016_v58, 5  ;;  %v1009_v28 = vsel %vm8103_vm2, %v1004_v21, %v1008_v11  ;;  %v1040_v58 = vshll.u32 %v455_v49, 16 }
  0xa2   : > { %v1146_v34 = vunpack.c.l.b16 %v1009_v28 }
  0xa3   : > { %v980_v40 = vrot.slane %v979_v3, 4  ;;  %v1042_v28 = vrot.slane %v1040_v58, 5 }
  0xa5   : > { %v985_v45 = vsel %vm8103_vm2, %v980_v40, %v984_v24  ;;  %v1019_v24 = vsel %vm8103_vm2, %v1014_v22, %v1018_v27 }
  0xa6   : > { %v1144_v52 = vunpack.c.l.b16 %v985_v45  ;;  %v1147_v3 = vunpack.c.l.b16 %v1019_v24 }
  0xa8   : > { %1640 = vmatmul.bf16.gmra.mxu2 %v8346_v18  ;;  %v8407_v56 = vpack.c.b16 %v1145_v53, %v1144_v52  ;;  %v8437_v37 = vpack.c.b16 %v1147_v3, %v1146_v34  ;;  %v454_v52 = vld [vmem:[%s8044_s28 + $0xc4] sm:$0xf]  ;;  %v1021_v53 = vshrl.u32 %v453_v46, 16 }
  0xa9   : > { %v1030_v60 = vshll.u32 %v454_v52, 16  ;;  %v1034_v61 = vshrl.u32 %v454_v52, 16 }
  0xaa   : > { %1432 = vmatmul.bf16.gmra.mxu0 %v8288_v33  ;;  %10592 = vst [vmem:[#allocation22_spill] sm:$0xff] %v8407_v56  ;;  %v1023_v4 = vrot.slane %v1021_v53, 4 }
  0xab   : > { %10593 = vst [vmem:[#allocation23_spill] sm:$0xff] %v8437_v37  ;;  %v1036_v11 = vrot.slane %v1034_v61, 4 }
  0xac   : > { %v1027_v13 = vor.u32 %v1026_v10, %v1023_v4  ;;  %v457_v4 = vld [vmem:[%s8044_s28 + $0xd0] sm:$0xf] }
  0xad   : > { %1888 = vmatmul.bf16.gmra.mxu3 %v8362_v43 }
  0xb0   : > { %1541 = vmatmul.bf16.gmra.mxu1 %v8333_v57 }
  0xb7   : > { %v8364_v50 = vpop.f32.mrf.mxu0 }
  0xb8   : > { %1645 = vmatmul.bf16.gmra.mxu2 %v8359_v48 }
  0xba   : > { %1437 = vmatmul.bf16.gmra.mxu0 %v8307_v2 }
  0xbd   : > { %1893 = vmatmul.bf16.gmra.mxu3 %v8382_v36 }
  0xbf   : > { %v8372_v9 = vpop.f32.mrf.mxu0 }
  0xc0   : > { %1546 = vmatmul.bf16.gmra.mxu1 %v8346_v18  ;;  %v8393_v25 = vpop.f32.mrf.mxu3 }
  0xc7   : > { %v8384_v17 = vpop.f32.mrf.mxu0 }
  0xc8   : > { %1650 = vmatmul.bf16.gmra.mxu2 %v8379_v16  ;;  %v8405_v55 = vpop.f32.mrf.mxu3 }
  0xca   : > { %1442 = vmatmul.bf16.gmra.mxu0 %v8320_v29 }
  0xcb   : > { %v8391_v23 = vpop.f32.mrf.mxu2 }
  0xcd   : > { %v1512_v31 = vpop.f32.mrf.mxu1  ;;  %1898 = vmatmul.bf16.gmra.mxu3 %v8412_v14 }
  0xcf   : > { %v8396_v39 = vpop.f32.mrf.mxu0 }
  0xd0   : > { %1551 = vmatmul.bf16.gmra.mxu1 %v8359_v48  ;;  %v8423_v15 = vpop.f32.mrf.mxu3 }
  0xd3   : > { %v8403_v47 = vpop.f32.mrf.mxu2 }
  0xd5   : > { %v8409_v54 = vpop.f32.mrf.mxu1 }
  0xd7   : > { %v8414_v38 = vpop.f32.mrf.mxu0 }
  0xd8   : > { %1655 = vmatmul.bf16.gmra.mxu2 %v8407_v56  ;;  %v8435_v26 = vpop.f32.mrf.mxu3 }
  0xda   : > { %1447 = vmatmul.bf16.gmra.mxu0 %v8333_v57 }
  0xdb   : > { %v8421_v0 = vpop.f32.mrf.mxu2 }
  0xdd   : > { %v1517_v19 = vpop.f32.mrf.mxu1  ;;  %1903 = vmatmul.bf16.gmra.mxu3 %v8442_v41 }
  0xdf   : > { %v8426_v20 = vpop.f32.mrf.mxu0 }
  0xe0   : > { %1556 = vmatmul.bf16.gmra.mxu1 %v8379_v16  ;;  %v8452_v63 = vpop.f32.mrf.mxu3 }
  0xe3   : > { %v8433_v30 = vpop.f32.mrf.mxu2 }
  0xe5   : > { %v8439_v40 = vpop.f32.mrf.mxu1 }
  0xe7   : > { %v1413_v42 = vpop.f32.mrf.mxu0 }
  0xe8   : > { %1660 = vmatmul.bf16.gmra.mxu2 %v8437_v37  ;;  %v1513_v45 = vadd.f32 %v1512_v31, %v1413_v42  ;;  %v1032_v31 = vrot.slane %v1030_v60, 5  ;;  %v8467_v52 = vpop.f32.mrf.mxu3  ;;  %v8477_v60 = vld [vmem:[%s8044_s28 + $0xa8] sm:$0xff] }
  0xea   : > { %v1612_v6 = vadd.f32 %v8391_v23, %v1513_v45  ;;  %1452 = vmatmul.bf16.gmra.mxu0 %v8346_v18  ;;  %v1037_v5 = vor.u32 %v1036_v11, %v1032_v31  ;;  %v1028_v23 = vrot.slane %v1027_v13, 4  ;;  %v1054_v11 = vshll.u32 %v457_v4, 16 }
  0xeb   : > { %v8450_v62 = vpop.f32.mrf.mxu2 }
  0xec   : > { %v8455_v12 = vadd.f32 %v8393_v25, %v1612_v6  ;;  %v1038_v27 = vrot.slane %v1037_v5, 4  ;;  %v1033_v34 = vsel %vm8103_vm2, %v1028_v23, %v1032_v31 }
  0xed   : > { %v1522_v21 = vpop.f32.mrf.mxu1  ;;  %v1148_v45 = vunpack.c.l.b16 %v1033_v34  ;;  %1908 = vmatmul.bf16.gmra.mxu3 %v8477_v60 }
  0xee   : > { %v1043_v25 = vsel %vm8103_vm2, %v1038_v27, %v1042_v28  ;;  %v458_v28 = vld [vmem:[%s8044_s28 + $0xd4] sm:$0x1] }
  0xef   : > { %v1415_v22 = vpop.f32.mrf.mxu0  ;;  %v1149_v46 = vunpack.c.l.b16 %v1043_v25  ;;  %v1064_v25 = vshll.u32 %v458_v28, 16  ;;  %v460_v28 = vld [vmem:[%s8044_s28 + $0xdc] sm:$0xf] }
  0xf0   : > { %v1515_v24 = vadd.f32 %v8409_v54, %v1415_v22  ;;  %1561 = vmatmul.bf16.gmra.mxu1 %v8407_v56  ;;  %v8487_v5 = vpop.f32.mrf.mxu3 }
  0xf1   : > { %v8472_v53 = vpack.c.b16 %v1149_v46, %v1148_v45 }
  0xf2   : > { %v1614_v3 = vadd.f32 %v8403_v47, %v1515_v24  ;;  %v456_v47 = vld [vmem:[%s8044_s28 + $0xcc] sm:$0xf] }
  0xf3   : > { %v8465_v42 = vpop.f32.mrf.mxu2  ;;  %10594 = vst [vmem:[#allocation24_spill] sm:$0xff] %v8472_v53  ;;  %v1045_v10 = vshrl.u32 %v456_v47, 16  ;;  %v1048_v31 = vshll.u32 %v456_v47, 16 }
  0xf4   : > { %v8470_v54 = vadd.f32 %v8405_v55, %v1614_v3  ;;  %v1058_v55 = vshrl.u32 %v457_v4, 16 }
  0xf5   : > { %v8474_v59 = vpop.f32.mrf.mxu1  ;;  %v1047_v58 = vrot.slane %v1045_v10, 4  ;;  %v1050_v22 = vrot.slane %v1048_v31, 5 }
  0xf6   : > { %v1060_v23 = vrot.slane %v1058_v55, 4 }
  0xf7   : > { %v1418_v61 = vpop.f32.mrf.mxu0  ;;  %v1051_v24 = vor.u32 %v1050_v22, %v1047_v58  ;;  %v8512_v22 = vld [vmem:[%s8044_s28 + $0xb4] sm:$0xff] }
  0xf8   : > { %1665 = vmatmul.bf16.gmra.mxu2 %v8472_v53  ;;  %v1518_v6 = vadd.f32 %v1517_v19, %v1418_v61  ;;  %v1056_v19 = vrot.slane %v1054_v11, 5  ;;  %v1066_v61 = vrot.slane %v1064_v25, 5  ;;  %v8502_v55 = vpop.f32.mrf.mxu3  ;;  %v1078_v25 = vshll.u32 %v460_v28, 16 }
  0xfa   : > { %v1617_v49 = vadd.f32 %v8421_v0, %v1518_v6  ;;  %1457 = vmatmul.bf16.gmra.mxu0 %v8359_v48  ;;  %v1061_v34 = vor.u32 %v1060_v23, %v1056_v19  ;;  %v1052_v0 = vrot.slane %v1051_v24, 4 }
  0xfb   : > { %v8485_v13 = vpop.f32.mrf.mxu2 }
  0xfc   : > { %v8490_v27 = vadd.f32 %v8423_v15, %v1617_v49  ;;  %v1062_v46 = vrot.slane %v1061_v34, 4  ;;  %v1057_v47 = vsel %vm8103_vm2, %v1052_v0, %v1056_v19 }
  0xfd   : > { %v1527_v3 = vpop.f32.mrf.mxu1  ;;  %v1150_v31 = vunpack.c.l.b16 %v1057_v47  ;;  %1913 = vmatmul.bf16.gmra.mxu3 %v8512_v22 }
  0xfe   : > { %v1067_v15 = vsel %vm8103_vm2, %v1062_v46, %v1066_v61 }
  0xff   : > { %v1420_v45 = vpop.f32.mrf.mxu0  ;;  %v1151_v11 = vunpack.c.l.b16 %v1067_v15 }
 0x100   : > { %v1520_v6 = vadd.f32 %v8439_v40, %v1420_v45  ;;  %1566 = vmatmul.bf16.gmra.mxu1 %v8437_v37  ;;  %v8522_v46 = vpop.f32.mrf.mxu3 }
 0x101   : > { %v8507_v49 = vpack.c.b16 %v1151_v11, %v1150_v31 }
 0x102   : > { %v1619_v4 = vadd.f32 %v8433_v30, %v1520_v6  ;;  %v459_v30 = vld [vmem:[%s8044_s28 + $0xd8] sm:$0xf] }
 0x103   : > { %v8500_v10 = vpop.f32.mrf.mxu2  ;;  %10595 = vst [vmem:[#allocation25_spill] sm:$0xff] %v8507_v49  ;;  %v1069_v24 = vshrl.u32 %v459_v30, 16  ;;  %v1072_v34 = vshll.u32 %v459_v30, 16 }
 0x104   : > { %v8505_v40 = vadd.f32 %v8435_v26, %v1619_v4  ;;  %v1082_v26 = vshrl.u32 %v460_v28, 16  ;;  %v461_v4 = vld [vmem:[%s8044_s28 + $0xe0] sm:$0x1] }
 0x105   : > { %v8509_v58 = vpop.f32.mrf.mxu1  ;;  %v1071_v61 = vrot.slane %v1069_v24, 4  ;;  %v1074_v6 = vrot.slane %v1072_v34, 5 }
 0x106   : > { %v1084_v47 = vrot.slane %v1082_v26, 4 }
 0x107   : > { %v1423_v19 = vpop.f32.mrf.mxu0  ;;  %v1075_v31 = vor.u32 %v1074_v6, %v1071_v61 }
 0x108   : > { %1670 = vmatmul.bf16.gmra.mxu2 %v8507_v49  ;;  %v1523_v23 = vadd.f32 %v1522_v21, %v1423_v19  ;;  %v1080_v21 = vrot.slane %v1078_v25, 5  ;;  %v1088_v19 = vshll.u32 %v461_v4, 16  ;;  %v8537_v61 = vpop.f32.mrf.mxu3  ;;  %v8545_v4 = vld [vmem:[%s8044_s28 + $0xc0] sm:$0xff] }
 0x10a   : > { %v1622_v45 = vadd.f32 %v8450_v62, %v1523_v23  ;;  %1462 = vmatmul.bf16.gmra.mxu0 %v8379_v16  ;;  %v1085_v11 = vor.u32 %v1084_v47, %v1080_v21  ;;  %v1076_v62 = vrot.slane %v1075_v31, 4  ;;  %v1090_v16 = vrot.slane %v1088_v19, 5 }
 0x10b   : > { %v8520_v0 = vpop.f32.mrf.mxu2 }
 0x10c   : > { %v8525_v15 = vadd.f32 %v8452_v63, %v1622_v45  ;;  %v1086_v23 = vrot.slane %v1085_v11, 4  ;;  %v1081_v24 = vsel %vm8103_vm2, %v1076_v62, %v1080_v21 }
 0x10d   : > { %v1532_v30 = vpop.f32.mrf.mxu1  ;;  %v1188_v26 = vunpack.c.l.b16 %v1081_v24  ;;  %1918 = vmatmul.bf16.gmra.mxu3 %v8545_v4 }
 0x10e   : > { %v1091_v63 = vsel %vm8103_vm2, %v1086_v23, %v1090_v16  ;;  %v463_v16 = vld [vmem:[%s8044_s28 + $0xe8] sm:$0xf] }
 0x10f   : > { %v1425_v28 = vpop.f32.mrf.mxu0  ;;  %v1189_v45 = vunpack.c.l.b16 %v1091_v63  ;;  %v1102_v19 = vshll.u32 %v463_v16, 16 }
 0x110   : > { %v1525_v48 = vadd.f32 %v8474_v59, %v1425_v28  ;;  %1571 = vmatmul.bf16.gmra.mxu1 %v8472_v53  ;;  %v1106_v28 = vshrl.u32 %v463_v16, 16  ;;  %v1879_v23 = vpop.f32.mrf.mxu3 }
 0x111   : > { %v1190_v6 = vpack.c.b16 %v1189_v45, %v1188_v26  ;;  %v464_v45 = vld [vmem:[%s8044_s28 + $0xec] sm:$0x1] }
 0x112   : > { %v1624_v34 = vadd.f32 %v8465_v42, %v1525_v48  ;;  %v462_v48 = vld [vmem:[%s8044_s28 + $0xe4] sm:$0xf]  ;;  %v1108_v26 = vrot.slane %v1106_v28, 4 }
 0x113   : > { %v8535_v25 = vpop.f32.mrf.mxu2  ;;  %v1093_v42 = vshrl.u32 %v462_v48, 16  ;;  %v1096_v11 = vshll.u32 %v462_v48, 16  ;;  %v1112_v48 = vshll.u32 %v464_v45, 16 }
 0x114   : > { %v8540_v59 = vadd.f32 %v8467_v52, %v1624_v34  ;;  %v1104_v34 = vrot.slane %v1102_v19, 5 }
 0x115   : > { %v8542_v47 = vpop.f32.mrf.mxu1  ;;  %v1095_v24 = vrot.slane %v1093_v42, 4  ;;  %v1098_v63 = vrot.slane %v1096_v11, 5 }
 0x116   : > { %v1109_v18 = vor.u32 %v1108_v26, %v1104_v34  ;;  %v8570_v26 = vld [vmem:[%s8044_s28 + $0xcc] sm:$0xff] }
 0x117   : > { %v1428_v21 = vpop.f32.mrf.mxu0 }
 0x118   : > { %1675 = vmatmul.bf16.gmra.mxu2 %v1190_v6  ;;  %v1528_v31 = vadd.f32 %v1527_v3, %v1428_v21  ;;  %v1099_v21 = vor.u32 %v1098_v63, %v1095_v24 }
 0x11a   : > { %v1627_v52 = vadd.f32 %v8485_v13, %v1528_v31  ;;  %1467 = vmatmul.bf16.gmra.mxu0 %v8407_v56  ;;  %v1100_v13 = vrot.slane %v1099_v21, 4  ;;  %v1110_v31 = vrot.slane %v1109_v18, 4  ;;  %v1114_v56 = vrot.slane %v1112_v48, 5 }
 0x11b   : > { %v1636_v62 = vpop.f32.mrf.mxu2 }
 0x11c   : > { %v8553_v3 = vadd.f32 %v8487_v5, %v1627_v52  ;;  %v1105_v42 = vsel %vm8103_vm2, %v1100_v13, %v1104_v34  ;;  %v1115_v5 = vsel %vm8103_vm2, %v1110_v31, %v1114_v56  ;;  %v8565_v52 = vpop.f32.mrf.mxu3 }
 0x11d   : > { %v1537_v57 = vpop.f32.mrf.mxu1  ;;  %v1192_v19 = vunpack.c.l.b16 %v1105_v42  ;;  %v1193_v28 = vunpack.c.l.b16 %v1115_v5  ;;  %1923 = vmatmul.bf16.gmra.mxu3 %v8570_v26 }
 0x11f   : > { %v8556_v16 = vpop.f32.mrf.mxu0  ;;  %v1194_v24 = vpack.c.b16 %v1193_v28, %v1192_v19 }
 0x120   : > { %1576 = vmatmul.bf16.gmra.mxu1 %v8507_v49 }
 0x123   : > { %v8563_v11 = vpop.f32.mrf.mxu2 }
 0x124   : > { %v1884_v21 = vpop.f32.mrf.mxu3 }
 0x125   : > { %v8567_v63 = vpop.f32.mrf.mxu1 }
 0x127   : > { %v1433_v18 = vpop.f32.mrf.mxu0 }
 0x128   : > { %1680 = vmatmul.bf16.gmra.mxu2 %v1194_v24  ;;  %v1533_v45 = vadd.f32 %v1532_v30, %v1433_v18 }
 0x12a   : > { %v1632_v34 = vadd.f32 %v8520_v0, %v1533_v45  ;;  %1472 = vmatmul.bf16.gmra.mxu0 %v8437_v37 }
 0x12b   : > { %v1641_v56 = vpop.f32.mrf.mxu2 }
 0x12c   : > { %v8576_v48 = vadd.f32 %v8522_v46, %v1632_v34  ;;  %v8582_v5 = vpop.f32.mrf.mxu3 }
 0x12d   : > { %v1542_v13 = vpop.f32.mrf.mxu1 }
 0x12f   : > { %v8578_v31 = vpop.f32.mrf.mxu0 }
 0x130   : > { %1581 = vmatmul.bf16.gmra.mxu1 %v1190_v6 }
 0x133   : > { %v8580_v42 = vpop.f32.mrf.mxu2 }
 0x134   : > { %v1889_v46 = vpop.f32.mrf.mxu3 }
 0x135   : > { %v8584_v30 = vpop.f32.mrf.mxu1 }
 0x137   : > { %v1438_v19 = vpop.f32.mrf.mxu0 }
 0x138   : > { %v1538_v28 = vadd.f32 %v1537_v57, %v1438_v19 }
 0x13a   : > { %v1637_v0 = vadd.f32 %v1636_v62, %v1538_v28  ;;  %1477 = vmatmul.bf16.gmra.mxu0 %v8472_v53 }
 0x13b   : > { %v1646_v24 = vpop.f32.mrf.mxu2 }
 0x13c   : > { %v8587_v18 = vadd.f32 %v1879_v23, %v1637_v0  ;;  %v8595_v2 = vpop.f32.mrf.mxu3 }
 0x13d   : > { %v1547_v45 = vpop.f32.mrf.mxu1  ;;  %10597 = vst [vmem:[#allocation27_spill] sm:$0xff] %v8595_v2 }
 0x13f   : > { %v8589_v34 = vpop.f32.mrf.mxu0 }
 0x143   : > { %v8591_v37 = vpop.f32.mrf.mxu2 }
 0x144   : > { %10596 = vst [vmem:[#allocation26_spill] sm:$0xff] %v8591_v37  ;;  %v1894_v28 = vpop.f32.mrf.mxu3 }
 0x145   : > { %v8593_v6 = vpop.f32.mrf.mxu1 }
 0x147   : > { %v1443_v29 = vpop.f32.mrf.mxu0 }
 0x148   : > { %v1543_v33 = vadd.f32 %v1542_v13, %v1443_v29 }
 0x14a   : > { %v1642_v35 = vadd.f32 %v1641_v56, %v1543_v33  ;;  %1482 = vmatmul.bf16.gmra.mxu0 %v8507_v49 }
 0x14b   : > { %v1651_v19 = vpop.f32.mrf.mxu2 }
 0x14c   : > { %v8598_v57 = vadd.f32 %v1884_v21, %v1642_v35  ;;  %v8607_v29 = vpop.f32.mrf.mxu3  ;;  %v7724_v35 = vld [vmem:[%s10537_s1 + $0x38] sm:$0xff]  ;;  %v7725_v21 = vld [vmem:[%s10537_s1 + $0x30] sm:$0xff] }
 0x14d   : > { %v1552_v62 = vpop.f32.mrf.mxu1  ;;  %10600 = vst [vmem:[#allocation30_spill] sm:$0xff] %v8607_v29 }
 0x14f   : > { %v8600_v23 = vpop.f32.mrf.mxu0 }
 0x153   : > { %v8604_v32 = vpop.f32.mrf.mxu2 }
 0x154   : > { %10599 = vst [vmem:[#allocation29_spill] sm:$0xff] %v8604_v32 }
 0x155   : > { %v8602_v53 = vpop.f32.mrf.mxu1 }
 0x156   : > { %10598 = vst [vmem:[#allocation28_spill] sm:$0xff] %v8602_v53 }
 0x157   : > { %v1448_v0 = vpop.f32.mrf.mxu0 }
 0x158   : > { %v1548_v1 = vadd.f32 %v1547_v45, %v1448_v0 }
 0x15a   : > { %v1647_v37 = vadd.f32 %v1646_v24, %v1548_v1  ;;  %1496 = vmatmul.bf16.vlgmr.msrb.gmra.mxu0 %v8234_v7  ;;  %v7726_v7 = vld [vmem:[%s10537_s1 + $0x28] sm:$0xff]  ;;  %v1899_v24 = vpop.f32.mrf.mxu3 }
 0x15b   : > { %1830 = vmatpush.bf16.msrb.mxu0 %v7724_v35  ;;  %v1656_v1 = vpop.f32.mrf.mxu2 }
 0x15c   : > { %v8612_v33 = vadd.f32 %v1889_v46, %v1647_v37  ;;  %v7727_v37 = vld [vmem:[%s10537_s1 + $0x20] sm:$0xff] }
 0x15d   : > { %v1557_v13 = vpop.f32.mrf.mxu1 }
 0x15e   : > { %10601 = vst [vmem:[#allocation31_spill] sm:$0xff] %v8612_v33 }
 0x15f   : > { %v8614_v56 = vpop.f32.mrf.mxu0  ;;  %1831 = vmatpush.bf16.msrb.mxu0 %v7725_v21  ;;  %v7728_v21 = vld [vmem:[%s10537_s1 + $0x18] sm:$0xff] }
 0x162   : > { %v8637_v32 = vpop.f32.mrf.mxu3 }
 0x163   : > { %1832 = vmatpush.bf16.msrb.mxu0 %v7726_v7  ;;  %v8633_v7 = vpop.f32.mrf.mxu2  ;;  %10606 = vst [vmem:[#allocation36_spill] sm:$0xff] %v8637_v32 }
 0x164   : > { %10604 = vst [vmem:[#allocation34_spill] sm:$0xff] %v8633_v7 }
 0x165   : > { %v8626_v35 = vpop.f32.mrf.mxu1 }
 0x166   : > { %10602 = vst [vmem:[#allocation32_spill] sm:$0xff] %v8626_v35 }
 0x167   : > { %v1453_v45 = vpop.f32.mrf.mxu0  ;;  %1833 = vmatpush.bf16.msrb.mxu0 %v7727_v37 }
 0x168   : > { %v1553_v46 = vadd.f32 %v1552_v62, %v1453_v45  ;;  %v7729_v62 = vld [vmem:[%s10537_s1 + $0x10] sm:$0xff] }
 0x16a   : > { %v1652_v0 = vadd.f32 %v1651_v19, %v1553_v46  ;;  %1501 = vmatmul.bf16.gmra.mxu0 %v8269_v8  ;;  %v7730_v19 = vld [vmem:[%s10537_s1 + $0x8] sm:$0xff]  ;;  %v7731_v46 = vld [vmem:[%s10537_s1] sm:$0xff] }
 0x16b   : > { %1834 = vmatpush.bf16.msrb.mxu0 %v7728_v21  ;;  %v1904_v21 = vpop.f32.mrf.mxu3 }
 0x16c   : > { %v8631_v49 = vadd.f32 %v1894_v28, %v1652_v0  ;;  %v1661_v28 = vpop.f32.mrf.mxu2 }
 0x16d   : > { %v1562_v45 = vpop.f32.mrf.mxu1 }
 0x16e   : > { %10603 = vst [vmem:[#allocation33_spill] sm:$0xff] %v8631_v49 }
 0x16f   : > { %v8635_v29 = vpop.f32.mrf.mxu0  ;;  %1835 = vmatpush.bf16.msrb.mxu0 %v7729_v62 }
 0x170   : > { %10605 = vst [vmem:[#allocation35_spill] sm:$0xff] %v8635_v29 }
 0x173   : > { %1836 = vmatpush.bf16.msrb.mxu0 %v7730_v19  ;;  %v8657_v49 = vpop.f32.mrf.mxu3 }
 0x174   : > { %v8655_v19 = vpop.f32.mrf.mxu2  ;;  %10609 = vst [vmem:[#allocation39_spill] sm:$0xff] %v8657_v49 }
 0x175   : > { %v8653_v35 = vpop.f32.mrf.mxu1  ;;  %10608 = vst [vmem:[#allocation38_spill] sm:$0xff] %v8655_v19 }
 0x176   : > { %10607 = vst [vmem:[#allocation37_spill] sm:$0xff] %v8653_v35 }
 0x177   : > { %v1458_v37 = vpop.f32.mrf.mxu0  ;;  %1837 = vmatpush.bf16.msrb.mxu0 %v7731_v46 }
 0x178   : > { %v1558_v0 = vadd.f32 %v1557_v13, %v1458_v37 }
 0x17a   : > { %v1657_v32 = vadd.f32 %v1656_v1, %v1558_v0  ;;  %1506 = vmatmul.bf16.gmra.mxu0 %v8292_v44 }
 0x17b   : > { %v1909_v37 = vpop.f32.mrf.mxu3 }
 0x17c   : > { %v8649_v7 = vadd.f32 %v1899_v24, %v1657_v32  ;;  %v1666_v13 = vpop.f32.mrf.mxu2 }
 0x17d   : > { %v1567_v2 = vpop.f32.mrf.mxu1 }
 0x17f   : > { %v8651_v62 = vpop.f32.mrf.mxu0 }
 0x183   : > { %v8668_v19 = vpop.f32.mrf.mxu3 }
 0x184   : > { %v8666_v46 = vpop.f32.mrf.mxu2  ;;  %10613 = vst [vmem:[#allocation43_spill] sm:$0xff] %v8668_v19 }
 0x185   : > { %v8664_v24 = vpop.f32.mrf.mxu1  ;;  %10612 = vst [vmem:[#allocation42_spill] sm:$0xff] %v8666_v46 }
 0x186   : > { %10611 = vst [vmem:[#allocation41_spill] sm:$0xff] %v8664_v24  ;;  %v7409_v24 = vld [vmem:[%s10537_s1 + $0x1a0] sm:$0xff] }
 0x187   : > { %v1463_v53 = vpop.f32.mrf.mxu0 }
 0x188   : > { %v1563_v29 = vadd.f32 %v1562_v45, %v1463_v53  ;;  %v7372_v53 = vld [vmem:[%s10537_s1 + $0x78] sm:$0xff] }
 0x18a   : > { %v1662_v33 = vadd.f32 %v1661_v28, %v1563_v29  ;;  %1595 = vmatmul.bf16.vlgmr.msra.gmra.mxu0 %v8269_v8 }
 0x18b   : > { %1929 = vmatpush.bf16.msra.mxu0 %v7372_v53  ;;  %v1914_v8 = vpop.f32.mrf.mxu3 }
 0x18c   : > { %v8660_v1 = vadd.f32 %v1904_v21, %v1662_v33  ;;  %v1671_v28 = vpop.f32.mrf.mxu2  ;;  %v7371_v21 = vld [vmem:[%s10537_s1 + $0x70] sm:$0xff] }
 0x18d   : > { %v1572_v33 = vpop.f32.mrf.mxu1 }
 0x18e   : > { %10610 = vst [vmem:[#allocation40_spill] sm:$0xff] %v8660_v1 }
 0x18f   : > { %v8662_v32 = vpop.f32.mrf.mxu0  ;;  %1930 = vmatpush.bf16.msra.mxu0 %v7371_v21  ;;  %v7380_v21 = vld [vmem:[%s10537_s1 + $0xb8] sm:$0xff] }
 0x190   : > { %2028 = vmatpush.bf16.msrb.mxu1 %v7380_v21  ;;  %v7378_v21 = vld [vmem:[%s10537_s1 + $0xa8] sm:$0xff] }
 0x193   : > { %v8689_v53 = vpop.f32.mrf.mxu3 }
 0x194   : > { %10618 = vst [vmem:[#allocation48_spill] sm:$0xff] %v8689_v53 }
 0x197   : > { %v1468_v0 = vpop.f32.mrf.mxu0 }
 0x198   : > { %v1568_v49 = vadd.f32 %v1567_v2, %v1468_v0  ;;  %v7370_v2 = vld [vmem:[%s10537_s1 + $0x68] sm:$0xff] }
 0x199   : > { %1931 = vmatpush.bf16.msra.mxu0 %v7370_v2  ;;  %v7369_v2 = vld [vmem:[%s10537_s1 + $0x60] sm:$0xff] }
 0x19a   : > { %v1667_v35 = vadd.f32 %v1666_v13, %v1568_v49  ;;  %1600 = vmatmul.bf16.gmra.mxu0 %v8292_v44  ;;  %v8684_v13 = vpop.f32.mrf.mxu1 }
 0x19b   : > { %10616 = vst [vmem:[#allocation46_spill] sm:$0xff] %v8684_v13 }
 0x19c   : > { %v8674_v29 = vadd.f32 %v1909_v37, %v1667_v35  ;;  %v8686_v37 = vpop.f32.mrf.mxu2 }
 0x19d   : > { %10617 = vst [vmem:[#allocation47_spill] sm:$0xff] %v8686_v37  ;;  %1932 = vmatpush.bf16.msra.mxu0 %v7369_v2  ;;  %v1919_v2 = vpop.f32.mrf.mxu3 }
 0x19e   : > { %10614 = vst [vmem:[#allocation44_spill] sm:$0xff] %v8674_v29 }
 0x19f   : > { %v8676_v45 = vpop.f32.mrf.mxu0 }
 0x1a0   : > { %10615 = vst [vmem:[#allocation45_spill] sm:$0xff] %v8676_v45 }
 0x1a7   : > { %v1473_v49 = vpop.f32.mrf.mxu0 }
 0x1a8   : > { %v1573_v35 = vadd.f32 %v1572_v33, %v1473_v49  ;;  %v7412_v33 = vld [vmem:[%s10537_s1 + $0x1b8] sm:$0xff]  ;;  %v7379_v49 = vld [vmem:[%s10537_s1 + $0xb0] sm:$0xff] }
 0x1a9   : > { %2563 = vmatpush.bf16.msrb.mxu2 %v7412_v33  ;;  %2029 = vmatpush.bf16.msrb.mxu1 %v7379_v49  ;;  %v7337_v33 = vld [vmem:[%s8044_s28] sm:$0xff] }
 0x1aa   : > { %v1672_v0 = vadd.f32 %v1671_v28, %v1573_v35  ;;  %1605 = vmatmul.bf16.gmra.mxu0 %v8255_v51  ;;  %v7368_v35 = vld [vmem:[%s10537_s1 + $0x58] sm:$0xff]  ;;  %v1676_v51 = vpop.f32.mrf.mxu2  ;;  %v7377_v49 = vld [vmem:[%s10537_s1 + $0xa0] sm:$0xff] }
 0x1ab   : > { %1933 = vmatpush.bf16.msra.mxu0 %v7368_v35  ;;  %v7376_v35 = vld [vmem:[%s10537_s1 + $0x98] sm:$0xff] }
 0x1ac   : > { %v8694_v44 = vadd.f32 %v1914_v8, %v1672_v0  ;;  %v1577_v8 = vpop.f32.mrf.mxu1  ;;  %v7420_v0 = vld [vmem:[%s10537_s1 + $0x1f8] sm:$0xff] }
 0x1ad   : > { %2662 = vmatpush.bf16.msrb.mxu3 %v7420_v0  ;;  %2030 = vmatpush.bf16.msrb.mxu1 %v7378_v21  ;;  %v7366_v21 = vld [vmem:[%s10537_s1 + $0x48] sm:$0xff] }
 0x1ae   : > { %10619 = vst [vmem:[#allocation49_spill] sm:$0xff] %v8694_v44  ;;  %v7367_v44 = vld [vmem:[%s10537_s1 + $0x50] sm:$0xff] }
 0x1af   : > { %v8702_v28 = vpop.f32.mrf.mxu0  ;;  %1934 = vmatpush.bf16.msra.mxu0 %v7367_v44  ;;  %v7365_v44 = vld [vmem:[%s10537_s1 + $0x40] sm:$0xff] }
 0x1b0   : > { %10620 = vst [vmem:[#allocation50_spill] sm:$0xff] %v8702_v28 }
 0x1b1   : > { %2031 = vmatpush.bf16.msrb.mxu1 %v7377_v49 }
 0x1b3   : > { %1935 = vmatpush.bf16.msra.mxu0 %v7366_v21 }
 0x1b4   : > { %v8726_v0 = vpop.f32.mrf.mxu1 }
 0x1b5   : > { %10621 = vst [vmem:[#allocation51_spill] sm:$0xff] %v8726_v0  ;;  %2032 = vmatpush.bf16.msrb.mxu1 %v7376_v35 }
 0x1b7   : > { %v1478_v53 = vpop.f32.mrf.mxu0  ;;  %1936 = vmatpush.bf16.msra.mxu0 %v7365_v44  ;;  %v7428_v44 = vld [vmem:[%s10537_s1 + $0x238] sm:$0xff] }
 0x1b8   : > { %v1578_v37 = vadd.f32 %v1577_v8, %v1478_v53  ;;  %v8733_v8 = vpop.f32.mrf.mxu2 }
 0x1b9   : > { %10623 = vst [vmem:[#allocation53_spill] sm:$0xff] %v8733_v8 }
 0x1ba   : > { %v1677_v13 = vadd.f32 %v1676_v51, %v1578_v37  ;;  %1838 = vmatmul.bf16.vlgmr.msrb.gmra.mxu0 %v7337_v33  ;;  %v8737_v51 = vpop.f32.mrf.mxu3  ;;  %v7375_v37 = vld [vmem:[%s10537_s1 + $0x90] sm:$0xff] }
 0x1bb   : > { %10625 = vst [vmem:[#allocation55_spill] sm:$0xff] %v8737_v51  ;;  %2033 = vmatpush.bf16.msrb.mxu1 %v7375_v37  ;;  %v7338_v33 = vld [vmem:[%s8044_s28 + $0xc] sm:$0xff]  ;;  %v7373_v51 = vld [vmem:[%s10537_s1 + $0x80] sm:$0xff]  ;;  %v7339_v37 = vld [vmem:[%s8044_s28 + $0x18] sm:$0xff]  ;;  %2761 = vmatpush.bf16.msrb.mxu0 %v7428_v44 }
 0x1bc   : > { %v8731_v53 = vadd.f32 %v1919_v2, %v1677_v13  ;;  %v7374_v13 = vld [vmem:[%s10537_s1 + $0x88] sm:$0xff]  ;;  %v1582_v2 = vpop.f32.mrf.mxu1  ;;  %v7427_v44 = vld [vmem:[%s10537_s1 + $0x230] sm:$0xff] }
 0x1be   : > { %10622 = vst [vmem:[#allocation52_spill] sm:$0xff] %v8731_v53 }
 0x1bf   : > { %v8735_v49 = vpop.f32.mrf.mxu0  ;;  %2034 = vmatpush.bf16.msrb.mxu1 %v7374_v13  ;;  %v7411_v13 = vld [vmem:[%s10537_s1 + $0x1b0] sm:$0xff]  ;;  %2762 = vmatpush.bf16.msrb.mxu0 %v7427_v44 }
 0x1c0   : > { %10624 = vst [vmem:[#allocation54_spill] sm:$0xff] %v8735_v49  ;;  %v1681_v21 = vpop.f32.mrf.mxu2  ;;  %2564 = vmatpush.bf16.msrb.mxu2 %v7411_v13  ;;  %v7733_v13 = vld [vmem:[%s8044_s28 + $0x30] sm:$0xff] }
 0x1c2   : > { %v1924_v53 = vpop.f32.mrf.mxu3 }
 0x1c3   : > { %2035 = vmatpush.bf16.msrb.mxu1 %v7373_v51 }
 0x1c6   : > { %2036 = vmatmul.bf16.vlgmr.msrb.gmra.mxu1 %v7339_v37 }
 0x1c7   : > { %v1483_v35 = vpop.f32.mrf.mxu0 }
 0x1c8   : > { %v1583_v8 = vadd.f32 %v1582_v2, %v1483_v35  ;;  %v7732_v35 = vld [vmem:[%s8044_s28 + $0x24] sm:$0xff] }
 0x1ca   : > { %v1682_v0 = vadd.f32 %v1681_v21, %v1583_v8  ;;  %1843 = vmatmul.bf16.gmra.mxu0 %v7338_v33  ;;  %v7419_v8 = vld [vmem:[%s10537_s1 + $0x1f0] sm:$0xff] }
 0x1cb   : > { %2663 = vmatpush.bf16.msrb.mxu3 %v7419_v8 }
 0x1cc   : > { %v8759_v49 = vadd.f32 %v1924_v53, %v1682_v0  ;;  %v7410_v0 = vld [vmem:[%s10537_s1 + $0x1a8] sm:$0xff] }
 0x1cd   : > { %v7418_v53 = vld [vmem:[%s10537_s1 + $0x1e8] sm:$0xff]  ;;  %2565 = vmatpush.bf16.msrb.mxu2 %v7410_v0  ;;  %v7417_v0 = vld [vmem:[%s10537_s1 + $0x1e0] sm:$0xff] }
 0x1ce   : > { %10626 = vst [vmem:[#allocation56_spill] sm:$0xff] %v8759_v49  ;;  %v7734_v49 = vld [vmem:[%s8044_s28 + $0x3c] sm:$0xff] }
 0x1cf   : > { %v8761_v2 = vpop.f32.mrf.mxu0  ;;  %2664 = vmatpush.bf16.msrb.mxu3 %v7418_v53  ;;  %v7735_v53 = vld [vmem:[%s8044_s28 + $0x48] sm:$0xff] }
 0x1d0   : > { %10627 = vst [vmem:[#allocation57_spill] sm:$0xff] %v8761_v2 }
 0x1d1   : > { %2566 = vmatpush.bf16.msrb.mxu2 %v7409_v24 }
 0x1d3   : > { %2665 = vmatpush.bf16.msrb.mxu3 %v7417_v0 }
 0x1d6   : > { %2041 = vmatmul.bf16.gmra.mxu1 %v7732_v35 }
 0x1d7   : > { %v1497_v51 = vpop.f32.mrf.mxu0 }
 0x1d8   : > { %v1498_v19 = vadd.f32 %v1497_v51, %v8364_v50 }
 0x1da   : > { %1848 = vmatmul.bf16.gmra.mxu0 %v7339_v37 }
 0x1df   : > { %v1499_v21 = vpop.f32.mrf.mxu0 }
 0x1e6   : > { %2046 = vmatmul.bf16.gmra.mxu1 %v7733_v13 }
 0x1e7   : > { %v1502_v28 = vpop.f32.mrf.mxu0 }
 0x1ea   : > { %1937 = vmatmul.bf16.vlgmr.msra.gmra.mxu0 %v7338_v33 }
 0x1ef   : > { %v1504_v8 = vpop.f32.mrf.mxu0 }
 0x1f0   : > { %v1505_v45 = vadd.f32 %v1504_v8, %v8396_v39 }
 0x1f6   : > { %2051 = vmatmul.bf16.gmra.mxu1 %v7734_v49 }
 0x1f7   : > { %v1507_v33 = vpop.f32.mrf.mxu0 }
 0x1fa   : > { %1942 = vmatmul.bf16.gmra.mxu0 %v7339_v37  ;;  %v1500_v37 = vadd.f32 %v1499_v21, %v8372_v9  ;;  %v7408_v9 = vld [vmem:[%s10537_s1 + $0x198] sm:$0xff]  ;;  %v1508_v21 = vadd.f32 %v1507_v33, %v8414_v38 }
 0x1fb   : > { %2567 = vmatpush.bf16.msrb.mxu2 %v7408_v9  ;;  %v7415_v9 = vld [vmem:[%s10537_s1 + $0x1d0] sm:$0xff] }
 0x1ff   : > { %v1509_v2 = vpop.f32.mrf.mxu0 }
 0x200   : > { %v1510_v39 = vadd.f32 %v1509_v2, %v8426_v20 }
 0x206   : > { %2056 = vmatmul.bf16.gmra.mxu1 %v7735_v53 }
 0x207   : > { %v1596_v46 = vpop.f32.mrf.mxu0 }
 0x208   : > { %v1597_v29 = vadd.f32 %v1596_v46, %v1498_v19  ;;  %v7426_v19 = vld [vmem:[%s10537_s1 + $0x228] sm:$0xff]  ;;  %v1503_v46 = vadd.f32 %v1502_v28, %v8384_v17  ;;  %v7416_v28 = vld [vmem:[%s10537_s1 + $0x1d8] sm:$0xff] }
 0x209   : > { %2763 = vmatpush.bf16.msrb.mxu0 %v7426_v19  ;;  %2666 = vmatpush.bf16.msrb.mxu3 %v7416_v28 }
 0x20a   : > { %1947 = vmatmul.bf16.gmra.mxu0 %v7732_v35  ;;  %v7736_v35 = vld [vmem:[%s8044_s28 + $0x54] sm:$0xff] }
 0x20d   : > { %2667 = vmatpush.bf16.msrb.mxu3 %v7415_v9 }
 0x20f   : > { %v1598_v44 = vpop.f32.mrf.mxu0 }
 0x210   : > { %v1599_v50 = vadd.f32 %v1598_v44, %v1500_v37  ;;  %v7425_v44 = vld [vmem:[%s10537_s1 + $0x220] sm:$0xff] }
 0x211   : > { %2764 = vmatpush.bf16.msrb.mxu0 %v7425_v44 }
 0x216   : > { %2061 = vmatmul.bf16.gmra.mxu1 %v7736_v35 }
 0x217   : > { %v1601_v51 = vpop.f32.mrf.mxu0 }
 0x218   : > { %v1602_v24 = vadd.f32 %v1601_v51, %v1503_v46  ;;  %v7407_v51 = vld [vmem:[%s10537_s1 + $0x190] sm:$0xff] }
 0x219   : > { %2568 = vmatpush.bf16.msrb.mxu2 %v7407_v51 }
 0x21a   : > { %1952 = vmatmul.bf16.gmra.mxu0 %v7733_v13  ;;  %v7737_v13 = vld [vmem:[%s8044_s28 + $0x60] sm:$0xff] }
 0x21f   : > { %v1603_v0 = vpop.f32.mrf.mxu0 }
 0x220   : > { %v1604_v1 = vadd.f32 %v1603_v0, %v1505_v45  ;;  %v8809_v0 = vpop.f32.mrf.mxu1 }
 0x226   : > { %2066 = vmatmul.bf16.gmra.mxu1 %v7737_v13 }
 0x227   : > { %v1606_v37 = vpop.f32.mrf.mxu0 }
 0x228   : > { %v1607_v17 = vadd.f32 %v1606_v37, %v1508_v21 }
 0x22a   : > { %1957 = vmatmul.bf16.gmra.mxu0 %v7734_v49  ;;  %v7738_v49 = vld [vmem:[%s8044_s28 + $0x6c] sm:$0xff] }
 0x22f   : > { %v1608_v45 = vpop.f32.mrf.mxu0 }
 0x230   : > { %v1609_v8 = vadd.f32 %v1608_v45, %v1510_v39 }
 0x236   : > { %2071 = vmatmul.bf16.gmra.mxu1 %v7738_v49 }
 0x237   : > { %v1839_v38 = vpop.f32.mrf.mxu0 }
 0x238   : > { %v1840_v33 = vadd.f32 %v1839_v38, %v1597_v29 }
 0x23a   : > { %1962 = vmatmul.bf16.gmra.mxu0 %v7735_v53 }
 0x23f   : > { %v1841_v19 = vpop.f32.mrf.mxu0 }
 0x240   : > { %v1842_v46 = vadd.f32 %v1841_v19, %v1599_v50 }
 0x243   : > { %v2037_v21 = vpop.f32.mrf.mxu1 }
 0x246   : > { %2076 = vmatmul.bf16.gmra.mxu1 %v8362_v43  ;;  %v7406_v43 = vld [vmem:[%s10537_s1 + $0x188] sm:$0xff] }
 0x247   : > { %v1844_v20 = vpop.f32.mrf.mxu0  ;;  %2569 = vmatpush.bf16.msrb.mxu2 %v7406_v43 }
 0x248   : > { %v1845_v2 = vadd.f32 %v1844_v20, %v1602_v24  ;;  %v7424_v24 = vld [vmem:[%s10537_s1 + $0x218] sm:$0xff] }
 0x249   : > { %2765 = vmatpush.bf16.msrb.mxu0 %v7424_v24 }
 0x24a   : > { %1967 = vmatmul.bf16.gmra.mxu0 %v7736_v35 }
 0x24b   : > { %v2039_v50 = vpop.f32.mrf.mxu1 }
 0x24f   : > { %v1846_v29 = vpop.f32.mrf.mxu0 }
 0x250   : > { %v1847_v53 = vadd.f32 %v1846_v29, %v1604_v1  ;;  %v7414_v1 = vld [vmem:[%s10537_s1 + $0x1c8] sm:$0xff] }
 0x251   : > { %2668 = vmatpush.bf16.msrb.mxu3 %v7414_v1 }
 0x253   : > { %v2042_v39 = vpop.f32.mrf.mxu1 }
 0x256   : > { %2081 = vmatmul.bf16.gmra.mxu1 %v8382_v36 }
 0x257   : > { %v1849_v37 = vpop.f32.mrf.mxu0 }
 0x258   : > { %v1850_v28 = vadd.f32 %v1849_v37, %v1607_v17 }
 0x25a   : > { %1972 = vmatmul.bf16.gmra.mxu0 %v7737_v13 }
 0x25b   : > { %v2044_v35 = vpop.f32.mrf.mxu1 }
 0x25f   : > { %v1851_v45 = vpop.f32.mrf.mxu0 }
 0x260   : > { %v8819_v44 = vadd.f32 %v1851_v45, %v1609_v8  ;;  %v7739_v45 = vld [vmem:[%s8044_s28 + $0x78] sm:$0xff] }
 0x263   : > { %v2047_v38 = vpop.f32.mrf.mxu1 }
 0x266   : > { %2086 = vmatmul.bf16.gmra.mxu1 %v8412_v14 }
 0x267   : > { %v1938_v17 = vpop.f32.mrf.mxu0 }
 0x268   : > { %v1939_v13 = vadd.f32 %v1938_v17, %v1840_v33  ;;  %v7423_v33 = vld [vmem:[%s10537_s1 + $0x210] sm:$0xff] }
 0x269   : > { %2766 = vmatpush.bf16.msrb.mxu0 %v7423_v33  ;;  %v7744_v33 = vld [vmem:[%s8044_s28 + $0x10] sm:$0xf] }
 0x26a   : > { %v8827_v19 = vadd.f32 %v2037_v21, %v1939_v13  ;;  %1977 = vmatmul.bf16.gmra.mxu0 %v7738_v49 }
 0x26b   : > { %v2049_v51 = vpop.f32.mrf.mxu1 }
 0x26f   : > { %v1940_v36 = vpop.f32.mrf.mxu0 }
 0x270   : > { %v1941_v8 = vadd.f32 %v1940_v36, %v1842_v46  ;;  %v7405_v46 = vld [vmem:[%s10537_s1 + $0x180] sm:$0xff] }
 0x271   : > { %2570 = vmatpush.bf16.msrb.mxu2 %v7405_v46 }
 0x272   : > { %v8830_v20 = vadd.f32 %v2039_v50, %v1941_v8  ;;  %v7413_v50 = vld [vmem:[%s10537_s1 + $0x1c0] sm:$0xff] }
 0x273   : > { %v2052_v37 = vpop.f32.mrf.mxu1  ;;  %2669 = vmatpush.bf16.msrb.mxu3 %v7413_v50 }
 0x276   : > { %2091 = vmatmul.bf16.gmra.mxu1 %v8442_v41  ;;  %v7740_v41 = vld [vmem:[%s8044_s28 + $0x4] sm:$0xf] }
 0x277   : > { %v1943_v9 = vpop.f32.mrf.mxu0 }
 0x278   : > { %v1944_v29 = vadd.f32 %v1943_v9, %v1845_v2 }
 0x27a   : > { %v8832_v24 = vadd.f32 %v2042_v39, %v1944_v29  ;;  %1982 = vmatmul.bf16.gmra.mxu0 %v7739_v45  ;;  %v2152_v39 = vrot.slane %v7740_v41, 5  ;;  %v7743_v29 = vld [vmem:[%s8044_s28 + $0x84] sm:$0xff] }
 0x27b   : > { %v8842_v2 = vpop.f32.mrf.mxu1 }
 0x27c   : > { %v2154_v8 = vrot.slane %v2152_v39, 4 }
 0x27f   : > { %v1945_v14 = vpop.f32.mrf.mxu0 }
 0x280   : > { %v1946_v49 = vadd.f32 %v1945_v14, %v1847_v53  ;;  %v7741_v53 = vld [vmem:[%s8044_s28 + $0x8] sm:$0x1]  ;;  %v2159_v14 = vrot.slane %v7744_v33, 5 }
 0x281   : > { %v2155_v43 = vrot.slane %v7741_v53, 5 }
 0x282   : > { %v8844_v21 = vadd.f32 %v2044_v35, %v1946_v49  ;;  %v7742_v35 = vld [vmem:[%s8044_s28] sm:$0xf] }
 0x283   : > { %v8851_v13 = vpop.f32.mrf.mxu1  ;;  %v6758_v36 = vrot.slane %v7742_v35, 9  ;;  %v2156_v49 = vsel %vm8857_vm5, %v2154_v8, %v2155_v43 }
 0x284   : > { %v2291_v50 = vunpack.c.l.b16 %v2156_v49 }
 0x286   : > { %2096 = vmatmul.bf16.gmra.mxu1 %v8477_v60 }
 0x287   : > { %v1948_v1 = vpop.f32.mrf.mxu0 }
 0x288   : > { %v1949_v17 = vadd.f32 %v1948_v1, %v1850_v28  ;;  %v2153_v28 = vsel %vm8857_vm5, %v6758_v36, %v2152_v39 }
 0x289   : > { %v2290_v46 = vunpack.c.l.b16 %v2153_v28 }
 0x28a   : > { %v8854_v9 = vadd.f32 %v2047_v38, %v1949_v17  ;;  %1987 = vmatmul.bf16.gmra.mxu0 %v7743_v29  ;;  %v7745_v38 = vld [vmem:[%s8044_s28 + $0x14] sm:$0x1]  ;;  %v7746_v17 = vld [vmem:[%s8044_s28 + $0xc] sm:$0xf]  ;;  %v2161_v29 = vrot.slane %v2159_v14, 4 }
 0x28b   : > { %v2162_v41 = vrot.slane %v7745_v38, 5  ;;  %v2326_v53 = vpack.c.b16 %v2291_v50, %v2290_v46  ;;  %v6759_v35 = vrot.slane %v7746_v17, 9  ;;  %v7749_v17 = vld [vmem:[%s8044_s28 + $0x18] sm:$0xf] }
 0x28c   : > { %10628 = vst [vmem:[#allocation58_spill] sm:$0xff] %v8854_v9  ;;  %v2059_v9 = vpop.f32.mrf.mxu1 }
 0x28d   : > { %2571 = vmatmul.bf16.vlgmr.msrb.gmra.mxu2 %v2326_v53  ;;  %v2160_v39 = vsel %vm8857_vm5, %v6759_v35, %v2159_v14  ;;  %v2163_v43 = vsel %vm8857_vm5, %v2161_v29, %v2162_v41  ;;  %v7747_v53 = vld [vmem:[%s8044_s28 + $0x90] sm:$0xff]  ;;  %v6760_v35 = vrot.slane %v7749_v17, 9  ;;  %v7751_v17 = vld [vmem:[%s8044_s28 + $0x9c] sm:$0xff] }
 0x28e   : > { %v2292_v8 = vunpack.c.l.b16 %v2160_v39  ;;  %v2293_v28 = vunpack.c.l.b16 %v2163_v43  ;;  %v7486_v14 = vld [vmem:[#allocation3 + $0x138] sm:$0xff] }
 0x28f   : > { %v1950_v1 = vpop.f32.mrf.mxu0  ;;  %4594 = vmatpush.bf16.msra.mxu2 %v7486_v14 }
 0x290   : > { %v1951_v33 = vadd.f32 %v1950_v1, %v8819_v44  ;;  %v2327_v49 = vpack.c.b16 %v2293_v28, %v2292_v8 }
 0x292   : > { %v8874_v36 = vadd.f32 %v2049_v51, %v1951_v33  ;;  %2670 = vmatmul.bf16.vlgmr.msrb.gmra.mxu3 %v2327_v49  ;;  %v7748_v51 = vld [vmem:[%s8044_s28 + $0x1c] sm:$0xf]  ;;  %v7750_v33 = vld [vmem:[%s8044_s28 + $0x20] sm:$0x1] }
 0x293   : > { %v2166_v41 = vrot.slane %v7748_v51, 5  ;;  %v2169_v39 = vrot.slane %v7750_v33, 5 }
 0x294   : > { %v2062_v50 = vpop.f32.mrf.mxu1 }
 0x295   : > { %v2168_v29 = vrot.slane %v2166_v41, 4 }
 0x296   : > { %2101 = vmatmul.bf16.gmra.mxu1 %v8512_v22 }
 0x297   : > { %v1953_v46 = vpop.f32.mrf.mxu0  ;;  %v2170_v8 = vsel %vm8857_vm5, %v2168_v29, %v2169_v39  ;;  %v7753_v39 = vld [vmem:[%s8044_s28 + $0x24] sm:$0xf] }
 0x298   : > { %v1954_v44 = vadd.f32 %v1953_v46, %v8455_v12  ;;  %v7422_v46 = vld [vmem:[%s10537_s1 + $0x208] sm:$0xff] }
 0x299   : > { %2767 = vmatpush.bf16.msrb.mxu0 %v7422_v46 }
 0x29a   : > { %v8877_v38 = vadd.f32 %v2052_v37, %v1954_v44  ;;  %1992 = vmatmul.bf16.gmra.mxu0 %v7747_v53  ;;  %v2167_v37 = vsel %vm8857_vm5, %v6760_v35, %v2166_v41  ;;  %v7478_v44 = vld [vmem:[#allocation3 + $0xf8] sm:$0xff]  ;;  %v7752_v35 = vld [vmem:[%s8044_s28 + $0x28] sm:$0xf] }
 0x29b   : > { %v7494_v53 = vld [vmem:[#allocation3 + $0x178] sm:$0xff]  ;;  %4505 = vmatpush.bf16.msra.mxu1 %v7478_v44  ;;  %v2173_v29 = vrot.slane %v7752_v35, 5 }
 0x29c   : > { %v2064_v12 = vpop.f32.mrf.mxu1  ;;  %4683 = vmatpush.bf16.msra.mxu3 %v7494_v53 }
 0x29d   : > { %2576 = vmatmul.bf16.gmra.mxu2 %v2327_v49  ;;  %v2295_v49 = vunpack.c.l.b16 %v2170_v8  ;;  %v7754_v8 = vld [vmem:[%s8044_s28 + $0x2c] sm:$0x1] }
 0x29e   : > { %v2176_v46 = vrot.slane %v7754_v8, 5 }
 0x29f   : > { %v1955_v1 = vpop.f32.mrf.mxu0 }
 0x2a0   : > { %v1956_v43 = vadd.f32 %v1955_v1, %v8470_v54  ;;  %v2294_v54 = vunpack.c.l.b16 %v2167_v37  ;;  %v2175_v37 = vrot.slane %v2173_v29, 4 }
 0x2a2   : > { %v8890_v28 = vadd.f32 %v8842_v2, %v1956_v43  ;;  %v8895_v14 = vpack.c.b16 %v2295_v49, %v2294_v54  ;;  %v6761_v43 = vrot.slane %v7753_v39, 9  ;;  %v2177_v53 = vsel %vm8857_vm5, %v2175_v37, %v2176_v46  ;;  %v7757_v46 = vld [vmem:[%s8044_s28 + $0x38] sm:$0x1] }
 0x2a4   : > { %2675 = vmatmul.bf16.gmra.mxu3 %v8895_v14  ;;  %v2067_v41 = vpop.f32.mrf.mxu1 }
 0x2a6   : > { %2106 = vmatmul.bf16.gmra.mxu1 %v8545_v4 }
 0x2a7   : > { %v1958_v2 = vpop.f32.mrf.mxu0 }
 0x2a8   : > { %v1959_v51 = vadd.f32 %v1958_v2, %v8490_v27  ;;  %v2297_v2 = vunpack.c.l.b16 %v2177_v53 }
 0x2aa   : > { %v8900_v1 = vadd.f32 %v8851_v13, %v1959_v51  ;;  %1997 = vmatmul.bf16.gmra.mxu0 %v7751_v17  ;;  %v2174_v13 = vsel %vm8857_vm5, %v6761_v43, %v2173_v29  ;;  %v7756_v43 = vld [vmem:[%s8044_s28 + $0x30] sm:$0xf] }
 0x2ab   : > { %v2296_v49 = vunpack.c.l.b16 %v2174_v13  ;;  %v6762_v37 = vrot.slane %v7756_v43, 9 }
 0x2ac   : > { %v8909_v27 = vpop.f32.mrf.mxu1 }
 0x2ad   : > { %2581 = vmatmul.bf16.gmra.mxu2 %v8895_v14  ;;  %v8917_v51 = vpack.c.b16 %v2297_v2, %v2296_v49  ;;  %v7485_v49 = vld [vmem:[#allocation3 + $0x130] sm:$0xff] }
 0x2ae   : > { %4595 = vmatpush.bf16.msra.mxu2 %v7485_v49 }
 0x2af   : > { %v1960_v33 = vpop.f32.mrf.mxu0 }
 0x2b0   : > { %v1961_v44 = vadd.f32 %v1960_v33, %v8505_v40 }
 0x2b2   : > { %v8915_v54 = vadd.f32 %v2059_v9, %v1961_v44  ;;  %v7755_v9 = vld [vmem:[%s8044_s28 + $0x34] sm:$0xf]  ;;  %v2183_v44 = vrot.slane %v7757_v46, 5 }
 0x2b3   : > { %v2180_v29 = vrot.slane %v7755_v9, 5  ;;  %v7493_v9 = vld [vmem:[#allocation3 + $0x170] sm:$0xff] }
 0x2b4   : > { %2680 = vmatmul.bf16.gmra.mxu3 %v8917_v51  ;;  %v8921_v35 = vpop.f32.mrf.mxu1 }
 0x2b5   : > { %v2182_v8 = vrot.slane %v2180_v29, 4  ;;  %4684 = vmatpush.bf16.msra.mxu3 %v7493_v9 }
 0x2b6   : > { %2111 = vmatmul.bf16.gmra.mxu1 %v8570_v26 }
 0x2b7   : > { %v1963_v40 = vpop.f32.mrf.mxu0 }
 0x2b8   : > { %v1964_v17 = vadd.f32 %v1963_v40, %v8525_v15 }
 0x2ba   : > { %v8923_v33 = vadd.f32 %v2062_v50, %v1964_v17  ;;  %2002 = vmatmul.bf16.gmra.mxu0 %v8477_v60  ;;  %v2181_v50 = vsel %vm8857_vm5, %v6762_v37, %v2180_v29  ;;  %v2184_v60 = vsel %vm8857_vm5, %v2182_v8, %v2183_v44  ;;  %v7421_v17 = vld [vmem:[%s10537_s1 + $0x200] sm:$0xff]  ;;  %v8954_v44 = vld [vmem:[%s8044_s28 + $0xd8] sm:$0xff] }
 0x2bb   : > { %v2298_v2 = vunpack.c.l.b16 %v2181_v50  ;;  %v2299_v40 = vunpack.c.l.b16 %v2184_v60  ;;  %2768 = vmatpush.bf16.msrb.mxu0 %v7421_v17  ;;  %v7759_v60 = vld [vmem:[%s8044_s28 + $0x3c] sm:$0xf] }
 0x2bc   : > { %v8932_v15 = vpop.f32.mrf.mxu1  ;;  %v6763_v49 = vrot.slane %v7759_v60, 9 }
 0x2bd   : > { %2586 = vmatmul.bf16.gmra.mxu2 %v8917_v51 }
 0x2bf   : > { %v1965_v39 = vpop.f32.mrf.mxu0 }
 0x2c0   : > { %v1966_v13 = vadd.f32 %v1965_v39, %v8540_v59  ;;  %v7477_v59 = vld [vmem:[#allocation3 + $0xf0] sm:$0xff]  ;;  %v8943_v39 = vpack.c.b16 %v2299_v40, %v2298_v2 }
 0x2c1   : > { %4506 = vmatpush.bf16.msra.mxu1 %v7477_v59 }
 0x2c2   : > { %v8938_v53 = vadd.f32 %v2064_v12, %v1966_v13  ;;  %v1530_v12 = vadd.f32 %v8509_v58, %v8556_v16  ;;  %v7758_v13 = vld [vmem:[%s8044_s28 + $0x40] sm:$0xf] }
 0x2c3   : > { %v2187_v50 = vrot.slane %v7758_v13, 5 }
 0x2c4   : > { %2685 = vmatmul.bf16.gmra.mxu3 %v8943_v39  ;;  %v2077_v37 = vpop.f32.mrf.mxu1  ;;  %v1629_v8 = vadd.f32 %v8500_v10, %v1530_v12 }
 0x2c5   : > { %v2189_v2 = vrot.slane %v2187_v50, 4 }
 0x2c6   : > { %2116 = vmatmul.bf16.gmra.mxu1 %v8954_v44  ;;  %v1872_v58 = vadd.f32 %v8502_v55, %v1629_v8 }
 0x2c7   : > { %v1968_v29 = vpop.f32.mrf.mxu0 }
 0x2c8   : > { %v1969_v43 = vadd.f32 %v1968_v29, %v8553_v3  ;;  %v7760_v3 = vld [vmem:[%s8044_s28 + $0x44] sm:$0x1]  ;;  %v1535_v29 = vadd.f32 %v8542_v47, %v8578_v31 }
 0x2c9   : > { %v2190_v40 = vrot.slane %v7760_v3, 5 }
 0x2ca   : > { %v8950_v46 = vadd.f32 %v2067_v41, %v1969_v43  ;;  %2007 = vmatmul.bf16.gmra.mxu0 %v8512_v22  ;;  %v2188_v22 = vsel %vm8857_vm5, %v6763_v49, %v2187_v50  ;;  %v1634_v50 = vadd.f32 %v8535_v25, %v1535_v29  ;;  %v7762_v49 = vld [vmem:[%s8044_s28 + $0x48] sm:$0xf]  ;;  %v1540_v29 = vadd.f32 %v8567_v63, %v8589_v34 }
 0x2cb   : > { %v2191_v41 = vsel %vm8857_vm5, %v2189_v2, %v2190_v40  ;;  %v2300_v59 = vunpack.c.l.b16 %v2188_v22  ;;  %v6764_v2 = vrot.slane %v7762_v49, 9  ;;  %v7763_v40 = vld [vmem:[%s8044_s28 + $0x50] sm:$0x1]  ;;  %v7765_v49 = vld [vmem:[%s8044_s28 + $0x54] sm:$0xf] }
 0x2cc   : > { %v8962_v10 = vpop.f32.mrf.mxu1  ;;  %v2301_v9 = vunpack.c.l.b16 %v2191_v41  ;;  %v1877_v47 = vadd.f32 %v8537_v61, %v1634_v50 }
 0x2cd   : > { %2591 = vmatmul.bf16.gmra.mxu2 %v8943_v39 }
 0x2ce   : > { %v8971_v12 = vpack.c.b16 %v2301_v9, %v2300_v59  ;;  %v7484_v59 = vld [vmem:[#allocation3 + $0x128] sm:$0xff] }
 0x2cf   : > { %v1970_v16 = vpop.f32.mrf.mxu0  ;;  %4596 = vmatpush.bf16.msra.mxu2 %v7484_v59 }
 0x2d0   : > { %v1971_v17 = vadd.f32 %v1970_v16, %v1872_v58  ;;  %v7356_v58 = vld [vmem:[%s8044_s28 + $0xe4] sm:$0xff]  ;;  %v7761_v16 = vld [vmem:[%s8044_s28 + $0x4c] sm:$0xf] }
 0x2d1   : > { %v2194_v60 = vrot.slane %v7761_v16, 5  ;;  %v7476_v16 = vld [vmem:[#allocation3 + $0xe8] sm:$0xff] }
 0x2d2   : > { %v8969_v55 = vadd.f32 %v8909_v27, %v1971_v17  ;;  %4507 = vmatpush.bf16.msra.mxu1 %v7476_v16 }
 0x2d3   : > { %v2196_v3 = vrot.slane %v2194_v60, 4 }
 0x2d4   : > { %2690 = vmatmul.bf16.gmra.mxu3 %v8971_v12  ;;  %v2082_v13 = vpop.f32.mrf.mxu1 }
 0x2d6   : > { %2121 = vmatmul.bf16.gmra.mxu1 %v7356_v58 }
 0x2d7   : > { %v1973_v43 = vpop.f32.mrf.mxu0 }
 0x2d8   : > { %v1974_v8 = vadd.f32 %v1973_v43, %v8576_v48  ;;  %v2197_v48 = vrot.slane %v7763_v40, 5 }
 0x2da   : > { %v8979_v27 = vadd.f32 %v8921_v35, %v1974_v8  ;;  %2012 = vmatmul.bf16.gmra.mxu0 %v8545_v4  ;;  %v2195_v35 = vsel %vm8857_vm5, %v6764_v2, %v2194_v60  ;;  %v2198_v4 = vsel %vm8857_vm5, %v2196_v3, %v2197_v48  ;;  %v7492_v60 = vld [vmem:[#allocation3 + $0x168] sm:$0xff]  ;;  %v6765_v2 = vrot.slane %v7765_v49, 9  ;;  %v7766_v3 = vld [vmem:[%s8044_s28 + $0x5c] sm:$0x1] }
 0x2db   : > { %v2302_v61 = vunpack.c.l.b16 %v2195_v35  ;;  %v2303_v41 = vunpack.c.l.b16 %v2198_v4  ;;  %4685 = vmatpush.bf16.msra.mxu3 %v7492_v60  ;;  %v2204_v40 = vrot.slane %v7766_v3, 5 }
 0x2dc   : > { %v2084_v25 = vpop.f32.mrf.mxu1 }
 0x2dd   : > { %2596 = vmatmul.bf16.gmra.mxu2 %v8971_v12  ;;  %v8995_v9 = vpack.c.b16 %v2303_v41, %v2302_v61  ;;  %v1545_v61 = vadd.f32 %v8584_v30, %v8600_v23  ;;  %v7769_v23 = vld [vmem:[%s8044_s28 + $0x68] sm:$0x1] }
 0x2df   : > { %v1975_v31 = vpop.f32.mrf.mxu0 }
 0x2e0   : > { %v1976_v17 = vadd.f32 %v1975_v31, %v1877_v47  ;;  %v7764_v47 = vld [vmem:[%s8044_s28 + $0x58] sm:$0xf] }
 0x2e1   : > { %v2201_v63 = vrot.slane %v7764_v47, 5  ;;  %v7768_v47 = vld [vmem:[%s8044_s28 + $0x60] sm:$0xf] }
 0x2e2   : > { %v8993_v22 = vadd.f32 %v8932_v15, %v1976_v17  ;;  %v1639_v15 = vadd.f32 %v8563_v11, %v1540_v29  ;;  %v1644_v29 = vadd.f32 %v8580_v42, %v1545_v61  ;;  %v7491_v61 = vld [vmem:[#allocation3 + $0x160] sm:$0xff] }
 0x2e3   : > { %v2202_v11 = vsel %vm8857_vm5, %v6765_v2, %v2201_v63  ;;  %v1550_v2 = vadd.f32 %v8593_v6, %v8614_v56  ;;  %4686 = vmatpush.bf16.msra.mxu3 %v7491_v61  ;;  %v7770_v6 = vld [vmem:[%s8044_s28 + $0x70] sm:$0xf] }
 0x2e4   : > { %10631 = vst [vmem:[#allocation59_spill] sm:$0xff] %v8993_v22  ;;  %2695 = vmatmul.bf16.gmra.mxu3 %v8995_v9  ;;  %v2087_v50 = vpop.f32.mrf.mxu1  ;;  %v1882_v34 = vadd.f32 %v8565_v52, %v1639_v15  ;;  %v2304_v52 = vunpack.c.l.b16 %v2202_v11  ;;  %v1887_v16 = vadd.f32 %v8582_v5, %v1644_v29  ;;  %v10637_v11 = vld [vmem:[#allocation26_spill] sm:$0xff]  ;;  %v2215_v56 = vrot.slane %v7770_v6, 5 }
 0x2e7   : > { %v1978_v43 = vpop.f32.mrf.mxu0 }
 0x2e8   : > { %v1979_v8 = vadd.f32 %v1978_v43, %v8587_v18  ;;  %v2203_v18 = vrot.slane %v2201_v63, 4  ;;  %v6766_v63 = vrot.slane %v7768_v47, 9 }
 0x2ea   : > { %v9002_v58 = vadd.f32 %v2077_v37, %v1979_v8  ;;  %2017 = vmatmul.bf16.gmra.mxu0 %v8570_v26  ;;  %v2205_v26 = vsel %vm8857_vm5, %v2203_v18, %v2204_v40  ;;  %v7767_v8 = vld [vmem:[%s8044_s28 + $0x64] sm:$0xf]  ;;  %v10636_v40 = vld [vmem:[#allocation31_spill] sm:$0xff] }
 0x2eb   : > { %v2305_v17 = vunpack.c.l.b16 %v2205_v26  ;;  %v2208_v15 = vrot.slane %v7767_v8, 5  ;;  %v1649_v26 = vadd.f32 %v10637_v11, %v1550_v2  ;;  %v10641_v2 = vld [vmem:[#allocation35_spill] sm:$0xff]  ;;  %v10643_v11 = vld [vmem:[#allocation33_spill] sm:$0xff] }
 0x2ec   : > { %10632 = vst [vmem:[#allocation60_spill] sm:$0xff] %v9002_v58  ;;  %v2089_v35 = vpop.f32.mrf.mxu1 }
 0x2ed   : > { %2601 = vmatmul.bf16.gmra.mxu2 %v8995_v9  ;;  %v9017_v4 = vpack.c.b16 %v2305_v17, %v2304_v52  ;;  %v2210_v30 = vrot.slane %v2208_v15, 4  ;;  %v2209_v42 = vsel %vm8857_vm5, %v6766_v63, %v2208_v15  ;;  %v7475_v17 = vld [vmem:[#allocation3 + $0xe0] sm:$0xff]  ;;  %v7771_v15 = vld [vmem:[%s8044_s28 + $0x6c] sm:$0xf] }
 0x2ee   : > { %4508 = vmatpush.bf16.msra.mxu1 %v7475_v17  ;;  %v10644_v17 = vld [vmem:[#allocation29_spill] sm:$0xff] }
 0x2ef   : > { %v1980_v31 = vpop.f32.mrf.mxu0 }
 0x2f0   : > { %v1981_v48 = vadd.f32 %v1980_v31, %v1882_v34  ;;  %v2211_v34 = vrot.slane %v7769_v23, 5 }
 0x2f2   : > { %v9015_v37 = vadd.f32 %v8962_v10, %v1981_v48 }
 0x2f4   : > { %10633 = vst [vmem:[#allocation61_spill] sm:$0xff] %v9015_v37  ;;  %2700 = vmatmul.bf16.gmra.mxu3 %v9017_v4  ;;  %v2092_v10 = vpop.f32.mrf.mxu1 }
 0x2f7   : > { %v1983_v41 = vpop.f32.mrf.mxu0 }
 0x2f8   : > { %v1984_v59 = vadd.f32 %v1983_v41, %v8598_v57  ;;  %v2212_v57 = vsel %vm8857_vm5, %v2210_v30, %v2211_v34  ;;  %v9048_v41 = vpop.f32.mrf.mxu2 }
 0x2f9   : > { %v2307_v49 = vunpack.c.l.b16 %v2212_v57 }
 0x2fa   : > { %v9024_v43 = vadd.f32 %v2082_v13, %v1984_v59  ;;  %2022 = vmatmul.bf16.gmra.mxu0 %v8954_v44  ;;  %v2306_v13 = vunpack.c.l.b16 %v2209_v42  ;;  %v10639_v59 = vld [vmem:[#allocation27_spill] sm:$0xff] }
 0x2fb   : > { %v1892_v29 = vadd.f32 %v10639_v59, %v1649_v26 }
 0x2fc   : > { %10634 = vst [vmem:[#allocation62_spill] sm:$0xff] %v9024_v43  ;;  %v9038_v5 = vpack.c.b16 %v2307_v49, %v2306_v13  ;;  %v2094_v3 = vpop.f32.mrf.mxu1 }
 0x2fd   : > { %2606 = vmatmul.bf16.gmra.mxu2 %v9017_v4 }
 0x2ff   : > { %v1985_v60 = vpop.f32.mrf.mxu0 }
 0x300   : > { %v1986_v31 = vadd.f32 %v1985_v60, %v1887_v16  ;;  %v6767_v16 = vrot.slane %v7771_v15, 9  ;;  %v7772_v60 = vld [vmem:[%s8044_s28 + $0x74] sm:$0x1]  ;;  %v10646_v15 = vld [vmem:[#allocation30_spill] sm:$0xff] }
 0x301   : > { %v2218_v47 = vrot.slane %v7772_v60, 5  ;;  %v7774_v60 = vld [vmem:[%s8044_s28 + $0x78] sm:$0xf] }
 0x302   : > { %v9036_v44 = vadd.f32 %v2084_v25, %v1986_v31  ;;  %v7483_v25 = vld [vmem:[#allocation3 + $0x120] sm:$0xff]  ;;  %v2216_v23 = vsel %vm8857_vm5, %v6767_v16, %v2215_v56 }
 0x303   : > { %4597 = vmatpush.bf16.msra.mxu2 %v7483_v25  ;;  %v2308_v42 = vunpack.c.l.b16 %v2216_v23  ;;  %v7775_v23 = vld [vmem:[%s8044_s28 + $0x80] sm:$0x1] }
 0x304   : > { %10635 = vst [vmem:[#allocation63_spill] sm:$0xff] %v9036_v44  ;;  %2705 = vmatmul.bf16.gmra.mxu3 %v9038_v5  ;;  %v2097_v30 = vpop.f32.mrf.mxu1  ;;  %v7790_v44 = vld [vmem:[%s8044_s28 + $0xbc] sm:$0x1] }
 0x307   : > { %v1988_v18 = vpop.f32.mrf.mxu0 }
 0x308   : > { %v1989_v48 = vadd.f32 %v1988_v18, %v10636_v40  ;;  %v10642_v18 = vld [vmem:[#allocation28_spill] sm:$0xff] }
 0x309   : > { %v1555_v40 = vadd.f32 %v10642_v18, %v10641_v2 }
 0x30a   : > { %v9045_v52 = vadd.f32 %v2087_v50, %v1989_v48  ;;  %2769 = vmatmul.bf16.vlgmr.msrb.gmra.mxu0 %v8895_v14  ;;  %v2217_v50 = vrot.slane %v2215_v56, 4  ;;  %v9055_v14 = vpop.f32.mrf.mxu3 }
 0x30c   : > { %10638 = vst [vmem:[#allocation31_spill] sm:$0xff] %v9045_v52  ;;  %v2219_v34 = vsel %vm8857_vm5, %v2217_v50, %v2218_v47  ;;  %v2099_v56 = vpop.f32.mrf.mxu1  ;;  %v6768_v47 = vrot.slane %v7774_v60, 9 }
 0x30d   : > { %2611 = vmatmul.bf16.gmra.mxu2 %v9038_v5  ;;  %v2309_v57 = vunpack.c.l.b16 %v2219_v34  ;;  %v2225_v34 = vrot.slane %v7775_v23, 5 }
 0x30f   : > { %v1990_v8 = vpop.f32.mrf.mxu0  ;;  %v9063_v49 = vpack.c.b16 %v2309_v57, %v2308_v42 }
 0x310   : > { %v1991_v63 = vadd.f32 %v1990_v8, %v1892_v29  ;;  %v2572_v13 = vpop.f32.mrf.mxu2  ;;  %v7773_v29 = vld [vmem:[%s8044_s28 + $0x7c] sm:$0xf] }
 0x311   : > { %v2222_v8 = vrot.slane %v7773_v29, 5 }
 0x312   : > { %v9061_v31 = vadd.f32 %v2089_v35, %v1991_v63  ;;  %v1654_v35 = vadd.f32 %v10644_v17, %v1555_v40 }
 0x313   : > { %v2224_v63 = vrot.slane %v2222_v8, 4 }
 0x314   : > { %10640 = vst [vmem:[#allocation26_spill] sm:$0xff] %v9061_v31  ;;  %2710 = vmatmul.bf16.gmra.mxu3 %v9063_v49  ;;  %v1897_v16 = vadd.f32 %v10646_v15, %v1654_v35 }
 0x315   : > { %v2671_v25 = vpop.f32.mrf.mxu3  ;;  %v2226_v57 = vsel %vm8857_vm5, %v2224_v63, %v2225_v34  ;;  %v10651_v63 = vld [vmem:[#allocation36_spill] sm:$0xff] }
 0x316   : > { %v9073_v6 = vadd.f32 %v2671_v25, %v2572_v13  ;;  %v2311_v18 = vunpack.c.l.b16 %v2226_v57 }
 0x317   : > { %v1993_v48 = vpop.f32.mrf.mxu0 }
 0x318   : > { %v1994_v26 = vadd.f32 %v1993_v48, %v10643_v11  ;;  %v9075_v59 = vpop.f32.mrf.mxu2  ;;  %v2102_v11 = vpop.f32.mrf.mxu1 }
 0x31a   : > { %v9070_v61 = vadd.f32 %v2092_v10, %v1994_v26  ;;  %2774 = vmatmul.bf16.gmra.mxu0 %v8917_v51  ;;  %v2223_v51 = vsel %vm8857_vm5, %v6768_v47, %v2222_v8  ;;  %v10648_v26 = vld [vmem:[#allocation32_spill] sm:$0xff]  ;;  %v10649_v8 = vld [vmem:[#allocation34_spill] sm:$0xff] }
 0x31b   : > { %v2310_v2 = vunpack.c.l.b16 %v2223_v51  ;;  %v1560_v25 = vadd.f32 %v10648_v26, %v8651_v62  ;;  %v7776_v62 = vld [vmem:[%s8044_s28 + $0x88] sm:$0xf] }
 0x31c   : > { %10645 = vst [vmem:[#allocation27_spill] sm:$0xff] %v9070_v61  ;;  %v2229_v47 = vrot.slane %v7776_v62, 5  ;;  %v10653_v62 = vld [vmem:[#allocation37_spill] sm:$0xff] }
 0x31d   : > { %2616 = vmatmul.bf16.gmra.mxu2 %v9063_v49  ;;  %v9082_v10 = vpop.f32.mrf.mxu3  ;;  %v9090_v48 = vpack.c.b16 %v2311_v18, %v2310_v2  ;;  %v7778_v2 = vld [vmem:[%s8044_s28 + $0x8c] sm:$0x1] }
 0x31e   : > { %v2231_v57 = vrot.slane %v2229_v47, 4 }
 0x31f   : > { %v1995_v50 = vpop.f32.mrf.mxu0 }
 0x320   : > { %v1996_v42 = vadd.f32 %v1995_v50, %v1897_v16  ;;  %v2577_v40 = vpop.f32.mrf.mxu2  ;;  %v7482_v50 = vld [vmem:[#allocation3 + $0x118] sm:$0xff] }
 0x321   : > { %4598 = vmatpush.bf16.msra.mxu2 %v7482_v50 }
 0x322   : > { %v9088_v13 = vadd.f32 %v2094_v3, %v1996_v42  ;;  %v1659_v3 = vadd.f32 %v10649_v8, %v1560_v25  ;;  %v7777_v42 = vld [vmem:[%s8044_s28 + $0x84] sm:$0xf] }
 0x323   : > { %v6769_v51 = vrot.slane %v7777_v42, 9 }
 0x324   : > { %10647 = vst [vmem:[#allocation35_spill] sm:$0xff] %v9088_v13  ;;  %2715 = vmatmul.bf16.gmra.mxu3 %v9090_v48  ;;  %v1902_v23 = vadd.f32 %v10651_v63, %v1659_v3  ;;  %v1565_v63 = vadd.f32 %v10653_v62, %v8662_v32 }
 0x327   : > { %v1998_v17 = vpop.f32.mrf.mxu0  ;;  %v2676_v29 = vpop.f32.mrf.mxu3 }
 0x328   : > { %v1999_v35 = vadd.f32 %v1998_v17, %v8649_v7  ;;  %v9100_v16 = vadd.f32 %v2676_v29, %v2577_v40  ;;  %v9102_v60 = vpop.f32.mrf.mxu2  ;;  %v2104_v7 = vpop.f32.mrf.mxu1  ;;  %v2230_v40 = vsel %vm8857_vm5, %v6769_v51, %v2229_v47  ;;  %v7474_v17 = vld [vmem:[#allocation3 + $0xd8] sm:$0xff]  ;;  %v10655_v51 = vld [vmem:[#allocation38_spill] sm:$0xff] }
 0x329   : > { %v2312_v29 = vunpack.c.l.b16 %v2230_v40  ;;  %4509 = vmatpush.bf16.msra.mxu1 %v7474_v17  ;;  %v7779_v40 = vld [vmem:[%s8044_s28 + $0x94] sm:$0xf] }
 0x32a   : > { %v9097_v15 = vadd.f32 %v2097_v30, %v1999_v35  ;;  %2779 = vmatmul.bf16.gmra.mxu0 %v8943_v39  ;;  %v2232_v30 = vrot.slane %v7778_v2, 5  ;;  %v7490_v35 = vld [vmem:[#allocation3 + $0x158] sm:$0xff]  ;;  %v2236_v32 = vrot.slane %v7779_v40, 5 }
 0x32b   : > { %4687 = vmatpush.bf16.msra.mxu3 %v7490_v35 }
 0x32c   : > { %10650 = vst [vmem:[#allocation28_spill] sm:$0xff] %v9097_v15  ;;  %v2233_v26 = vsel %vm8857_vm5, %v2231_v57, %v2232_v30  ;;  %v1664_v57 = vadd.f32 %v10655_v51, %v1565_v63  ;;  %v2238_v62 = vrot.slane %v2236_v32, 4 }
 0x32d   : > { %2621 = vmatmul.bf16.gmra.mxu2 %v9090_v48  ;;  %v2313_v8 = vunpack.c.l.b16 %v2233_v26  ;;  %v10657_v26 = vld [vmem:[#allocation39_spill] sm:$0xff] }
 0x32e   : > { %v1907_v17 = vadd.f32 %v10657_v26, %v1664_v57  ;;  %v10659_v26 = vld [vmem:[#allocation45_spill] sm:$0xff] }
 0x32f   : > { %v2000_v34 = vpop.f32.mrf.mxu0  ;;  %v9109_v39 = vpop.f32.mrf.mxu3  ;;  %v9117_v50 = vpack.c.b16 %v2313_v8, %v2312_v29  ;;  %v7780_v29 = vld [vmem:[%s8044_s28 + $0x90] sm:$0xf] }
 0x330   : > { %v2001_v18 = vadd.f32 %v2000_v34, %v1902_v23  ;;  %v2582_v3 = vpop.f32.mrf.mxu2  ;;  %v10654_v23 = vld [vmem:[#allocation40_spill] sm:$0xff]  ;;  %v2107_v34 = vpop.f32.mrf.mxu1  ;;  %v6770_v8 = vrot.slane %v7780_v29, 9 }
 0x332   : > { %v9115_v25 = vadd.f32 %v2099_v56, %v2001_v18 }
 0x334   : > { %10652 = vst [vmem:[#allocation33_spill] sm:$0xff] %v9115_v25  ;;  %2720 = vmatmul.bf16.gmra.mxu3 %v9117_v50 }
 0x337   : > { %v2003_v47 = vpop.f32.mrf.mxu0  ;;  %v2681_v42 = vpop.f32.mrf.mxu3 }
 0x338   : > { %v2004_v56 = vadd.f32 %v2003_v47, %v10654_v23  ;;  %v9127_v30 = vadd.f32 %v2681_v42, %v2582_v3  ;;  %v9129_v18 = vpop.f32.mrf.mxu2  ;;  %v7781_v47 = vld [vmem:[%s8044_s28 + $0x98] sm:$0x1]  ;;  %v2109_v51 = vpop.f32.mrf.mxu1 }
 0x339   : > { %v2239_v23 = vrot.slane %v7781_v47, 5 }
 0x33a   : > { %v9124_v2 = vadd.f32 %v2102_v11, %v2004_v56  ;;  %2784 = vmatmul.bf16.gmra.mxu0 %v8971_v12  ;;  %v2237_v12 = vsel %vm8857_vm5, %v6770_v8, %v2236_v32  ;;  %v10661_v32 = vld [vmem:[#allocation44_spill] sm:$0xff] }
 0x33b   : > { %v2240_v3 = vsel %vm8857_vm5, %v2238_v62, %v2239_v23  ;;  %v2314_v56 = vunpack.c.l.b16 %v2237_v12 }
 0x33c   : > { %10656 = vst [vmem:[#allocation29_spill] sm:$0xff] %v9124_v2  ;;  %v2315_v42 = vunpack.c.l.b16 %v2240_v3  ;;  %v7783_v2 = vld [vmem:[%s8044_s28 + $0x9c] sm:$0xf] }
 0x33d   : > { %2626 = vmatmul.bf16.gmra.mxu2 %v9117_v50  ;;  %v6771_v15 = vrot.slane %v7783_v2, 9  ;;  %v7473_v2 = vld [vmem:[#allocation3 + $0xd0] sm:$0xff] }
 0x33e   : > { %v9144_v40 = vpack.c.b16 %v2315_v42, %v2314_v56  ;;  %v7782_v56 = vld [vmem:[%s8044_s28 + $0xa0] sm:$0xf]  ;;  %4510 = vmatpush.bf16.msra.mxu1 %v7473_v2 }
 0x33f   : > { %v2005_v35 = vpop.f32.mrf.mxu0  ;;  %v9136_v11 = vpop.f32.mrf.mxu3  ;;  %v2243_v42 = vrot.slane %v7782_v56, 5  ;;  %v7489_v56 = vld [vmem:[#allocation3 + $0x150] sm:$0xff] }
 0x340   : > { %v2006_v25 = vadd.f32 %v2005_v35, %v1907_v17  ;;  %v2587_v57 = vpop.f32.mrf.mxu2  ;;  %v10660_v17 = vld [vmem:[#allocation41_spill] sm:$0xff]  ;;  %v2112_v3 = vpop.f32.mrf.mxu1  ;;  %4688 = vmatpush.bf16.msra.mxu3 %v7489_v56  ;;  %v10671_v56 = vld [vmem:[#allocation48_spill] sm:$0xff] }
 0x341   : > { %v1570_v35 = vadd.f32 %v10660_v17, %v10659_v26  ;;  %v10664_v26 = vld [vmem:[#allocation43_spill] sm:$0xff] }
 0x342   : > { %v9142_v63 = vadd.f32 %v2104_v7, %v2006_v25  ;;  %v10662_v7 = vld [vmem:[#allocation42_spill] sm:$0xff] }
 0x343   : > { %v1669_v25 = vadd.f32 %v10662_v7, %v1570_v35 }
 0x344   : > { %10658 = vst [vmem:[#allocation30_spill] sm:$0xff] %v9142_v63  ;;  %2725 = vmatmul.bf16.gmra.mxu3 %v9144_v40 }
 0x345   : > { %v1912_v17 = vadd.f32 %v10664_v26, %v1669_v25 }
 0x347   : > { %v2008_v29 = vpop.f32.mrf.mxu0  ;;  %v2686_v62 = vpop.f32.mrf.mxu3 }
 0x348   : > { %v2009_v8 = vadd.f32 %v2008_v29, %v10661_v32  ;;  %v9154_v23 = vadd.f32 %v2686_v62, %v2587_v57  ;;  %v9156_v12 = vpop.f32.mrf.mxu2  ;;  %v2245_v29 = vrot.slane %v2243_v42, 4  ;;  %v7784_v32 = vld [vmem:[%s8044_s28 + $0xa4] sm:$0x1]  ;;  %v7481_v62 = vld [vmem:[#allocation3 + $0x110] sm:$0xff] }
 0x349   : > { %v2246_v13 = vrot.slane %v7784_v32, 5  ;;  %4599 = vmatpush.bf16.msra.mxu2 %v7481_v62  ;;  %v10667_v32 = vld [vmem:[#allocation46_spill] sm:$0xff] }
 0x34a   : > { %v9151_v47 = vadd.f32 %v2107_v34, %v2009_v8  ;;  %2789 = vmatmul.bf16.gmra.mxu0 %v8995_v9  ;;  %v2244_v9 = vsel %vm8857_vm5, %v6771_v15, %v2243_v42  ;;  %v10668_v42 = vld [vmem:[#allocation49_spill] sm:$0xff] }
 0x34b   : > { %v2247_v57 = vsel %vm8857_vm5, %v2245_v29, %v2246_v13  ;;  %v2316_v7 = vunpack.c.l.b16 %v2244_v9  ;;  %v10669_v9 = vld [vmem:[#allocation47_spill] sm:$0xff] }
 0x34c   : > { %10663 = vst [vmem:[#allocation32_spill] sm:$0xff] %v9151_v47  ;;  %v2317_v25 = vunpack.c.l.b16 %v2247_v57  ;;  %v7786_v47 = vld [vmem:[%s8044_s28 + $0xa8] sm:$0xf] }
 0x34d   : > { %2631 = vmatmul.bf16.gmra.mxu2 %v9144_v40  ;;  %v6772_v61 = vrot.slane %v7786_v47, 9 }
 0x34f   : > { %v2010_v63 = vpop.f32.mrf.mxu0  ;;  %v9163_v34 = vpop.f32.mrf.mxu3 }
 0x350   : > { %v2011_v35 = vadd.f32 %v2010_v63, %v1912_v17  ;;  %v2592_v26 = vpop.f32.mrf.mxu2  ;;  %v9171_v63 = vpack.c.b16 %v2317_v25, %v2316_v7  ;;  %v10666_v17 = vld [vmem:[#allocation50_spill] sm:$0xff]  ;;  %v7785_v25 = vld [vmem:[%s8044_s28 + $0xac] sm:$0xf] }
 0x351   : > { %v1575_v15 = vadd.f32 %v10667_v32, %v10666_v17  ;;  %v2250_v2 = vrot.slane %v7785_v25, 5  ;;  %v10673_v25 = vld [vmem:[#allocation54_spill] sm:$0xff] }
 0x352   : > { %v9169_v8 = vadd.f32 %v2109_v51, %v2011_v35  ;;  %v2114_v51 = vpop.f32.mrf.mxu1 }
 0x353   : > { %v1674_v57 = vadd.f32 %v10669_v9, %v1575_v15  ;;  %v2252_v31 = vrot.slane %v2250_v2, 4 }
 0x354   : > { %10665 = vst [vmem:[#allocation34_spill] sm:$0xff] %v9169_v8  ;;  %2730 = vmatmul.bf16.gmra.mxu3 %v9171_v63 }
 0x355   : > { %v1917_v17 = vadd.f32 %v10671_v56, %v1674_v57  ;;  %v10674_v56 = vld [vmem:[#allocation51_spill] sm:$0xff] }
 0x357   : > { %v2013_v13 = vpop.f32.mrf.mxu0  ;;  %v2691_v35 = vpop.f32.mrf.mxu3 }
 0x358   : > { %v2014_v29 = vadd.f32 %v2013_v13, %v10668_v42  ;;  %v9181_v62 = vadd.f32 %v2691_v35, %v2592_v26  ;;  %v9183_v7 = vpop.f32.mrf.mxu2  ;;  %v7787_v13 = vld [vmem:[%s8044_s28 + $0xb0] sm:$0x1] }
 0x359   : > { %v2253_v42 = vrot.slane %v7787_v13, 5  ;;  %v10675_v13 = vld [vmem:[#allocation52_spill] sm:$0xff] }
 0x35a   : > { %v9178_v8 = vadd.f32 %v2112_v3, %v2014_v29  ;;  %2794 = vmatmul.bf16.gmra.mxu0 %v9017_v4  ;;  %v2117_v3 = vpop.f32.mrf.mxu1  ;;  %v2251_v4 = vsel %vm8857_vm5, %v6772_v61, %v2250_v2 }
 0x35b   : > { %v2254_v26 = vsel %vm8857_vm5, %v2252_v31, %v2253_v42  ;;  %v2318_v35 = vunpack.c.l.b16 %v2251_v4  ;;  %v10676_v31 = vld [vmem:[#allocation53_spill] sm:$0xff] }
 0x35c   : > { %10670 = vst [vmem:[#allocation36_spill] sm:$0xff] %v9178_v8  ;;  %v2319_v47 = vunpack.c.l.b16 %v2254_v26  ;;  %v10678_v26 = vld [vmem:[#allocation55_spill] sm:$0xff] }
 0x35d   : > { %2636 = vmatmul.bf16.gmra.mxu2 %v9171_v63 }
 0x35e   : > { %v9198_v57 = vpack.c.b16 %v2319_v47, %v2318_v35  ;;  %v7788_v47 = vld [vmem:[%s8044_s28 + $0xb8] sm:$0xf] }
 0x35f   : > { %v2015_v32 = vpop.f32.mrf.mxu0  ;;  %v9190_v15 = vpop.f32.mrf.mxu3 }
 0x360   : > { %v2016_v52 = vadd.f32 %v2015_v32, %v1917_v17  ;;  %v2597_v9 = vpop.f32.mrf.mxu2  ;;  %v1580_v17 = vadd.f32 %v10674_v56, %v10673_v25  ;;  %v2257_v25 = vrot.slane %v7788_v47, 5 }
 0x362   : > { %v9196_v29 = vadd.f32 %v2114_v51, %v2016_v52  ;;  %v1679_v52 = vadd.f32 %v10676_v31, %v1580_v17  ;;  %v2119_v42 = vpop.f32.mrf.mxu1  ;;  %v2259_v8 = vrot.slane %v2257_v25, 4  ;;  %v2260_v17 = vrot.slane %v7790_v44, 5  ;;  %v10680_v44 = vld [vmem:[#allocation57_spill] sm:$0xff] }
 0x364   : > { %10672 = vst [vmem:[#allocation37_spill] sm:$0xff] %v9196_v29  ;;  %2735 = vmatmul.bf16.gmra.mxu3 %v9198_v57  ;;  %v1922_v35 = vadd.f32 %v10678_v26, %v1679_v52  ;;  %v2261_v52 = vsel %vm8857_vm5, %v2259_v8, %v2260_v17 }
 0x367   : > { %v2018_v32 = vpop.f32.mrf.mxu0  ;;  %v2696_v2 = vpop.f32.mrf.mxu3 }
 0x368   : > { %v2019_v61 = vadd.f32 %v2018_v32, %v10675_v13  ;;  %v9208_v4 = vpop.f32.mrf.mxu2  ;;  %v7789_v32 = vld [vmem:[%s8044_s28 + $0xb4] sm:$0xf] }
 0x369   : > { %v6773_v13 = vrot.slane %v7789_v32, 9 }
 0x36a   : > { %v9205_v51 = vadd.f32 %v2117_v3, %v2019_v61  ;;  %2799 = vmatmul.bf16.gmra.mxu0 %v9038_v5  ;;  %v9217_v61 = vadd.f32 %v2696_v2, %v2597_v9  ;;  %v10681_v2 = vld [vmem:[#allocation56_spill] sm:$0xff] }
 0x36b   : > { %v2258_v31 = vsel %vm8857_vm5, %v6773_v13, %v2257_v25 }
 0x36c   : > { %10677 = vst [vmem:[#allocation40_spill] sm:$0xff] %v9205_v51  ;;  %v2320_v26 = vunpack.c.l.b16 %v2258_v31 }
 0x36d   : > { %2641 = vmatmul.bf16.gmra.mxu2 %v9198_v57 }
 0x36f   : > { %v2020_v56 = vpop.f32.mrf.mxu0  ;;  %v9219_v5 = vpop.f32.mrf.mxu3 }
 0x370   : > { %v2021_v29 = vadd.f32 %v2020_v56, %v1922_v35  ;;  %v2321_v35 = vunpack.c.l.b16 %v2261_v52  ;;  %v2602_v47 = vpop.f32.mrf.mxu2  ;;  %v2122_v56 = vpop.f32.mrf.mxu1  ;;  %v7791_v52 = vld [vmem:[%s8044_s28 + $0xc4] sm:$0xf] }
 0x372   : > { %v9215_v3 = vadd.f32 %v2119_v42, %v2021_v29  ;;  %v9225_v32 = vpack.c.b16 %v2321_v35, %v2320_v26  ;;  %v1585_v29 = vadd.f32 %v8809_v0, %v10680_v44  ;;  %v2264_v0 = vrot.slane %v7791_v52, 5 }
 0x374   : > { %10679 = vst [vmem:[#allocation38_spill] sm:$0xff] %v9215_v3  ;;  %2740 = vmatmul.bf16.gmra.mxu3 %v9225_v32  ;;  %v1684_v25 = vadd.f32 %v9048_v41, %v1585_v29  ;;  %v2266_v3 = vrot.slane %v2264_v0, 4  ;;  %v7793_v41 = vld [vmem:[%s8044_s28 + $0xc8] sm:$0x1] }
 0x376   : > { %v1927_v31 = vadd.f32 %v9055_v14, %v1684_v25 }
 0x377   : > { %v2023_v9 = vpop.f32.mrf.mxu0  ;;  %v2701_v13 = vpop.f32.mrf.mxu3 }
 0x378   : > { %v2024_v42 = vadd.f32 %v2023_v9, %v10681_v2  ;;  %v9235_v17 = vpop.f32.mrf.mxu2  ;;  %v2124_v35 = vpop.f32.mrf.mxu1  ;;  %v7792_v9 = vld [vmem:[%s8044_s28 + $0xc0] sm:$0xf]  ;;  %v9250_v25 = vadd.f32 %v2701_v13, %v2602_v47 }
 0x379   : > { %v6774_v2 = vrot.slane %v7792_v9, 9  ;;  %v9265_v47 = vld [vmem:[%s10539_s3] ss:$0 sm:$0xff] }
 0x37a   : > { %v9232_v8 = vadd.f32 %v2122_v56, %v2024_v42  ;;  %2804 = vmatmul.bf16.gmra.mxu0 %v9063_v49  ;;  %v2267_v56 = vrot.slane %v7793_v41, 5 }
 0x37b   : > { %v2265_v42 = vsel %vm8857_vm5, %v6774_v2, %v2264_v0  ;;  %v9259_v0 = vld [vmem:[%s10538_s2] ss:$0 sm:$0xff] }
 0x37c   : > { %10682 = vst [vmem:[#allocation39_spill] sm:$0xff] %v9232_v8  ;;  %v2268_v14 = vsel %vm8857_vm5, %v2266_v3, %v2267_v56  ;;  %v7472_v56 = vld [vmem:[#allocation3 + $0xc8] sm:$0xff] }
 0x37d   : > { %2646 = vmatmul.bf16.gmra.mxu2 %v9225_v32  ;;  %v2323_v52 = vunpack.c.l.b16 %v2268_v14  ;;  %v7794_v14 = vld [vmem:[%s8044_s28 + $0xd0] sm:$0xf]  ;;  %4511 = vmatpush.bf16.msra.mxu1 %v7472_v56 }
 0x37f   : > { %v2025_v26 = vpop.f32.mrf.mxu0  ;;  %v9244_v49 = vpop.f32.mrf.mxu3 }
 0x380   : > { %v2026_v44 = vadd.f32 %v2025_v26, %v1927_v31  ;;  %v2322_v31 = vunpack.c.l.b16 %v2265_v42  ;;  %v2607_v26 = vpop.f32.mrf.mxu2  ;;  %v7488_v42 = vld [vmem:[#allocation3 + $0x148] sm:$0xff] }
 0x381   : > { %4689 = vmatpush.bf16.msra.mxu3 %v7488_v42 }
 0x382   : > { %v9242_v29 = vadd.f32 %v2124_v35, %v2026_v44  ;;  %v9252_v8 = vpack.c.b16 %v2323_v52, %v2322_v31  ;;  %v2271_v31 = vrot.slane %v7794_v14, 5 }
 0x384   : > { %10683 = vst [vmem:[#allocation45_spill] sm:$0xff] %v9242_v29  ;;  %2745 = vmatmul.bf16.gmra.mxu3 %v9252_v8  ;;  %v7796_v29 = vld [vmem:[%s8044_s28 + $0xd4] sm:$0x1] }
 0x387   : > { %v2770_v9 = vpop.f32.mrf.mxu0  ;;  %v2706_v13 = vpop.f32.mrf.mxu3 }
 0x388   : > { %v2771_v35 = vadd.f32 %v2770_v9, %v9073_v6  ;;  %v9269_v2 = vpop.f32.mrf.mxu2  ;;  %v2674_v6 = vadd.f32 %v9082_v10, %v9075_v59  ;;  %v2274_v59 = vrot.slane %v7796_v29, 5  ;;  %v9283_v43 = vadd.f32 %v2706_v13, %v2607_v26 }
 0x38a   : > { %v2860_v3 = vadd.f32 %v2771_v35, %v8827_v19  ;;  %2809 = vmatmul.bf16.gmra.mxu0 %v9090_v48  ;;  %v7480_v19 = vld [vmem:[#allocation3 + $0x108] sm:$0xff]  ;;  %v7795_v48 = vld [vmem:[%s8044_s28 + $0xcc] sm:$0xf] }
 0x38b   : > { %4600 = vmatpush.bf16.msra.mxu2 %v7480_v19  ;;  %v6775_v35 = vrot.slane %v7795_v48, 9 }
 0x38c   : > { %v2900_v44 = vmul.f32 %v9259_v0, %v2860_v3  ;;  %v2273_v3 = vrot.slane %v2271_v31, 4 }
 0x38d   : > { %2651 = vmatmul.bf16.gmra.mxu2 %v9252_v8  ;;  %v2272_v14 = vsel %vm8857_vm5, %v6775_v35, %v2271_v31 }
 0x38e   : > { %v2940_v41 = vadd.f32 %v9265_v47, %v2900_v44  ;;  %v2324_v19 = vunpack.c.l.b16 %v2272_v14 }
 0x38f   : > { %v2772_v52 = vpop.f32.mrf.mxu0  ;;  %v9279_v51 = vpop.f32.mrf.mxu3 }
 0x390   : > { %v2773_v9 = vadd.f32 %v2772_v52, %v2674_v6  ;;  %v2976_v10 = vmax.f32 %v2940_v41, 0.0  ;;  %v2275_v6 = vsel %vm8857_vm5, %v2273_v3, %v2274_v59  ;;  %v2612_v42 = vpop.f32.mrf.mxu2 }
 0x391   : > { %v2325_v52 = vunpack.c.l.b16 %v2275_v6  ;;  %v7471_v6 = vld [vmem:[#allocation3 + $0xc0] sm:$0xff] }
 0x392   : > { %v2861_v44 = vadd.f32 %v2773_v9, %v8830_v20  ;;  %v3015_v48 = vmul.f32 0.0, %v2976_v10  ;;  %4512 = vmatpush.bf16.msra.mxu1 %v7471_v6 }
 0x393   : > { %v9289_v41 = vpack.c.b16 %v2325_v52, %v2324_v19 }
 0x394   : > { %v2901_v56 = vmul.f32 %v9259_v0, %v2861_v44  ;;  %v3019_v26 = vpack.c.bf16 %v3015_v48, %v3015_v48  ;;  %v2679_v44 = vadd.f32 %v9109_v39, %v9102_v60 }
 0x395   : > { %2750 = vmatmul.bf16.gmra.mxu3 %v9289_v41 }
 0x396   : > { %v2941_v29 = vadd.f32 %v9265_v47, %v2901_v56  ;;  %v3091_v14 = vunpack.c.l.b16 %v3019_v26  ;;  %v7797_v56 = vld [vmem:[%s8044_s28 + $0xdc] sm:$0xf]  ;;  %v7798_v26 = vld [vmem:[%s8044_s28 + $0xd8] sm:$0xf] }
 0x397   : > { %v2775_v20 = vpop.f32.mrf.mxu0  ;;  %v2711_v35 = vpop.f32.mrf.mxu3  ;;  %v2278_v52 = vrot.slane %v7797_v56, 5 }
 0x398   : > { %v2977_v9 = vmax.f32 %v2941_v29, 0.0  ;;  %v2776_v37 = vadd.f32 %v2775_v20, %v9100_v16  ;;  %v9296_v10 = vpop.f32.mrf.mxu2 }
 0x39a   : > { %v3016_v13 = vmul.f32 0.0, %v2977_v9  ;;  %v2862_v31 = vadd.f32 %v2776_v37, %v8832_v24  ;;  %2814 = vmatmul.bf16.gmra.mxu0 %v9117_v50  ;;  %v9310_v9 = vadd.f32 %v2711_v35, %v2612_v42 }
 0x39c   : > { %v3020_v3 = vpack.c.bf16 %v3016_v13, %v3016_v13  ;;  %v2902_v59 = vmul.f32 %v9259_v0, %v2862_v31  ;;  %10687 = vst [vmem:[#allocation44_spill] sm:$0xff] %v9310_v9  ;;  %v6776_v13 = vrot.slane %v7798_v26, 9  ;;  %v2280_v31 = vrot.slane %v2278_v52, 4  ;;  %v10689_v9 = vld [vmem:[#allocation58_spill] sm:$0xff] }
 0x39d   : > { %2656 = vmatmul.bf16.gmra.mxu2 %v9289_v41 }
 0x39e   : > { %v3092_v16 = vunpack.c.l.b16 %v3020_v3  ;;  %v2942_v19 = vadd.f32 %v9265_v47, %v2902_v59 }
 0x39f   : > { %v2777_v24 = vpop.f32.mrf.mxu0  ;;  %v9304_v39 = vpop.f32.mrf.mxu3 }
 0x3a0   : > { %v3127_v37 = vpack.c.b16 %v3092_v16, %v3091_v14  ;;  %v2778_v50 = vadd.f32 %v2777_v24, %v2679_v44  ;;  %10684 = vst [vmem:[#allocation41_spill] sm:$0xff] %v9304_v39  ;;  %v2978_v20 = vmax.f32 %v2942_v19, 0.0  ;;  %v7799_v14 = vld [vmem:[%s8044_s28 + $0xe0] sm:$0x1]  ;;  %v9320_v42 = vpop.f32.mrf.mxu2 }
 0x3a1   : > { %v2281_v16 = vrot.slane %v7799_v14, 5 }
 0x3a2   : > { %v3146_v48 = vshrl.u32 %v3127_v37, 16  ;;  %v2863_v60 = vadd.f32 %v2778_v50, %v8844_v21  ;;  %v3149_v59 = vshll.u32 %v3127_v37, 16  ;;  %v2279_v21 = vsel %vm8857_vm5, %v6776_v13, %v2278_v52 }
 0x3a3   : > { %v2282_v35 = vsel %vm8857_vm5, %v2280_v31, %v2281_v16  ;;  %v2362_v56 = vunpack.c.l.b16 %v2279_v21  ;;  %v3021_v26 = vpack.c.bf16 %v2978_v20, %v2978_v20 }
 0x3a4   : > { %v3148_v3 = vrot.slane %v3146_v48, 7  ;;  %v2903_v44 = vmul.f32 %v9259_v0, %v2863_v60  ;;  %v2363_v48 = vunpack.c.l.b16 %v2282_v35  ;;  %v2684_v35 = vadd.f32 %v9136_v11, %v9129_v18 }
 0x3a5   : > { %v3093_v21 = vunpack.c.l.b16 %v3021_v26 }
 0x3a6   : > { %v3151_v6 = vor.u32 %v3149_v59, %v3148_v3  ;;  %v3328_v24 = vsel %vm9306_vm8, %v3148_v3, 0  ;;  %v2943_v19 = vadd.f32 %v9265_v47, %v2903_v44  ;;  %v9327_v44 = vpack.c.b16 %v2363_v48, %v2362_v56 }
 0x3a7   : > { %v3384_v50 = vunpack.c.l.b16 %v3328_v24  ;;  %v2780_v37 = vpop.f32.mrf.mxu0  ;;  %v7487_v24 = vld [vmem:[#allocation3 + $0x140] sm:$0xff] }
 0x3a8   : > { %v3310_v60 = vsel %vm9306_vm8, 0, %v3151_v6  ;;  %v2979_v52 = vmax.f32 %v2943_v19, 0.0  ;;  %v2781_v13 = vadd.f32 %v2780_v37, %v9127_v30  ;;  %10688 = vst [vmem:[#allocation42_spill] sm:$0xff] %v9327_v44  ;;  %2755 = vmatmul.bf16.gmra.mxu3 %v9327_v44  ;;  %v7479_v30 = vld [vmem:[#allocation3 + $0x100] sm:$0xff]  ;;  %v2716_v19 = vpop.f32.mrf.mxu3 }
 0x3a9   : > { %v3382_v59 = vunpack.c.l.b16 %v3310_v60  ;;  %v3383_v3 = vunpack.c.h.b16 %v3310_v60  ;;  %v3438_v14 = vpack.c.b16 %v3384_v50, %v3384_v50  ;;  %4601 = vmatpush.bf16.msra.mxu2 %v7479_v30  ;;  %4690 = vmatpush.bf16.msra.mxu3 %v7487_v24  ;;  %v9336_v50 = vpop.f32.mrf.mxu2 }
 0x3aa   : > { %v3022_v58 = vpack.c.bf16 %v2979_v52, %v2979_v52  ;;  %v2864_v22 = vadd.f32 %v2781_v13, %v10689_v9  ;;  %2819 = vmatmul.bf16.gmra.mxu0 %v9144_v40  ;;  %10690 = vst [vmem:[#allocation43_spill] sm:$0xff] %v9336_v50 }
 0x3ab   : > { %v3436_v31 = vpack.c.b16 %v3382_v59, %v3382_v59  ;;  %v3437_v16 = vpack.c.b16 %v3383_v3, %v3383_v3  ;;  %3546 = vst [vmem:[#allocation2 + $0x8] sm:$0x1] %v3438_v14 }
 0x3ac   : > { %v3094_v20 = vunpack.c.l.b16 %v3022_v58  ;;  %v2904_v6 = vmul.f32 %v9259_v0, %v2864_v22 }
 0x3ad   : > { %3544 = vst [vmem:[#allocation2] sm:$0xf] %v3436_v31 }
 0x3ae   : > { %3545 = vst [vmem:[#allocation2 + $0x4] sm:$0xf] %v3437_v16  ;;  %v3128_v9 = vpack.c.b16 %v3094_v20, %v3093_v21  ;;  %v2944_v40 = vadd.f32 %v9265_v47, %v2904_v6 }
 0x3af   : > { %v2782_v37 = vpop.f32.mrf.mxu0 }
 0x3b0   : > { %v3153_v56 = vshrl.u32 %v3128_v9, 16  ;;  %v2980_v58 = vmax.f32 %v2944_v40, 0.0  ;;  %v2783_v48 = vadd.f32 %v2782_v37, %v2684_v35  ;;  %v3156_v60 = vshll.u32 %v3128_v9, 16  ;;  %v9342_v14 = vpop.f32.mrf.mxu3 }
 0x3b1   : > { %10691 = vst [vmem:[#allocation50_spill] sm:$0xff] %v9342_v14  ;;  %v9347_v9 = vpop.f32.mrf.mxu2 }
 0x3b2   : > { %v3155_v22 = vrot.slane %v3153_v56, 7  ;;  %v2865_v26 = vadd.f32 %v2783_v48, %v8874_v36  ;;  %v3600_v52 = vld [vmem:[#allocation2 + $0x8] sm:$0x1]  ;;  %v3023_v11 = vpack.c.bf16 %v2980_v58, %v2980_v58 }
 0x3b3   : > { %v3828_v6 = vshll.u32 %v3600_v52, 16 }
 0x3b4   : > { %v3158_v13 = vor.u32 %v3156_v60, %v3155_v22  ;;  %v3329_v18 = vsel %vm9306_vm8, %v3155_v22, 0  ;;  %v2905_v59 = vmul.f32 %v9259_v0, %v2865_v26  ;;  %v3598_v3 = vld [vmem:[#allocation2] sm:$0xf] }
 0x3b5   : > { %v3387_v31 = vunpack.c.l.b16 %v3329_v18  ;;  %v3599_v16 = vld [vmem:[#allocation2 + $0x4] sm:$0xf]  ;;  %v3809_v21 = vshrl.u32 %v3598_v3, 16  ;;  %v3812_v20 = vshll.u32 %v3598_v3, 16 }
 0x3b6   : > { %v3311_v30 = vsel %vm9306_vm8, 0, %v3158_v13  ;;  %v2945_v36 = vadd.f32 %v9265_v47, %v2905_v59  ;;  %v3818_v24 = vshll.u32 %v3599_v16, 16  ;;  %v3822_v35 = vshrl.u32 %v3599_v16, 16 }
 0x3b7   : > { %v3385_v40 = vunpack.c.l.b16 %v3311_v30  ;;  %v3386_v37 = vunpack.c.h.b16 %v3311_v30  ;;  %v3441_v56 = vpack.c.b16 %v3387_v31, %v3387_v31  ;;  %v2785_v58 = vpop.f32.mrf.mxu0  ;;  %v3811_v48 = vrot.slane %v3809_v21, 4 }
 0x3b8   : > { %v2981_v22 = vmax.f32 %v2945_v36, 0.0  ;;  %v2786_v60 = vadd.f32 %v2785_v58, %v9154_v23  ;;  %v3814_v26 = vrot.slane %v3812_v20, 5  ;;  %v3820_v18 = vrot.slane %v3818_v24, 5 }
 0x3b9   : > { %v3439_v14 = vpack.c.b16 %v3385_v40, %v3385_v40  ;;  %v3440_v50 = vpack.c.b16 %v3386_v37, %v3386_v37  ;;  %3549 = vst [vmem:[#allocation2 + $0x14] sm:$0x1] %v3441_v56  ;;  %v3824_v13 = vrot.slane %v3822_v35, 4  ;;  %v9351_v59 = vadd.f32 %v2716_v19, %v9320_v42  ;;  %v2721_v37 = vpop.f32.mrf.mxu3 }
 0x3ba   : > { %v3024_v44 = vpack.c.bf16 %v2981_v22, %v2981_v22  ;;  %v2866_v39 = vadd.f32 %v2786_v60, %v8877_v38  ;;  %2824 = vmatmul.bf16.gmra.mxu0 %v9171_v63  ;;  %v3815_v31 = vor.u32 %v3814_v26, %v3811_v48  ;;  %v7186_v30 = vrot.slane %v3598_v3, 9 }
 0x3bb   : > { %3547 = vst [vmem:[#allocation2 + $0xc] sm:$0xf] %v3439_v14  ;;  %v3825_v21 = vor.u32 %v3824_v13, %v3820_v18  ;;  %v5203_v36 = vrot.slane %v3599_v16, 5  ;;  %v5206_v23 = vrot.slane %v3600_v52, 5  ;;  %v3095_v20 = vunpack.c.l.b16 %v3023_v11 }
 0x3bc   : > { %3548 = vst [vmem:[#allocation2 + $0x10] sm:$0xf] %v3440_v50  ;;  %v3096_v24 = vunpack.c.l.b16 %v3024_v44  ;;  %v2906_v40 = vmul.f32 %v9259_v0, %v2866_v39  ;;  %v3816_v35 = vrot.slane %v3815_v31, 4  ;;  %v3830_v19 = vrot.slane %v3828_v6, 5  ;;  %v9363_v44 = vpop.f32.mrf.mxu2 }
 0x3bd   : > { %v3826_v42 = vrot.slane %v3825_v21, 4  ;;  %v5204_v38 = vsel %vm8857_vm5, %v7186_v30, %v5203_v36  ;;  %v5205_v56 = vrot.slane %v5203_v36, 4  ;;  %v2689_v63 = vadd.f32 %v9163_v34, %v9156_v12 }
 0x3be   : > { %v3129_v14 = vpack.c.b16 %v3096_v24, %v3095_v20  ;;  %v2946_v3 = vadd.f32 %v9265_v47, %v2906_v40  ;;  %v3821_v50 = vsel %vm8103_vm2, %v3816_v35, %v3820_v18  ;;  %v5327_v60 = vunpack.c.l.b16 %v5204_v38 }
 0x3bf   : > { %v2787_v39 = vpop.f32.mrf.mxu0  ;;  %v3831_v11 = vsel %vm8103_vm2, %v3826_v42, %v3830_v19  ;;  %v4240_v16 = vunpack.c.l.b16 %v3821_v50  ;;  %v5207_v6 = vsel %vm8857_vm5, %v5205_v56, %v5206_v23 }
 0x3c0   : > { %v3160_v58 = vshrl.u32 %v3129_v14, 16  ;;  %v2982_v48 = vmax.f32 %v2946_v3, 0.0  ;;  %v2788_v22 = vadd.f32 %v2787_v39, %v2689_v63  ;;  %v9369_v12 = vld [vmem:[#allocation2 + $0x14] sm:$0x1]  ;;  %v4241_v34 = vunpack.c.l.b16 %v3831_v11 }
 0x3c1   : > { %v3163_v13 = vshll.u32 %v3129_v14, 16  ;;  %v3852_v21 = vshll.u32 %v9369_v12, 16  ;;  %v5328_v40 = vunpack.c.l.b16 %v5207_v6  ;;  %v9376_v38 = vpop.f32.mrf.mxu3  ;;  %v9382_v11 = vadd.f32 %v2721_v37, %v9347_v9 }
 0x3c2   : > { %v3162_v26 = vrot.slane %v3160_v58, 7  ;;  %v2867_v18 = vadd.f32 %v2788_v22, %v8890_v28  ;;  %v3601_v31 = vld [vmem:[#allocation2 + $0xc] sm:$0xf]  ;;  %v4272_v30 = vpack.c.b16 %v4241_v34, %v4240_v16  ;;  %v3025_v42 = vpack.c.bf16 %v2982_v48, %v2982_v48 }
 0x3c3   : > { %v3602_v36 = vld [vmem:[#allocation2 + $0x10] sm:$0xf]  ;;  %v3833_v20 = vshrl.u32 %v3601_v31, 16  ;;  %v3836_v24 = vshll.u32 %v3601_v31, 16 }
 0x3c4   : > { %v3165_v23 = vor.u32 %v3163_v13, %v3162_v26  ;;  %v3330_v35 = vsel %vm9306_vm8, %v3162_v26, 0  ;;  %v2907_v19 = vmul.f32 %v9259_v0, %v2867_v18  ;;  %4513 = vmatmul.bf16.vlgmr.msra.gmra.mxu1 %v4272_v30  ;;  %v3842_v14 = vshll.u32 %v3602_v36, 16  ;;  %v9384_v16 = vpop.f32.mrf.mxu2 }
 0x3c5   : > { %v3390_v56 = vunpack.c.l.b16 %v3330_v35  ;;  %v3835_v28 = vrot.slane %v3833_v20, 4  ;;  %v3838_v63 = vrot.slane %v3836_v24, 5  ;;  %v3846_v39 = vshrl.u32 %v3602_v36, 16 }
 0x3c6   : > { %v3312_v3 = vsel %vm9306_vm8, 0, %v3165_v23  ;;  %v2947_v50 = vadd.f32 %v9265_v47, %v2907_v19  ;;  %v3844_v18 = vrot.slane %v3842_v14, 5  ;;  %v9389_v19 = vpack.c.b16 %v5328_v40, %v5327_v60 }
 0x3c7   : > { %v3388_v6 = vunpack.c.l.b16 %v3312_v3  ;;  %v3389_v58 = vunpack.c.h.b16 %v3312_v3  ;;  %v3444_v48 = vpack.c.b16 %v3390_v56, %v3390_v56  ;;  %v2790_v22 = vpop.f32.mrf.mxu0  ;;  %v3839_v34 = vor.u32 %v3838_v63, %v3835_v28 }
 0x3c8   : > { %v2983_v26 = vmax.f32 %v2947_v50, 0.0  ;;  %v2791_v13 = vadd.f32 %v2790_v22, %v9181_v62  ;;  %v3848_v30 = vrot.slane %v3846_v39, 4  ;;  %v3854_v28 = vrot.slane %v3852_v21, 5 }
 0x3c9   : > { %v3442_v20 = vpack.c.b16 %v3388_v6, %v3388_v6  ;;  %v3443_v24 = vpack.c.b16 %v3389_v58, %v3389_v58  ;;  %3552 = vst [vmem:[#allocation2 + $0x20] sm:$0x1] %v3444_v48  ;;  %v3840_v23 = vrot.slane %v3839_v34, 4  ;;  %v7187_v62 = vrot.slane %v3601_v31, 9  ;;  %v7462_v6 = vld [vmem:[#allocation3 + $0x78] sm:$0xff] }
 0x3ca   : > { %v3026_v35 = vpack.c.bf16 %v2983_v26, %v2983_v26  ;;  %v2868_v9 = vadd.f32 %v2791_v13, %v8900_v1  ;;  %2829 = vmatmul.bf16.gmra.mxu0 %v9198_v57  ;;  %v3849_v37 = vor.u32 %v3848_v30, %v3844_v18  ;;  %v5210_v63 = vrot.slane %v3602_v36, 5  ;;  %v2726_v1 = vpop.f32.mrf.mxu3  ;;  %5005 = vmatpush.bf16.msrb.mxu2 %v7462_v6 }
 0x3cb   : > { %3550 = vst [vmem:[#allocation2 + $0x18] sm:$0xf] %v3442_v20  ;;  %v3845_v56 = vsel %vm8103_vm2, %v3840_v23, %v3844_v18  ;;  %v3097_v14 = vunpack.c.l.b16 %v3025_v42  ;;  %v5213_v40 = vrot.slane %v9369_v12, 5  ;;  %v2694_v21 = vadd.f32 %v9190_v15, %v9183_v7 }
 0x3cc   : > { %3551 = vst [vmem:[#allocation2 + $0x1c] sm:$0xf] %v3443_v24  ;;  %v3098_v3 = vunpack.c.l.b16 %v3026_v35  ;;  %v2908_v50 = vmul.f32 %v9259_v0, %v2868_v9  ;;  %v3850_v39 = vrot.slane %v3849_v37, 4  ;;  %v4242_v58 = vunpack.c.l.b16 %v3845_v56  ;;  %v9402_v48 = vpop.f32.mrf.mxu2 }
 0x3cd   : > { %v5211_v57 = vsel %vm8857_vm5, %v7187_v62, %v5210_v63  ;;  %v5212_v60 = vrot.slane %v5210_v63, 4 }
 0x3ce   : > { %v3130_v31 = vpack.c.b16 %v3098_v3, %v3097_v14  ;;  %v2948_v36 = vadd.f32 %v9265_v47, %v2908_v50  ;;  %v3855_v42 = vsel %vm8103_vm2, %v3850_v39, %v3854_v28  ;;  %v5329_v15 = vunpack.c.l.b16 %v5211_v57 }
 0x3cf   : > { %v2792_v22 = vpop.f32.mrf.mxu0  ;;  %v4243_v34 = vunpack.c.l.b16 %v3855_v42  ;;  %v5214_v26 = vsel %vm8857_vm5, %v5212_v60, %v5213_v40 }
 0x3d0   : > { %v3167_v13 = vshrl.u32 %v3130_v31, 16  ;;  %v2984_v18 = vmax.f32 %v2948_v36, 0.0  ;;  %v2793_v12 = vadd.f32 %v2792_v22, %v2694_v21  ;;  %v9406_v30 = vld [vmem:[#allocation2 + $0x20] sm:$0x1]  ;;  %v5330_v20 = vunpack.c.l.b16 %v5214_v26 }
 0x3d1   : > { %v4273_v7 = vpack.c.b16 %v4243_v34, %v4242_v58  ;;  %v3170_v23 = vshll.u32 %v3130_v31, 16  ;;  %v3876_v62 = vshll.u32 %v9406_v30, 16  ;;  %v9421_v36 = vadd.f32 %v2726_v1, %v9384_v16 }
 0x3d2   : > { %v3169_v24 = vrot.slane %v3167_v13, 7  ;;  %v2869_v35 = vadd.f32 %v2793_v12, %v8915_v54  ;;  %v3604_v9 = vld [vmem:[#allocation2 + $0x18] sm:$0xf]  ;;  %v9410_v63 = vpack.c.b16 %v5330_v20, %v5329_v15  ;;  %v3027_v50 = vpack.c.bf16 %v2984_v18, %v2984_v18  ;;  %v9415_v6 = vpop.f32.mrf.mxu3 }
 0x3d3   : > { %4602 = vmatmul.bf16.vlgmr.msra.gmra.mxu2 %v4273_v7  ;;  %v3605_v37 = vld [vmem:[#allocation2 + $0x1c] sm:$0xf]  ;;  %v3857_v56 = vshrl.u32 %v3604_v9, 16  ;;  %v3860_v28 = vshll.u32 %v3604_v9, 16 }
 0x3d4   : > { %v3172_v14 = vor.u32 %v3170_v23, %v3169_v24  ;;  %v3331_v3 = vsel %vm9306_vm8, %v3169_v24, 0  ;;  %v2909_v39 = vmul.f32 %v9259_v0, %v2869_v35  ;;  %4518 = vmatmul.bf16.gmra.mxu1 %v4273_v7  ;;  %v3866_v60 = vshll.u32 %v3605_v37, 16  ;;  %v9424_v20 = vpop.f32.mrf.mxu2 }
 0x3d5   : > { %v3393_v58 = vunpack.c.l.b16 %v3331_v3  ;;  %v3859_v54 = vrot.slane %v3857_v56, 4  ;;  %v3862_v57 = vrot.slane %v3860_v28, 5  ;;  %v3870_v31 = vshrl.u32 %v3605_v37, 16 }
 0x3d6   : > { %v3313_v40 = vsel %vm9306_vm8, 0, %v3172_v14  ;;  %v2949_v21 = vadd.f32 %v9265_v47, %v2909_v39  ;;  %v3868_v7 = vrot.slane %v3866_v60, 5  ;;  %v7188_v28 = vrot.slane %v3604_v9, 9 }
 0x3d7   : > { %v3391_v42 = vunpack.c.l.b16 %v3313_v40  ;;  %v3392_v22 = vunpack.c.h.b16 %v3313_v40  ;;  %v3447_v34 = vpack.c.b16 %v3393_v58, %v3393_v58  ;;  %v2795_v26 = vpop.f32.mrf.mxu0  ;;  %v3863_v13 = vor.u32 %v3862_v57, %v3859_v54  ;;  %v7470_v40 = vld [vmem:[#allocation3 + $0xb8] sm:$0xff] }
 0x3d8   : > { %v2985_v18 = vmax.f32 %v2949_v21, 0.0  ;;  %v2796_v12 = vadd.f32 %v2795_v26, %v9217_v61  ;;  %v3872_v15 = vrot.slane %v3870_v31, 4  ;;  %v2699_v14 = vadd.f32 %v9219_v5, %v9208_v4  ;;  %5094 = vmatpush.bf16.msrb.mxu3 %v7470_v40 }
 0x3d9   : > { %v3445_v24 = vpack.c.b16 %v3391_v42, %v3391_v42  ;;  %v3446_v23 = vpack.c.b16 %v3392_v22, %v3392_v22  ;;  %3555 = vst [vmem:[#allocation2 + $0x2c] sm:$0x1] %v3447_v34  ;;  %v3864_v35 = vrot.slane %v3863_v13, 4  ;;  %v3878_v3 = vrot.slane %v3876_v62, 5 }
 0x3da   : > { %v3028_v56 = vpack.c.bf16 %v2985_v18, %v2985_v18  ;;  %v2870_v16 = vadd.f32 %v2796_v12, %v8923_v33  ;;  %2834 = vmatmul.bf16.gmra.mxu0 %v9225_v32  ;;  %v3873_v1 = vor.u32 %v3872_v15, %v3868_v7  ;;  %v5217_v39 = vrot.slane %v3605_v37, 5  ;;  %v7454_v33 = vld [vmem:[#allocation3 + $0x38] sm:$0xff]  ;;  %v2731_v32 = vpop.f32.mrf.mxu3 }
 0x3db   : > { %3553 = vst [vmem:[#allocation2 + $0x24] sm:$0xf] %v3445_v24  ;;  %v3869_v61 = vsel %vm8103_vm2, %v3864_v35, %v3868_v7  ;;  %v3099_v58 = vunpack.c.l.b16 %v3027_v50  ;;  %v5220_v5 = vrot.slane %v9406_v30, 5  ;;  %4916 = vmatpush.bf16.msrb.mxu1 %v7454_v33 }
 0x3dc   : > { %3554 = vst [vmem:[#allocation2 + $0x28] sm:$0xf] %v3446_v23  ;;  %v3100_v54 = vunpack.c.l.b16 %v3028_v56  ;;  %v2910_v57 = vmul.f32 %v9259_v0, %v2870_v16  ;;  %v3874_v60 = vrot.slane %v3873_v1, 4  ;;  %v4244_v21 = vunpack.c.l.b16 %v3869_v61  ;;  %v9444_v56 = vpop.f32.mrf.mxu2 }
 0x3dd   : > { %v5218_v9 = vsel %vm8857_vm5, %v7188_v28, %v5217_v39  ;;  %v5219_v4 = vrot.slane %v5217_v39, 4 }
 0x3de   : > { %v3131_v31 = vpack.c.b16 %v3100_v54, %v3099_v58  ;;  %v2950_v62 = vadd.f32 %v9265_v47, %v2910_v57  ;;  %v3879_v37 = vsel %vm8103_vm2, %v3874_v60, %v3878_v3  ;;  %v5331_v30 = vunpack.c.l.b16 %v5218_v9 }
 0x3df   : > { %v2797_v50 = vpop.f32.mrf.mxu0  ;;  %v4245_v42 = vunpack.c.l.b16 %v3879_v37  ;;  %v5221_v22 = vsel %vm8857_vm5, %v5219_v4, %v5220_v5  ;;  %v9458_v5 = vadd.f32 %v2731_v32, %v9424_v20 }
 0x3e0   : > { %v3174_v34 = vshrl.u32 %v3131_v31, 16  ;;  %v2986_v26 = vmax.f32 %v2950_v62, 0.0  ;;  %v2798_v13 = vadd.f32 %v2797_v50, %v2699_v14  ;;  %v9441_v18 = vld [vmem:[#allocation2 + $0x2c] sm:$0x1]  ;;  %v5332_v7 = vunpack.c.l.b16 %v5221_v22 }
 0x3e1   : > { %v4274_v12 = vpack.c.b16 %v4245_v42, %v4244_v21  ;;  %v3177_v24 = vshll.u32 %v3131_v31, 16  ;;  %v3900_v61 = vshll.u32 %v9441_v18, 16 }
 0x3e2   : > { %v3176_v15 = vrot.slane %v3174_v34, 7  ;;  %v2871_v23 = vadd.f32 %v2798_v13, %v8938_v53  ;;  %v3607_v35 = vld [vmem:[#allocation2 + $0x24] sm:$0xf]  ;;  %v9447_v14 = vpack.c.b16 %v5332_v7, %v5331_v30  ;;  %v3029_v58 = vpack.c.bf16 %v2986_v26, %v2986_v26  ;;  %v9452_v53 = vpop.f32.mrf.mxu3 }
 0x3e3   : > { %4607 = vmatmul.bf16.gmra.mxu2 %v4274_v12  ;;  %4691 = vmatmul.bf16.vlgmr.msra.gmra.mxu3 %v4274_v12  ;;  %v3608_v16 = vld [vmem:[#allocation2 + $0x28] sm:$0xf]  ;;  %v3881_v1 = vshrl.u32 %v3607_v35, 16  ;;  %v3884_v28 = vshll.u32 %v3607_v35, 16  ;;  %v7189_v32 = vrot.slane %v3607_v35, 9 }
 0x3e4   : > { %v3179_v3 = vor.u32 %v3177_v24, %v3176_v15  ;;  %v3332_v39 = vsel %vm9306_vm8, %v3176_v15, 0  ;;  %v2911_v54 = vmul.f32 %v9259_v0, %v2871_v23  ;;  %4523 = vmatmul.bf16.gmra.mxu1 %v4274_v12  ;;  %v3890_v40 = vshll.u32 %v3608_v16, 16 }
 0x3e5   : > { %v3396_v57 = vunpack.c.l.b16 %v3332_v39  ;;  %v3883_v60 = vrot.slane %v3881_v1, 4  ;;  %v3886_v33 = vrot.slane %v3884_v28, 5  ;;  %v3894_v4 = vshrl.u32 %v3608_v16, 16 }
 0x3e6   : > { %v3314_v21 = vsel %vm9306_vm8, 0, %v3179_v3  ;;  %v2951_v9 = vadd.f32 %v9265_v47, %v2911_v54  ;;  %v3892_v26 = vrot.slane %v3890_v40, 5  ;;  %v2704_v23 = vadd.f32 %v9244_v49, %v9235_v17 }
 0x3e7   : > { %v3394_v31 = vunpack.c.l.b16 %v3314_v21  ;;  %v3395_v62 = vunpack.c.h.b16 %v3314_v21  ;;  %v3450_v37 = vpack.c.b16 %v3396_v57, %v3396_v57  ;;  %v2800_v50 = vpop.f32.mrf.mxu0  ;;  %v3887_v42 = vor.u32 %v3886_v33, %v3883_v60  ;;  %v2637_v60 = vpop.f32.mrf.mxu2 }
 0x3e8   : > { %v2987_v22 = vmax.f32 %v2951_v9, 0.0  ;;  %v2801_v34 = vadd.f32 %v2800_v50, %v9250_v25  ;;  %v3896_v13 = vrot.slane %v3894_v4, 4  ;;  %v3902_v1 = vrot.slane %v3900_v61, 5 }
 0x3e9   : > { %v3448_v12 = vpack.c.b16 %v3394_v31, %v3394_v31  ;;  %v3449_v30 = vpack.c.b16 %v3395_v62, %v3395_v62  ;;  %3558 = vst [vmem:[#allocation2 + $0x38] sm:$0x1] %v3450_v37  ;;  %v3888_v7 = vrot.slane %v3887_v42, 4  ;;  %v5224_v28 = vrot.slane %v3608_v16, 5  ;;  %v7501_v42 = vld [vmem:[#allocation3 + $0x1b0] sm:$0xff] }
 0x3ea   : > { %v3030_v15 = vpack.c.bf16 %v2987_v22, %v2987_v22  ;;  %v2872_v24 = vadd.f32 %v2801_v34, %v8950_v46  ;;  %2839 = vmatmul.bf16.gmra.mxu0 %v9252_v8  ;;  %v3897_v20 = vor.u32 %v3896_v13, %v3892_v26  ;;  %v3101_v3 = vunpack.c.l.b16 %v3029_v58  ;;  %v7461_v46 = vld [vmem:[#allocation3 + $0x70] sm:$0xff]  ;;  %v7502_v8 = vld [vmem:[#allocation3 + $0x1b8] sm:$0xff]  ;;  %v2736_v35 = vpop.f32.mrf.mxu3 }
 0x3eb   : > { %3556 = vst [vmem:[#allocation2 + $0x30] sm:$0xf] %v3448_v12  ;;  %v3893_v25 = vsel %vm8103_vm2, %v3888_v7, %v3892_v26  ;;  %v5225_v17 = vsel %vm8857_vm5, %v7189_v32, %v5224_v28  ;;  %v5226_v49 = vrot.slane %v5224_v28, 4  ;;  %v5227_v40 = vrot.slane %v9441_v18, 5  ;;  %5006 = vmatpush.bf16.msrb.mxu2 %v7461_v46  ;;  %5592 = vmatpush.bf16.msra.mxu0 %v7502_v8  ;;  %v7500_v28 = vld [vmem:[#allocation3 + $0x1a8] sm:$0xff] }
 0x3ec   : > { %3557 = vst [vmem:[#allocation2 + $0x34] sm:$0xf] %v3449_v30  ;;  %v3102_v39 = vunpack.c.l.b16 %v3030_v15  ;;  %v2912_v54 = vmul.f32 %v9259_v0, %v2872_v24  ;;  %v3898_v57 = vrot.slane %v3897_v20, 4  ;;  %v4246_v33 = vunpack.c.l.b16 %v3893_v25 }
 0x3ed   : > { %v5228_v4 = vsel %vm8857_vm5, %v5226_v49, %v5227_v40  ;;  %v5333_v22 = vunpack.c.l.b16 %v5225_v17  ;;  %v9496_v17 = vadd.f32 %v2736_v35, %v2637_v60  ;;  %v2709_v60 = vadd.f32 %v9279_v51, %v9269_v2  ;;  %v7801_v51 = vld [vmem:[%s8044_s28 + $0xe8] sm:$0xf] }
 0x3ee   : > { %v3132_v21 = vpack.c.b16 %v3102_v39, %v3101_v3  ;;  %v2952_v16 = vadd.f32 %v9265_v47, %v2912_v54  ;;  %v3903_v61 = vsel %vm8103_vm2, %v3898_v57, %v3902_v1  ;;  %v5334_v34 = vunpack.c.l.b16 %v5228_v4 }
 0x3ef   : > { %v2802_v58 = vpop.f32.mrf.mxu0  ;;  %v4247_v9 = vunpack.c.l.b16 %v3903_v61  ;;  %5593 = vmatpush.bf16.msra.mxu0 %v7501_v42  ;;  %v9498_v49 = vpop.f32.mrf.mxu2  ;;  %v7499_v42 = vld [vmem:[#allocation3 + $0x1a0] sm:$0xff]  ;;  %v2285_v2 = vrot.slane %v7801_v51, 5 }
 0x3f0   : > { %v3181_v31 = vshrl.u32 %v3132_v21, 16  ;;  %v2988_v62 = vmax.f32 %v2952_v16, 0.0  ;;  %v2803_v37 = vadd.f32 %v2802_v58, %v2704_v23  ;;  %v9476_v50 = vld [vmem:[#allocation2 + $0x38] sm:$0x1]  ;;  %v3184_v13 = vshll.u32 %v3132_v21, 16 }
 0x3f1   : > { %v4275_v18 = vpack.c.b16 %v4247_v9, %v4246_v33  ;;  %v3924_v20 = vshll.u32 %v9476_v50, 16  ;;  %v9486_v32 = vpack.c.b16 %v5334_v34, %v5333_v22 }
 0x3f2   : > { %v3183_v26 = vrot.slane %v3181_v31, 7  ;;  %v2873_v12 = vadd.f32 %v2803_v37, %v8969_v55  ;;  %v9479_v30 = vld [vmem:[#allocation2 + $0x30] sm:$0xf]  ;;  %v3031_v55 = vpack.c.bf16 %v2988_v62, %v2988_v62  ;;  %v9500_v9 = vpop.f32.mrf.mxu3 }
 0x3f3   : > { %4612 = vmatmul.bf16.gmra.mxu2 %v4275_v18  ;;  %4696 = vmatmul.bf16.gmra.mxu3 %v4275_v18  ;;  %v9481_v7 = vld [vmem:[#allocation2 + $0x34] sm:$0xf]  ;;  %v3905_v15 = vshrl.u32 %v9479_v30, 16  ;;  %v3908_v24 = vshll.u32 %v9479_v30, 16 }
 0x3f4   : > { %v3186_v23 = vor.u32 %v3184_v13, %v3183_v26  ;;  %v3333_v25 = vsel %vm9306_vm8, %v3183_v26, 0  ;;  %v2913_v1 = vmul.f32 %v9259_v0, %v2873_v12  ;;  %4528 = vmatmul.bf16.gmra.mxu1 %v4275_v18  ;;  %v3914_v57 = vshll.u32 %v9481_v7, 16  ;;  %5594 = vmatpush.bf16.msra.mxu0 %v7500_v28  ;;  %v7800_v12 = vld [vmem:[%s8044_s28 + $0xe4] sm:$0xf]  ;;  %v7453_v28 = vld [vmem:[#allocation3 + $0x30] sm:$0xff] }
 0x3f5   : > { %v3399_v3 = vunpack.c.l.b16 %v3333_v25  ;;  %v3907_v39 = vrot.slane %v3905_v15, 4  ;;  %v3910_v54 = vrot.slane %v3908_v24, 5  ;;  %v3918_v33 = vshrl.u32 %v9481_v7, 16  ;;  %4917 = vmatpush.bf16.msrb.mxu1 %v7453_v28  ;;  %v7496_v28 = vld [vmem:[#allocation3 + $0x188] sm:$0xff] }
 0x3f6   : > { %v3315_v46 = vsel %vm9306_vm8, 0, %v3186_v23  ;;  %v2953_v8 = vadd.f32 %v9265_v47, %v2913_v1  ;;  %v3916_v62 = vrot.slane %v3914_v57, 5  ;;  %v6777_v15 = vrot.slane %v7800_v12, 9  ;;  %v10694_v12 = vld [vmem:[#allocation59_spill] sm:$0xff] }
 0x3f7   : > { %v3397_v40 = vunpack.c.l.b16 %v3315_v46  ;;  %v3398_v21 = vunpack.c.h.b16 %v3315_v46  ;;  %v3453_v16 = vpack.c.b16 %v3399_v3, %v3399_v3  ;;  %v2805_v61 = vpop.f32.mrf.mxu0  ;;  %v3911_v58 = vor.u32 %v3910_v54, %v3907_v39  ;;  %v7469_v3 = vld [vmem:[#allocation3 + $0xb0] sm:$0xff]  ;;  %v7498_v39 = vld [vmem:[#allocation3 + $0x198] sm:$0xff] }
 0x3f8   : > { %v2989_v4 = vmax.f32 %v2953_v8, 0.0  ;;  %v2806_v31 = vadd.f32 %v2805_v61, %v9283_v43  ;;  %v3920_v37 = vrot.slane %v3918_v33, 4  ;;  %v3926_v24 = vrot.slane %v3924_v20, 5  ;;  %5595 = vmatpush.bf16.msra.mxu0 %v7499_v42  ;;  %v7802_v20 = vld [vmem:[%s8044_s28 + $0xec] sm:$0x1]  ;;  %5095 = vmatpush.bf16.msrb.mxu3 %v7469_v3  ;;  %v10693_v42 = vld [vmem:[#allocation41_spill] sm:$0xff] }
 0x3f9   : > { %v3451_v35 = vpack.c.b16 %v3397_v40, %v3397_v40  ;;  %v3452_v18 = vpack.c.b16 %v3398_v21, %v3398_v21  ;;  %3561 = vst [vmem:[#allocation2 + $0x44] sm:$0x1] %v3453_v16  ;;  %v3912_v22 = vrot.slane %v3911_v58, 4  ;;  %v7190_v23 = vrot.slane %v9479_v30, 9  ;;  %s6436_s28 = sshll.u32 %s391_s11, 7 }
 0x3fa   : > { %v3032_v34 = vpack.c.bf16 %v2989_v4, %v2989_v4  ;;  %v2874_v26 = vadd.f32 %v2806_v31, %v8979_v27  ;;  %2844 = vmatmul.bf16.gmra.mxu0 %v9289_v41  ;;  %v3921_v13 = vor.u32 %v3920_v37, %v3916_v62  ;;  %v3103_v25 = vunpack.c.l.b16 %v3031_v55  ;;  %v7497_v37 = vld [vmem:[#allocation3 + $0x190] sm:$0xff]  ;;  %s10289_s12 = scalar_lea.vmem [#allocation6], %s6436_s28 }
 0x3fb   : > { %3559 = vst [vmem:[#allocation2 + $0x3c] sm:$0xf] %v3451_v35  ;;  %v3917_v43 = vsel %vm8103_vm2, %v3912_v22, %v3916_v62  ;;  %v9515_v57 = vsel %vm8857_vm5, %v6777_v15, %v2285_v2  ;;  %v2288_v46 = vrot.slane %v7802_v20, 5  ;;  %v5231_v8 = vrot.slane %v9481_v7, 5  ;;  %v2642_v62 = vpop.f32.mrf.mxu2  ;;  %v2741_v22 = vpop.f32.mrf.mxu3  ;;  %s6332_s24 = sshll.u32 %s10289_s12, 4  ;;  %s6333_s24 = int_to_ptr.vmem [resolvable:$true] %s6332_s24 }
 0x3fc   : > { %3560 = vst [vmem:[#allocation2 + $0x40] sm:$0xf] %v3452_v18  ;;  %v3104_v1 = vunpack.c.l.b16 %v3032_v34  ;;  %v2914_v27 = vmul.f32 %v9259_v0, %v2874_v26  ;;  %v3922_v41 = vrot.slane %v3921_v13, 4  ;;  %v4248_v54 = vunpack.c.l.b16 %v3917_v43  ;;  %5596 = vmatpush.bf16.msra.mxu0 %v7498_v39 }
 0x3fd   : > { %v2287_v0 = vrot.slane %v2285_v2, 4  ;;  %v9524_v16 = vsel %vm8857_vm5, %v7190_v23, %v5231_v8  ;;  %v5233_v61 = vrot.slane %v5231_v8, 4  ;;  %v5234_v58 = vrot.slane %v9476_v50, 5 }
 0x3fe   : > { %v3133_v33 = vpack.c.b16 %v3104_v1, %v3103_v25  ;;  %v2954_v30 = vadd.f32 %v9265_v47, %v2914_v27  ;;  %v3927_v55 = vsel %vm8103_vm2, %v3922_v41, %v3926_v24  ;;  %v9531_v35 = vadd.f32 %v10693_v42, %v9296_v10  ;;  %v9555_v27 = vld [vmem:[%s10538_s2] ss:$0 sm:$0xff] }
 0x3ff   : > { %v2807_v40 = vpop.f32.mrf.mxu0  ;;  %v4249_v21 = vunpack.c.l.b16 %v3927_v55  ;;  %v2366_v34 = vunpack.c.l.b16 %v9515_v57  ;;  %v9536_v26 = vsel %vm8857_vm5, %v5233_v61, %v5234_v58  ;;  %v9543_v43 = vsel %vm8857_vm5, %v2287_v0, %v2288_v46 }
 0x400   : > { %v3188_v7 = vshrl.u32 %v3133_v33, 16  ;;  %v2990_v4 = vmax.f32 %v2954_v30, 0.0  ;;  %v2808_v31 = vadd.f32 %v2807_v40, %v2709_v60  ;;  %v9527_v47 = vld [vmem:[#allocation2 + $0x44] sm:$0x1]  ;;  %v3191_v13 = vshll.u32 %v3133_v33, 16  ;;  %5597 = vmatpush.bf16.msra.mxu0 %v7497_v37 }
 0x401   : > { %v4276_v18 = vpack.c.b16 %v4249_v21, %v4248_v54  ;;  %v3948_v23 = vshll.u32 %v9527_v47, 16  ;;  %v5335_v3 = vunpack.c.l.b16 %v9524_v16  ;;  %v9564_v33 = vld [vmem:[%s10539_s3] ss:$0 sm:$0xff]  ;;  %v9567_v0 = vadd.f32 %v2741_v22, %v2642_v62  ;;  %v10696_v62 = vld [vmem:[#allocation60_spill] sm:$0xff] }
 0x402   : > { %v3190_v50 = vrot.slane %v3188_v7, 7  ;;  %v2875_v60 = vadd.f32 %v2808_v31, %v10694_v12  ;;  %v9539_v15 = vld [vmem:[#allocation2 + $0x3c] sm:$0xf]  ;;  %v9545_v10 = vpack.c.bf16 %v2990_v4, %v2990_v4  ;;  %v10695_v4 = vld [vmem:[#allocation44_spill] sm:$0xff] }
 0x403   : > { %4617 = vmatmul.bf16.gmra.mxu2 %v4276_v18  ;;  %4701 = vmatmul.bf16.gmra.mxu3 %v4276_v18  ;;  %v3614_v24 = vld [vmem:[#allocation2 + $0x40] sm:$0xf]  ;;  %v3929_v51 = vshrl.u32 %v9539_v15, 16  ;;  %v3932_v2 = vshll.u32 %v9539_v15, 16 }
 0x404   : > { %v3193_v25 = vor.u32 %v3191_v13, %v3190_v50  ;;  %v3334_v1 = vsel %vm9306_vm8, %v3190_v50, 0  ;;  %v2915_v41 = vmul.f32 %v9555_v27, %v2875_v60  ;;  %4533 = vmatmul.bf16.gmra.mxu1 %v4276_v18  ;;  %v3938_v46 = vshll.u32 %v3614_v24, 16  ;;  %5598 = vmatpush.bf16.msra.mxu0 %v7496_v28  ;;  %v7495_v18 = vld [vmem:[#allocation3 + $0x180] sm:$0xff] }
 0x405   : > { %v3402_v39 = vunpack.c.l.b16 %v3334_v1  ;;  %v3931_v54 = vrot.slane %v3929_v51, 4  ;;  %v3934_v20 = vrot.slane %v3932_v2, 5  ;;  %v3942_v55 = vshrl.u32 %v3614_v24, 16  ;;  %v10697_v2 = vld [vmem:[#allocation42_spill] sm:$0xff]  ;;  %v9572_v1 = vpop.f32.mrf.mxu2 }
 0x406   : > { %v3316_v8 = vsel %vm9306_vm8, 0, %v3193_v25  ;;  %v2955_v30 = vadd.f32 %v9564_v33, %v2915_v41  ;;  %v3940_v37 = vrot.slane %v3938_v46, 5  ;;  %v3950_v60 = vrot.slane %v3948_v23, 5 }
 0x407   : > { %v3400_v40 = vunpack.c.l.b16 %v3316_v8  ;;  %v3401_v21 = vunpack.c.h.b16 %v3316_v8  ;;  %v3456_v16 = vpack.c.b16 %v3402_v39, %v3402_v39  ;;  %v2810_v61 = vpop.f32.mrf.mxu0  ;;  %v3935_v58 = vor.u32 %v3934_v20, %v3931_v54  ;;  %v9578_v54 = vpop.f32.mrf.mxu3 }
 0x408   : > { %v2991_v7 = vmax.f32 %v2955_v30, 0.0  ;;  %v2811_v31 = vadd.f32 %v2810_v61, %v10695_v4  ;;  %v3944_v42 = vrot.slane %v3942_v55, 4  ;;  %v5336_v41 = vunpack.c.l.b16 %v9536_v26  ;;  %v7460_v55 = vld [vmem:[#allocation3 + $0x68] sm:$0xff]  ;;  %5599 = vmatpush.bf16.msra.mxu0 %v7495_v18 }
 0x409   : > { %v3454_v50 = vpack.c.b16 %v3400_v40, %v3400_v40  ;;  %v3455_v13 = vpack.c.b16 %v3401_v21, %v3401_v21  ;;  %3564 = vst [vmem:[#allocation2 + $0x50] sm:$0x1] %v3456_v16  ;;  %v3936_v12 = vrot.slane %v3935_v58, 4  ;;  %v3105_v39 = vunpack.c.l.b16 %v9545_v10  ;;  %5007 = vmatpush.bf16.msrb.mxu2 %v7460_v55 }
 0x40a   : > { %v3034_v51 = vpack.c.bf16 %v2991_v7, %v2991_v7  ;;  %v2876_v22 = vadd.f32 %v2811_v31, %v10696_v62  ;;  %2849 = vmatmul.bf16.gmra.mxu0 %v10697_v2  ;;  %v3945_v25 = vor.u32 %v3944_v42, %v3940_v37  ;;  %v7191_v23 = vrot.slane %v9539_v15, 9 }
 0x40b   : > { %3562 = vst [vmem:[#allocation2 + $0x48] sm:$0xf] %v3454_v50  ;;  %v3941_v28 = vsel %vm8103_vm2, %v3936_v12, %v3940_v37  ;;  %v5238_v20 = vrot.slane %v3614_v24, 5  ;;  %v5241_v26 = vrot.slane %v9527_v47, 5  ;;  %v9583_v21 = vpack.c.b16 %v5336_v41, %v5335_v3 }
 0x40c   : > { %3563 = vst [vmem:[#allocation2 + $0x4c] sm:$0xf] %v3455_v13  ;;  %v3106_v46 = vunpack.c.l.b16 %v3034_v51  ;;  %v2916_v8 = vmul.f32 %v9555_v27, %v2876_v22  ;;  %v3946_v30 = vrot.slane %v3945_v25, 4  ;;  %v4250_v40 = vunpack.c.l.b16 %v3941_v28 }
 0x40d   : > { %v5239_v10 = vsel %vm8857_vm5, %v7191_v23, %v5238_v20  ;;  %v5240_v16 = vrot.slane %v5238_v20, 4  ;;  %v2367_v58 = vunpack.c.l.b16 %v9543_v43 }
 0x40e   : > { %v3134_v61 = vpack.c.b16 %v3106_v46, %v3105_v39  ;;  %v2956_v15 = vadd.f32 %v9564_v33, %v2916_v8  ;;  %v3951_v24 = vsel %vm8103_vm2, %v3946_v30, %v3950_v60  ;;  %v5337_v50 = vunpack.c.l.b16 %v5239_v10  ;;  %v10698_v60 = vld [vmem:[#allocation61_spill] sm:$0xff]  ;;  %v2647_v8 = vpop.f32.mrf.mxu2 }
 0x40f   : > { %v2812_v7 = vpop.f32.mrf.mxu0  ;;  %v4251_v4 = vunpack.c.l.b16 %v3951_v24  ;;  %v5242_v47 = vsel %vm8857_vm5, %v5240_v16, %v5241_v26  ;;  %v2368_v43 = vpack.c.b16 %v2367_v58, %v2366_v34  ;;  %v2746_v26 = vpop.f32.mrf.mxu3 }
 0x410   : > { %v3195_v3 = vshrl.u32 %v3134_v61, 16  ;;  %v2992_v31 = vmax.f32 %v2956_v15, 0.0  ;;  %v2813_v37 = vadd.f32 %v2812_v7, %v9531_v35  ;;  %v9594_v42 = vld [vmem:[#allocation2 + $0x50] sm:$0x1]  ;;  %v5338_v13 = vunpack.c.l.b16 %v5242_v47 }
 0x411   : > { %v4277_v18 = vpack.c.b16 %v4251_v4, %v4250_v40  ;;  %v3198_v51 = vshll.u32 %v3134_v61, 16  ;;  %v3972_v35 = vshll.u32 %v9594_v42, 16  ;;  %v9608_v61 = vadd.f32 %v2746_v26, %v2647_v8  ;;  %v7468_v26 = vld [vmem:[#allocation3 + $0xa8] sm:$0xff] }
 0x412   : > { %v3197_v12 = vrot.slane %v3195_v3, 7  ;;  %v2877_v62 = vadd.f32 %v2813_v37, %v10698_v60  ;;  %v3616_v22 = vld [vmem:[#allocation2 + $0x48] sm:$0xf]  ;;  %v9600_v39 = vpack.c.b16 %v5338_v13, %v5337_v50  ;;  %v3035_v20 = vpack.c.bf16 %v2992_v31, %v2992_v31  ;;  %v10699_v60 = vld [vmem:[#allocation62_spill] sm:$0xff]  ;;  %5096 = vmatpush.bf16.msrb.mxu3 %v7468_v26 }
 0x413   : > { %4622 = vmatmul.bf16.gmra.mxu2 %v4277_v18  ;;  %4706 = vmatmul.bf16.gmra.mxu3 %v4277_v18  ;;  %v3617_v2 = vld [vmem:[#allocation2 + $0x4c] sm:$0xf]  ;;  %v3953_v25 = vshrl.u32 %v3616_v22, 16  ;;  %v3956_v41 = vshll.u32 %v3616_v22, 16  ;;  %v3974_v8 = vrot.slane %v3972_v35, 5 }
 0x414   : > { %v3200_v28 = vor.u32 %v3198_v51, %v3197_v12  ;;  %v3335_v23 = vsel %vm9306_vm8, %v3197_v12, 0  ;;  %v2917_v46 = vmul.f32 %v9555_v27, %v2877_v62  ;;  %4538 = vmatmul.bf16.gmra.mxu1 %v4277_v18  ;;  %v3962_v55 = vshll.u32 %v3617_v2, 16 }
 0x415   : > { %v3405_v57 = vunpack.c.l.b16 %v3335_v23  ;;  %v3955_v34 = vrot.slane %v3953_v25, 4  ;;  %v3958_v30 = vrot.slane %v3956_v41, 5  ;;  %v3966_v16 = vshrl.u32 %v3617_v2, 16  ;;  %v10701_v23 = vld [vmem:[#allocation50_spill] sm:$0xff] }
 0x416   : > { %v3317_v40 = vsel %vm9306_vm8, 0, %v3200_v28  ;;  %v2957_v10 = vadd.f32 %v9564_v33, %v2917_v46  ;;  %v3964_v31 = vrot.slane %v3962_v55, 5  ;;  %v7192_v12 = vrot.slane %v3616_v22, 9  ;;  %v10700_v28 = vld [vmem:[#allocation43_spill] sm:$0xff]  ;;  %v7452_v55 = vld [vmem:[#allocation3 + $0x28] sm:$0xff] }
 0x417   : > { %v3403_v15 = vunpack.c.l.b16 %v3317_v40  ;;  %v3404_v24 = vunpack.c.h.b16 %v3317_v40  ;;  %v3459_v58 = vpack.c.b16 %v3405_v57, %v3405_v57  ;;  %v2815_v7 = vpop.f32.mrf.mxu0  ;;  %v3959_v4 = vor.u32 %v3958_v30, %v3955_v34  ;;  %4918 = vmatpush.bf16.msrb.mxu1 %v7452_v55 }
 0x418   : > { %v2993_v47 = vmax.f32 %v2957_v10, 0.0  ;;  %v2816_v3 = vadd.f32 %v2815_v7, %v9351_v59  ;;  %v3968_v37 = vrot.slane %v3966_v16, 4  ;;  %v5245_v41 = vrot.slane %v3617_v2, 5  ;;  %v9625_v7 = vpop.f32.mrf.mxu3 }
 0x419   : > { %v3457_v18 = vpack.c.b16 %v3403_v15, %v3403_v15  ;;  %v3458_v50 = vpack.c.b16 %v3404_v24, %v3404_v24  ;;  %3567 = vst [vmem:[#allocation2 + $0x5c] sm:$0x1] %v3459_v58  ;;  %v3960_v13 = vrot.slane %v3959_v4, 4  ;;  %v2719_v46 = vadd.f32 %v10701_v23, %v10700_v28 }
 0x41a   : > { %v3036_v51 = vpack.c.bf16 %v2993_v47, %v2993_v47  ;;  %v2878_v62 = vadd.f32 %v2816_v3, %v10699_v60  ;;  %2854 = vmatmul.bf16.gmra.mxu0 %v2368_v43  ;;  %v3969_v25 = vor.u32 %v3968_v37, %v3964_v31  ;;  %v3107_v57 = vunpack.c.l.b16 %v3035_v20  ;;  %v9623_v20 = vpop.f32.mrf.mxu2 }
 0x41b   : > { %3565 = vst [vmem:[#allocation2 + $0x54] sm:$0xf] %v3457_v18  ;;  %v3965_v59 = vsel %vm8103_vm2, %v3960_v13, %v3964_v31  ;;  %v5246_v43 = vsel %vm8857_vm5, %v7192_v12, %v5245_v41  ;;  %v5247_v2 = vrot.slane %v5245_v41, 4  ;;  %v5248_v10 = vrot.slane %v9594_v42, 5 }
 0x41c   : > { %3566 = vst [vmem:[#allocation2 + $0x58] sm:$0xf] %v3458_v50  ;;  %v3108_v34 = vunpack.c.l.b16 %v3036_v51  ;;  %v2918_v30 = vmul.f32 %v9555_v27, %v2878_v62  ;;  %v3970_v22 = vrot.slane %v3969_v25, 4  ;;  %v4252_v40 = vunpack.c.l.b16 %v3965_v59  ;;  %v10702_v51 = vld [vmem:[#allocation63_spill] sm:$0xff] }
 0x41d   : > { %v5249_v4 = vsel %vm8857_vm5, %v5247_v2, %v5248_v10  ;;  %v5339_v18 = vunpack.c.l.b16 %v5246_v43 }
 0x41e   : > { %v3135_v16 = vpack.c.b16 %v3108_v34, %v3107_v57  ;;  %v2958_v15 = vadd.f32 %v9564_v33, %v2918_v30  ;;  %v3975_v35 = vsel %vm8103_vm2, %v3970_v22, %v3974_v8  ;;  %v5340_v50 = vunpack.c.l.b16 %v5249_v4 }
 0x41f   : > { %v2817_v24 = vpop.f32.mrf.mxu0  ;;  %v4253_v58 = vunpack.c.l.b16 %v3975_v35 }
 0x420   : > { %v3202_v47 = vshrl.u32 %v3135_v16, 16  ;;  %v2994_v3 = vmax.f32 %v2958_v15, 0.0  ;;  %v2818_v42 = vadd.f32 %v2817_v24, %v2719_v46  ;;  %v9629_v31 = vld [vmem:[#allocation2 + $0x5c] sm:$0x1]  ;;  %v3205_v12 = vshll.u32 %v3135_v16, 16 }
 0x421   : > { %v4278_v37 = vpack.c.b16 %v4253_v58, %v4252_v40  ;;  %v3996_v23 = vshll.u32 %v9629_v31, 16  ;;  %v9633_v59 = vpack.c.b16 %v5340_v50, %v5339_v18  ;;  %v2751_v18 = vpop.f32.mrf.mxu3 }
 0x422   : > { %v3204_v13 = vrot.slane %v3202_v47, 7  ;;  %v2879_v60 = vadd.f32 %v2818_v42, %v10702_v51  ;;  %v3619_v62 = vld [vmem:[#allocation2 + $0x54] sm:$0xf]  ;;  %v3037_v57 = vpack.c.bf16 %v2994_v3, %v2994_v3 }
 0x423   : > { %4627 = vmatmul.bf16.gmra.mxu2 %v4278_v37  ;;  %4711 = vmatmul.bf16.gmra.mxu3 %v4278_v37  ;;  %v3620_v25 = vld [vmem:[#allocation2 + $0x58] sm:$0xf]  ;;  %v3977_v41 = vshrl.u32 %v3619_v62, 16  ;;  %v3980_v28 = vshll.u32 %v3619_v62, 16  ;;  %v7193_v10 = vrot.slane %v3619_v62, 9 }
 0x424   : > { %v3207_v46 = vor.u32 %v3205_v12, %v3204_v13  ;;  %v3336_v8 = vsel %vm9306_vm8, %v3204_v13, 0  ;;  %v2919_v34 = vmul.f32 %v9555_v27, %v2879_v60  ;;  %4543 = vmatmul.bf16.gmra.mxu1 %v4278_v37  ;;  %v3986_v26 = vshll.u32 %v3620_v25, 16  ;;  %v2652_v37 = vpop.f32.mrf.mxu2 }
 0x425   : > { %v3408_v30 = vunpack.c.l.b16 %v3336_v8  ;;  %v3979_v22 = vrot.slane %v3977_v41, 4  ;;  %v3982_v55 = vrot.slane %v3980_v28, 5  ;;  %v3990_v2 = vshrl.u32 %v3620_v25, 16  ;;  %v10703_v41 = vld [vmem:[#allocation31_spill] sm:$0xff] }
 0x426   : > { %v3318_v40 = vsel %vm9306_vm8, 0, %v3207_v46  ;;  %v2959_v43 = vadd.f32 %v9564_v33, %v2919_v34  ;;  %v3988_v3 = vrot.slane %v3986_v26, 5  ;;  %v5252_v51 = vrot.slane %v3620_v25, 5 }
 0x427   : > { %v3406_v16 = vunpack.c.l.b16 %v3318_v40  ;;  %v3407_v15 = vunpack.c.h.b16 %v3318_v40  ;;  %v3462_v35 = vpack.c.b16 %v3408_v30, %v3408_v30  ;;  %v2820_v24 = vpop.f32.mrf.mxu0  ;;  %v3983_v58 = vor.u32 %v3982_v55, %v3979_v22  ;;  %v7459_v40 = vld [vmem:[#allocation3 + $0x60] sm:$0xff] }
 0x428   : > { %v2995_v4 = vmax.f32 %v2959_v43, 0.0  ;;  %v2821_v47 = vadd.f32 %v2820_v24, %v9382_v11  ;;  %v3992_v42 = vrot.slane %v3990_v2, 4  ;;  %v5255_v46 = vrot.slane %v9629_v31, 5  ;;  %5008 = vmatpush.bf16.msrb.mxu2 %v7459_v40 }
 0x429   : > { %v3460_v50 = vpack.c.b16 %v3406_v16, %v3406_v16  ;;  %v3461_v13 = vpack.c.b16 %v3407_v15, %v3407_v15  ;;  %3570 = vst [vmem:[#allocation2 + $0x68] sm:$0x1] %v3462_v35  ;;  %v3984_v12 = vrot.slane %v3983_v58, 4  ;;  %v3998_v8 = vrot.slane %v3996_v23, 5 }
 0x42a   : > { %v3038_v60 = vpack.c.bf16 %v2995_v4, %v2995_v4  ;;  %v2880_v62 = vadd.f32 %v2821_v47, %v10703_v41  ;;  %5600 = vmatmul.bf16.vlgmr.msra.gmra.mxu0 %v9389_v19  ;;  %v3993_v28 = vor.u32 %v3992_v42, %v3988_v3  ;;  %v5253_v34 = vsel %vm8857_vm5, %v7193_v10, %v5252_v51 }
 0x42b   : > { %3568 = vst [vmem:[#allocation2 + $0x60] sm:$0xf] %v3460_v50  ;;  %v3989_v11 = vsel %vm8103_vm2, %v3984_v12, %v3988_v3  ;;  %v5254_v30 = vrot.slane %v5252_v51, 4  ;;  %v3109_v22 = vunpack.c.l.b16 %v3037_v57  ;;  %v2724_v19 = vadd.f32 %v9376_v38, %v9363_v44  ;;  %v9666_v51 = vpop.f32.mrf.mxu3 }
 0x42c   : > { %3569 = vst [vmem:[#allocation2 + $0x64] sm:$0xf] %v3461_v13  ;;  %v3110_v25 = vunpack.c.l.b16 %v3038_v60  ;;  %v2920_v55 = vmul.f32 %v9555_v27, %v2880_v62  ;;  %v3994_v26 = vrot.slane %v3993_v28, 4  ;;  %v4254_v31 = vunpack.c.l.b16 %v3989_v11  ;;  %v9664_v13 = vpop.f32.mrf.mxu2 }
 0x42d   : > { %v9652_v43 = vadd.f32 %v2751_v18, %v2652_v37  ;;  %v5256_v23 = vsel %vm8857_vm5, %v5254_v30, %v5255_v46  ;;  %v5341_v24 = vunpack.c.l.b16 %v5253_v34  ;;  %v10704_v18 = vld [vmem:[#allocation26_spill] sm:$0xff] }
 0x42e   : > { %v3136_v2 = vpack.c.b16 %v3110_v25, %v3109_v22  ;;  %v2960_v10 = vadd.f32 %v9564_v33, %v2920_v55  ;;  %v3999_v57 = vsel %vm8103_vm2, %v3994_v26, %v3998_v8  ;;  %v5342_v16 = vunpack.c.l.b16 %v5256_v23 }
 0x42f   : > { %v2822_v15 = vpop.f32.mrf.mxu0  ;;  %v4255_v35 = vunpack.c.l.b16 %v3999_v57 }
 0x430   : > { %v3209_v58 = vshrl.u32 %v3136_v2, 16  ;;  %v2996_v4 = vmax.f32 %v2960_v10, 0.0  ;;  %v2823_v44 = vadd.f32 %v2822_v15, %v2724_v19  ;;  %v9659_v38 = vld [vmem:[#allocation2 + $0x68] sm:$0x1]  ;;  %v9661_v3 = vpack.c.b16 %v5342_v16, %v5341_v24 }
 0x431   : > { %v4279_v47 = vpack.c.b16 %v4255_v35, %v4254_v31  ;;  %v3212_v37 = vshll.u32 %v3136_v2, 16  ;;  %v4020_v46 = vshll.u32 %v9659_v38, 16 }
 0x432   : > { %v3211_v42 = vrot.slane %v3209_v58, 7  ;;  %v2881_v50 = vadd.f32 %v2823_v44, %v10704_v18  ;;  %v3622_v12 = vld [vmem:[#allocation2 + $0x60] sm:$0xf]  ;;  %v3039_v60 = vpack.c.bf16 %v2996_v4, %v2996_v4 }
 0x433   : > { %4632 = vmatmul.bf16.gmra.mxu2 %v4279_v47  ;;  %4716 = vmatmul.bf16.gmra.mxu3 %v4279_v47  ;;  %v3623_v41 = vld [vmem:[#allocation2 + $0x64] sm:$0xf]  ;;  %v4001_v62 = vshrl.u32 %v3622_v12, 16  ;;  %v4004_v28 = vshll.u32 %v3622_v12, 16  ;;  %v7194_v30 = vrot.slane %v3622_v12, 9 }
 0x434   : > { %v3214_v11 = vor.u32 %v3212_v37, %v3211_v42  ;;  %v3337_v8 = vsel %vm9306_vm8, %v3211_v42, 0  ;;  %v2921_v34 = vmul.f32 %v9555_v27, %v2881_v50  ;;  %4548 = vmatmul.bf16.gmra.mxu1 %v4279_v47  ;;  %v4010_v26 = vshll.u32 %v3623_v41, 16  ;;  %v10705_v50 = vld [vmem:[#allocation27_spill] sm:$0xff] }
 0x435   : > { %v3411_v22 = vunpack.c.l.b16 %v3337_v8  ;;  %v4003_v25 = vrot.slane %v4001_v62, 4  ;;  %v4006_v55 = vrot.slane %v4004_v28, 5  ;;  %v4014_v31 = vshrl.u32 %v3623_v41, 16 }
 0x436   : > { %v3319_v40 = vsel %vm9306_vm8, 0, %v3214_v11  ;;  %v2961_v19 = vadd.f32 %v9564_v33, %v2921_v34  ;;  %v5259_v23 = vrot.slane %v3623_v41, 5  ;;  %v4012_v58 = vrot.slane %v4010_v26, 5  ;;  %v2657_v26 = vpop.f32.mrf.mxu2 }
 0x437   : > { %v3409_v2 = vunpack.c.l.b16 %v3319_v40  ;;  %v3410_v10 = vunpack.c.h.b16 %v3319_v40  ;;  %v3465_v57 = vpack.c.b16 %v3411_v22, %v3411_v22  ;;  %v2825_v16 = vpop.f32.mrf.mxu0  ;;  %v4007_v15 = vor.u32 %v4006_v55, %v4003_v25  ;;  %v7451_v25 = vld [vmem:[#allocation3 + $0x20] sm:$0xff]  ;;  %v2756_v40 = vpop.f32.mrf.mxu3 }
 0x438   : > { %v2997_v35 = vmax.f32 %v2961_v19, 0.0  ;;  %v2826_v24 = vadd.f32 %v2825_v16, %v9421_v36  ;;  %v4016_v4 = vrot.slane %v4014_v31, 4  ;;  %v5260_v37 = vsel %vm8857_vm5, %v7194_v30, %v5259_v23  ;;  %v7467_v55 = vld [vmem:[#allocation3 + $0xa0] sm:$0xff]  ;;  %4919 = vmatpush.bf16.msrb.mxu1 %v7451_v25 }
 0x439   : > { %v3463_v44 = vpack.c.b16 %v3409_v2, %v3409_v2  ;;  %v3464_v47 = vpack.c.b16 %v3410_v10, %v3410_v10  ;;  %3573 = vst [vmem:[#allocation2 + $0x74] sm:$0x1] %v3465_v57  ;;  %v4008_v42 = vrot.slane %v4007_v15, 4  ;;  %v5261_v62 = vrot.slane %v5259_v23, 4  ;;  %5097 = vmatpush.bf16.msrb.mxu3 %v7467_v55 }
 0x43a   : > { %v3040_v18 = vpack.c.bf16 %v2997_v35, %v2997_v35  ;;  %v2882_v12 = vadd.f32 %v2826_v24, %v10705_v50  ;;  %5605 = vmatmul.bf16.gmra.mxu0 %v9410_v63  ;;  %v4017_v41 = vor.u32 %v4016_v4, %v4012_v58  ;;  %v4022_v28 = vrot.slane %v4020_v46, 5 }
 0x43b   : > { %3571 = vst [vmem:[#allocation2 + $0x6c] sm:$0xf] %v3463_v44  ;;  %v4013_v36 = vsel %vm8103_vm2, %v4008_v42, %v4012_v58  ;;  %v5262_v11 = vrot.slane %v9659_v38, 5  ;;  %v3111_v8 = vunpack.c.l.b16 %v3039_v60  ;;  %v2729_v19 = vadd.f32 %v9415_v6, %v9402_v48  ;;  %v10706_v42 = vld [vmem:[#allocation35_spill] sm:$0xff] }
 0x43c   : > { %3572 = vst [vmem:[#allocation2 + $0x70] sm:$0xf] %v3464_v47  ;;  %v3112_v34 = vunpack.c.l.b16 %v3040_v18  ;;  %v2922_v22 = vmul.f32 %v9555_v27, %v2882_v12  ;;  %v4018_v30 = vrot.slane %v4017_v41, 4  ;;  %v4256_v31 = vunpack.c.l.b16 %v4013_v36 }
 0x43d   : > { %v9686_v23 = vadd.f32 %v2756_v40, %v2657_v26  ;;  %v5263_v46 = vsel %vm8857_vm5, %v5261_v62, %v5262_v11  ;;  %v5343_v15 = vunpack.c.l.b16 %v5260_v37 }
 0x43e   : > { %v3137_v38 = vpack.c.b16 %v3112_v34, %v3111_v8  ;;  %v2962_v60 = vadd.f32 %v9564_v33, %v2922_v22  ;;  %v4023_v2 = vsel %vm8103_vm2, %v4018_v30, %v4022_v28  ;;  %v5344_v10 = vunpack.c.l.b16 %v5263_v46 }
 0x43f   : > { %v2827_v57 = vpop.f32.mrf.mxu0  ;;  %v4257_v16 = vunpack.c.l.b16 %v4023_v2 }
 0x440   : > { %v3216_v35 = vshrl.u32 %v3137_v38, 16  ;;  %v2998_v48 = vmax.f32 %v2962_v60, 0.0  ;;  %v2828_v6 = vadd.f32 %v2827_v57, %v2729_v19  ;;  %v9693_v24 = vld [vmem:[#allocation2 + $0x74] sm:$0x1]  ;;  %v9695_v4 = vpack.c.b16 %v5344_v10, %v5343_v15 }
 0x441   : > { %v4280_v58 = vpack.c.b16 %v4257_v16, %v4256_v31  ;;  %v3219_v47 = vshll.u32 %v3137_v38, 16  ;;  %v9698_v50 = vpop.f32.mrf.mxu1  ;;  %v4044_v28 = vshll.u32 %v9693_v24, 16 }
 0x442   : > { %v3218_v44 = vrot.slane %v3216_v35, 7  ;;  %v2883_v18 = vadd.f32 %v2828_v6, %v10706_v42  ;;  %v3625_v12 = vld [vmem:[#allocation2 + $0x6c] sm:$0xf]  ;;  %v3041_v41 = vpack.c.bf16 %v2998_v48, %v2998_v48 }
 0x443   : > { %4637 = vmatmul.bf16.gmra.mxu2 %v4280_v58  ;;  %4721 = vmatmul.bf16.gmra.mxu3 %v4280_v58  ;;  %v3626_v62 = vld [vmem:[#allocation2 + $0x70] sm:$0xf]  ;;  %v4025_v37 = vshrl.u32 %v3625_v12, 16  ;;  %v4028_v36 = vshll.u32 %v3625_v12, 16  ;;  %v7195_v22 = vrot.slane %v3625_v12, 9 }
 0x444   : > { %v3221_v11 = vor.u32 %v3219_v47, %v3218_v44  ;;  %v3338_v8 = vsel %vm9306_vm8, %v3218_v44, 0  ;;  %v2923_v34 = vmul.f32 %v9555_v27, %v2883_v18  ;;  %4553 = vmatmul.bf16.gmra.mxu1 %v4280_v58  ;;  %v4034_v26 = vshll.u32 %v3626_v62, 16  ;;  %v10707_v18 = vld [vmem:[#allocation28_spill] sm:$0xff] }
 0x445   : > { %v3414_v30 = vunpack.c.l.b16 %v3338_v8  ;;  %v4027_v25 = vrot.slane %v4025_v37, 4  ;;  %v4030_v55 = vrot.slane %v4028_v36, 5  ;;  %v4038_v31 = vshrl.u32 %v3626_v62, 16 }
 0x446   : > { %v3320_v40 = vsel %vm9306_vm8, 0, %v3221_v11  ;;  %v2963_v19 = vadd.f32 %v9564_v33, %v2923_v34  ;;  %v5266_v46 = vrot.slane %v3626_v62, 5  ;;  %v4036_v35 = vrot.slane %v4034_v26, 5  ;;  %v7458_v26 = vld [vmem:[#allocation3 + $0x58] sm:$0xff] }
 0x447   : > { %v3412_v38 = vunpack.c.l.b16 %v3320_v40  ;;  %v3413_v60 = vunpack.c.h.b16 %v3320_v40  ;;  %v3468_v2 = vpack.c.b16 %v3414_v30, %v3414_v30  ;;  %v2830_v10 = vpop.f32.mrf.mxu0  ;;  %v4031_v57 = vor.u32 %v4030_v55, %v4027_v25  ;;  %v9718_v25 = vpop.f32.mrf.mxu2  ;;  %5009 = vmatpush.bf16.msrb.mxu2 %v7458_v26 }
 0x448   : > { %v2999_v16 = vmax.f32 %v2963_v19, 0.0  ;;  %v2831_v15 = vadd.f32 %v2830_v10, %v9458_v5  ;;  %v4040_v48 = vrot.slane %v4038_v31, 4  ;;  %v5267_v47 = vsel %vm8857_vm5, %v7195_v22, %v5266_v46 }
 0x449   : > { %v3466_v6 = vpack.c.b16 %v3412_v38, %v3412_v38  ;;  %v3467_v58 = vpack.c.b16 %v3413_v60, %v3413_v60  ;;  %3576 = vst [vmem:[#allocation2 + $0x80] sm:$0x1] %v3468_v2  ;;  %v4032_v44 = vrot.slane %v4031_v57, 4  ;;  %v9711_v62 = vpop.f32.mrf.mxu1  ;;  %v5268_v36 = vrot.slane %v5266_v46, 4 }
 0x44a   : > { %v3042_v42 = vpack.c.bf16 %v2999_v16, %v2999_v16  ;;  %v2884_v12 = vadd.f32 %v2831_v15, %v10707_v18  ;;  %5610 = vmatmul.bf16.gmra.mxu0 %v9447_v14  ;;  %v4041_v37 = vor.u32 %v4040_v48, %v4036_v35  ;;  %v4046_v11 = vrot.slane %v4044_v28, 5 }
 0x44b   : > { %3574 = vst [vmem:[#allocation2 + $0x78] sm:$0xf] %v3466_v6  ;;  %v4037_v5 = vsel %vm8103_vm2, %v4032_v44, %v4036_v35  ;;  %v5269_v8 = vrot.slane %v9693_v24, 5  ;;  %v3113_v34 = vunpack.c.l.b16 %v3041_v41  ;;  %v2734_v40 = vadd.f32 %v9452_v53, %v9444_v56  ;;  %v10708_v6 = vld [vmem:[#allocation33_spill] sm:$0xff] }
 0x44c   : > { %3575 = vst [vmem:[#allocation2 + $0x7c] sm:$0xf] %v3467_v58  ;;  %v3114_v30 = vunpack.c.l.b16 %v3042_v42  ;;  %v2924_v22 = vmul.f32 %v9555_v27, %v2884_v12  ;;  %v4042_v55 = vrot.slane %v4041_v37, 4  ;;  %v4258_v19 = vunpack.c.l.b16 %v4037_v5 }
 0x44d   : > { %v5270_v31 = vsel %vm8857_vm5, %v5268_v36, %v5269_v8  ;;  %v5345_v2 = vunpack.c.l.b16 %v5267_v47 }
 0x44e   : > { %v3138_v46 = vpack.c.b16 %v3114_v30, %v3113_v34  ;;  %v2964_v28 = vadd.f32 %v9564_v33, %v2924_v22  ;;  %v4047_v24 = vsel %vm8103_vm2, %v4042_v55, %v4046_v11  ;;  %v5346_v41 = vunpack.c.l.b16 %v5270_v31 }
 0x44f   : > { %v2832_v38 = vpop.f32.mrf.mxu0  ;;  %v4259_v60 = vunpack.c.l.b16 %v4047_v24 }
 0x450   : > { %v3223_v10 = vshrl.u32 %v3138_v46, 16  ;;  %v3000_v57 = vmax.f32 %v2964_v28, 0.0  ;;  %v2833_v16 = vadd.f32 %v2832_v38, %v2734_v40  ;;  %v3630_v15 = vld [vmem:[#allocation2 + $0x80] sm:$0x1]  ;;  %v9727_v53 = vpack.c.b16 %v5346_v41, %v5345_v2 }
 0x451   : > { %v4281_v56 = vpack.c.b16 %v4259_v60, %v4258_v19  ;;  %v3226_v48 = vshll.u32 %v3138_v46, 16  ;;  %v9730_v44 = vpop.f32.mrf.mxu1  ;;  %v4068_v18 = vshll.u32 %v3630_v15, 16  ;;  %v5276_v5 = vrot.slane %v3630_v15, 5 }
 0x452   : > { %v3225_v35 = vrot.slane %v3223_v10, 7  ;;  %v2885_v58 = vadd.f32 %v2833_v16, %v10708_v6  ;;  %v3628_v42 = vld [vmem:[#allocation2 + $0x78] sm:$0xf]  ;;  %v3043_v12 = vpack.c.bf16 %v3000_v57, %v3000_v57 }
 0x453   : > { %4642 = vmatmul.bf16.gmra.mxu2 %v4281_v56  ;;  %4726 = vmatmul.bf16.gmra.mxu3 %v4281_v56  ;;  %v3629_v37 = vld [vmem:[#allocation2 + $0x7c] sm:$0xf]  ;;  %v4049_v47 = vshrl.u32 %v3628_v42, 16  ;;  %v4052_v36 = vshll.u32 %v3628_v42, 16  ;;  %v7196_v30 = vrot.slane %v3628_v42, 9 }
 0x454   : > { %v3228_v11 = vor.u32 %v3226_v48, %v3225_v35  ;;  %v3339_v8 = vsel %vm9306_vm8, %v3225_v35, 0  ;;  %v2925_v34 = vmul.f32 %v9555_v27, %v2885_v58  ;;  %4558 = vmatmul.bf16.gmra.mxu1 %v4281_v56  ;;  %v4058_v40 = vshll.u32 %v3629_v37, 16 }
 0x455   : > { %v3417_v22 = vunpack.c.l.b16 %v3339_v8  ;;  %v4051_v55 = vrot.slane %v4049_v47, 4  ;;  %v4054_v26 = vrot.slane %v4052_v36, 5  ;;  %v4062_v28 = vshrl.u32 %v3629_v37, 16 }
 0x456   : > { %v3321_v19 = vsel %vm9306_vm8, 0, %v3228_v11  ;;  %v2965_v31 = vadd.f32 %v9564_v33, %v2925_v34  ;;  %v4603_v46 = vpop.f32.mrf.mxu2  ;;  %v5273_v24 = vrot.slane %v3629_v37, 5  ;;  %v4060_v56 = vrot.slane %v4058_v40, 5  ;;  %v10709_v37 = vld [vmem:[#allocation29_spill] sm:$0xff] }
 0x457   : > { %v3415_v41 = vunpack.c.l.b16 %v3321_v19  ;;  %v3416_v38 = vunpack.c.h.b16 %v3321_v19  ;;  %v3471_v60 = vpack.c.b16 %v3417_v22, %v3417_v22  ;;  %v9739_v2 = vadd.f32 %v4603_v46, %v9698_v50  ;;  %v2835_v10 = vpop.f32.mrf.mxu0 }
 0x458   : > { %v3001_v57 = vmax.f32 %v2965_v31, 0.0  ;;  %v2836_v16 = vadd.f32 %v2835_v10, %v9496_v17  ;;  %v4055_v15 = vor.u32 %v4054_v26, %v4051_v55  ;;  %v4064_v6 = vrot.slane %v4062_v28, 4  ;;  %v7466_v26 = vld [vmem:[#allocation3 + $0x98] sm:$0xff] }
 0x459   : > { %v3469_v35 = vpack.c.b16 %v3415_v41, %v3415_v41  ;;  %v3470_v48 = vpack.c.b16 %v3416_v38, %v3416_v38  ;;  %3579 = vst [vmem:[#allocation2 + $0x8c] sm:$0x1] %v3471_v60  ;;  %v5274_v58 = vsel %vm8857_vm5, %v7196_v30, %v5273_v24  ;;  %v9745_v36 = vpop.f32.mrf.mxu1  ;;  %v5275_v11 = vrot.slane %v5273_v24, 4  ;;  %v7450_v30 = vld [vmem:[#allocation3 + $0x18] sm:$0xff]  ;;  %v9755_v41 = vpop.f32.mrf.mxu3  ;;  %5098 = vmatpush.bf16.msrb.mxu3 %v7466_v26 }
 0x45a   : > { %v3044_v42 = vpack.c.bf16 %v3001_v57, %v3001_v57  ;;  %v2886_v47 = vadd.f32 %v2836_v16, %v10709_v37  ;;  %5615 = vmatmul.bf16.gmra.mxu0 %v9486_v32  ;;  %v4056_v50 = vrot.slane %v4055_v15, 4  ;;  %v3115_v17 = vunpack.c.l.b16 %v3043_v12  ;;  %4920 = vmatpush.bf16.msrb.mxu1 %v7450_v30 }
 0x45b   : > { %3577 = vst [vmem:[#allocation2 + $0x84] sm:$0xf] %v3469_v35  ;;  %v4065_v8 = vor.u32 %v4064_v6, %v4060_v56  ;;  %v5277_v40 = vsel %vm8857_vm5, %v5275_v11, %v5276_v5  ;;  %v4070_v31 = vrot.slane %v4068_v18, 5  ;;  %v5347_v46 = vunpack.c.l.b16 %v5274_v58  ;;  %v10710_v58 = vld [vmem:[#allocation30_spill] sm:$0xff] }
 0x45c   : > { %3578 = vst [vmem:[#allocation2 + $0x88] sm:$0xf] %v3470_v48  ;;  %v3116_v34 = vunpack.c.l.b16 %v3044_v42  ;;  %v2926_v22 = vmul.f32 %v9555_v27, %v2886_v47  ;;  %v4061_v55 = vsel %vm8103_vm2, %v4056_v50, %v4060_v56  ;;  %v5348_v28 = vunpack.c.l.b16 %v5277_v40 }
 0x45d   : > { %v4066_v19 = vrot.slane %v4065_v8, 4  ;;  %v2739_v12 = vadd.f32 %v9500_v9, %v9498_v49  ;;  %v4260_v5 = vunpack.c.l.b16 %v4061_v55 }
 0x45e   : > { %v3139_v24 = vpack.c.b16 %v3116_v34, %v3115_v17  ;;  %v2966_v38 = vadd.f32 %v9564_v33, %v2926_v22  ;;  %v4605_v60 = vpop.f32.mrf.mxu2  ;;  %v9763_v16 = vpack.c.b16 %v5348_v28, %v5347_v46 }
 0x45f   : > { %v9759_v10 = vadd.f32 %v4605_v60, %v9711_v62  ;;  %v2837_v57 = vpop.f32.mrf.mxu0  ;;  %v4071_v18 = vsel %vm8103_vm2, %v4066_v19, %v4070_v31 }
 0x460   : > { %v3230_v15 = vshrl.u32 %v3139_v24, 16  ;;  %v3002_v49 = vmax.f32 %v2966_v38, 0.0  ;;  %v2838_v9 = vadd.f32 %v2837_v57, %v2739_v12  ;;  %v9765_v56 = vld [vmem:[#allocation2 + $0x8c] sm:$0x1]  ;;  %v4261_v35 = vunpack.c.l.b16 %v4071_v18 }
 0x461   : > { %v3233_v6 = vshll.u32 %v3139_v24, 16  ;;  %v9768_v37 = vpop.f32.mrf.mxu1  ;;  %v4092_v8 = vshll.u32 %v9765_v56, 16 }
 0x462   : > { %v3232_v48 = vrot.slane %v3230_v15, 7  ;;  %v2887_v42 = vadd.f32 %v2838_v9, %v10710_v58  ;;  %v3631_v62 = vld [vmem:[#allocation2 + $0x84] sm:$0xf]  ;;  %v4282_v47 = vpack.c.b16 %v4261_v35, %v4260_v5  ;;  %v3045_v55 = vpack.c.bf16 %v3002_v49, %v3002_v49 }
 0x463   : > { %v3632_v50 = vld [vmem:[#allocation2 + $0x88] sm:$0xf]  ;;  %v4073_v11 = vshrl.u32 %v3631_v62, 16  ;;  %v4076_v17 = vshll.u32 %v3631_v62, 16  ;;  %v7197_v60 = vrot.slane %v3631_v62, 9 }
 0x464   : > { %v3235_v34 = vor.u32 %v3233_v6, %v3232_v48  ;;  %v3340_v22 = vsel %vm9306_vm8, %v3232_v48, 0  ;;  %v2927_v30 = vmul.f32 %v9555_v27, %v2887_v42  ;;  %4647 = vmatmul.bf16.gmra.mxu2 %v4282_v47  ;;  %4731 = vmatmul.bf16.gmra.mxu3 %v4282_v47  ;;  %v4082_v31 = vshll.u32 %v3632_v50, 16 }
 0x465   : > { %v3420_v26 = vunpack.c.l.b16 %v3340_v22  ;;  %v4075_v40 = vrot.slane %v4073_v11, 4  ;;  %v4078_v19 = vrot.slane %v4076_v17, 5  ;;  %4563 = vmatmul.bf16.gmra.mxu1 %v4282_v47  ;;  %v4086_v38 = vshrl.u32 %v3632_v50, 16  ;;  %v10711_v17 = vld [vmem:[#allocation32_spill] sm:$0xff] }
 0x466   : > { %v3322_v46 = vsel %vm9306_vm8, 0, %v3235_v34  ;;  %v2967_v28 = vadd.f32 %v9564_v33, %v2927_v30  ;;  %v4608_v12 = vpop.f32.mrf.mxu2  ;;  %v4692_v24 = vpop.f32.mrf.mxu3  ;;  %v4084_v47 = vrot.slane %v4082_v31, 5  ;;  %v5280_v30 = vrot.slane %v3632_v50, 5  ;;  %v7457_v31 = vld [vmem:[#allocation3 + $0x50] sm:$0xff] }
 0x467   : > { %v3418_v57 = vunpack.c.l.b16 %v3322_v46  ;;  %v3419_v18 = vunpack.c.h.b16 %v3322_v46  ;;  %v3474_v5 = vpack.c.b16 %v3420_v26, %v3420_v26  ;;  %v9778_v15 = vadd.f32 %v4608_v12, %v9730_v44  ;;  %v2840_v49 = vpop.f32.mrf.mxu0  ;;  %5010 = vmatpush.bf16.msrb.mxu2 %v7457_v31  ;;  %v9818_v31 = vld [vmem:[%s10538_s2] ss:$0 sm:$0xff] }
 0x468   : > { %v3003_v9 = vmax.f32 %v2967_v28, 0.0  ;;  %v9781_v35 = vadd.f32 %v4692_v24, %v9739_v2  ;;  %v2841_v48 = vadd.f32 %v2840_v49, %v9567_v0  ;;  %v4079_v6 = vor.u32 %v4078_v19, %v4075_v40 }
 0x469   : > { %v3472_v58 = vpack.c.b16 %v3418_v57, %v3418_v57  ;;  %v3473_v42 = vpack.c.b16 %v3419_v18, %v3419_v18  ;;  %3582 = vst [vmem:[#allocation2 + $0x98] sm:$0x1] %v3474_v5  ;;  %v4088_v11 = vrot.slane %v4086_v38, 4  ;;  %v9785_v22 = vpop.f32.mrf.mxu1  ;;  %v3117_v2 = vunpack.c.l.b16 %v3045_v55 }
 0x46a   : > { %v3046_v62 = vpack.c.bf16 %v3003_v9, %v3003_v9  ;;  %v2888_v34 = vadd.f32 %v2841_v48, %v10711_v17  ;;  %5620 = vmatmul.bf16.gmra.mxu0 %v9583_v21  ;;  %v4080_v44 = vrot.slane %v4079_v6, 4  ;;  %v5281_v46 = vsel %vm8857_vm5, %v7197_v60, %v5280_v30 }
 0x46b   : > { %3580 = vst [vmem:[#allocation2 + $0x90] sm:$0xf] %v3472_v58  ;;  %v4089_v26 = vor.u32 %v4088_v11, %v4084_v47  ;;  %v4094_v12 = vrot.slane %v4092_v8, 5  ;;  %v5282_v24 = vrot.slane %v5280_v30, 4  ;;  %v5283_v38 = vrot.slane %v9765_v56, 5 }
 0x46c   : > { %3581 = vst [vmem:[#allocation2 + $0x94] sm:$0xf] %v3473_v42  ;;  %v3118_v0 = vunpack.c.l.b16 %v3046_v62  ;;  %v2928_v40 = vmul.f32 %v9555_v27, %v2888_v34  ;;  %v4085_v19 = vsel %vm8103_vm2, %v4080_v44, %v4084_v47  ;;  %v2744_v50 = vadd.f32 %v9578_v54, %v9572_v1  ;;  %v10712_v47 = vld [vmem:[#allocation34_spill] sm:$0xff] }
 0x46d   : > { %v4090_v28 = vrot.slane %v4089_v26, 4  ;;  %v4262_v5 = vunpack.c.l.b16 %v4085_v19  ;;  %v5284_v1 = vsel %vm8857_vm5, %v5282_v24, %v5283_v38  ;;  %v5349_v58 = vunpack.c.l.b16 %v5281_v46 }
 0x46e   : > { %v3140_v55 = vpack.c.b16 %v3118_v0, %v3117_v2  ;;  %v2968_v57 = vadd.f32 %v9564_v33, %v2928_v40  ;;  %v4610_v18 = vpop.f32.mrf.mxu2  ;;  %v4694_v27 = vpop.f32.mrf.mxu3  ;;  %v5350_v17 = vunpack.c.l.b16 %v5284_v1 }
 0x46f   : > { %v9798_v49 = vadd.f32 %v4610_v18, %v9745_v36  ;;  %v9801_v60 = vadd.f32 %v4694_v27, %v9759_v10  ;;  %v2842_v8 = vpop.f32.mrf.mxu0  ;;  %v4095_v56 = vsel %vm8103_vm2, %v4090_v28, %v4094_v12 }
 0x470   : > { %v3237_v54 = vshrl.u32 %v3140_v55, 16  ;;  %v3004_v9 = vmax.f32 %v2968_v57, 0.0  ;;  %v2843_v33 = vadd.f32 %v2842_v8, %v2744_v50  ;;  %v9807_v48 = vld [vmem:[#allocation2 + $0x98] sm:$0x1]  ;;  %v4263_v6 = vunpack.c.l.b16 %v4095_v56 }
 0x471   : > { %v3240_v36 = vshll.u32 %v3140_v55, 16  ;;  %v9810_v10 = vpop.f32.mrf.mxu1  ;;  %v4116_v26 = vshll.u32 %v9807_v48, 16  ;;  %v9826_v55 = vld [vmem:[%s10539_s3] ss:$0 sm:$0xff]  ;;  %v9829_v8 = vpack.c.b16 %v5350_v17, %v5349_v58 }
 0x472   : > { %v3239_v42 = vrot.slane %v3237_v54, 7  ;;  %v2889_v11 = vadd.f32 %v2843_v33, %v10712_v47  ;;  %v3634_v62 = vld [vmem:[#allocation2 + $0x90] sm:$0xf]  ;;  %v4283_v34 = vpack.c.b16 %v4263_v6, %v4262_v5  ;;  %v3047_v19 = vpack.c.bf16 %v3004_v9, %v3004_v9 }
 0x473   : > { %v3635_v44 = vld [vmem:[#allocation2 + $0x94] sm:$0xf]  ;;  %v4097_v30 = vshrl.u32 %v3634_v62, 16  ;;  %v4100_v2 = vshll.u32 %v3634_v62, 16 }
 0x474   : > { %v3242_v0 = vor.u32 %v3240_v36, %v3239_v42  ;;  %v3341_v40 = vsel %vm9306_vm8, %v3239_v42, 0  ;;  %v2929_v46 = vmul.f32 %v9818_v31, %v2889_v11  ;;  %4652 = vmatmul.bf16.gmra.mxu2 %v4283_v34  ;;  %4736 = vmatmul.bf16.gmra.mxu3 %v4283_v34  ;;  %v4106_v38 = vshll.u32 %v3635_v44, 16 }
 0x475   : > { %v3423_v28 = vunpack.c.l.b16 %v3341_v40  ;;  %v4099_v12 = vrot.slane %v4097_v30, 4  ;;  %v4102_v24 = vrot.slane %v4100_v2, 5  ;;  %4568 = vmatmul.bf16.gmra.mxu1 %v4283_v34  ;;  %v4110_v5 = vshrl.u32 %v3635_v44, 16  ;;  %v10713_v2 = vld [vmem:[#allocation36_spill] sm:$0xff] }
 0x476   : > { %v3323_v50 = vsel %vm9306_vm8, 0, %v3242_v0  ;;  %v2969_v57 = vadd.f32 %v9826_v55, %v2929_v46  ;;  %v4613_v18 = vpop.f32.mrf.mxu2  ;;  %v4697_v27 = vpop.f32.mrf.mxu3  ;;  %v4108_v30 = vrot.slane %v4106_v38, 5  ;;  %v7198_v46 = vrot.slane %v3634_v62, 9 }
 0x477   : > { %v3421_v56 = vunpack.c.l.b16 %v3323_v50  ;;  %v3422_v1 = vunpack.c.h.b16 %v3323_v50  ;;  %v3477_v54 = vpack.c.b16 %v3423_v28, %v3423_v28  ;;  %v9832_v9 = vadd.f32 %v4613_v18, %v9768_v37  ;;  %v2845_v33 = vpop.f32.mrf.mxu0  ;;  %v7465_v18 = vld [vmem:[#allocation3 + $0x90] sm:$0xff] }
 0x478   : > { %v3005_v6 = vmax.f32 %v2969_v57, 0.0  ;;  %v9835_v42 = vadd.f32 %v4697_v27, %v9778_v15  ;;  %v2846_v36 = vadd.f32 %v2845_v33, %v9608_v61  ;;  %v4103_v47 = vor.u32 %v4102_v24, %v4099_v12  ;;  %v7449_v57 = vld [vmem:[#allocation3 + $0x10] sm:$0xff]  ;;  %5099 = vmatpush.bf16.msrb.mxu3 %v7465_v18 }
 0x479   : > { %v3475_v11 = vpack.c.b16 %v3421_v56, %v3421_v56  ;;  %v3476_v34 = vpack.c.b16 %v3422_v1, %v3422_v1  ;;  %3585 = vst [vmem:[#allocation2 + $0xa4] sm:$0x1] %v3477_v54  ;;  %v4112_v58 = vrot.slane %v4110_v5, 4  ;;  %v9839_v40 = vpop.f32.mrf.mxu1  ;;  %v5287_v28 = vrot.slane %v3635_v44, 5  ;;  %4921 = vmatpush.bf16.msrb.mxu1 %v7449_v57 }
 0x47a   : > { %v3048_v17 = vpack.c.bf16 %v3005_v6, %v3005_v6  ;;  %v2890_v0 = vadd.f32 %v2846_v36, %v10713_v2  ;;  %5625 = vmatmul.bf16.gmra.mxu0 %v9600_v39  ;;  %v4104_v37 = vrot.slane %v4103_v47, 4  ;;  %v5290_v61 = vrot.slane %v9807_v48, 5 }
 0x47b   : > { %3583 = vst [vmem:[#allocation2 + $0x9c] sm:$0xf] %v3475_v11  ;;  %v4113_v15 = vor.u32 %v4112_v58, %v4108_v30  ;;  %v3119_v12 = vunpack.c.l.b16 %v3047_v19  ;;  %v4118_v5 = vrot.slane %v4116_v26, 5  ;;  %v5288_v62 = vsel %vm8857_vm5, %v7198_v46, %v5287_v28 }
 0x47c   : > { %3584 = vst [vmem:[#allocation2 + $0xa0] sm:$0xf] %v3476_v34  ;;  %v3120_v24 = vunpack.c.l.b16 %v3048_v17  ;;  %v2930_v38 = vmul.f32 %v9818_v31, %v2890_v0  ;;  %v4109_v50 = vsel %vm8103_vm2, %v4104_v37, %v4108_v30  ;;  %v5289_v56 = vrot.slane %v5287_v28, 4  ;;  %v10714_v0 = vld [vmem:[#allocation37_spill] sm:$0xff] }
 0x47d   : > { %v4114_v27 = vrot.slane %v4113_v15, 4  ;;  %v2749_v44 = vadd.f32 %v9625_v7, %v9623_v20  ;;  %v4264_v33 = vunpack.c.l.b16 %v4109_v50  ;;  %v5351_v17 = vunpack.c.l.b16 %v5288_v62 }
 0x47e   : > { %v3141_v48 = vpack.c.b16 %v3120_v24, %v3119_v12  ;;  %v2970_v19 = vadd.f32 %v9826_v55, %v2930_v38  ;;  %v4615_v1 = vpop.f32.mrf.mxu2  ;;  %v4699_v54 = vpop.f32.mrf.mxu3  ;;  %v5291_v20 = vsel %vm8857_vm5, %v5289_v56, %v5290_v61 }
 0x47f   : > { %v9852_v6 = vadd.f32 %v4615_v1, %v9785_v22  ;;  %v9855_v26 = vadd.f32 %v4699_v54, %v9798_v49  ;;  %v2847_v36 = vpop.f32.mrf.mxu0  ;;  %v4119_v47 = vsel %vm8103_vm2, %v4114_v27, %v4118_v5  ;;  %v5352_v15 = vunpack.c.l.b16 %v5291_v20 }
 0x480   : > { %v3244_v7 = vshrl.u32 %v3141_v48, 16  ;;  %v3006_v11 = vmax.f32 %v2970_v19, 0.0  ;;  %v2848_v34 = vadd.f32 %v2847_v36, %v2749_v44  ;;  %v9861_v30 = vld [vmem:[#allocation2 + $0xa4] sm:$0x1]  ;;  %v4265_v58 = vunpack.c.l.b16 %v4119_v47 }
 0x481   : > { %v3247_v22 = vshll.u32 %v3141_v48, 16  ;;  %v9864_v49 = vpop.f32.mrf.mxu1  ;;  %v4140_v61 = vshll.u32 %v9861_v30, 16  ;;  %v9873_v36 = vpack.c.b16 %v5352_v15, %v5351_v17 }
 0x482   : > { %v3246_v2 = vrot.slane %v3244_v7, 7  ;;  %v2891_v37 = vadd.f32 %v2848_v34, %v10714_v0  ;;  %v3637_v46 = vld [vmem:[#allocation2 + $0x9c] sm:$0xf]  ;;  %v4284_v28 = vpack.c.b16 %v4265_v58, %v4264_v33  ;;  %v3049_v18 = vpack.c.bf16 %v3006_v11, %v3006_v11 }
 0x483   : > { %v3638_v12 = vld [vmem:[#allocation2 + $0xa0] sm:$0xf]  ;;  %v4121_v24 = vshrl.u32 %v3637_v46, 16  ;;  %v4124_v38 = vshll.u32 %v3637_v46, 16 }
 0x484   : > { %v3249_v50 = vor.u32 %v3247_v22, %v3246_v2  ;;  %v3342_v57 = vsel %vm9306_vm8, %v3246_v2, 0  ;;  %v2931_v27 = vmul.f32 %v9818_v31, %v2891_v37  ;;  %4657 = vmatmul.bf16.gmra.mxu2 %v4284_v28  ;;  %4741 = vmatmul.bf16.gmra.mxu3 %v4284_v28  ;;  %v4130_v44 = vshll.u32 %v3638_v12, 16 }
 0x485   : > { %v3426_v5 = vunpack.c.l.b16 %v3342_v57  ;;  %v4123_v62 = vrot.slane %v4121_v24, 4  ;;  %v4126_v56 = vrot.slane %v4124_v38, 5  ;;  %4573 = vmatmul.bf16.gmra.mxu1 %v4284_v28  ;;  %v4134_v33 = vshrl.u32 %v3638_v12, 16  ;;  %v10715_v38 = vld [vmem:[#allocation40_spill] sm:$0xff] }
 0x486   : > { %v3324_v48 = vsel %vm9306_vm8, 0, %v3249_v50  ;;  %v2971_v19 = vadd.f32 %v9826_v55, %v2931_v27  ;;  %v4618_v1 = vpop.f32.mrf.mxu2  ;;  %v4702_v54 = vpop.f32.mrf.mxu3  ;;  %v4132_v24 = vrot.slane %v4130_v44, 5  ;;  %v7199_v27 = vrot.slane %v3637_v46, 9 }
 0x487   : > { %v3424_v47 = vunpack.c.l.b16 %v3324_v48  ;;  %v3425_v20 = vunpack.c.h.b16 %v3324_v48  ;;  %v3480_v7 = vpack.c.b16 %v3426_v5, %v3426_v5  ;;  %v9876_v11 = vadd.f32 %v4618_v1, %v9810_v10  ;;  %v2850_v34 = vpop.f32.mrf.mxu0 }
 0x488   : > { %v3007_v58 = vmax.f32 %v2971_v19, 0.0  ;;  %v9879_v2 = vadd.f32 %v4702_v54, %v9832_v9  ;;  %v2851_v22 = vadd.f32 %v2850_v34, %v9652_v43  ;;  %v4127_v0 = vor.u32 %v4126_v56, %v4123_v62  ;;  %v7456_v19 = vld [vmem:[#allocation3 + $0x48] sm:$0xff] }
 0x489   : > { %v3478_v37 = vpack.c.b16 %v3424_v47, %v3424_v47  ;;  %v3479_v28 = vpack.c.b16 %v3425_v20, %v3425_v20  ;;  %3588 = vst [vmem:[#allocation2 + $0xb0] sm:$0x1] %v3480_v7  ;;  %v4136_v17 = vrot.slane %v4134_v33, 4  ;;  %v9883_v57 = vpop.f32.mrf.mxu1  ;;  %v5294_v5 = vrot.slane %v3638_v12, 5  ;;  %5011 = vmatpush.bf16.msrb.mxu2 %v7456_v19 }
 0x48a   : > { %v3050_v15 = vpack.c.bf16 %v3007_v58, %v3007_v58  ;;  %v2892_v50 = vadd.f32 %v2851_v22, %v10715_v38  ;;  %5630 = vmatmul.bf16.gmra.mxu0 %v9633_v59  ;;  %v4128_v10 = vrot.slane %v4127_v0, 4  ;;  %v5297_v43 = vrot.slane %v9861_v30, 5  ;;  %v10716_v38 = vld [vmem:[#allocation38_spill] sm:$0xff] }
 0x48b   : > { %3586 = vst [vmem:[#allocation2 + $0xa8] sm:$0xf] %v3478_v37  ;;  %v4137_v9 = vor.u32 %v4136_v17, %v4132_v24  ;;  %v3121_v62 = vunpack.c.l.b16 %v3049_v18  ;;  %v4142_v54 = vrot.slane %v4140_v61, 5  ;;  %v5295_v33 = vsel %vm8857_vm5, %v7199_v27, %v5294_v5 }
 0x48c   : > { %3587 = vst [vmem:[#allocation2 + $0xac] sm:$0xf] %v3479_v28  ;;  %v3122_v56 = vunpack.c.l.b16 %v3050_v15  ;;  %v2932_v44 = vmul.f32 %v9818_v31, %v2892_v50  ;;  %v4133_v48 = vsel %vm8103_vm2, %v4128_v10, %v4132_v24  ;;  %v5296_v46 = vrot.slane %v5294_v5, 4 }
 0x48d   : > { %v4138_v1 = vrot.slane %v4137_v9, 4  ;;  %v2754_v12 = vadd.f32 %v9666_v51, %v9664_v13  ;;  %v4266_v7 = vunpack.c.l.b16 %v4133_v48  ;;  %v5353_v17 = vunpack.c.l.b16 %v5295_v33 }
 0x48e   : > { %v3142_v47 = vpack.c.b16 %v3122_v56, %v3121_v62  ;;  %v2972_v30 = vadd.f32 %v9826_v55, %v2932_v44  ;;  %v4620_v18 = vpop.f32.mrf.mxu2  ;;  %v4704_v20 = vpop.f32.mrf.mxu3  ;;  %v5298_v13 = vsel %vm8857_vm5, %v5296_v46, %v5297_v43 }
 0x48f   : > { %v9896_v34 = vadd.f32 %v4620_v18, %v9839_v40  ;;  %v9899_v58 = vadd.f32 %v4704_v20, %v9852_v6  ;;  %v2852_v61 = vpop.f32.mrf.mxu0  ;;  %v4143_v22 = vsel %vm8103_vm2, %v4138_v1, %v4142_v54  ;;  %v5354_v27 = vunpack.c.l.b16 %v5298_v13 }
 0x490   : > { %v3251_v51 = vshrl.u32 %v3142_v47, 16  ;;  %v3008_v0 = vmax.f32 %v2972_v30, 0.0  ;;  %v2853_v37 = vadd.f32 %v2852_v61, %v2754_v12  ;;  %v9905_v28 = vld [vmem:[#allocation2 + $0xb0] sm:$0x1]  ;;  %v4267_v24 = vunpack.c.l.b16 %v4143_v22 }
 0x491   : > { %v3254_v40 = vshll.u32 %v3142_v47, 16  ;;  %v9908_v6 = vpop.f32.mrf.mxu1  ;;  %v4164_v43 = vshll.u32 %v9905_v28, 16  ;;  %v9917_v61 = vpack.c.b16 %v5354_v27, %v5353_v17 }
 0x492   : > { %v3253_v15 = vrot.slane %v3251_v51, 7  ;;  %v2893_v50 = vadd.f32 %v2853_v37, %v10716_v38  ;;  %v3640_v10 = vld [vmem:[#allocation2 + $0xa8] sm:$0xf]  ;;  %v4285_v9 = vpack.c.b16 %v4267_v24, %v4266_v7  ;;  %v3051_v19 = vpack.c.bf16 %v3008_v0, %v3008_v0 }
 0x493   : > { %v3641_v5 = vld [vmem:[#allocation2 + $0xac] sm:$0xf]  ;;  %v4145_v62 = vshrl.u32 %v3640_v10, 16  ;;  %v4148_v56 = vshll.u32 %v3640_v10, 16  ;;  %10717 = vst [vmem:[#allocation46_spill] sm:$0xff] %v9917_v61 }
 0x494   : > { %v3256_v44 = vor.u32 %v3254_v40, %v3253_v15  ;;  %v3343_v48 = vsel %vm9306_vm8, %v3253_v15, 0  ;;  %v2933_v1 = vmul.f32 %v9818_v31, %v2893_v50  ;;  %4662 = vmatmul.bf16.gmra.mxu2 %v4285_v9  ;;  %4746 = vmatmul.bf16.gmra.mxu3 %v4285_v9  ;;  %v4154_v12 = vshll.u32 %v3641_v5, 16 }
 0x495   : > { %v3429_v54 = vunpack.c.l.b16 %v3343_v48  ;;  %v4147_v33 = vrot.slane %v4145_v62, 4  ;;  %v4150_v46 = vrot.slane %v4148_v56, 5  ;;  %4578 = vmatmul.bf16.gmra.mxu1 %v4285_v9  ;;  %v4158_v7 = vshrl.u32 %v3641_v5, 16  ;;  %v10718_v56 = vld [vmem:[#allocation39_spill] sm:$0xff] }
 0x496   : > { %v3325_v47 = vsel %vm9306_vm8, 0, %v3256_v44  ;;  %v2973_v30 = vadd.f32 %v9826_v55, %v2933_v1  ;;  %v4623_v18 = vpop.f32.mrf.mxu2  ;;  %v4707_v20 = vpop.f32.mrf.mxu3  ;;  %v4156_v62 = vrot.slane %v4154_v12, 5  ;;  %v7200_v1 = vrot.slane %v3640_v10, 9 }
 0x497   : > { %v3427_v22 = vunpack.c.l.b16 %v3325_v47  ;;  %v3428_v13 = vunpack.c.h.b16 %v3325_v47  ;;  %v3483_v51 = vpack.c.b16 %v3429_v54, %v3429_v54  ;;  %v9920_v0 = vadd.f32 %v4623_v18, %v9864_v49  ;;  %v2855_v37 = vpop.f32.mrf.mxu0 }
 0x498   : > { %v3009_v24 = vmax.f32 %v2973_v30, 0.0  ;;  %v9923_v15 = vadd.f32 %v4707_v20, %v9876_v11  ;;  %v2856_v40 = vadd.f32 %v2855_v37, %v9686_v23  ;;  %v4151_v38 = vor.u32 %v4150_v46, %v4147_v33  ;;  %v7464_v37 = vld [vmem:[#allocation3 + $0x88] sm:$0xff] }
 0x499   : > { %v3481_v50 = vpack.c.b16 %v3427_v22, %v3427_v22  ;;  %v3482_v9 = vpack.c.b16 %v3428_v13, %v3428_v13  ;;  %3591 = vst [vmem:[#allocation2 + $0xbc] sm:$0x1] %v3483_v51  ;;  %v4160_v17 = vrot.slane %v4158_v7, 4  ;;  %v9927_v48 = vpop.f32.mrf.mxu1  ;;  %v5301_v54 = vrot.slane %v3641_v5, 5  ;;  %v7448_v51 = vld [vmem:[#allocation3 + $0x8] sm:$0xff]  ;;  %5100 = vmatpush.bf16.msrb.mxu3 %v7464_v37 }
 0x49a   : > { %v3052_v27 = vpack.c.bf16 %v3009_v24, %v3009_v24  ;;  %v2894_v44 = vadd.f32 %v2856_v40, %v10718_v56  ;;  %5635 = vmatmul.bf16.gmra.mxu0 %v9661_v3  ;;  %v4152_v49 = vrot.slane %v4151_v38, 4  ;;  %v5304_v23 = vrot.slane %v9905_v28, 5  ;;  %4922 = vmatpush.bf16.msrb.mxu1 %v7448_v51 }
 0x49b   : > { %3589 = vst [vmem:[#allocation2 + $0xb4] sm:$0xf] %v3481_v50  ;;  %v4161_v11 = vor.u32 %v4160_v17, %v4156_v62  ;;  %v3123_v33 = vunpack.c.l.b16 %v3051_v19  ;;  %v4166_v18 = vrot.slane %v4164_v43, 5  ;;  %v9936_v20 = vsel %vm8857_vm5, %v7200_v1, %v5301_v54  ;;  %v7455_v50 = vld [vmem:[#allocation3 + $0x40] sm:$0xff] }
 0x49c   : > { %3590 = vst [vmem:[#allocation2 + $0xb8] sm:$0xf] %v3482_v9  ;;  %v3124_v46 = vunpack.c.l.b16 %v3052_v27  ;;  %v2934_v12 = vmul.f32 %v9818_v31, %v2894_v44  ;;  %v4157_v47 = vsel %vm8103_vm2, %v4152_v49, %v4156_v62  ;;  %v5303_v10 = vrot.slane %v5301_v54, 4  ;;  %5012 = vmatpush.bf16.msrb.mxu2 %v7455_v50  ;;  %v10719_v49 = vld [vmem:[#allocation45_spill] sm:$0xff] }
 0x49d   : > { %v4162_v30 = vrot.slane %v4161_v11, 4  ;;  %v2759_v5 = vadd.f32 %v9755_v41, %v9718_v25  ;;  %v4268_v13 = vunpack.c.l.b16 %v4157_v47 }
 0x49e   : > { %v3143_v7 = vpack.c.b16 %v3124_v46, %v3123_v33  ;;  %v2974_v28 = vadd.f32 %v9826_v55, %v2934_v12  ;;  %v4625_v19 = vpop.f32.mrf.mxu2  ;;  %v4709_v22 = vpop.f32.mrf.mxu3  ;;  %v5305_v25 = vsel %vm8857_vm5, %v5303_v10, %v5304_v23  ;;  %v7447_v23 = vld [vmem:[#allocation3] sm:$0xff] }
 0x49f   : > { %v9942_v24 = vadd.f32 %v4625_v19, %v9883_v57  ;;  %v9945_v43 = vadd.f32 %v4709_v22, %v9896_v34  ;;  %v2857_v40 = vpop.f32.mrf.mxu0  ;;  %v4167_v38 = vsel %vm8103_vm2, %v4162_v30, %v4166_v18  ;;  %v5355_v34 = vunpack.c.l.b16 %v9936_v20  ;;  %4923 = vmatpush.bf16.msrb.mxu1 %v7447_v23 }
 0x4a0   : > { %v3258_v41 = vshrl.u32 %v3143_v7, 16  ;;  %v3010_v9 = vmax.f32 %v2974_v28, 0.0  ;;  %v2858_v62 = vadd.f32 %v2857_v40, %v2759_v5  ;;  %v9951_v17 = vld [vmem:[#allocation2 + $0xbc] sm:$0x1]  ;;  %v4269_v57 = vunpack.c.l.b16 %v4167_v38 }
 0x4a1   : > { %v3261_v56 = vshll.u32 %v3143_v7, 16  ;;  %v9955_v11 = vpop.f32.mrf.mxu1  ;;  %v4188_v30 = vshll.u32 %v9951_v17, 16  ;;  %v5356_v5 = vunpack.c.l.b16 %v5305_v25 }
 0x4a2   : > { %v3260_v27 = vrot.slane %v3258_v41, 7  ;;  %v3017_v44 = vmul.f32 0.0, %v3010_v9  ;;  %v2895_v1 = vadd.f32 %v2858_v62, %v10719_v49  ;;  %v3643_v54 = vld [vmem:[#allocation2 + $0xb4] sm:$0xf]  ;;  %v4286_v33 = vpack.c.b16 %v4269_v57, %v4268_v13  ;;  %v7463_v41 = vld [vmem:[#allocation3 + $0x80] sm:$0xff] }
 0x4a3   : > { %v3644_v46 = vld [vmem:[#allocation2 + $0xb8] sm:$0xf]  ;;  %v4169_v12 = vshrl.u32 %v3643_v54, 16  ;;  %v4172_v47 = vshll.u32 %v3643_v54, 16  ;;  %5101 = vmatpush.bf16.msrb.mxu3 %v7463_v41  ;;  %v9970_v23 = vpack.c.b16 %v5356_v5, %v5355_v34 }
 0x4a4   : > { %v3263_v18 = vor.u32 %v3261_v56, %v3260_v27  ;;  %v3344_v10 = vsel %vm9306_vm8, %v3260_v27, 0  ;;  %v2935_v20 = vmul.f32 %v9818_v31, %v2895_v1  ;;  %4667 = vmatmul.bf16.gmra.mxu2 %v4286_v33  ;;  %4751 = vmatmul.bf16.gmra.mxu3 %v4286_v33  ;;  %v4178_v22 = vshll.u32 %v3644_v46, 16 }
 0x4a5   : > { %v3432_v7 = vunpack.c.l.b16 %v3344_v10  ;;  %v4171_v28 = vrot.slane %v4169_v12, 4  ;;  %v4174_v19 = vrot.slane %v4172_v47, 5  ;;  %v3053_v51 = vpack.c.bf16 %v3017_v44, %v3017_v44  ;;  %4583 = vmatmul.bf16.gmra.mxu1 %v4286_v33  ;;  %10720 = vst [vmem:[#allocation49_spill] sm:$0xff] %v9970_v23 }
 0x4a6   : > { %v3326_v13 = vsel %vm9306_vm8, 0, %v3263_v18  ;;  %v2975_v37 = vadd.f32 %v9826_v55, %v2935_v20  ;;  %v4628_v40 = vpop.f32.mrf.mxu2  ;;  %v4712_v38 = vpop.f32.mrf.mxu3  ;;  %v4182_v50 = vshrl.u32 %v3644_v46, 16  ;;  %v4180_v49 = vrot.slane %v4178_v22, 5 }
 0x4a7   : > { %v3430_v31 = vunpack.c.l.b16 %v3326_v13  ;;  %v3431_v9 = vunpack.c.h.b16 %v3326_v13  ;;  %v3486_v25 = vpack.c.b16 %v3432_v7, %v3432_v7  ;;  %v9965_v62 = vadd.f32 %v4628_v40, %v9908_v6 }
 0x4a8   : > { %v3011_v57 = vmax.f32 %v2975_v37, 0.0  ;;  %v9968_v27 = vadd.f32 %v4712_v38, %v9920_v0  ;;  %v4175_v56 = vor.u32 %v4174_v19, %v4171_v28  ;;  %v4184_v1 = vrot.slane %v4182_v50, 4 }
 0x4a9   : > { %v3484_v44 = vpack.c.b16 %v3430_v31, %v3430_v31  ;;  %v3485_v55 = vpack.c.b16 %v3431_v9, %v3431_v9  ;;  %3594 = vst [vmem:[#allocation2 + $0xc8] sm:$0x1] %v3486_v25  ;;  %v9972_v12 = vpop.f32.mrf.mxu1  ;;  %v7201_v47 = vrot.slane %v3643_v54, 9  ;;  %v5308_v18 = vrot.slane %v3644_v46, 5 }
 0x4aa   : > { %v3018_v33 = vmul.f32 0.0, %v3011_v57  ;;  %5640 = vmatmul.bf16.gmra.mxu0 %v9695_v4  ;;  %v4176_v6 = vrot.slane %v4175_v56, 4  ;;  %v4185_v0 = vor.u32 %v4184_v1, %v4180_v49  ;;  %v5311_v10 = vrot.slane %v9951_v17, 5 }
 0x4ab   : > { %3592 = vst [vmem:[#allocation2 + $0xc0] sm:$0xf] %v3484_v44  ;;  %v5309_v34 = vsel %vm8857_vm5, %v7201_v47, %v5308_v18  ;;  %v5310_v5 = vrot.slane %v5308_v18, 4  ;;  %v3125_v28 = vunpack.c.l.b16 %v3053_v51  ;;  %v4190_v22 = vrot.slane %v4188_v30, 5 }
 0x4ac   : > { %3593 = vst [vmem:[#allocation2 + $0xc4] sm:$0xf] %v3485_v55  ;;  %v3054_v20 = vpack.c.bf16 %v3018_v33, %v3018_v33  ;;  %v4181_v7 = vsel %vm8103_vm2, %v4176_v6, %v4180_v49  ;;  %v4186_v19 = vrot.slane %v4185_v0, 4  ;;  %v5357_v17 = vunpack.c.l.b16 %v5309_v34 }
 0x4ad   : > { %v4270_v46 = vunpack.c.l.b16 %v4181_v7  ;;  %v5312_v40 = vsel %vm8857_vm5, %v5310_v5, %v5311_v10 }
 0x4ae   : > { %v3126_v13 = vunpack.c.l.b16 %v3054_v20  ;;  %v4630_v37 = vpop.f32.mrf.mxu2  ;;  %v4714_v54 = vpop.f32.mrf.mxu3  ;;  %v4191_v41 = vsel %vm8103_vm2, %v4186_v19, %v4190_v22  ;;  %v5358_v51 = vunpack.c.l.b16 %v5312_v40 }
 0x4af   : > { %v9983_v38 = vadd.f32 %v4630_v37, %v9927_v48  ;;  %v9986_v50 = vadd.f32 %v4714_v54, %v9942_v24  ;;  %v4271_v30 = vunpack.c.l.b16 %v4191_v41 }
 0x4b0   : > { %v3144_v31 = vpack.c.b16 %v3126_v13, %v3125_v28  ;;  %v3648_v9 = vld [vmem:[#allocation2 + $0xc8] sm:$0x1]  ;;  %v9990_v25 = vpack.c.b16 %v5358_v51, %v5357_v17 }
 0x4b1   : > { %v9992_v56 = vpop.f32.mrf.mxu1  ;;  %v4287_v49 = vpack.c.b16 %v4271_v30, %v4270_v46  ;;  %v4212_v24 = vshll.u32 %v3648_v9, 16  ;;  %v5318_v34 = vrot.slane %v3648_v9, 5 }
 0x4b2   : > { %10721 = vst [vmem:[#allocation47_spill] sm:$0xff] %v9990_v25  ;;  %v3265_v57 = vshrl.u32 %v3144_v31, 16  ;;  %v3646_v44 = vld [vmem:[#allocation2 + $0xc0] sm:$0xf]  ;;  %v3268_v55 = vshll.u32 %v3144_v31, 16 }
 0x4b3   : > { %v3647_v48 = vld [vmem:[#allocation2 + $0xc4] sm:$0xf]  ;;  %v4193_v1 = vshrl.u32 %v3646_v44, 16  ;;  %v4196_v33 = vshll.u32 %v3646_v44, 16  ;;  %v7202_v0 = vrot.slane %v3646_v44, 9 }
 0x4b4   : > { %v3267_v6 = vrot.slane %v3265_v57, 7  ;;  %v4202_v47 = vshll.u32 %v3647_v48, 16  ;;  %v4206_v18 = vshrl.u32 %v3647_v48, 16  ;;  %4672 = vmatmul.bf16.gmra.mxu2 %v4287_v49  ;;  %4756 = vmatmul.bf16.gmra.mxu3 %v4287_v49  ;;  %v5315_v7 = vrot.slane %v3647_v48, 5 }
 0x4b5   : > { %v4195_v10 = vrot.slane %v4193_v1, 4  ;;  %v4198_v20 = vrot.slane %v4196_v33, 5  ;;  %4588 = vmatmul.bf16.gmra.mxu1 %v4287_v49 }
 0x4b6   : > { %v3270_v5 = vor.u32 %v3268_v55, %v3267_v6  ;;  %v3345_v28 = vsel %vm9306_vm8, %v3267_v6, 0  ;;  %v4633_v19 = vpop.f32.mrf.mxu2  ;;  %v4717_v22 = vpop.f32.mrf.mxu3  ;;  %v4204_v13 = vrot.slane %v4202_v47, 5  ;;  %v4208_v37 = vrot.slane %v4206_v18, 4 }
 0x4b7   : > { %v3435_v54 = vunpack.c.l.b16 %v3345_v28  ;;  %v4634_v46 = vadd.f32 %v4633_v19, %v9955_v11  ;;  %v9998_v40 = vadd.f32 %v4717_v22, %v9965_v62  ;;  %v4199_v17 = vor.u32 %v4198_v20, %v4195_v10  ;;  %v7518_v28 = vld [vmem:[#allocation3 + $0x238] sm:$0xff] }
 0x4b8   : > { %v3327_v41 = vsel %vm9306_vm8, 0, %v3270_v5  ;;  %v4209_v51 = vor.u32 %v4208_v37, %v4204_v13  ;;  %v5316_v31 = vsel %vm8857_vm5, %v7202_v0, %v5315_v7  ;;  %v5317_v30 = vrot.slane %v5315_v7, 4  ;;  %5770 = vmatpush.bf16.msra.mxu2 %v7518_v28  ;;  %v7429_v37 = vld [vmem:[#allocation2] sm:$0xff] }
 0x4b9   : > { %v3433_v9 = vunpack.c.l.b16 %v3327_v41  ;;  %v3434_v57 = vunpack.c.h.b16 %v3327_v41  ;;  %v3489_v49 = vpack.c.b16 %v3435_v54, %v3435_v54  ;;  %v4200_v44 = vrot.slane %v4199_v17, 4  ;;  %v10004_v55 = vpop.f32.mrf.mxu1 }
 0x4ba   : > { %5645 = vmatmul.bf16.gmra.mxu0 %v9727_v53  ;;  %v4210_v11 = vrot.slane %v4209_v51, 4  ;;  %v4214_v62 = vrot.slane %v4212_v24, 5  ;;  %v5319_v48 = vsel %vm8857_vm5, %v5317_v30, %v5318_v34  ;;  %v5391_v29 = vunpack.c.l.b16 %v5316_v31 }
 0x4bb   : > { %v3487_v1 = vpack.c.b16 %v3433_v9, %v3433_v9  ;;  %v3488_v33 = vpack.c.b16 %v3434_v57, %v3434_v57  ;;  %3597 = vst [vmem:[#allocation2 + $0xd4] sm:$0x1] %v3489_v49  ;;  %v4205_v6 = vsel %vm8103_vm2, %v4200_v44, %v4204_v13  ;;  %v5392_v47 = vunpack.c.l.b16 %v5319_v48  ;;  %v7510_v49 = vld [vmem:[#allocation3 + $0x1f8] sm:$0xff]  ;;  %v7526_v44 = vld [vmem:[%s10543_s7 + $0x38] sm:$0xff] }
 0x4bc   : > { %v4215_v18 = vsel %vm8103_vm2, %v4210_v11, %v4214_v62  ;;  %v4304_v0 = vunpack.c.l.b16 %v4205_v6  ;;  %5681 = vmatpush.bf16.msra.mxu1 %v7510_v49  ;;  %6027 = vmatpush.bf16.msra.mxu3 %v7526_v44  ;;  %v10039_v44 = vpop.f32.mrf.mxu0 }
 0x4bd   : > { %3595 = vst [vmem:[#allocation2 + $0xcc] sm:$0xf] %v3487_v1  ;;  %v4305_v10 = vunpack.c.l.b16 %v4215_v18  ;;  %v10013_v20 = vpack.c.b16 %v5392_v47, %v5391_v29 }
 0x4be   : > { %3596 = vst [vmem:[#allocation2 + $0xd0] sm:$0xf] %v3488_v33  ;;  %v4635_v24 = vpop.f32.mrf.mxu2  ;;  %v4719_v7 = vpop.f32.mrf.mxu3 }
 0x4bf   : > { %10722 = vst [vmem:[#allocation48_spill] sm:$0xff] %v10013_v20  ;;  %v4636_v34 = vadd.f32 %v4635_v24, %v9972_v12  ;;  %v10017_v5 = vadd.f32 %v4719_v7, %v9983_v38  ;;  %v4306_v19 = vpack.c.b16 %v4305_v10, %v4304_v0 }
 0x4c1   : > { %v4554_v22 = vpop.f32.mrf.mxu1 }
 0x4c2   : > { %v3651_v13 = vld [vmem:[#allocation2 + $0xd4] sm:$0x1] }
 0x4c3   : > { %v4236_v31 = vshll.u32 %v3651_v13, 16  ;;  %v5325_v30 = vrot.slane %v3651_v13, 5 }
 0x4c4   : > { %v3649_v54 = vld [vmem:[#allocation2 + $0xcc] sm:$0xf]  ;;  %4677 = vmatmul.bf16.gmra.mxu2 %v4306_v19  ;;  %4761 = vmatmul.bf16.gmra.mxu3 %v4306_v19 }
 0x4c5   : > { %v3650_v17 = vld [vmem:[#allocation2 + $0xd0] sm:$0xf]  ;;  %v4217_v41 = vshrl.u32 %v3649_v54, 16  ;;  %v4220_v51 = vshll.u32 %v3649_v54, 16  ;;  %4924 = vmatmul.bf16.vlgmr.msrb.gmra.mxu1 %v7429_v37  ;;  %v7203_v11 = vrot.slane %v3649_v54, 9  ;;  %v4238_v37 = vrot.slane %v4236_v31, 5 }
 0x4c6   : > { %v4638_v9 = vpop.f32.mrf.mxu2  ;;  %v4722_v12 = vpop.f32.mrf.mxu3  ;;  %v4226_v57 = vshll.u32 %v3650_v17, 16  ;;  %v4230_v38 = vshrl.u32 %v3650_v17, 16  ;;  %v5322_v62 = vrot.slane %v3650_v17, 5  ;;  %v7430_v31 = vld [vmem:[#allocation2 + $0xc] sm:$0xff] }
 0x4c7   : > { %v4639_v48 = vadd.f32 %v4638_v9, %v9992_v56  ;;  %v10023_v29 = vadd.f32 %v4722_v12, %v4634_v46  ;;  %v4219_v1 = vrot.slane %v4217_v41, 4  ;;  %v4222_v33 = vrot.slane %v4220_v51, 5 }
 0x4c8   : > { %v4228_v6 = vrot.slane %v4226_v57, 5  ;;  %v4232_v47 = vrot.slane %v4230_v38, 4  ;;  %v5323_v18 = vsel %vm8857_vm5, %v7203_v11, %v5322_v62  ;;  %v5324_v0 = vrot.slane %v5322_v62, 4 }
 0x4c9   : > { %v4223_v10 = vor.u32 %v4222_v33, %v4219_v1  ;;  %v4556_v24 = vpop.f32.mrf.mxu1  ;;  %v5395_v28 = vunpack.c.l.b16 %v5323_v18 }
 0x4ca   : > { %5650 = vmatmul.bf16.gmra.mxu0 %v9763_v16  ;;  %v4233_v7 = vor.u32 %v4232_v47, %v4228_v6  ;;  %v5326_v56 = vsel %vm8857_vm5, %v5324_v0, %v5325_v30  ;;  %v7517_v0 = vld [vmem:[#allocation3 + $0x230] sm:$0xff] }
 0x4cb   : > { %v4224_v46 = vrot.slane %v4223_v10, 4  ;;  %v5396_v19 = vunpack.c.l.b16 %v5326_v56  ;;  %5771 = vmatpush.bf16.msra.mxu2 %v7517_v0 }
 0x4cc   : > { %v4234_v13 = vrot.slane %v4233_v7, 4  ;;  %v7431_v7 = vld [vmem:[#allocation2 + $0x18] sm:$0xff] }
 0x4cd   : > { %v4229_v54 = vsel %vm8103_vm2, %v4224_v46, %v4228_v6  ;;  %v10032_v17 = vpack.c.b16 %v5396_v19, %v5395_v28 }
 0x4ce   : > { %v4640_v41 = vpop.f32.mrf.mxu2  ;;  %v4724_v51 = vpop.f32.mrf.mxu3  ;;  %v4239_v9 = vsel %vm8103_vm2, %v4234_v13, %v4238_v37  ;;  %v4308_v12 = vunpack.c.l.b16 %v4229_v54 }
 0x4cf   : > { %10723 = vst [vmem:[#allocation54_spill] sm:$0xff] %v10032_v17  ;;  %v4641_v57 = vadd.f32 %v4640_v41, %v10004_v55  ;;  %v10037_v45 = vadd.f32 %v4724_v51, %v4636_v34  ;;  %v4309_v30 = vunpack.c.l.b16 %v4239_v9  ;;  %v10044_v55 = vpop.f32.mrf.mxu0  ;;  %v7435_v17 = vld [vmem:[#allocation2 + $0x48] sm:$0xff] }
 0x4d1   : > { %v4310_v38 = vpack.c.b16 %v4309_v30, %v4308_v12  ;;  %v4559_v49 = vpop.f32.mrf.mxu1 }
 0x4d4   : > { %5013 = vmatmul.bf16.vlgmr.msrb.gmra.mxu2 %v7430_v31  ;;  %4766 = vmatmul.bf16.gmra.mxu3 %v4310_v38 }
 0x4d5   : > { %4929 = vmatmul.bf16.gmra.mxu1 %v7430_v31 }
 0x4d6   : > { %v4643_v11 = vpop.f32.mrf.mxu2  ;;  %v4727_v62 = vpop.f32.mrf.mxu3 }
 0x4d7   : > { %v4644_v1 = vadd.f32 %v4643_v11, %v4554_v22  ;;  %v10041_v33 = vadd.f32 %v4727_v62, %v4639_v48  ;;  %v7509_v22 = vld [vmem:[#allocation3 + $0x1f0] sm:$0xff]  ;;  %v7525_v48 = vld [vmem:[%s10543_s7 + $0x30] sm:$0xff]  ;;  %v10051_v56 = vpop.f32.mrf.mxu0 }
 0x4d8   : > { %5682 = vmatpush.bf16.msra.mxu1 %v7509_v22  ;;  %6028 = vmatpush.bf16.msra.mxu3 %v7525_v48  ;;  %v7524_v48 = vld [vmem:[%s10543_s7 + $0x28] sm:$0xff] }
 0x4d9   : > { %v4561_v52 = vpop.f32.mrf.mxu1 }
 0x4da   : > { %5655 = vmatmul.bf16.gmra.mxu0 %v9829_v8 }
 0x4dc   : > { %6029 = vmatpush.bf16.msra.mxu3 %v7524_v48 }
 0x4de   : > { %v4645_v34 = vpop.f32.mrf.mxu2  ;;  %v4729_v6 = vpop.f32.mrf.mxu3 }
 0x4df   : > { %v4646_v47 = vadd.f32 %v4645_v34, %v4556_v24  ;;  %v10046_v18 = vadd.f32 %v4729_v6, %v4641_v57  ;;  %v10056_v41 = vpop.f32.mrf.mxu0  ;;  %v7432_v57 = vld [vmem:[#allocation2 + $0x24] sm:$0xff] }
 0x4e2   : > { %v4564_v10 = vpop.f32.mrf.mxu1 }
 0x4e4   : > { %5018 = vmatmul.bf16.gmra.mxu2 %v7431_v7  ;;  %5102 = vmatmul.bf16.vlgmr.msrb.gmra.mxu3 %v7431_v7 }
 0x4e5   : > { %4934 = vmatmul.bf16.gmra.mxu1 %v7431_v7  ;;  %v7433_v7 = vld [vmem:[#allocation2 + $0x30] sm:$0xff] }
 0x4e7   : > { %v4648_v46 = vpop.f32.mrf.mxu2  ;;  %v4732_v28 = vpop.f32.mrf.mxu3 }
 0x4e8   : > { %v4649_v24 = vadd.f32 %v4648_v46, %v4559_v49  ;;  %v10053_v19 = vadd.f32 %v4732_v28, %v4644_v1  ;;  %v10063_v11 = vpop.f32.mrf.mxu0 }
 0x4e9   : > { %10724 = vst [vmem:[#allocation51_spill] sm:$0xff] %v10063_v11  ;;  %v7439_v11 = vld [vmem:[#allocation2 + $0x78] sm:$0xff] }
 0x4ea   : > { %5660 = vmatmul.bf16.gmra.mxu0 %v9873_v36  ;;  %v4566_v13 = vpop.f32.mrf.mxu1 }
 0x4ef   : > { %v4650_v37 = vpop.f32.mrf.mxu2  ;;  %v4734_v54 = vpop.f32.mrf.mxu3 }
 0x4f0   : > { %v4651_v51 = vadd.f32 %v4650_v37, %v4561_v52  ;;  %v10058_v9 = vadd.f32 %v4734_v54, %v4646_v47  ;;  %v7516_v47 = vld [vmem:[#allocation3 + $0x228] sm:$0xff]  ;;  %v10067_v22 = vpop.f32.mrf.mxu0 }
 0x4f1   : > { %5772 = vmatpush.bf16.msra.mxu2 %v7516_v47  ;;  %10725 = vst [vmem:[#allocation52_spill] sm:$0xff] %v10067_v22 }
 0x4f2   : > { %v4569_v12 = vpop.f32.mrf.mxu1 }
 0x4f4   : > { %5023 = vmatmul.bf16.gmra.mxu2 %v7432_v57  ;;  %5107 = vmatmul.bf16.gmra.mxu3 %v7432_v57 }
 0x4f5   : > { %4939 = vmatmul.bf16.gmra.mxu1 %v7432_v57 }
 0x4f7   : > { %v4653_v30 = vpop.f32.mrf.mxu2  ;;  %v4737_v38 = vpop.f32.mrf.mxu3 }
 0x4f8   : > { %v4654_v49 = vadd.f32 %v4653_v30, %v4564_v10  ;;  %v10060_v31 = vadd.f32 %v4737_v38, %v4649_v24  ;;  %v7508_v10 = vld [vmem:[#allocation3 + $0x1e8] sm:$0xff]  ;;  %v10075_v54 = vpop.f32.mrf.mxu0 }
 0x4f9   : > { %5683 = vmatpush.bf16.msra.mxu1 %v7508_v10  ;;  %10726 = vst [vmem:[#allocation53_spill] sm:$0xff] %v10075_v54 }
 0x4fa   : > { %5665 = vmatmul.bf16.gmra.mxu0 %v9917_v61  ;;  %v4571_v62 = vpop.f32.mrf.mxu1 }
 0x4ff   : > { %v4655_v1 = vpop.f32.mrf.mxu2  ;;  %v4739_v34 = vpop.f32.mrf.mxu3 }
 0x500   : > { %v4656_v52 = vadd.f32 %v4655_v1, %v4566_v13  ;;  %v10065_v6 = vadd.f32 %v4739_v34, %v4651_v51  ;;  %v7434_v34 = vld [vmem:[#allocation2 + $0x3c] sm:$0xff]  ;;  %v10081_v10 = vpop.f32.mrf.mxu0 }
 0x501   : > { %10727 = vst [vmem:[#allocation55_spill] sm:$0xff] %v10081_v10 }
 0x502   : > { %v4574_v0 = vpop.f32.mrf.mxu1 }
 0x504   : > { %5028 = vmatmul.bf16.gmra.mxu2 %v7433_v7  ;;  %5112 = vmatmul.bf16.gmra.mxu3 %v7433_v7 }
 0x505   : > { %4944 = vmatmul.bf16.gmra.mxu1 %v7433_v7 }
 0x507   : > { %v4658_v46 = vpop.f32.mrf.mxu2  ;;  %v4742_v28 = vpop.f32.mrf.mxu3 }
 0x508   : > { %v4659_v24 = vadd.f32 %v4658_v46, %v4569_v12  ;;  %v10072_v13 = vadd.f32 %v4742_v28, %v4654_v49 }
 0x50a   : > { %5670 = vmatmul.bf16.gmra.mxu0 %v9970_v23  ;;  %v4576_v37 = vpop.f32.mrf.mxu1 }
 0x50f   : > { %v4660_v51 = vpop.f32.mrf.mxu2  ;;  %v4744_v57 = vpop.f32.mrf.mxu3 }
 0x510   : > { %v4661_v30 = vadd.f32 %v4660_v51, %v4571_v62  ;;  %v10077_v38 = vadd.f32 %v4744_v57, %v4656_v52  ;;  %v7515_v51 = vld [vmem:[#allocation3 + $0x220] sm:$0xff] }
 0x511   : > { %5773 = vmatpush.bf16.msra.mxu2 %v7515_v51 }
 0x512   : > { %v4579_v1 = vpop.f32.mrf.mxu1 }
 0x514   : > { %5033 = vmatmul.bf16.gmra.mxu2 %v7434_v34  ;;  %5117 = vmatmul.bf16.gmra.mxu3 %v7434_v34 }
 0x515   : > { %4949 = vmatmul.bf16.gmra.mxu1 %v7434_v34 }
 0x517   : > { %v4663_v47 = vpop.f32.mrf.mxu2  ;;  %v4747_v7 = vpop.f32.mrf.mxu3 }
 0x518   : > { %v4664_v12 = vadd.f32 %v4663_v47, %v4574_v0  ;;  %v10079_v49 = vadd.f32 %v4747_v7, %v4659_v24  ;;  %v7507_v0 = vld [vmem:[#allocation3 + $0x1e0] sm:$0xff]  ;;  %v7523_v24 = vld [vmem:[%s10543_s7 + $0x20] sm:$0xff] }
 0x519   : > { %5684 = vmatpush.bf16.msra.mxu1 %v7507_v0  ;;  %6030 = vmatpush.bf16.msra.mxu3 %v7523_v24 }
 0x51a   : > { %5675 = vmatmul.bf16.gmra.mxu0 %v9990_v25  ;;  %v4581_v48 = vpop.f32.mrf.mxu1 }
 0x51f   : > { %v4665_v46 = vpop.f32.mrf.mxu2  ;;  %v4749_v28 = vpop.f32.mrf.mxu3 }
 0x520   : > { %v4666_v62 = vadd.f32 %v4665_v46, %v4576_v37  ;;  %v10084_v52 = vadd.f32 %v4749_v28, %v4661_v30 }
 0x522   : > { %v4584_v57 = vpop.f32.mrf.mxu1 }
 0x524   : > { %5038 = vmatmul.bf16.gmra.mxu2 %v7435_v17  ;;  %5122 = vmatmul.bf16.gmra.mxu3 %v7435_v17 }
 0x525   : > { %4954 = vmatmul.bf16.gmra.mxu1 %v7435_v17  ;;  %v7436_v17 = vld [vmem:[#allocation2 + $0x54] sm:$0xff] }
 0x527   : > { %v4668_v34 = vpop.f32.mrf.mxu2  ;;  %v4752_v47 = vpop.f32.mrf.mxu3 }
 0x528   : > { %v4669_v7 = vadd.f32 %v4668_v34, %v4579_v1  ;;  %v10089_v37 = vadd.f32 %v4752_v47, %v4664_v12  ;;  %v7514_v47 = vld [vmem:[#allocation3 + $0x218] sm:$0xff] }
 0x529   : > { %5774 = vmatpush.bf16.msra.mxu2 %v7514_v47 }
 0x52a   : > { %v4586_v30 = vpop.f32.mrf.mxu1 }
 0x52f   : > { %v4670_v46 = vpop.f32.mrf.mxu2  ;;  %v4754_v28 = vpop.f32.mrf.mxu3 }
 0x530   : > { %v4671_v20 = vadd.f32 %v4670_v46, %v4581_v48  ;;  %v10091_v51 = vadd.f32 %v4754_v28, %v4666_v62  ;;  %v7437_v62 = vld [vmem:[#allocation2 + $0x60] sm:$0xff]  ;;  %v7506_v28 = vld [vmem:[#allocation3 + $0x1d8] sm:$0xff] }
 0x531   : > { %5685 = vmatpush.bf16.msra.mxu1 %v7506_v28 }
 0x532   : > { %v4589_v25 = vpop.f32.mrf.mxu1 }
 0x534   : > { %5043 = vmatmul.bf16.gmra.mxu2 %v7436_v17  ;;  %5127 = vmatmul.bf16.gmra.mxu3 %v7436_v17 }
 0x535   : > { %4959 = vmatmul.bf16.gmra.mxu1 %v7436_v17 }
 0x537   : > { %v4673_v23 = vpop.f32.mrf.mxu2  ;;  %v4757_v10 = vpop.f32.mrf.mxu3 }
 0x538   : > { %v4674_v54 = vadd.f32 %v4673_v23, %v4584_v57  ;;  %v10093_v61 = vadd.f32 %v4757_v10, %v4669_v7  ;;  %v7522_v23 = vld [vmem:[%s10543_s7 + $0x18] sm:$0xff] }
 0x539   : > { %6031 = vmatpush.bf16.msra.mxu3 %v7522_v23 }
 0x53a   : > { %v4591_v0 = vpop.f32.mrf.mxu1 }
 0x53f   : > { %v4675_v1 = vpop.f32.mrf.mxu2  ;;  %v4759_v12 = vpop.f32.mrf.mxu3 }
 0x540   : > { %v4676_v24 = vadd.f32 %v4675_v1, %v4586_v30  ;;  %v10095_v34 = vadd.f32 %v4759_v12, %v4671_v20 }
 0x542   : > { %v4925_v48 = vpop.f32.mrf.mxu1 }
 0x543   : > { %v4926_v46 = vadd.f32 %v4925_v48, %v9781_v35 }
 0x544   : > { %5048 = vmatmul.bf16.gmra.mxu2 %v7437_v62  ;;  %5132 = vmatmul.bf16.gmra.mxu3 %v7437_v62 }
 0x545   : > { %4964 = vmatmul.bf16.gmra.mxu1 %v7437_v62  ;;  %v7438_v62 = vld [vmem:[#allocation2 + $0x6c] sm:$0xff] }
 0x547   : > { %v4678_v10 = vpop.f32.mrf.mxu2  ;;  %v4762_v57 = vpop.f32.mrf.mxu3 }
 0x548   : > { %v4679_v20 = vadd.f32 %v4678_v10, %v4589_v25  ;;  %v10101_v7 = vadd.f32 %v4762_v57, %v4674_v54 }
 0x54a   : > { %v4927_v30 = vpop.f32.mrf.mxu1 }
 0x54b   : > { %v4928_v17 = vadd.f32 %v4927_v30, %v9801_v60 }
 0x54f   : > { %v4680_v1 = vpop.f32.mrf.mxu2  ;;  %v4764_v35 = vpop.f32.mrf.mxu3 }
 0x550   : > { %v4681_v12 = vadd.f32 %v4680_v1, %v4591_v0  ;;  %v10104_v47 = vadd.f32 %v4764_v35, %v4676_v24  ;;  %v7513_v1 = vld [vmem:[#allocation3 + $0x210] sm:$0xff] }
 0x551   : > { %5775 = vmatpush.bf16.msra.mxu2 %v7513_v1 }
 0x552   : > { %v4930_v48 = vpop.f32.mrf.mxu1 }
 0x553   : > { %v4931_v22 = vadd.f32 %v4930_v48, %v9835_v42 }
 0x554   : > { %5053 = vmatmul.bf16.gmra.mxu2 %v7438_v62  ;;  %5137 = vmatmul.bf16.gmra.mxu3 %v7438_v62 }
 0x555   : > { %4969 = vmatmul.bf16.gmra.mxu1 %v7438_v62 }
 0x557   : > { %v5014_v28 = vpop.f32.mrf.mxu2  ;;  %v4767_v23 = vpop.f32.mrf.mxu3 }
 0x558   : > { %v5015_v25 = vadd.f32 %v5014_v28, %v4926_v46  ;;  %v10107_v54 = vadd.f32 %v4767_v23, %v4679_v20  ;;  %v7505_v46 = vld [vmem:[#allocation3 + $0x1d0] sm:$0xff]  ;;  %v7521_v20 = vld [vmem:[%s10543_s7 + $0x10] sm:$0xff] }
 0x559   : > { %5686 = vmatpush.bf16.msra.mxu1 %v7505_v46  ;;  %6032 = vmatpush.bf16.msra.mxu3 %v7521_v20 }
 0x55a   : > { %v4932_v10 = vpop.f32.mrf.mxu1 }
 0x55b   : > { %v4933_v60 = vadd.f32 %v4932_v10, %v9855_v26 }
 0x55f   : > { %v5016_v57 = vpop.f32.mrf.mxu2  ;;  %v4769_v30 = vpop.f32.mrf.mxu3 }
 0x560   : > { %v5017_v0 = vadd.f32 %v5016_v57, %v4928_v17  ;;  %v10110_v24 = vadd.f32 %v4769_v30, %v4681_v12  ;;  %v7440_v30 = vld [vmem:[#allocation2 + $0x84] sm:$0xff] }
 0x562   : > { %v4935_v35 = vpop.f32.mrf.mxu1 }
 0x563   : > { %v4936_v42 = vadd.f32 %v4935_v35, %v9879_v2 }
 0x564   : > { %5058 = vmatmul.bf16.gmra.mxu2 %v7439_v11  ;;  %5142 = vmatmul.bf16.gmra.mxu3 %v7439_v11 }
 0x565   : > { %4974 = vmatmul.bf16.gmra.mxu1 %v7439_v11 }
 0x567   : > { %v5019_v26 = vpop.f32.mrf.mxu2  ;;  %v5103_v48 = vpop.f32.mrf.mxu3 }
 0x568   : > { %v5020_v17 = vadd.f32 %v5019_v26, %v4931_v22  ;;  %v10116_v12 = vadd.f32 %v5103_v48, %v5015_v25 }
 0x56a   : > { %v4937_v62 = vpop.f32.mrf.mxu1 }
 0x56b   : > { %v4938_v28 = vadd.f32 %v4937_v62, %v9899_v58  ;;  %v7512_v62 = vld [vmem:[#allocation3 + $0x208] sm:$0xff] }
 0x56c   : > { %5776 = vmatpush.bf16.msra.mxu2 %v7512_v62  ;;  %v7442_v62 = vld [vmem:[#allocation2 + $0x9c] sm:$0xff] }
 0x56f   : > { %v5021_v23 = vpop.f32.mrf.mxu2  ;;  %v5105_v2 = vpop.f32.mrf.mxu3 }
 0x570   : > { %v5022_v10 = vadd.f32 %v5021_v23, %v4933_v60  ;;  %v10119_v57 = vadd.f32 %v5105_v2, %v5017_v0  ;;  %v7441_v2 = vld [vmem:[#allocation2 + $0x90] sm:$0xff] }
 0x572   : > { %v4940_v11 = vpop.f32.mrf.mxu1 }
 0x573   : > { %v4941_v1 = vadd.f32 %v4940_v11, %v9923_v15 }
 0x574   : > { %5063 = vmatmul.bf16.gmra.mxu2 %v7440_v30  ;;  %5147 = vmatmul.bf16.gmra.mxu3 %v7440_v30 }
 0x575   : > { %4979 = vmatmul.bf16.gmra.mxu1 %v7440_v30 }
 0x577   : > { %v5024_v35 = vpop.f32.mrf.mxu2  ;;  %v5108_v46 = vpop.f32.mrf.mxu3 }
 0x578   : > { %v5025_v22 = vadd.f32 %v5024_v35, %v4936_v42  ;;  %v10122_v25 = vadd.f32 %v5108_v46, %v5020_v17  ;;  %v7504_v42 = vld [vmem:[#allocation3 + $0x1c8] sm:$0xff]  ;;  %v7520_v17 = vld [vmem:[%s10543_s7 + $0x8] sm:$0xff] }
 0x579   : > { %5687 = vmatpush.bf16.msra.mxu1 %v7504_v42  ;;  %6033 = vmatpush.bf16.msra.mxu3 %v7520_v17 }
 0x57a   : > { %v4942_v20 = vpop.f32.mrf.mxu1 }
 0x57b   : > { %v4943_v58 = vadd.f32 %v4942_v20, %v9945_v43 }
 0x57f   : > { %v5026_v26 = vpop.f32.mrf.mxu2  ;;  %v5110_v48 = vpop.f32.mrf.mxu3 }
 0x580   : > { %v5027_v60 = vadd.f32 %v5026_v26, %v4938_v28  ;;  %v10125_v0 = vadd.f32 %v5110_v48, %v5022_v10 }
 0x582   : > { %v4945_v23 = vpop.f32.mrf.mxu1 }
 0x583   : > { %v4946_v15 = vadd.f32 %v4945_v23, %v9968_v27 }
 0x584   : > { %5068 = vmatmul.bf16.gmra.mxu2 %v7441_v2  ;;  %5152 = vmatmul.bf16.gmra.mxu3 %v7441_v2 }
 0x585   : > { %4984 = vmatmul.bf16.gmra.mxu1 %v7441_v2 }
 0x587   : > { %v5029_v43 = vpop.f32.mrf.mxu2  ;;  %v5113_v11 = vpop.f32.mrf.mxu3 }
 0x588   : > { %v5030_v28 = vadd.f32 %v5029_v43, %v4941_v1  ;;  %v10131_v10 = vadd.f32 %v5113_v11, %v5025_v22 }
 0x58a   : > { %v4947_v30 = vpop.f32.mrf.mxu1 }
 0x58b   : > { %v4948_v35 = vadd.f32 %v4947_v30, %v9986_v50  ;;  %v7511_v30 = vld [vmem:[#allocation3 + $0x200] sm:$0xff] }
 0x58c   : > { %5777 = vmatpush.bf16.msra.mxu2 %v7511_v30  ;;  %v7444_v30 = vld [vmem:[#allocation2 + $0xb4] sm:$0xff] }
 0x58f   : > { %v5031_v46 = vpop.f32.mrf.mxu2  ;;  %v5115_v27 = vpop.f32.mrf.mxu3 }
 0x590   : > { %v5032_v20 = vadd.f32 %v5031_v46, %v4943_v58  ;;  %v10134_v26 = vadd.f32 %v5115_v27, %v5027_v60  ;;  %v7443_v27 = vld [vmem:[#allocation2 + $0xa8] sm:$0xff] }
 0x592   : > { %v4950_v48 = vpop.f32.mrf.mxu1 }
 0x593   : > { %v4951_v23 = vadd.f32 %v4950_v48, %v9998_v40  ;;  %v7503_v48 = vld [vmem:[#allocation3 + $0x1c0] sm:$0xff] }
 0x594   : > { %5073 = vmatmul.bf16.gmra.mxu2 %v7442_v62  ;;  %5157 = vmatmul.bf16.gmra.mxu3 %v7442_v62 }
 0x595   : > { %4989 = vmatmul.bf16.gmra.mxu1 %v7442_v62 }
 0x596   : > { %5688 = vmatpush.bf16.msra.mxu1 %v7503_v48 }
 0x597   : > { %v5034_v2 = vpop.f32.mrf.mxu2  ;;  %v5118_v42 = vpop.f32.mrf.mxu3 }
 0x598   : > { %v5035_v1 = vadd.f32 %v5034_v2, %v4946_v15  ;;  %v10137_v22 = vadd.f32 %v5118_v42, %v5030_v28  ;;  %v7519_v15 = vld [vmem:[%s10543_s7] sm:$0xff] }
 0x599   : > { %6034 = vmatpush.bf16.msra.mxu3 %v7519_v15 }
 0x59a   : > { %v4952_v17 = vpop.f32.mrf.mxu1 }
 0x59b   : > { %v4953_v50 = vadd.f32 %v4952_v17, %v10017_v5 }
 0x59f   : > { %v5036_v43 = vpop.f32.mrf.mxu2  ;;  %v5120_v11 = vpop.f32.mrf.mxu3 }
 0x5a0   : > { %v5037_v58 = vadd.f32 %v5036_v43, %v4948_v35  ;;  %v10140_v60 = vadd.f32 %v5120_v11, %v5032_v20 }
 0x5a2   : > { %v4955_v46 = vpop.f32.mrf.mxu1 }
 0x5a3   : > { %v4956_v40 = vadd.f32 %v4955_v46, %v10023_v29 }
 0x5a4   : > { %5078 = vmatmul.bf16.gmra.mxu2 %v7443_v27  ;;  %5162 = vmatmul.bf16.gmra.mxu3 %v7443_v27 }
 0x5a5   : > { %4994 = vmatmul.bf16.gmra.mxu1 %v7443_v27 }
 0x5a7   : > { %v5039_v5 = vpop.f32.mrf.mxu2  ;;  %v5123_v28 = vpop.f32.mrf.mxu3 }
 0x5a8   : > { %v5040_v35 = vadd.f32 %v5039_v5, %v4951_v23  ;;  %v10146_v20 = vadd.f32 %v5123_v28, %v5035_v1 }
 0x5aa   : > { %v4957_v62 = vpop.f32.mrf.mxu1 }
 0x5ab   : > { %v4958_v2 = vadd.f32 %v4957_v62, %v10037_v45 }
 0x5af   : > { %v5041_v42 = vpop.f32.mrf.mxu2  ;;  %v5125_v29 = vpop.f32.mrf.mxu3 }
 0x5b0   : > { %v5042_v17 = vadd.f32 %v5041_v42, %v4953_v50  ;;  %v10149_v43 = vadd.f32 %v5125_v29, %v5037_v58  ;;  %v7445_v42 = vld [vmem:[#allocation2 + $0xc0] sm:$0xff] }
 0x5b2   : > { %v4960_v11 = vpop.f32.mrf.mxu1 }
 0x5b3   : > { %v4961_v46 = vadd.f32 %v4960_v11, %v10041_v33 }
 0x5b4   : > { %5083 = vmatmul.bf16.gmra.mxu2 %v7444_v30  ;;  %5167 = vmatmul.bf16.gmra.mxu3 %v7444_v30 }
 0x5b5   : > { %4999 = vmatmul.bf16.gmra.mxu1 %v7444_v30 }
 0x5b7   : > { %v5044_v27 = vpop.f32.mrf.mxu2  ;;  %v5128_v48 = vpop.f32.mrf.mxu3 }
 0x5b8   : > { %v5045_v23 = vadd.f32 %v5044_v27, %v4956_v40  ;;  %v10152_v1 = vadd.f32 %v5128_v48, %v5040_v35 }
 0x5ba   : > { %v4962_v15 = vpop.f32.mrf.mxu1 }
 0x5bb   : > { %v4963_v45 = vadd.f32 %v4962_v15, %v10046_v18 }
 0x5bf   : > { %v5046_v5 = vpop.f32.mrf.mxu2  ;;  %v5130_v28 = vpop.f32.mrf.mxu3 }
 0x5c0   : > { %v5047_v50 = vadd.f32 %v5046_v5, %v4958_v2  ;;  %v10155_v58 = vadd.f32 %v5130_v28, %v5042_v17  ;;  %v7446_v5 = vld [vmem:[#allocation2 + $0xcc] sm:$0xff] }
 0x5c2   : > { %v4965_v62 = vpop.f32.mrf.mxu1 }
 0x5c3   : > { %v4966_v33 = vadd.f32 %v4965_v62, %v10053_v19 }
 0x5c4   : > { %5088 = vmatmul.bf16.gmra.mxu2 %v7445_v42  ;;  %5172 = vmatmul.bf16.gmra.mxu3 %v7445_v42 }
 0x5c5   : > { %5689 = vmatmul.bf16.vlgmr.msra.gmra.mxu1 %v9410_v63 }
 0x5c7   : > { %v5049_v29 = vpop.f32.mrf.mxu2  ;;  %v5133_v40 = vpop.f32.mrf.mxu3 }
 0x5c8   : > { %v5050_v35 = vadd.f32 %v5049_v29, %v4961_v46  ;;  %v10159_v11 = vadd.f32 %v5133_v40, %v5045_v23 }
 0x5ca   : > { %v4967_v30 = vpop.f32.mrf.mxu1 }
 0x5cb   : > { %v4968_v18 = vadd.f32 %v4967_v30, %v10058_v9  ;;  %v10728_v30 = vld [vmem:[#allocation13_spill] sm:$0xff] }
 0x5cf   : > { %v5051_v27 = vpop.f32.mrf.mxu2  ;;  %v5135_v2 = vpop.f32.mrf.mxu3 }
 0x5d0   : > { %v5052_v17 = vadd.f32 %v5051_v27, %v4963_v45  ;;  %v10162_v48 = vadd.f32 %v5135_v2, %v5047_v50 }
 0x5d2   : > { %v4970_v15 = vpop.f32.mrf.mxu1 }
 0x5d3   : > { %v4971_v19 = vadd.f32 %v4970_v15, %v10060_v31 }
 0x5d4   : > { %5778 = vmatmul.bf16.vlgmr.msra.gmra.mxu2 %v9447_v14  ;;  %5177 = vmatmul.bf16.gmra.mxu3 %v7446_v5 }
 0x5d5   : > { %5694 = vmatmul.bf16.gmra.mxu1 %v9447_v14 }
 0x5d7   : > { %v5054_v63 = vpop.f32.mrf.mxu2  ;;  %v5138_v46 = vpop.f32.mrf.mxu3 }
 0x5d8   : > { %v5055_v23 = vadd.f32 %v5054_v63, %v4966_v33  ;;  %v10167_v28 = vadd.f32 %v5138_v46, %v5050_v35  ;;  %v10729_v46 = vld [vmem:[#allocation15_spill] sm:$0xff] }
 0x5da   : > { %v4972_v9 = vpop.f32.mrf.mxu1 }
 0x5db   : > { %v4973_v62 = vadd.f32 %v4972_v9, %v10065_v6 }
 0x5df   : > { %v5056_v45 = vpop.f32.mrf.mxu2  ;;  %v5140_v50 = vpop.f32.mrf.mxu3 }
 0x5e0   : > { %v5057_v42 = vadd.f32 %v5056_v45, %v4968_v18  ;;  %v10170_v29 = vadd.f32 %v5140_v50, %v5052_v17 }
 0x5e2   : > { %v4975_v40 = vpop.f32.mrf.mxu1 }
 0x5e3   : > { %v4976_v31 = vadd.f32 %v4975_v40, %v10072_v13 }
 0x5e4   : > { %5783 = vmatmul.bf16.gmra.mxu2 %v9486_v32  ;;  %6035 = vmatmul.bf16.vlgmr.msra.gmra.mxu3 %v10728_v30 }
 0x5e5   : > { %5699 = vmatmul.bf16.gmra.mxu1 %v9486_v32 }
 0x5e7   : > { %v5059_v14 = vpop.f32.mrf.mxu2  ;;  %v5143_v33 = vpop.f32.mrf.mxu3 }
 0x5e8   : > { %v5060_v35 = vadd.f32 %v5059_v14, %v4971_v19  ;;  %v10176_v27 = vadd.f32 %v5143_v33, %v5055_v23  ;;  %v10730_v14 = vld [vmem:[#allocation11_spill] sm:$0xff] }
 0x5ea   : > { %v4977_v6 = vpop.f32.mrf.mxu1 }
 0x5eb   : > { %v4978_v2 = vadd.f32 %v4977_v6, %v10077_v38 }
 0x5ef   : > { %v5061_v18 = vpop.f32.mrf.mxu2  ;;  %v5145_v17 = vpop.f32.mrf.mxu3 }
 0x5f0   : > { %v5062_v15 = vadd.f32 %v5061_v18, %v4973_v62  ;;  %v10179_v5 = vadd.f32 %v5145_v17, %v5057_v42 }
 0x5f2   : > { %v4980_v13 = vpop.f32.mrf.mxu1 }
 0x5f3   : > { %v4981_v63 = vadd.f32 %v4980_v13, %v10079_v49 }
 0x5f4   : > { %5788 = vmatmul.bf16.gmra.mxu2 %v9583_v21  ;;  %6040 = vmatmul.bf16.gmra.mxu3 %v10729_v46  ;;  %v10731_v46 = vld [vmem:[#allocation10_spill] sm:$0xff] }
 0x5f5   : > { %5704 = vmatmul.bf16.gmra.mxu1 %v9583_v21 }
 0x5f7   : > { %v5064_v32 = vpop.f32.mrf.mxu2  ;;  %v5148_v19 = vpop.f32.mrf.mxu3 }
 0x5f8   : > { %v5065_v23 = vadd.f32 %v5064_v32, %v4976_v31  ;;  %v10185_v9 = vadd.f32 %v5148_v19, %v5060_v35 }
 0x5fa   : > { %v4982_v38 = vpop.f32.mrf.mxu1 }
 0x5fb   : > { %v4983_v45 = vadd.f32 %v4982_v38, %v10084_v52 }
 0x5ff   : > { %v5066_v62 = vpop.f32.mrf.mxu2  ;;  %v5150_v50 = vpop.f32.mrf.mxu3 }
 0x600   : > { %v5067_v42 = vadd.f32 %v5066_v62, %v4978_v2  ;;  %v10188_v40 = vadd.f32 %v5150_v50, %v5062_v15 }
 0x602   : > { %v4985_v49 = vpop.f32.mrf.mxu1 }
 0x603   : > { %v4986_v30 = vadd.f32 %v4985_v49, %v10089_v37  ;;  %v10732_v49 = vld [vmem:[#allocation12_spill] sm:$0xff] }
 0x604   : > { %5793 = vmatmul.bf16.gmra.mxu2 %v9600_v39  ;;  %6045 = vmatmul.bf16.gmra.mxu3 %v10730_v14 }
 0x605   : > { %5709 = vmatmul.bf16.gmra.mxu1 %v9600_v39 }
 0x607   : > { %v5069_v21 = vpop.f32.mrf.mxu2  ;;  %v5153_v31 = vpop.f32.mrf.mxu3 }
 0x608   : > { %v5070_v33 = vadd.f32 %v5069_v21, %v4981_v63  ;;  %v10194_v35 = vadd.f32 %v5153_v31, %v5065_v23 }
 0x60a   : > { %v4987_v52 = vpop.f32.mrf.mxu1 }
 0x60b   : > { %v4988_v6 = vadd.f32 %v4987_v52, %v10091_v51 }
 0x60f   : > { %v5071_v2 = vpop.f32.mrf.mxu2  ;;  %v5155_v18 = vpop.f32.mrf.mxu3 }
 0x610   : > { %v5072_v17 = vadd.f32 %v5071_v2, %v4983_v45  ;;  %v10197_v15 = vadd.f32 %v5155_v18, %v5067_v42 }
 0x612   : > { %v4990_v37 = vpop.f32.mrf.mxu1 }
 0x613   : > { %v4991_v13 = vadd.f32 %v4990_v37, %v10093_v61 }
 0x614   : > { %5798 = vmatmul.bf16.gmra.mxu2 %v9633_v59  ;;  %6050 = vmatmul.bf16.gmra.mxu3 %v10731_v46 }
 0x615   : > { %5714 = vmatmul.bf16.gmra.mxu1 %v9633_v59 }
 0x617   : > { %v5074_v39 = vpop.f32.mrf.mxu2  ;;  %v5158_v63 = vpop.f32.mrf.mxu3 }
 0x618   : > { %v5075_v32 = vadd.f32 %v5074_v39, %v4986_v30  ;;  %v10203_v19 = vadd.f32 %v5158_v63, %v5070_v33 }
 0x61a   : > { %v4992_v51 = vpop.f32.mrf.mxu1 }
 0x61b   : > { %v4993_v23 = vadd.f32 %v4992_v51, %v10095_v34 }
 0x61f   : > { %v5076_v38 = vpop.f32.mrf.mxu2  ;;  %v5160_v45 = vpop.f32.mrf.mxu3 }
 0x620   : > { %v5077_v62 = vadd.f32 %v5076_v38, %v4988_v6  ;;  %v10206_v50 = vadd.f32 %v5160_v45, %v5072_v17  ;;  %v10733_v17 = vld [vmem:[#allocation14_spill] sm:$0xff]  ;;  %v10734_v38 = vld [vmem:[#allocation16_spill] sm:$0xff] }
 0x622   : > { %v4995_v61 = vpop.f32.mrf.mxu1 }
 0x623   : > { %v4996_v42 = vadd.f32 %v4995_v61, %v10101_v7 }
 0x624   : > { %5803 = vmatmul.bf16.gmra.mxu2 %v9661_v3  ;;  %6055 = vmatmul.bf16.gmra.mxu3 %v10732_v49 }
 0x625   : > { %5719 = vmatmul.bf16.gmra.mxu1 %v9661_v3 }
 0x627   : > { %v5079_v59 = vpop.f32.mrf.mxu2  ;;  %v5163_v30 = vpop.f32.mrf.mxu3 }
 0x628   : > { %v5080_v14 = vadd.f32 %v5079_v59, %v4991_v13  ;;  %v10212_v21 = vadd.f32 %v5163_v30, %v5075_v32 }
 0x62a   : > { %v4997_v34 = vpop.f32.mrf.mxu1 }
 0x62b   : > { %v4998_v31 = vadd.f32 %v4997_v34, %v10104_v47  ;;  %v10735_v34 = vld [vmem:[#allocation17_spill] sm:$0xff] }
 0x62f   : > { %v5081_v33 = vpop.f32.mrf.mxu2  ;;  %v5165_v52 = vpop.f32.mrf.mxu3 }
 0x630   : > { %v5082_v6 = vadd.f32 %v5081_v33, %v4993_v23  ;;  %v10215_v2 = vadd.f32 %v5165_v52, %v5077_v62 }
 0x632   : > { %v5000_v7 = vpop.f32.mrf.mxu1 }
 0x633   : > { %v5001_v18 = vadd.f32 %v5000_v7, %v10107_v54 }
 0x634   : > { %5808 = vmatmul.bf16.gmra.mxu2 %v9695_v4  ;;  %6060 = vmatmul.bf16.gmra.mxu3 %v10733_v17 }
 0x635   : > { %5724 = vmatmul.bf16.gmra.mxu1 %v9695_v4 }
 0x637   : > { %v5084_v3 = vpop.f32.mrf.mxu2  ;;  %v5168_v37 = vpop.f32.mrf.mxu3 }
 0x638   : > { %v5085_v13 = vadd.f32 %v5084_v3, %v4996_v42  ;;  %v10221_v46 = vadd.f32 %v5168_v37, %v5080_v14 }
 0x63a   : > { %v5002_v47 = vpop.f32.mrf.mxu1 }
 0x63b   : > { %v5003_v39 = vadd.f32 %v5002_v47, %v10110_v24  ;;  %v10736_v47 = vld [vmem:[#allocation18_spill] sm:$0xff] }
 0x63f   : > { %v5086_v63 = vpop.f32.mrf.mxu2  ;;  %v5170_v32 = vpop.f32.mrf.mxu3 }
 0x640   : > { %v5087_v51 = vadd.f32 %v5086_v63, %v4998_v31  ;;  %v10224_v23 = vadd.f32 %v5170_v32, %v5082_v6 }
 0x642   : > { %v5690_v54 = vpop.f32.mrf.mxu1 }
 0x643   : > { %v5691_v17 = vadd.f32 %v5690_v54, %v10039_v44  ;;  %v10261_v54 = vld [vmem:[%s10545_s9] ss:$0 sm:$0xff] }
 0x644   : > { %5813 = vmatmul.bf16.gmra.mxu2 %v9727_v53  ;;  %6065 = vmatmul.bf16.gmra.mxu3 %v10734_v38 }
 0x645   : > { %5729 = vmatmul.bf16.gmra.mxu1 %v9727_v53 }
 0x647   : > { %v5089_v4 = vpop.f32.mrf.mxu2  ;;  %v5173_v45 = vpop.f32.mrf.mxu3 }
 0x648   : > { %v5090_v62 = vadd.f32 %v5089_v4, %v5001_v18  ;;  %v10229_v61 = vadd.f32 %v5173_v45, %v5085_v13  ;;  %v10263_v4 = vpop.f32.mrf.mxu0 }
 0x64a   : > { %v5692_v42 = vpop.f32.mrf.mxu1 }
 0x64b   : > { %v5693_v37 = vadd.f32 %v5692_v42, %v10044_v55  ;;  %v10254_v55 = vld [vmem:[%s10541_s5] ss:$0 sm:$0xff] }
 0x64f   : > { %v5091_v49 = vpop.f32.mrf.mxu2  ;;  %v5175_v24 = vpop.f32.mrf.mxu3 }
 0x650   : > { %v5092_v59 = vadd.f32 %v5091_v49, %v5003_v39  ;;  %v10231_v30 = vadd.f32 %v5175_v24, %v5087_v51  ;;  %v10248_v39 = vld [vmem:[%s10544_s8] ss:$0 sm:$0xff] }
 0x652   : > { %v5695_v14 = vpop.f32.mrf.mxu1 }
 0x654   : > { %5818 = vmatmul.bf16.gmra.mxu2 %v9763_v16  ;;  %6070 = vmatmul.bf16.gmra.mxu3 %v10735_v34  ;;  %v5696_v34 = vadd.f32 %v5695_v14, %v10051_v56 }
 0x655   : > { %5734 = vmatmul.bf16.gmra.mxu1 %v9763_v16 }
 0x657   : > { %v5779_v31 = vpop.f32.mrf.mxu2  ;;  %v5178_v53 = vpop.f32.mrf.mxu3 }
 0x658   : > { %v10236_v33 = vadd.f32 %v5178_v53, %v5090_v62  ;;  %v5780_v13 = vadd.f32 %v5779_v31, %v5691_v17 }
 0x65a   : > { %v5697_v52 = vpop.f32.mrf.mxu1  ;;  %v5859_v44 = vadd.f32 %v5780_v13, %v10116_v12  ;;  %v10269_v12 = vld [vmem:[%s10542_s6] ss:$0 sm:$0xff] }
 0x65b   : > { %v5698_v17 = vadd.f32 %v5697_v52, %v10056_v41 }
 0x65c   : > { %v5895_v45 = vmul.f32 %v10254_v55, %v5859_v44 }
 0x65e   : > { %v5931_v24 = vadd.f32 %v10269_v12, %v5895_v45 }
 0x65f   : > { %v5781_v6 = vpop.f32.mrf.mxu2  ;;  %v5180_v7 = vpop.f32.mrf.mxu3 }
 0x660   : > { %v10238_v18 = vadd.f32 %v5180_v7, %v5092_v59  ;;  %v5782_v16 = vadd.f32 %v5781_v6, %v5693_v37 }
 0x662   : > { %v5700_v3 = vpop.f32.mrf.mxu1  ;;  %v5860_v51 = vadd.f32 %v5782_v16, %v10119_v57  ;;  %v10285_v16 = vpop.f32.mrf.mxu0 }
 0x664   : > { %5823 = vmatmul.bf16.gmra.mxu2 %v9829_v8  ;;  %6075 = vmatmul.bf16.gmra.mxu3 %v10736_v47  ;;  %v5896_v57 = vmul.f32 %v10254_v55, %v5860_v51  ;;  %v10737_v47 = vld [vmem:[#allocation19_spill] sm:$0xff] }
 0x665   : > { %5739 = vmatmul.bf16.gmra.mxu1 %v9829_v8 }
 0x666   : > { %v5932_v53 = vadd.f32 %v10269_v12, %v5896_v57 }
 0x667   : > { %v5784_v63 = vpop.f32.mrf.mxu2  ;;  %v6036_v32 = vpop.f32.mrf.mxu3 }
 0x668   : > { %v6120_v8 = vmul.f32 %v10248_v39, %v6036_v32  ;;  %v5785_v37 = vadd.f32 %v5784_v63, %v5696_v34 }
 0x66a   : > { %v5702_v38 = vpop.f32.mrf.mxu1  ;;  %v6156_v62 = vadd.f32 %v10261_v54, %v6120_v8  ;;  %v5861_v8 = vadd.f32 %v5785_v37, %v10122_v25  ;;  %v10739_v37 = vld [vmem:[#allocation52_spill] sm:$0xff] }
 0x66c   : > { %v6188_v31 = vadd.f32 %v6156_v62, %v5931_v24  ;;  %v10296_v24 = vpop.f32.mrf.mxu0 }
 0x66e   : > { %v6220_v56 = vmax.f32 %v6188_v31, 0.0 }
 0x66f   : > { %v5786_v42 = vpop.f32.mrf.mxu2  ;;  %v6038_v49 = vpop.f32.mrf.mxu3 }
 0x670   : > { %v6121_v59 = vmul.f32 %v10248_v39, %v6038_v49  ;;  %v5787_v14 = vadd.f32 %v5786_v42, %v5698_v17 }
 0x672   : > { %v6157_v6 = vadd.f32 %v10261_v54, %v6121_v59  ;;  %v5705_v7 = vpop.f32.mrf.mxu1  ;;  %v5862_v52 = vadd.f32 %v5787_v14, %v10125_v0  ;;  %v10738_v59 = vld [vmem:[#allocation51_spill] sm:$0xff]  ;;  %v10740_v14 = vld [vmem:[#allocation46_spill] sm:$0xff] }
 0x673   : > { %v5701_v34 = vadd.f32 %v5700_v3, %v10738_v59 }
 0x674   : > { %v6189_v13 = vadd.f32 %v6157_v6, %v5932_v53  ;;  %5828 = vmatmul.bf16.gmra.mxu2 %v9873_v36  ;;  %6080 = vmatmul.bf16.gmra.mxu3 %v10737_v47  ;;  %v5898_v57 = vmul.f32 %v10254_v55, %v5862_v52 }
 0x675   : > { %5744 = vmatmul.bf16.gmra.mxu1 %v9873_v36  ;;  %v5897_v36 = vmul.f32 %v10254_v55, %v5861_v8 }
 0x676   : > { %v6221_v32 = vmax.f32 %v6189_v13, 0.0  ;;  %v5934_v53 = vadd.f32 %v10269_v12, %v5898_v57  ;;  %v5703_v13 = vadd.f32 %v5702_v38, %v10739_v37  ;;  %v10308_v57 = vpop.f32.mrf.mxu0 }
 0x677   : > { %v5789_v44 = vpop.f32.mrf.mxu2  ;;  %v6041_v51 = vpop.f32.mrf.mxu3  ;;  %v5933_v25 = vadd.f32 %v10269_v12, %v5897_v36 }
 0x678   : > { %v7531_v41 = vpack.c.bf16 %v6221_v32, %v6220_v56  ;;  %v6122_v63 = vmul.f32 %v10248_v39, %v6041_v51  ;;  %v5790_v47 = vadd.f32 %v5789_v44, %v5701_v34  ;;  %v10741_v32 = vld [vmem:[#allocation20_spill] sm:$0xff] }
 0x67a   : > { %7532 = vst [vmem:[%s10289_s12] sm:$0xff] %v7531_v41   ;;  %v5707_v45 = vpop.f32.mrf.mxu1  ;;  %v6158_v62 = vadd.f32 %v10261_v54, %v6122_v63  ;;  %v5863_v63 = vadd.f32 %v5790_v47, %v10131_v10 }
 0x67c   : > { %v6190_v31 = vadd.f32 %v6158_v62, %v5933_v25 }
 0x67e   : > { %v6222_v51 = vmax.f32 %v6190_v31, 0.0  ;;  %v10742_v31 = vld [vmem:[#allocation53_spill] sm:$0xff]  ;;  %v10321_v47 = vpop.f32.mrf.mxu0 }
 0x67f   : > { %v5791_v42 = vpop.f32.mrf.mxu2  ;;  %v6043_v49 = vpop.f32.mrf.mxu3 }
 0x680   : > { %v6123_v0 = vmul.f32 %v10248_v39, %v6043_v49  ;;  %v5792_v8 = vadd.f32 %v5791_v42, %v5703_v13  ;;  %v5899_v49 = vmul.f32 %v10254_v55, %v5863_v63 }
 0x682   : > { %v6159_v6 = vadd.f32 %v10261_v54, %v6123_v0  ;;  %v5710_v17 = vpop.f32.mrf.mxu1  ;;  %v5864_v38 = vadd.f32 %v5792_v8, %v10134_v26  ;;  %v5935_v34 = vadd.f32 %v10269_v12, %v5899_v49  ;;  %v10744_v8 = vld [vmem:[#allocation49_spill] sm:$0xff] }
 0x684   : > { %v6191_v56 = vadd.f32 %v6159_v6, %v5934_v53  ;;  %5833 = vmatmul.bf16.gmra.mxu2 %v10740_v14  ;;  %6085 = vmatmul.bf16.gmra.mxu3 %v10741_v32  ;;  %v5900_v25 = vmul.f32 %v10254_v55, %v5864_v38  ;;  %v5706_v53 = vadd.f32 %v5705_v7, %v10742_v31 }
 0x685   : > { %5749 = vmatmul.bf16.gmra.mxu1 %v10740_v14 }
 0x686   : > { %v6223_v3 = vmax.f32 %v6191_v56, 0.0  ;;  %v5936_v26 = vadd.f32 %v10269_v12, %v5900_v25  ;;  %v10743_v56 = vld [vmem:[#allocation55_spill] sm:$0xff] }
 0x687   : > { %v5794_v41 = vpop.f32.mrf.mxu2  ;;  %v6046_v52 = vpop.f32.mrf.mxu3  ;;  %v5708_v14 = vadd.f32 %v5707_v45, %v10743_v56 }
 0x688   : > { %v7536_v36 = vpack.c.bf16 %v6223_v3, %v6222_v51  ;;  %v6124_v44 = vmul.f32 %v10248_v39, %v6046_v52  ;;  %v5795_v32 = vadd.f32 %v5794_v41, %v5706_v53  ;;  %v10745_v3 = vld [vmem:[#allocation21_spill] sm:$0xff] }
 0x68a   : > { %7608 = vst [vmem:[%s10289_s12 + $0x8] sm:$0xff] %v7536_v36   ;;  %v5712_v62 = vpop.f32.mrf.mxu1  ;;  %v6160_v42 = vadd.f32 %v10261_v54, %v6124_v44  ;;  %v5865_v44 = vadd.f32 %v5795_v32, %v10137_v22 }
 0x68c   : > { %v6192_v6 = vadd.f32 %v6160_v42, %v5935_v34  ;;  %v5901_v42 = vmul.f32 %v10254_v55, %v5865_v44 }
 0x68e   : > { %v6224_v7 = vmax.f32 %v6192_v6, 0.0  ;;  %v5937_v53 = vadd.f32 %v10269_v12, %v5901_v42 }
 0x68f   : > { %v5796_v0 = vpop.f32.mrf.mxu2  ;;  %v6048_v59 = vpop.f32.mrf.mxu3 }
 0x690   : > { %v6125_v10 = vmul.f32 %v10248_v39, %v6048_v59  ;;  %v5797_v52 = vadd.f32 %v5796_v0, %v5708_v14  ;;  %v10332_v59 = vpop.f32.mrf.mxu0  ;;  %v5713_v14 = vadd.f32 %v5712_v62, %v10285_v16 }
 0x692   : > { %v6161_v37 = vadd.f32 %v10261_v54, %v6125_v10  ;;  %v5715_v13 = vpop.f32.mrf.mxu1  ;;  %v5866_v25 = vadd.f32 %v5797_v52, %v10140_v60  ;;  %v5711_v60 = vadd.f32 %v5710_v17, %v10263_v4 }
 0x694   : > { %v6193_v51 = vadd.f32 %v6161_v37, %v5936_v26  ;;  %5838 = vmatmul.bf16.gmra.mxu2 %v10744_v8  ;;  %6090 = vmatmul.bf16.gmra.mxu3 %v10745_v3  ;;  %v5902_v34 = vmul.f32 %v10254_v55, %v5866_v25  ;;  %v10747_v3 = vld [vmem:[#allocation22_spill] sm:$0xff] }
 0x695   : > { %5754 = vmatmul.bf16.gmra.mxu1 %v10744_v8  ;;  %v10746_v8 = vld [vmem:[#allocation47_spill] sm:$0xff] }
 0x696   : > { %v6225_v63 = vmax.f32 %v6193_v51, 0.0  ;;  %v5938_v26 = vadd.f32 %v10269_v12, %v5902_v34 }
 0x697   : > { %v5799_v36 = vpop.f32.mrf.mxu2  ;;  %v6051_v38 = vpop.f32.mrf.mxu3 }
 0x698   : > { %v7541_v49 = vpack.c.bf16 %v6225_v63, %v6224_v7  ;;  %v6126_v45 = vmul.f32 %v10248_v39, %v6051_v38  ;;  %v5800_v32 = vadd.f32 %v5799_v36, %v5711_v60  ;;  %v10345_v38 = vpop.f32.mrf.mxu0 }
 0x69a   : > { %7609 = vst [vmem:[%s10289_s12 + $0x10] sm:$0xff] %v7541_v49   ;;  %v5717_v41 = vpop.f32.mrf.mxu1  ;;  %v6162_v0 = vadd.f32 %v10261_v54, %v6126_v45  ;;  %v5867_v44 = vadd.f32 %v5800_v32, %v10146_v20  ;;  %v10748_v32 = vld [vmem:[#allocation48_spill] sm:$0xff] }
 0x69c   : > { %v6194_v6 = vadd.f32 %v6162_v0, %v5937_v53  ;;  %v5903_v25 = vmul.f32 %v10254_v55, %v5867_v44 }
 0x69e   : > { %v6226_v7 = vmax.f32 %v6194_v6, 0.0 }
 0x69f   : > { %v5801_v10 = vpop.f32.mrf.mxu2  ;;  %v6053_v31 = vpop.f32.mrf.mxu3 }
 0x6a0   : > { %v6127_v22 = vmul.f32 %v10248_v39, %v6053_v31  ;;  %v5802_v52 = vadd.f32 %v5801_v10, %v5713_v14  ;;  %v5939_v10 = vadd.f32 %v10269_v12, %v5903_v25  ;;  %v10356_v20 = vpop.f32.mrf.mxu0 }
 0x6a2   : > { %v6163_v37 = vadd.f32 %v10261_v54, %v6127_v22  ;;  %v5720_v56 = vpop.f32.mrf.mxu1  ;;  %v5868_v16 = vadd.f32 %v5802_v52, %v10149_v43  ;;  %v5716_v43 = vadd.f32 %v5715_v13, %v10296_v24 }
 0x6a4   : > { %v6195_v51 = vadd.f32 %v6163_v37, %v5938_v26  ;;  %5843 = vmatmul.bf16.gmra.mxu2 %v10746_v8  ;;  %6095 = vmatmul.bf16.gmra.mxu3 %v10747_v3  ;;  %v5904_v45 = vmul.f32 %v10254_v55, %v5868_v16  ;;  %v5718_v26 = vadd.f32 %v5717_v41, %v10308_v57 }
 0x6a5   : > { %5759 = vmatmul.bf16.gmra.mxu1 %v10746_v8 }
 0x6a6   : > { %v6227_v4 = vmax.f32 %v6195_v51, 0.0  ;;  %v5940_v22 = vadd.f32 %v10269_v12, %v5904_v45  ;;  %v10749_v51 = vld [vmem:[#allocation23_spill] sm:$0xff] }
 0x6a7   : > { %v5804_v17 = vpop.f32.mrf.mxu2  ;;  %v6056_v63 = vpop.f32.mrf.mxu3 }
 0x6a8   : > { %v7546_v49 = vpack.c.bf16 %v6227_v4, %v6226_v7  ;;  %v6128_v62 = vmul.f32 %v10248_v39, %v6056_v63  ;;  %v5805_v37 = vadd.f32 %v5804_v17, %v5716_v43  ;;  %v10369_v17 = vpop.f32.mrf.mxu0 }
 0x6aa   : > { %7610 = vst [vmem:[%s10289_s12 + $0x18] sm:$0xff] %v7546_v49   ;;  %v5722_v36 = vpop.f32.mrf.mxu1  ;;  %v6164_v42 = vadd.f32 %v10261_v54, %v6128_v62  ;;  %v5869_v52 = vadd.f32 %v5805_v37, %v10152_v1 }
 0x6ac   : > { %v6196_v53 = vadd.f32 %v6164_v42, %v5939_v10  ;;  %v5905_v44 = vmul.f32 %v10254_v55, %v5869_v52 }
 0x6ae   : > { %v6228_v8 = vmax.f32 %v6196_v53, 0.0  ;;  %v5941_v45 = vadd.f32 %v10269_v12, %v5905_v44 }
 0x6af   : > { %v5806_v34 = vpop.f32.mrf.mxu2  ;;  %v6058_v0 = vpop.f32.mrf.mxu3 }
 0x6b0   : > { %v6129_v31 = vmul.f32 %v10248_v39, %v6058_v0  ;;  %v5807_v3 = vadd.f32 %v5806_v34, %v5718_v26  ;;  %v5643_v26 = vpop.f32.mrf.mxu0 }
 0x6b2   : > { %v6165_v60 = vadd.f32 %v10261_v54, %v6129_v31  ;;  %v5725_v6 = vpop.f32.mrf.mxu1  ;;  %v5870_v63 = vadd.f32 %v5807_v3, %v10155_v58  ;;  %v5721_v58 = vadd.f32 %v5720_v56, %v10321_v47  ;;  %v5723_v31 = vadd.f32 %v5722_v36, %v10332_v59 }
 0x6b3   : > { %v5726_v44 = vadd.f32 %v5725_v6, %v10345_v38 }
 0x6b4   : > { %v6197_v14 = vadd.f32 %v6165_v60, %v5940_v22  ;;  %5848 = vmatmul.bf16.gmra.mxu2 %v10748_v32  ;;  %6100 = vmatmul.bf16.gmra.mxu3 %v10749_v51  ;;  %v5906_v49 = vmul.f32 %v10254_v55, %v5870_v63  ;;  %v10750_v22 = vld [vmem:[#allocation54_spill] sm:$0xff]  ;;  %v10751_v60 = vld [vmem:[#allocation24_spill] sm:$0xff] }
 0x6b5   : > { %5764 = vmatmul.bf16.gmra.mxu1 %v10748_v32 }
 0x6b6   : > { %v6229_v24 = vmax.f32 %v6197_v14, 0.0  ;;  %v5942_v34 = vadd.f32 %v10269_v12, %v5906_v49 }
 0x6b7   : > { %v5809_v13 = vpop.f32.mrf.mxu2  ;;  %v6061_v7 = vpop.f32.mrf.mxu3 }
 0x6b8   : > { %v7551_v4 = vpack.c.bf16 %v6229_v24, %v6228_v8  ;;  %v6130_v57 = vmul.f32 %v10248_v39, %v6061_v7  ;;  %v5810_v43 = vadd.f32 %v5809_v13, %v5721_v58  ;;  %v5646_v63 = vpop.f32.mrf.mxu0  ;;  %v10752_v58 = vld [vmem:[#allocation25_spill] sm:$0xff] }
 0x6ba   : > { %7611 = vst [vmem:[%s10289_s12 + $0x20] sm:$0xff] %v7551_v4   ;;  %v5727_v41 = vpop.f32.mrf.mxu1  ;;  %v6166_v16 = vadd.f32 %v10261_v54, %v6130_v57  ;;  %v5871_v51 = vadd.f32 %v5810_v43, %v10159_v11 }
 0x6bc   : > { %v6198_v42 = vadd.f32 %v6166_v16, %v5941_v45  ;;  %v5907_v24 = vmul.f32 %v10254_v55, %v5871_v51 }
 0x6be   : > { %v6230_v37 = vmax.f32 %v6198_v42, 0.0  ;;  %v5943_v57 = vadd.f32 %v10269_v12, %v5907_v24 }
 0x6bf   : > { %v5811_v62 = vpop.f32.mrf.mxu2  ;;  %v6063_v25 = vpop.f32.mrf.mxu3 }
 0x6c0   : > { %v6131_v1 = vmul.f32 %v10248_v39, %v6063_v25  ;;  %v5812_v14 = vadd.f32 %v5811_v62, %v5723_v31  ;;  %v5728_v25 = vadd.f32 %v5727_v41, %v10356_v20 }
 0x6c2   : > { %v6167_v0 = vadd.f32 %v10261_v54, %v6131_v1  ;;  %v5730_v10 = vpop.f32.mrf.mxu1  ;;  %v5872_v3 = vadd.f32 %v5812_v14, %v10162_v48 }
 0x6c3   : > { %v5731_v51 = vadd.f32 %v5730_v10, %v10369_v17 }
 0x6c4   : > { %v6199_v53 = vadd.f32 %v6167_v0, %v5942_v34  ;;  %5853 = vmatmul.bf16.gmra.mxu2 %v10750_v22  ;;  %6105 = vmatmul.bf16.gmra.mxu3 %v10751_v60  ;;  %v5908_v13 = vmul.f32 %v10254_v55, %v5872_v3 }
 0x6c6   : > { %v6231_v32 = vmax.f32 %v6199_v53, 0.0  ;;  %v5944_v49 = vadd.f32 %v10269_v12, %v5908_v13  ;;  %v5648_v53 = vpop.f32.mrf.mxu0 }
 0x6c7   : > { %v5814_v47 = vpop.f32.mrf.mxu2  ;;  %v6066_v56 = vpop.f32.mrf.mxu3 }
 0x6c8   : > { %v7556_v8 = vpack.c.bf16 %v6231_v32, %v6230_v37  ;;  %v6132_v59 = vmul.f32 %v10248_v39, %v6066_v56  ;;  %v5815_v45 = vadd.f32 %v5814_v47, %v5726_v44 }
 0x6ca   : > { %7612 = vst [vmem:[%s10289_s12 + $0x28] sm:$0xff] %v7556_v8   ;;  %v5732_v36 = vpop.f32.mrf.mxu1  ;;  %v6168_v7 = vadd.f32 %v10261_v54, %v6132_v59  ;;  %v5873_v38 = vadd.f32 %v5815_v45, %v10167_v28 }
 0x6cb   : > { %v5733_v13 = vadd.f32 %v5732_v36, %v5643_v26 }
 0x6cc   : > { %v6200_v48 = vadd.f32 %v6168_v7, %v5943_v57  ;;  %v5909_v20 = vmul.f32 %v10254_v55, %v5873_v38 }
 0x6ce   : > { %v6232_v42 = vmax.f32 %v6200_v48, 0.0  ;;  %v5945_v56 = vadd.f32 %v10269_v12, %v5909_v20  ;;  %v5651_v24 = vpop.f32.mrf.mxu0 }
 0x6cf   : > { %v5816_v52 = vpop.f32.mrf.mxu2  ;;  %v6068_v4 = vpop.f32.mrf.mxu3 }
 0x6d0   : > { %v6133_v11 = vmul.f32 %v10248_v39, %v6068_v4  ;;  %v5817_v34 = vadd.f32 %v5816_v52, %v5728_v25 }
 0x6d2   : > { %v6169_v16 = vadd.f32 %v10261_v54, %v6133_v11  ;;  %v5735_v62 = vpop.f32.mrf.mxu1  ;;  %v5874_v22 = vadd.f32 %v5817_v34, %v10170_v29 }
 0x6d4   : > { %v6201_v1 = vadd.f32 %v6169_v16, %v5944_v49  ;;  %6110 = vmatmul.bf16.gmra.mxu3 %v10752_v58  ;;  %v5910_v41 = vmul.f32 %v10254_v55, %v5874_v22 }
 0x6d6   : > { %v6233_v0 = vmax.f32 %v6201_v1, 0.0  ;;  %v5946_v29 = vadd.f32 %v10269_v12, %v5910_v41  ;;  %v5653_v1 = vpop.f32.mrf.mxu0 }
 0x6d7   : > { %v5819_v31 = vpop.f32.mrf.mxu2  ;;  %v6071_v43 = vpop.f32.mrf.mxu3 }
 0x6d8   : > { %v7561_v6 = vpack.c.bf16 %v6233_v0, %v6232_v42  ;;  %v6134_v60 = vmul.f32 %v10248_v39, %v6071_v43  ;;  %v5820_v7 = vadd.f32 %v5819_v31, %v5731_v51  ;;  %v5736_v0 = vadd.f32 %v5735_v62, %v5646_v63 }
 0x6da   : > { %7613 = vst [vmem:[%s10289_s12 + $0x30] sm:$0xff] %v7561_v6   ;;  %v5737_v37 = vpop.f32.mrf.mxu1  ;;  %v6170_v14 = vadd.f32 %v10261_v54, %v6134_v60  ;;  %v5875_v49 = vadd.f32 %v5820_v7, %v10176_v27 }
 0x6db   : > { %v5738_v38 = vadd.f32 %v5737_v37, %v5648_v53 }
 0x6dc   : > { %v6202_v8 = vadd.f32 %v6170_v14, %v5945_v56  ;;  %v5911_v25 = vmul.f32 %v10254_v55, %v5875_v49 }
 0x6de   : > { %v6234_v4 = vmax.f32 %v6202_v8, 0.0  ;;  %v5947_v34 = vadd.f32 %v10269_v12, %v5911_v25  ;;  %v5656_v56 = vpop.f32.mrf.mxu0 }
 0x6df   : > { %v5821_v32 = vpop.f32.mrf.mxu2  ;;  %v6073_v47 = vpop.f32.mrf.mxu3 }
 0x6e0   : > { %v6135_v28 = vmul.f32 %v10248_v39, %v6073_v47  ;;  %v5822_v57 = vadd.f32 %v5821_v32, %v5733_v13 }
 0x6e2   : > { %v6171_v3 = vadd.f32 %v10261_v54, %v6135_v28  ;;  %v5740_v59 = vpop.f32.mrf.mxu1  ;;  %v5876_v17 = vadd.f32 %v5822_v57, %v10179_v5 }
 0x6e4   : > { %v6203_v52 = vadd.f32 %v6171_v3, %v5946_v29  ;;  %v5912_v26 = vmul.f32 %v10254_v55, %v5876_v17 }
 0x6e6   : > { %v6235_v11 = vmax.f32 %v6203_v52, 0.0  ;;  %v5948_v5 = vadd.f32 %v10269_v12, %v5912_v26 }
 0x6e7   : > { %v5824_v44 = vpop.f32.mrf.mxu2  ;;  %v6076_v48 = vpop.f32.mrf.mxu3 }
 0x6e8   : > { %v7566_v16 = vpack.c.bf16 %v6235_v11, %v6234_v4  ;;  %v6136_v10 = vmul.f32 %v10248_v39, %v6076_v48  ;;  %v5825_v6 = vadd.f32 %v5824_v44, %v5736_v0  ;;  %v5741_v4 = vadd.f32 %v5740_v59, %v5651_v24 }
 0x6ea   : > { %7614 = vst [vmem:[%s10289_s12 + $0x38] sm:$0xff] %v7566_v16   ;;  %v5742_v45 = vpop.f32.mrf.mxu1  ;;  %v6172_v36 = vadd.f32 %v10261_v54, %v6136_v10  ;;  %v5877_v28 = vadd.f32 %v5825_v6, %v10185_v9  ;;  %v5658_v9 = vpop.f32.mrf.mxu0 }
 0x6eb   : > { %v5743_v44 = vadd.f32 %v5742_v45, %v5653_v1 }
 0x6ec   : > { %v6204_v31 = vadd.f32 %v6172_v36, %v5947_v34  ;;  %v5913_v8 = vmul.f32 %v10254_v55, %v5877_v28 }
 0x6ee   : > { %v6236_v60 = vmax.f32 %v6204_v31, 0.0  ;;  %v5949_v13 = vadd.f32 %v10269_v12, %v5913_v8 }
 0x6ef   : > { %v5826_v58 = vpop.f32.mrf.mxu2  ;;  %v6078_v42 = vpop.f32.mrf.mxu3 }
 0x6f0   : > { %v6137_v27 = vmul.f32 %v10248_v39, %v6078_v42  ;;  %v5827_v20 = vadd.f32 %v5826_v58, %v5738_v38 }
 0x6f2   : > { %v6173_v43 = vadd.f32 %v10261_v54, %v6137_v27  ;;  %v5745_v14 = vpop.f32.mrf.mxu1  ;;  %v5878_v63 = vadd.f32 %v5827_v20, %v10188_v40  ;;  %v5661_v34 = vpop.f32.mrf.mxu0 }
 0x6f4   : > { %v6205_v22 = vadd.f32 %v6173_v43, %v5948_v5  ;;  %v5914_v53 = vmul.f32 %v10254_v55, %v5878_v63  ;;  %v5746_v43 = vadd.f32 %v5745_v14, %v5656_v56 }
 0x6f6   : > { %v6237_v41 = vmax.f32 %v6205_v22, 0.0  ;;  %v5950_v57 = vadd.f32 %v10269_v12, %v5914_v53 }
 0x6f7   : > { %v5829_v32 = vpop.f32.mrf.mxu2  ;;  %v6081_v47 = vpop.f32.mrf.mxu3 }
 0x6f8   : > { %v7571_v51 = vpack.c.bf16 %v6237_v41, %v6236_v60  ;;  %v6138_v62 = vmul.f32 %v10248_v39, %v6081_v47  ;;  %v5830_v48 = vadd.f32 %v5829_v32, %v5741_v4 }
 0x6fa   : > { %7615 = vst [vmem:[%s10289_s12 + $0x40] sm:$0xff] %v7571_v51   ;;  %v6174_v37 = vadd.f32 %v10261_v54, %v6138_v62  ;;  %v5747_v7 = vpop.f32.mrf.mxu1  ;;  %v5879_v36 = vadd.f32 %v5830_v48, %v10194_v35  ;;  %v5663_v32 = vpop.f32.mrf.mxu0 }
 0x6fb   : > { %v5748_v22 = vadd.f32 %v5747_v7, %v5658_v9 }
 0x6fc   : > { %v6206_v40 = vadd.f32 %v6174_v37, %v5949_v13  ;;  %v5915_v27 = vmul.f32 %v10254_v55, %v5879_v36 }
 0x6fe   : > { %v6238_v16 = vmax.f32 %v6206_v40, 0.0  ;;  %v5951_v5 = vadd.f32 %v10269_v12, %v5915_v27 }
 0x6ff   : > { %v5831_v29 = vpop.f32.mrf.mxu2  ;;  %v6083_v3 = vpop.f32.mrf.mxu3 }
 0x700   : > { %v6139_v52 = vmul.f32 %v10248_v39, %v6083_v3  ;;  %v5832_v17 = vadd.f32 %v5831_v29, %v5743_v44 }
 0x702   : > { %v6175_v11 = vadd.f32 %v10261_v54, %v6139_v52  ;;  %v5880_v42 = vadd.f32 %v5832_v17, %v10197_v15  ;;  %v5750_v59 = vpop.f32.mrf.mxu1  ;;  %v5666_v9 = vpop.f32.mrf.mxu0 }
 0x703   : > { %v5751_v40 = vadd.f32 %v5750_v59, %v5661_v34 }
 0x704   : > { %v6207_v49 = vadd.f32 %v6175_v11, %v5950_v57  ;;  %v5916_v45 = vmul.f32 %v10254_v55, %v5880_v42 }
 0x706   : > { %v6239_v10 = vmax.f32 %v6207_v49, 0.0  ;;  %v5952_v15 = vadd.f32 %v10269_v12, %v5916_v45 }
 0x707   : > { %v5834_v25 = vpop.f32.mrf.mxu2  ;;  %v6086_v26 = vpop.f32.mrf.mxu3 }
 0x708   : > { %v7576_v58 = vpack.c.bf16 %v6239_v10, %v6238_v16  ;;  %v6140_v24 = vmul.f32 %v10248_v39, %v6086_v26  ;;  %v5835_v60 = vadd.f32 %v5834_v25, %v5746_v43 }
 0x70a   : > { %7616 = vst [vmem:[%s10289_s12 + $0x48] sm:$0xff] %v7576_v58   ;;  %v6176_v1 = vadd.f32 %v10261_v54, %v6140_v24  ;;  %v5752_v20 = vpop.f32.mrf.mxu1  ;;  %v5881_v8 = vadd.f32 %v5835_v60, %v10203_v19  ;;  %v5668_v24 = vpop.f32.mrf.mxu0 }
 0x70b   : > { %v5753_v44 = vadd.f32 %v5752_v20, %v5663_v32 }
 0x70c   : > { %v6208_v38 = vadd.f32 %v6176_v1, %v5951_v5  ;;  %v5917_v37 = vmul.f32 %v10254_v55, %v5881_v8 }
 0x70e   : > { %v6240_v47 = vmax.f32 %v6208_v38, 0.0  ;;  %v5953_v4 = vadd.f32 %v10269_v12, %v5917_v37 }
 0x70f   : > { %v5836_v0 = vpop.f32.mrf.mxu2  ;;  %v6088_v31 = vpop.f32.mrf.mxu3 }
 0x710   : > { %v6141_v35 = vmul.f32 %v10248_v39, %v6088_v31  ;;  %v5837_v28 = vadd.f32 %v5836_v0, %v5748_v22 }
 0x712   : > { %v6177_v6 = vadd.f32 %v10261_v54, %v6141_v35  ;;  %v5882_v14 = vadd.f32 %v5837_v28, %v10206_v50  ;;  %v5755_v3 = vpop.f32.mrf.mxu1 }
 0x713   : > { %v5756_v35 = vadd.f32 %v5755_v3, %v5666_v9 }
 0x714   : > { %v6209_v41 = vadd.f32 %v6177_v6, %v5952_v15  ;;  %v5918_v29 = vmul.f32 %v10254_v55, %v5882_v14  ;;  %v5671_v6 = vpop.f32.mrf.mxu0 }
 0x716   : > { %v6241_v51 = vmax.f32 %v6209_v41, 0.0  ;;  %v5954_v50 = vadd.f32 %v10269_v12, %v5918_v29 }
 0x717   : > { %v5839_v63 = vpop.f32.mrf.mxu2  ;;  %v6091_v62 = vpop.f32.mrf.mxu3 }
 0x718   : > { %v7581_v53 = vpack.c.bf16 %v6241_v51, %v6240_v47  ;;  %v6142_v56 = vmul.f32 %v10248_v39, %v6091_v62  ;;  %v5840_v48 = vadd.f32 %v5839_v63, %v5751_v40 }
 0x71a   : > { %7617 = vst [vmem:[%s10289_s12 + $0x50] sm:$0xff] %v7581_v53   ;;  %v6178_v13 = vadd.f32 %v10261_v54, %v6142_v56  ;;  %v5883_v36 = vadd.f32 %v5840_v48, %v10212_v21  ;;  %v5757_v42 = vpop.f32.mrf.mxu1 }
 0x71b   : > { %v5758_v22 = vadd.f32 %v5757_v42, %v5668_v24 }
 0x71c   : > { %v6210_v57 = vadd.f32 %v6178_v13, %v5953_v4  ;;  %v5919_v27 = vmul.f32 %v10254_v55, %v5883_v36  ;;  %v5673_v37 = vpop.f32.mrf.mxu0 }
 0x71e   : > { %v6242_v16 = vmax.f32 %v6210_v57, 0.0  ;;  %v5955_v5 = vadd.f32 %v10269_v12, %v5919_v27 }
 0x71f   : > { %v5841_v7 = vpop.f32.mrf.mxu2  ;;  %v6093_v52 = vpop.f32.mrf.mxu3 }
 0x720   : > { %v6143_v19 = vmul.f32 %v10248_v39, %v6093_v52  ;;  %v5842_v17 = vadd.f32 %v5841_v7, %v5753_v44 }
 0x722   : > { %v6179_v11 = vadd.f32 %v10261_v54, %v6143_v19  ;;  %v5884_v59 = vadd.f32 %v5842_v17, %v10215_v2  ;;  %v5760_v15 = vpop.f32.mrf.mxu1 }
 0x723   : > { %v5761_v9 = vadd.f32 %v5760_v15, %v5671_v6 }
 0x724   : > { %v6211_v49 = vadd.f32 %v6179_v11, %v5954_v50  ;;  %v5920_v45 = vmul.f32 %v10254_v55, %v5884_v59 }
 0x726   : > { %v6243_v10 = vmax.f32 %v6211_v49, 0.0  ;;  %v5956_v2 = vadd.f32 %v10269_v12, %v5920_v45 }
 0x727   : > { %v5844_v25 = vpop.f32.mrf.mxu2  ;;  %v6096_v26 = vpop.f32.mrf.mxu3 }
 0x728   : > { %v7586_v58 = vpack.c.bf16 %v6243_v10, %v6242_v16  ;;  %v6144_v34 = vmul.f32 %v10248_v39, %v6096_v26  ;;  %v5845_v60 = vadd.f32 %v5844_v25, %v5756_v35  ;;  %v5676_v25 = vpop.f32.mrf.mxu0 }
 0x72a   : > { %7618 = vst [vmem:[%s10289_s12 + $0x58] sm:$0xff] %v7586_v58   ;;  %v6180_v1 = vadd.f32 %v10261_v54, %v6144_v34  ;;  %v5885_v63 = vadd.f32 %v5845_v60, %v10221_v46  ;;  %v5762_v56 = vpop.f32.mrf.mxu1 }
 0x72b   : > { %v5763_v40 = vadd.f32 %v5762_v56, %v5673_v37 }
 0x72c   : > { %v6212_v43 = vadd.f32 %v6180_v1, %v5955_v5  ;;  %v5921_v14 = vmul.f32 %v10254_v55, %v5885_v63 }
 0x72e   : > { %v6244_v41 = vmax.f32 %v6212_v43, 0.0  ;;  %v5957_v52 = vadd.f32 %v10269_v12, %v5921_v14 }
 0x72f   : > { %v5846_v0 = vpop.f32.mrf.mxu2  ;;  %v6098_v31 = vpop.f32.mrf.mxu3 }
 0x730   : > { %v6145_v21 = vmul.f32 %v10248_v39, %v6098_v31  ;;  %v5847_v32 = vadd.f32 %v5846_v0, %v5758_v22  ;;  %v5678_v5 = vpop.f32.mrf.mxu0 }
 0x732   : > { %v6181_v38 = vadd.f32 %v10261_v54, %v6145_v21  ;;  %v5886_v8 = vadd.f32 %v5847_v32, %v10224_v23  ;;  %v5765_v49 = vpop.f32.mrf.mxu1 }
 0x733   : > { %v5766_v1 = vadd.f32 %v5765_v49, %v5676_v25 }
 0x734   : > { %v6213_v20 = vadd.f32 %v6181_v38, %v5956_v2  ;;  %v5922_v29 = vmul.f32 %v10254_v55, %v5886_v8 }
 0x736   : > { %v6245_v47 = vmax.f32 %v6213_v20, 0.0  ;;  %v5958_v23 = vadd.f32 %v10269_v12, %v5922_v29 }
 0x737   : > { %v5849_v28 = vpop.f32.mrf.mxu2  ;;  %v6101_v51 = vpop.f32.mrf.mxu3 }
 0x738   : > { %v7591_v62 = vpack.c.bf16 %v6245_v47, %v6244_v41  ;;  %v6146_v53 = vmul.f32 %v10248_v39, %v6101_v51  ;;  %v5850_v57 = vadd.f32 %v5849_v28, %v5761_v9 }
 0x73a   : > { %7619 = vst [vmem:[%s10289_s12 + $0x60] sm:$0xff] %v7591_v62   ;;  %v6182_v3 = vadd.f32 %v10261_v54, %v6146_v53  ;;  %v5887_v17 = vadd.f32 %v5850_v57, %v10229_v61  ;;  %v5767_v61 = vpop.f32.mrf.mxu1 }
 0x73b   : > { %v5768_v35 = vadd.f32 %v5767_v61, %v5678_v5 }
 0x73c   : > { %v6214_v4 = vadd.f32 %v6182_v3, %v5957_v52  ;;  %v5923_v42 = vmul.f32 %v10254_v55, %v5887_v17 }
 0x73e   : > { %v6246_v11 = vmax.f32 %v6214_v4, 0.0  ;;  %v5959_v27 = vadd.f32 %v10269_v12, %v5923_v42 }
 0x73f   : > { %v5851_v13 = vpop.f32.mrf.mxu2  ;;  %v6103_v7 = vpop.f32.mrf.mxu3 }
 0x740   : > { %v6147_v46 = vmul.f32 %v10248_v39, %v6103_v7  ;;  %v5852_v44 = vadd.f32 %v5851_v13, %v5763_v40 }
 0x742   : > { %v6183_v19 = vadd.f32 %v10261_v54, %v6147_v46  ;;  %v5888_v36 = vadd.f32 %v5852_v44, %v10231_v30 }
 0x744   : > { %v6215_v50 = vadd.f32 %v6183_v19, %v5958_v23  ;;  %v5924_v24 = vmul.f32 %v10254_v55, %v5888_v36 }
 0x746   : > { %v6247_v48 = vmax.f32 %v6215_v50, 0.0  ;;  %v5960_v30 = vadd.f32 %v10269_v12, %v5924_v24 }
 0x747   : > { %v6106_v16 = vpop.f32.mrf.mxu3  ;;  %v5854_v26 = vpop.f32.mrf.mxu2 }
 0x748   : > { %v7596_v10 = vpack.c.bf16 %v6247_v48, %v6246_v11  ;;  %v6148_v58 = vmul.f32 %v10248_v39, %v6106_v16  ;;  %v5855_v43 = vadd.f32 %v5854_v26, %v5766_v1 }
 0x74a   : > { %7620 = vst [vmem:[%s10289_s12 + $0x68] sm:$0xff] %v7596_v10   ;;  %v6184_v59 = vadd.f32 %v10261_v54, %v6148_v58  ;;  %v5889_v60 = vadd.f32 %v5855_v43, %v10236_v33 }
 0x74c   : > { %v6216_v0 = vadd.f32 %v6184_v59, %v5959_v27  ;;  %v5925_v47 = vmul.f32 %v10254_v55, %v5889_v60 }
 0x74e   : > { %v6248_v38 = vmax.f32 %v6216_v0, 0.0  ;;  %v5961_v62 = vadd.f32 %v10269_v12, %v5925_v47 }
 0x74f   : > { %v6108_v34 = vpop.f32.mrf.mxu3  ;;  %v5856_v21 = vpop.f32.mrf.mxu2 }
 0x750   : > { %v6149_v45 = vmul.f32 %v10248_v39, %v6108_v34  ;;  %v5857_v15 = vadd.f32 %v5856_v21, %v5768_v35 }
 0x752   : > { %v6185_v31 = vadd.f32 %v10261_v54, %v6149_v45  ;;  %v5890_v41 = vadd.f32 %v5857_v15, %v10238_v18 }
 0x754   : > { %v6217_v2 = vadd.f32 %v6185_v31, %v5960_v30  ;;  %v5926_v28 = vmul.f32 %v10254_v55, %v5890_v41 }
 0x756   : > { %v6249_v6 = vmax.f32 %v6217_v2, 0.0  ;;  %v5962_v18 = vadd.f32 %v10269_v12, %v5926_v28 }
 0x757   : > { %v6111_v22 = vpop.f32.mrf.mxu3 }
 0x758   : > { %v7601_v20 = vpack.c.bf16 %v6249_v6, %v6248_v38  ;;  %v6150_v32 = vmul.f32 %v10248_v39, %v6111_v22 }
 0x75a   : > { %7621 = vst [vmem:[%s10289_s12 + $0x70] sm:$0xff] %v7601_v20   ;;  %v6186_v51 = vadd.f32 %v10261_v54, %v6150_v32 }
 0x75c   : > { %v6218_v8 = vadd.f32 %v6186_v51, %v5961_v62 }
 0x75e   : > { %v6250_v14 = vmax.f32 %v6218_v8, 0.0 }
 0x75f   : > { %v6113_v63 = vpop.f32.mrf.mxu3 }
 0x760   : > { %v6151_v33 = vmul.f32 %v10248_v39, %v6113_v63 }
 0x762   : > { %v6187_v53 = vadd.f32 %v10261_v54, %v6151_v33 }
 0x764   : > { %v6219_v55 = vadd.f32 %v6187_v53, %v5962_v18 }
 0x766   : > { %v6251_v56 = vmax.f32 %v6219_v55, 0.0 }
 0x768   : > { %v7606_v37 = vpack.c.bf16 %v6251_v56, %v6250_v14 }
 0x76a   : > { %7622 = vst [vmem:[%s10289_s12 + $0x78] sm:$0xff] %v7606_v37  }
 0x76b   : > { %7864 = shalt.err (!%p7861_p9)
}
 0x76c   : > { %s7924_s11 = smov 64   ;;  %s7925_s12 = smov 4  }
 0x76d   : > { %7652 = dma.vmem_to_hbm [thread:$0]  (%p8021_p4), %s6333_s24, 2048, %s6335_s27, %s6317_s16, %s7924_s11, %s7924_s11, %s7925_s12  }
 0x76e PF: > { %p7664_p10 = scmp.ge.s32.totalorder %s7919_s18, 2  ;;  %s6349_s28 = sand.u32 1, %s7899_s13  }
 0x76f   : > { %s6350_s20 = scalar_lea.sflag [#allocation5], %s6349_s28 }
 0x770   : > { %p7659_p11 = pnand %p7664_p10, %p8028_p8 }
 0x772   : > { %p7660_p12 = pneg %p7659_p11 }
 0x774   : > { %7894 = dma.done.wait (%p7660_p12), %s6350_s20, 2048  }
 0x775   : > { %7896 = vsyncadd (%p7660_p12), %s6350_s20, 4294965248  ;;  %s24_s18 = sadd.s32 1, %s7919_s18   ;;  %s10753_s13 = smov %s7903_s14 }
 0x776   : > { %p21_p13 = scmp.ge.s32.totalorder %s24_s18, 4   ;;  %s10754_s14 = smov %s7907_s15 }
 0x777   : > { %s10755_s15 = smov %s8034_s26  ;;  %s10756_s16 = smov %s7915_s17 }
 0x778   : > { %s10757_s17 = smov %s10759_s21  ;;  %23 = sbr.rel (!%p21_p13) target bundleno = 7 (0x7), region = 104 }
 0x77d   :  { %6356 = vsyncpa [#allocation4], 1 }
 0x77e   :  { %6358 = vsyncpa [#allocation4 + $0x1], 1 }
 0x77f   :  { %6359 = vsyncpa [#allocation5], 1 }
 0x780   :  { %6361 = vsyncpa [#allocation5 + $0x1], 1 }

</bundles_post_ra>
